<compile_context>
chip_gen: v7x
topology: tpu7x:2x2x1
jax: 0.10.0
libtpu: 0.0.40
codegen_flags: <defaults>
</compile_context>

<pallas_src>
import functools

import jax
import jax.numpy as jnp
from jax import lax
from jax.experimental import pallas as pl
from jax.experimental.pallas import tpu as pltpu


def _round_up(x, m):
    return ((x + m - 1) // m) * m


# ----------------------------------------------------------------------------
# Kernel 1: transposed conv GEMM (single K block) + fused bias/ReLU[/BN affine]
#   o(Cout, tn) = (relu?(W @ X + b)) [* scale + shift]
# Operands live in HBM as bf16; dot runs in f32 (MXU + interpret-safe).
# ----------------------------------------------------------------------------
def _conv_mm_kernel(*refs, relu, affine):
    if affine:
        w_ref, x_ref, b_ref, sc_ref, sh_ref, o_ref = refs
    else:
        w_ref, x_ref, b_ref, o_ref = refs
    y = jnp.dot(w_ref[...].astype(jnp.float32),
                x_ref[...].astype(jnp.float32),
                preferred_element_type=jnp.float32)
    y = y + b_ref[...]                      # (Cout,1) broadcast along lanes
    if relu:
        y = jnp.maximum(y, 0.0)
    if affine:
        y = y * sc_ref[...] + sh_ref[...]
    o_ref[...] = y.astype(o_ref.dtype)      # bf16 store (half the writeback)


def matmul_cm(wmat, patT, bias, scale=None, shift=None, *, relu=False):
    """wmat: (Cout, K); patT: (K, M)  ->  (Cout, M) bf16, lane-dense on M."""
    Cout, K = wmat.shape
    M = patT.shape[1]
    Cp = _round_up(Cout, 8)                 # 16/32/64 already fine
    Kp = _round_up(K, 16)                   # NOT 128: keep K un-amplified

    # Balanced lane tiles: as big as possible with minimal padding.  Cap the
    # tile lower when K is large so per-step VMEM (bf16 tile + its f32 cast,
    # double-buffered) stays well under the 16 MiB v5e scoped default.
    tn_cap = 8192 if Kp <= 64 else 4096
    n_steps = max(1, -(-M // tn_cap))
    tn = _round_up(-(-M // n_steps), 128)
    Mp = tn * n_steps

    w_p = jnp.zeros((Cp, Kp), jnp.bfloat16).at[:Cout, :K].set(
        wmat.astype(jnp.bfloat16))
    x_p = jnp.zeros((Kp, Mp), jnp.bfloat16).at[:K, :M].set(
        patT.astype(jnp.bfloat16))
    b_p = jnp.zeros((Cp, 1), jnp.float32).at[:Cout, 0].set(bias)

    affine = scale is not None
    args = [w_p, x_p, b_p]
    in_specs = [
        pl.BlockSpec((Cp, Kp), lambda j: (0, 0)),   # weight (constant block)
        pl.BlockSpec((Kp, tn), lambda j: (0, j)),   # patches tile
        pl.BlockSpec((Cp, 1), lambda j: (0, 0)),    # bias
    ]
    if affine:
        sc_p = jnp.ones((Cp, 1), jnp.float32).at[:Cout, 0].set(scale)
        sh_p = jnp.zeros((Cp, 1), jnp.float32).at[:Cout, 0].set(shift)
        args += [sc_p, sh_p]
        in_specs += [pl.BlockSpec((Cp, 1), lambda j: (0, 0)),
                     pl.BlockSpec((Cp, 1), lambda j: (0, 0))]

    out = pl.pallas_call(
        functools.partial(_conv_mm_kernel, relu=relu, affine=affine),
        out_shape=jax.ShapeDtypeStruct((Cp, Mp), jnp.bfloat16),
        grid_spec=pltpu.PrefetchScalarGridSpec(
            num_scalar_prefetch=0,
            grid=(Mp // tn,),
            in_specs=in_specs,
            out_specs=pl.BlockSpec((Cp, tn), lambda j: (0, j)),
        ),
        compiler_params=pltpu.CompilerParams(
            dimension_semantics=("parallel",)),
    )(*args)
    return out[:Cout, :M]


# ----------------------------------------------------------------------------
# im2col (channel-major, transposed): (C,N,H,W) -> patchesT (9*C, N*OH*OW).
# K-dim row order is (ki, kj, c); matches the weight reshape below.
# TODO(synk): patch extraction stays as XLA slicing glue (no Pallas gather).
# ----------------------------------------------------------------------------
def _im2col_T(x_cnhw, k=3, stride=2, pad=1):
    C, N, H, W = x_cnhw.shape
    OH = (H + 2 * pad - k) // stride + 1
    OW = (W + 2 * pad - k) // stride + 1
    xp = jnp.pad(x_cnhw.astype(jnp.bfloat16),
                 ((0, 0), (0, 0), (pad, pad), (pad, pad)))
    rows = []
    for ki in range(k):
        for kj in range(k):
            rows.append(
                xp[:, :,
                   ki:ki + stride * (OH - 1) + 1:stride,
                   kj:kj + stride * (OW - 1) + 1:stride].reshape(C, N * OH * OW))
    return jnp.concatenate(rows, axis=0), OH, OW


def conv2d_fused(x_cnhw, w, b, scale=None, shift=None, *, relu):
    """x: (Cin, N, H, W); w: (Cout, Cin, 3, 3) -> (Cout, N, OH, OW) bf16."""
    Cout, Cin, kh, kw = w.shape
    _, N, _, _ = x_cnhw.shape
    patT, OH, OW = _im2col_T(x_cnhw, k=kh)
    wmat = w.transpose(2, 3, 1, 0).reshape(kh * kw * Cin, Cout).T   # (Cout, K)
    y = matmul_cm(wmat, patT, b, scale, shift, relu=relu)
    return y.reshape(Cout, N, OH, OW)


# ----------------------------------------------------------------------------
# Kernel 2: 2x2 max-pool (4-way max) + per-channel BN affine.
# Lane dim of every operand is OH*OW (dense stores); bf16 in / bf16 out.
# TODO(synk): the 2x2 decimation uses XLA strided slices outside the kernel.
# ----------------------------------------------------------------------------
def _pool_bn_kernel(a_ref, b_ref, c_ref, d_ref, sc_ref, sh_ref, o_ref):
    m = jnp.maximum(jnp.maximum(a_ref[...], b_ref[...]),
                    jnp.maximum(c_ref[...], d_ref[...])).astype(jnp.float32)
    o_ref[...] = (m * sc_ref[...] + sh_ref[...]).astype(o_ref.dtype)


def maxpool_bn(x, scale, shift):
    """x: (C, N, H, W) bf16; MaxPool2d(2,2) then per-channel affine -> bf16."""
    C, N, H, W = x.shape
    OH, OW = H // 2, W // 2
    rs = lambda t: t.reshape(C * N, OH * OW)
    a = rs(x[:, :, 0:2 * OH:2, 0:2 * OW:2])
    b = rs(x[:, :, 0:2 * OH:2, 1:2 * OW:2])
    c = rs(x[:, :, 1:2 * OH:2, 0:2 * OW:2])
    d = rs(x[:, :, 1:2 * OH:2, 1:2 * OW:2])
    sc = jnp.repeat(scale, N).reshape(C * N, 1).astype(jnp.float32)
    sh = jnp.repeat(shift, N).reshape(C * N, 1).astype(jnp.float32)
    out = pl.pallas_call(
        _pool_bn_kernel,
        out_shape=jax.ShapeDtypeStruct((C * N, OH * OW), jnp.bfloat16),
    )(a, b, c, d, sc, sh)
    return out.reshape(C, N, OH, OW)


# ----------------------------------------------------------------------------
# Kernel 3: fused fc1 -> fc2 -> fc3 -> log_softmax, single grid point.
# Weights stored bf16 in HBM; all dots in f32; intermediates never leave VMEM.
# ----------------------------------------------------------------------------
def _fc_head_kernel(x_ref, w1_ref, b1_ref, w2_ref, b2_ref, w3_ref, b3_ref,
                    o_ref, *, n_cls):
    h = jnp.dot(x_ref[...].astype(jnp.float32), w1_ref[...].astype(jnp.float32),
                preferred_element_type=jnp.float32) + b1_ref[...]
    h = jnp.dot(h, w2_ref[...].astype(jnp.float32),
                preferred_element_type=jnp.float32) + b2_ref[...]
    h = jnp.dot(h, w3_ref[...].astype(jnp.float32),
                preferred_element_type=jnp.float32) + b3_ref[...]
    # mask padded class columns, then row-wise log_softmax
    col = lax.broadcasted_iota(jnp.int32, h.shape, 1)
    h = jnp.where(col < n_cls, h, jnp.float32(-1e30))
    m = jnp.max(h, axis=-1, keepdims=True)
    s = h - m
    lse = jnp.log(jnp.sum(jnp.exp(s), axis=-1, keepdims=True))
    o_ref[...] = s - lse


def fc_head(x, w1, b1, w2, b2, w3, b3):
    """x: (B, 1600) -> log_softmax(fc3(fc2(fc1(x)))) : (B, 4) f32."""
    B, F = x.shape
    Bp = _round_up(B, 8)
    n_cls = w3.shape[0]
    NC = _round_up(n_cls, 128)
    xp = jnp.zeros((Bp, F), jnp.bfloat16).at[:B].set(x.astype(jnp.bfloat16))
    w1t = w1.T.astype(jnp.bfloat16)                       # (1600, 512)
    w2t = w2.T.astype(jnp.bfloat16)                       # (512, 256)
    w3t = jnp.zeros((w3.shape[1], NC), jnp.bfloat16).at[:, :n_cls].set(
        w3.T.astype(jnp.bfloat16))                        # (256, 128)
    b1r = b1.reshape(1, -1)
    b2r = b2.reshape(1, -1)
    b3r = jnp.zeros((1, NC), jnp.float32).at[0, :n_cls].set(b3)
    out = pl.pallas_call(
        functools.partial(_fc_head_kernel, n_cls=n_cls),
        out_shape=jax.ShapeDtypeStruct((Bp, NC), jnp.float32),
    )(xp, w1t, b1r, w2t, b2r, w3t, b3r)
    return out[:B, :n_cls]


# ----------------------------------------------------------------------------
# Parameters (deterministic, synthetic) and forward pass.
# ----------------------------------------------------------------------------
def _bn_scale_shift(g, b, m, v, eps=1e-5):
    sc = g / jnp.sqrt(v + eps)
    return sc, b - m * sc


def init_params(key):
    ks = jax.random.split(key, 20)
    nrm = lambda k, s, std=0.05: std * jax.random.normal(k, s, jnp.float32)
    p = {
        "w1": nrm(ks[0], (16, 3, 3, 3)),   "b1": nrm(ks[1], (16,)),
        "w2": nrm(ks[2], (32, 16, 3, 3)),  "b2": nrm(ks[3], (32,)),
        "w3": nrm(ks[4], (64, 32, 3, 3)),  "b3": nrm(ks[5], (64,)),
        "w4": nrm(ks[6], (64, 64, 3, 3)),  "b4": nrm(ks[7], (64,)),
        "fc1_w": nrm(ks[8], (512, 1600)),  "fc1_b": nrm(ks[9], (512,)),
        "fc2_w": nrm(ks[10], (256, 512)),  "fc2_b": nrm(ks[11], (256,)),
        "fc3_w": nrm(ks[12], (4, 256)),    "fc3_b": nrm(ks[13], (4,)),
    }
    for i, c in zip((1, 2, 3), (16, 32, 64)):
        kk = jax.random.split(ks[13 + i], 4)
        p[f"bn{i}_g"] = 1.0 + 0.1 * jax.random.normal(kk[0], (c,), jnp.float32)
        p[f"bn{i}_b"] = 0.1 * jax.random.normal(kk[1], (c,), jnp.float32)
        p[f"bn{i}_m"] = 0.1 * jax.random.normal(kk[2], (c,), jnp.float32)
        p[f"bn{i}_v"] = 0.9 + 0.2 * jax.random.uniform(kk[3], (c,), jnp.float32)
    return p


def net_forward(params, x):
    sc1, sh1 = _bn_scale_shift(params["bn1_g"], params["bn1_b"],
                               params["bn1_m"], params["bn1_v"])
    sc2, sh2 = _bn_scale_shift(params["bn2_g"], params["bn2_b"],
                               params["bn2_m"], params["bn2_v"])
    sc3, sh3 = _bn_scale_shift(params["bn3_g"], params["bn3_b"],
                               params["bn3_m"], params["bn3_v"])

    # NCHW -> channel-major (C, N, H, W) once at the start.
    x = x.transpose(1, 0, 2, 3)

    # x = batchnorm1(relu(conv1(x)))
    x = conv2d_fused(x, params["w1"], params["b1"], sc1, sh1, relu=True)
    # x = batchnorm2(relu(conv2(x)))
    x = conv2d_fused(x, params["w2"], params["b2"], sc2, sh2, relu=True)
    # x = dropout(batchnorm2(pool(x)))   (dropout = identity; bn2 applied again)
    x = maxpool_bn(x, sc2, sh2)
    # x = batchnorm3(pool(relu(conv3(x))))   (no affine inside the conv kernel)
    x = conv2d_fused(x, params["w3"], params["b3"], relu=True)
    x = maxpool_bn(x, sc3, sh3)
    # x = dropout(conv4(x))              (dropout = identity; bias-only epilogue)
    x = conv2d_fused(x, params["w4"], params["b4"], relu=False)

    # x.view(-1, 64*5*5): PyTorch flattens NCHW in (c, h, w) order.
    n = x.shape[1]
    feats = x.transpose(1, 0, 2, 3).reshape(n, 64 * 5 * 5)

    # fused fc1/fc2/fc3 + log_softmax (dropouts = identity)
    return fc_head(feats, params["fc1_w"], params["fc1_b"],
                   params["fc2_w"], params["fc2_b"],
                   params["fc3_w"], params["fc3_b"])


if __name__ == "__main__":
    key = jax.random.PRNGKey(0)
    pkey, xkey = jax.random.split(key)
    params = init_params(pkey)
    # 300x300 input is what the fc1 (64*5*5) layer implies.
    x = jax.random.normal(xkey, (2, 3, 300, 300), jnp.float32)

    fwd = jax.jit(net_forward)
    out = fwd(params, x)
    out = jax.block_until_ready(out)
    assert out.shape == (2, 4) and out.dtype == jnp.float32
    assert bool(jnp.all(jnp.isfinite(out)))
    print("KERNEL_OK")
</pallas_src>

<mosaic_0001>
module attributes {stable_mosaic.version = 11 : i64} {
  func.func @_conv_mm_kernel(%arg0: i32, %arg1: memref<16x32xbf16, #tpu.memory_space<vmem>>, %arg2: memref<32x7552xbf16, #tpu.memory_space<vmem>>, %arg3: memref<16x1xf32, #tpu.memory_space<vmem>>, %arg4: memref<16x1xf32, #tpu.memory_space<vmem>>, %arg5: memref<16x1xf32, #tpu.memory_space<vmem>>, %arg6: memref<16x7552xbf16, #tpu.memory_space<vmem>>) attributes {dimension_semantics = [#tpu.dimension_semantics<parallel>], iteration_bounds = array<i64: 6>, scalar_prefetch = 0 : i64, scratch_operands = 0 : i64, tpu.core_type = #tpu.core_type<tc>, window_params = [{pipeline_mode = #tpu.pipeline_mode<synchronous>, transform_indices = @transform_0, window_bounds = array<i64: 16, 32>}, {transform_indices = @transform_1, window_bounds = array<i64: 32, 7552>}, {pipeline_mode = #tpu.pipeline_mode<synchronous>, transform_indices = @transform_2, window_bounds = array<i64: 16, 1>}, {pipeline_mode = #tpu.pipeline_mode<synchronous>, transform_indices = @transform_3, window_bounds = array<i64: 16, 1>}, {pipeline_mode = #tpu.pipeline_mode<synchronous>, transform_indices = @transform_4, window_bounds = array<i64: 16, 1>}, {transform_indices = @transform_5, window_bounds = array<i64: 16, 7552>}]} {
    %c0 = arith.constant 0 : index
    %c0_0 = arith.constant 0 : index
    %0 = vector.load %arg1[%c0, %c0_0] : memref<16x32xbf16, #tpu.memory_space<vmem>>, vector<16x32xbf16>
    %1 = arith.extf %0 : vector<16x32xbf16> to vector<16x32xf32>
    %c0_1 = arith.constant 0 : index
    %c0_2 = arith.constant 0 : index
    %2 = vector.load %arg2[%c0_1, %c0_2] : memref<32x7552xbf16, #tpu.memory_space<vmem>>, vector<32x7552xbf16>
    %3 = arith.extf %2 : vector<32x7552xbf16> to vector<32x7552xf32>
    %cst = arith.constant dense<0.000000e+00> : vector<16x7552xf32>
    %4 = tpu.matmul %1, %3, %cst {dimension_numbers = #tpu.dot_dimension_numbers<[1], [0], [0], [1], [0, 0, 1, 1], [], []>} : vector<16x32xf32>, vector<32x7552xf32>, vector<16x7552xf32> -> vector<16x7552xf32>
    %c0_3 = arith.constant 0 : index
    %c0_4 = arith.constant 0 : index
    %5 = vector.load %arg3[%c0_3, %c0_4] : memref<16x1xf32, #tpu.memory_space<vmem>>, vector<16x1xf32>
    %6 = vector.broadcast %5 : vector<16x1xf32> to vector<16x7552xf32>
    %7 = arith.addf %4, %6 : vector<16x7552xf32>
    %cst_5 = arith.constant 0.000000e+00 : f32
    %8 = vector.broadcast %cst_5 : f32 to vector<16x7552xf32>
    %9 = arith.maximumf %7, %8 : vector<16x7552xf32>
    %c0_6 = arith.constant 0 : index
    %c0_7 = arith.constant 0 : index
    %10 = vector.load %arg4[%c0_6, %c0_7] : memref<16x1xf32, #tpu.memory_space<vmem>>, vector<16x1xf32>
    %11 = vector.broadcast %10 : vector<16x1xf32> to vector<16x7552xf32>
    %12 = arith.mulf %9, %11 : vector<16x7552xf32>
    %c0_8 = arith.constant 0 : index
    %c0_9 = arith.constant 0 : index
    %13 = vector.load %arg5[%c0_8, %c0_9] : memref<16x1xf32, #tpu.memory_space<vmem>>, vector<16x1xf32>
    %14 = vector.broadcast %13 : vector<16x1xf32> to vector<16x7552xf32>
    %15 = arith.addf %12, %14 : vector<16x7552xf32>
    %16 = arith.truncf %15 : vector<16x7552xf32> to vector<16x7552xbf16>
    %c0_10 = arith.constant 0 : index
    %c0_11 = arith.constant 0 : index
    %17 = vector.load %arg6[%c0_10, %c0_11] : memref<16x7552xbf16, #tpu.memory_space<vmem>>, vector<16x7552xbf16>
    tpu.vector_store %arg6[%c0_10, %c0_11], %16 {strides = array<i32>} : memref<16x7552xbf16, #tpu.memory_space<vmem>>, vector<16x7552xbf16>,
    return
  }
  func.func @transform_0(%arg0: i32) -> (i32, i32) {
    %c0_i32 = arith.constant 0 : i32
    %c0_i32_0 = arith.constant 0 : i32
    %c0_i32_1 = arith.constant 0 : i32
    return %c0_i32, %c0_i32_0 : i32, i32
  }
  func.func @transform_1(%arg0: i32) -> (i32, i32) {
    %c0_i32 = arith.constant 0 : i32
    %c0_i32_0 = arith.constant 0 : i32
    return %c0_i32, %arg0 : i32, i32
  }
  func.func @transform_2(%arg0: i32) -> (i32, i32) {
    %c0_i32 = arith.constant 0 : i32
    %c0_i32_0 = arith.constant 0 : i32
    %c0_i32_1 = arith.constant 0 : i32
    return %c0_i32, %c0_i32_0 : i32, i32
  }
  func.func @transform_3(%arg0: i32) -> (i32, i32) {
    %c0_i32 = arith.constant 0 : i32
    %c0_i32_0 = arith.constant 0 : i32
    %c0_i32_1 = arith.constant 0 : i32
    return %c0_i32, %c0_i32_0 : i32, i32
  }
  func.func @transform_4(%arg0: i32) -> (i32, i32) {
    %c0_i32 = arith.constant 0 : i32
    %c0_i32_0 = arith.constant 0 : i32
    %c0_i32_1 = arith.constant 0 : i32
    return %c0_i32, %c0_i32_0 : i32, i32
  }
  func.func @transform_5(%arg0: i32) -> (i32, i32) {
    %c0_i32 = arith.constant 0 : i32
    %c0_i32_0 = arith.constant 0 : i32
    return %c0_i32, %arg0 : i32, i32
  }
}

module attributes {stable_mosaic.version = 11 : i64} {
  func.func @_conv_mm_kernel(%arg0: i32, %arg1: memref<32x144xbf16, #tpu.memory_space<vmem>>, %arg2: memref<144x3840xbf16, #tpu.memory_space<vmem>>, %arg3: memref<32x1xf32, #tpu.memory_space<vmem>>, %arg4: memref<32x1xf32, #tpu.memory_space<vmem>>, %arg5: memref<32x1xf32, #tpu.memory_space<vmem>>, %arg6: memref<32x3840xbf16, #tpu.memory_space<vmem>>) attributes {dimension_semantics = [#tpu.dimension_semantics<parallel>], iteration_bounds = array<i64: 3>, scalar_prefetch = 0 : i64, scratch_operands = 0 : i64, tpu.core_type = #tpu.core_type<tc>, window_params = [{pipeline_mode = #tpu.pipeline_mode<synchronous>, transform_indices = @transform_0, window_bounds = array<i64: 32, 144>}, {transform_indices = @transform_1, window_bounds = array<i64: 144, 3840>}, {pipeline_mode = #tpu.pipeline_mode<synchronous>, transform_indices = @transform_2, window_bounds = array<i64: 32, 1>}, {pipeline_mode = #tpu.pipeline_mode<synchronous>, transform_indices = @transform_3, window_bounds = array<i64: 32, 1>}, {pipeline_mode = #tpu.pipeline_mode<synchronous>, transform_indices = @transform_4, window_bounds = array<i64: 32, 1>}, {transform_indices = @transform_5, window_bounds = array<i64: 32, 3840>}]} {
    %c0 = arith.constant 0 : index
    %c0_0 = arith.constant 0 : index
    %0 = vector.load %arg1[%c0, %c0_0] : memref<32x144xbf16, #tpu.memory_space<vmem>>, vector<32x144xbf16>
    %1 = arith.extf %0 : vector<32x144xbf16> to vector<32x144xf32>
    %c0_1 = arith.constant 0 : index
    %c0_2 = arith.constant 0 : index
    %2 = vector.load %arg2[%c0_1, %c0_2] : memref<144x3840xbf16, #tpu.memory_space<vmem>>, vector<144x3840xbf16>
    %3 = arith.extf %2 : vector<144x3840xbf16> to vector<144x3840xf32>
    %cst = arith.constant dense<0.000000e+00> : vector<32x3840xf32>
    %4 = tpu.matmul %1, %3, %cst {dimension_numbers = #tpu.dot_dimension_numbers<[1], [0], [0], [1], [0, 0, 1, 1], [], []>} : vector<32x144xf32>, vector<144x3840xf32>, vector<32x3840xf32> -> vector<32x3840xf32>
    %c0_3 = arith.constant 0 : index
    %c0_4 = arith.constant 0 : index
    %5 = vector.load %arg3[%c0_3, %c0_4] : memref<32x1xf32, #tpu.memory_space<vmem>>, vector<32x1xf32>
    %6 = vector.broadcast %5 : vector<32x1xf32> to vector<32x3840xf32>
    %7 = arith.addf %4, %6 : vector<32x3840xf32>
    %cst_5 = arith.constant 0.000000e+00 : f32
    %8 = vector.broadcast %cst_5 : f32 to vector<32x3840xf32>
    %9 = arith.maximumf %7, %8 : vector<32x3840xf32>
    %c0_6 = arith.constant 0 : index
    %c0_7 = arith.constant 0 : index
    %10 = vector.load %arg4[%c0_6, %c0_7] : memref<32x1xf32, #tpu.memory_space<vmem>>, vector<32x1xf32>
    %11 = vector.broadcast %10 : vector<32x1xf32> to vector<32x3840xf32>
    %12 = arith.mulf %9, %11 : vector<32x3840xf32>
    %c0_8 = arith.constant 0 : index
    %c0_9 = arith.constant 0 : index
    %13 = vector.load %arg5[%c0_8, %c0_9] : memref<32x1xf32, #tpu.memory_space<vmem>>, vector<32x1xf32>
    %14 = vector.broadcast %13 : vector<32x1xf32> to vector<32x3840xf32>
    %15 = arith.addf %12, %14 : vector<32x3840xf32>
    %16 = arith.truncf %15 : vector<32x3840xf32> to vector<32x3840xbf16>
    %c0_10 = arith.constant 0 : index
    %c0_11 = arith.constant 0 : index
    %17 = vector.load %arg6[%c0_10, %c0_11] : memref<32x3840xbf16, #tpu.memory_space<vmem>>, vector<32x3840xbf16>
    tpu.vector_store %arg6[%c0_10, %c0_11], %16 {strides = array<i32>} : memref<32x3840xbf16, #tpu.memory_space<vmem>>, vector<32x3840xbf16>,
    return
  }
  func.func @transform_0(%arg0: i32) -> (i32, i32) {
    %c0_i32 = arith.constant 0 : i32
    %c0_i32_0 = arith.constant 0 : i32
    %c0_i32_1 = arith.constant 0 : i32
    return %c0_i32, %c0_i32_0 : i32, i32
  }
  func.func @transform_1(%arg0: i32) -> (i32, i32) {
    %c0_i32 = arith.constant 0 : i32
    %c0_i32_0 = arith.constant 0 : i32
    return %c0_i32, %arg0 : i32, i32
  }
  func.func @transform_2(%arg0: i32) -> (i32, i32) {
    %c0_i32 = arith.constant 0 : i32
    %c0_i32_0 = arith.constant 0 : i32
    %c0_i32_1 = arith.constant 0 : i32
    return %c0_i32, %c0_i32_0 : i32, i32
  }
  func.func @transform_3(%arg0: i32) -> (i32, i32) {
    %c0_i32 = arith.constant 0 : i32
    %c0_i32_0 = arith.constant 0 : i32
    %c0_i32_1 = arith.constant 0 : i32
    return %c0_i32, %c0_i32_0 : i32, i32
  }
  func.func @transform_4(%arg0: i32) -> (i32, i32) {
    %c0_i32 = arith.constant 0 : i32
    %c0_i32_0 = arith.constant 0 : i32
    %c0_i32_1 = arith.constant 0 : i32
    return %c0_i32, %c0_i32_0 : i32, i32
  }
  func.func @transform_5(%arg0: i32) -> (i32, i32) {
    %c0_i32 = arith.constant 0 : i32
    %c0_i32_0 = arith.constant 0 : i32
    return %c0_i32, %arg0 : i32, i32
  }
}

module attributes {stable_mosaic.version = 11 : i64} {
  func.func @_pool_bn_kernel(%arg0: memref<64x1369xbf16, #tpu.memory_space<vmem>>, %arg1: memref<64x1369xbf16, #tpu.memory_space<vmem>>, %arg2: memref<64x1369xbf16, #tpu.memory_space<vmem>>, %arg3: memref<64x1369xbf16, #tpu.memory_space<vmem>>, %arg4: memref<64x1xf32, #tpu.memory_space<vmem>>, %arg5: memref<64x1xf32, #tpu.memory_space<vmem>>, %arg6: memref<64x1369xbf16, #tpu.memory_space<vmem>>) attributes {dimension_semantics = [], scalar_prefetch = 0 : i64, scratch_operands = 0 : i64, tpu.core_type = #tpu.core_type<tc>} {
    %c0 = arith.constant 0 : index
    %c0_0 = arith.constant 0 : index
    %0 = vector.load %arg0[%c0, %c0_0] : memref<64x1369xbf16, #tpu.memory_space<vmem>>, vector<64x1369xbf16>
    %c0_1 = arith.constant 0 : index
    %c0_2 = arith.constant 0 : index
    %1 = vector.load %arg1[%c0_1, %c0_2] : memref<64x1369xbf16, #tpu.memory_space<vmem>>, vector<64x1369xbf16>
    %2 = arith.maximumf %0, %1 : vector<64x1369xbf16>
    %c0_3 = arith.constant 0 : index
    %c0_4 = arith.constant 0 : index
    %3 = vector.load %arg2[%c0_3, %c0_4] : memref<64x1369xbf16, #tpu.memory_space<vmem>>, vector<64x1369xbf16>
    %c0_5 = arith.constant 0 : index
    %c0_6 = arith.constant 0 : index
    %4 = vector.load %arg3[%c0_5, %c0_6] : memref<64x1369xbf16, #tpu.memory_space<vmem>>, vector<64x1369xbf16>
    %5 = arith.maximumf %3, %4 : vector<64x1369xbf16>
    %6 = arith.maximumf %2, %5 : vector<64x1369xbf16>
    %7 = arith.extf %6 : vector<64x1369xbf16> to vector<64x1369xf32>
    %c0_7 = arith.constant 0 : index
    %c0_8 = arith.constant 0 : index
    %8 = vector.load %arg4[%c0_7, %c0_8] : memref<64x1xf32, #tpu.memory_space<vmem>>, vector<64x1xf32>
    %9 = vector.broadcast %8 : vector<64x1xf32> to vector<64x1369xf32>
    %10 = arith.mulf %7, %9 : vector<64x1369xf32>
    %c0_9 = arith.constant 0 : index
    %c0_10 = arith.constant 0 : index
    %11 = vector.load %arg5[%c0_9, %c0_10] : memref<64x1xf32, #tpu.memory_space<vmem>>, vector<64x1xf32>
    %12 = vector.broadcast %11 : vector<64x1xf32> to vector<64x1369xf32>
    %13 = arith.addf %10, %12 : vector<64x1369xf32>
    %14 = arith.truncf %13 : vector<64x1369xf32> to vector<64x1369xbf16>
    %c0_11 = arith.constant 0 : index
    %c0_12 = arith.constant 0 : index
    %15 = vector.load %arg6[%c0_11, %c0_12] : memref<64x1369xbf16, #tpu.memory_space<vmem>>, vector<64x1369xbf16>
    tpu.vector_store %arg6[%c0_11, %c0_12], %14 {strides = array<i32>} : memref<64x1369xbf16, #tpu.memory_space<vmem>>, vector<64x1369xbf16>,
    return
  }
}

module attributes {stable_mosaic.version = 11 : i64} {
  func.func @_conv_mm_kernel(%arg0: i32, %arg1: memref<64x288xbf16, #tpu.memory_space<vmem>>, %arg2: memref<288x768xbf16, #tpu.memory_space<vmem>>, %arg3: memref<64x1xf32, #tpu.memory_space<vmem>>, %arg4: memref<64x768xbf16, #tpu.memory_space<vmem>>) attributes {dimension_semantics = [#tpu.dimension_semantics<parallel>], iteration_bounds = array<i64: 1>, scalar_prefetch = 0 : i64, scratch_operands = 0 : i64, tpu.core_type = #tpu.core_type<tc>, window_params = [{pipeline_mode = #tpu.pipeline_mode<synchronous>, transform_indices = @transform_0, window_bounds = array<i64: 64, 288>}, {transform_indices = @transform_1, window_bounds = array<i64: 288, 768>}, {pipeline_mode = #tpu.pipeline_mode<synchronous>, transform_indices = @transform_2, window_bounds = array<i64: 64, 1>}, {transform_indices = @transform_3, window_bounds = array<i64: 64, 768>}]} {
    %c0 = arith.constant 0 : index
    %c0_0 = arith.constant 0 : index
    %0 = vector.load %arg1[%c0, %c0_0] : memref<64x288xbf16, #tpu.memory_space<vmem>>, vector<64x288xbf16>
    %1 = arith.extf %0 : vector<64x288xbf16> to vector<64x288xf32>
    %c0_1 = arith.constant 0 : index
    %c0_2 = arith.constant 0 : index
    %2 = vector.load %arg2[%c0_1, %c0_2] : memref<288x768xbf16, #tpu.memory_space<vmem>>, vector<288x768xbf16>
    %3 = arith.extf %2 : vector<288x768xbf16> to vector<288x768xf32>
    %cst = arith.constant dense<0.000000e+00> : vector<64x768xf32>
    %4 = tpu.matmul %1, %3, %cst {dimension_numbers = #tpu.dot_dimension_numbers<[1], [0], [0], [1], [0, 0, 1, 1], [], []>} : vector<64x288xf32>, vector<288x768xf32>, vector<64x768xf32> -> vector<64x768xf32>
    %c0_3 = arith.constant 0 : index
    %c0_4 = arith.constant 0 : index
    %5 = vector.load %arg3[%c0_3, %c0_4] : memref<64x1xf32, #tpu.memory_space<vmem>>, vector<64x1xf32>
    %6 = vector.broadcast %5 : vector<64x1xf32> to vector<64x768xf32>
    %7 = arith.addf %4, %6 : vector<64x768xf32>
    %cst_5 = arith.constant 0.000000e+00 : f32
    %8 = vector.broadcast %cst_5 : f32 to vector<64x768xf32>
    %9 = arith.maximumf %7, %8 : vector<64x768xf32>
    %10 = arith.truncf %9 : vector<64x768xf32> to vector<64x768xbf16>
    %c0_6 = arith.constant 0 : index
    %c0_7 = arith.constant 0 : index
    %11 = vector.load %arg4[%c0_6, %c0_7] : memref<64x768xbf16, #tpu.memory_space<vmem>>, vector<64x768xbf16>
    tpu.vector_store %arg4[%c0_6, %c0_7], %10 {strides = array<i32>} : memref<64x768xbf16, #tpu.memory_space<vmem>>, vector<64x768xbf16>,
    return
  }
  func.func @transform_0(%arg0: i32) -> (i32, i32) {
    %c0_i32 = arith.constant 0 : i32
    %c0_i32_0 = arith.constant 0 : i32
    %c0_i32_1 = arith.constant 0 : i32
    return %c0_i32, %c0_i32_0 : i32, i32
  }
  func.func @transform_1(%arg0: i32) -> (i32, i32) {
    %c0_i32 = arith.constant 0 : i32
    %c0_i32_0 = arith.constant 0 : i32
    return %c0_i32, %arg0 : i32, i32
  }
  func.func @transform_2(%arg0: i32) -> (i32, i32) {
    %c0_i32 = arith.constant 0 : i32
    %c0_i32_0 = arith.constant 0 : i32
    %c0_i32_1 = arith.constant 0 : i32
    return %c0_i32, %c0_i32_0 : i32, i32
  }
  func.func @transform_3(%arg0: i32) -> (i32, i32) {
    %c0_i32 = arith.constant 0 : i32
    %c0_i32_0 = arith.constant 0 : i32
    return %c0_i32, %arg0 : i32, i32
  }
}

module attributes {stable_mosaic.version = 11 : i64} {
  func.func @_pool_bn_kernel(%arg0: memref<128x81xbf16, #tpu.memory_space<vmem>>, %arg1: memref<128x81xbf16, #tpu.memory_space<vmem>>, %arg2: memref<128x81xbf16, #tpu.memory_space<vmem>>, %arg3: memref<128x81xbf16, #tpu.memory_space<vmem>>, %arg4: memref<128x1xf32, #tpu.memory_space<vmem>>, %arg5: memref<128x1xf32, #tpu.memory_space<vmem>>, %arg6: memref<128x81xbf16, #tpu.memory_space<vmem>>) attributes {dimension_semantics = [], scalar_prefetch = 0 : i64, scratch_operands = 0 : i64, tpu.core_type = #tpu.core_type<tc>} {
    %c0 = arith.constant 0 : index
    %c0_0 = arith.constant 0 : index
    %0 = vector.load %arg0[%c0, %c0_0] : memref<128x81xbf16, #tpu.memory_space<vmem>>, vector<128x81xbf16>
    %c0_1 = arith.constant 0 : index
    %c0_2 = arith.constant 0 : index
    %1 = vector.load %arg1[%c0_1, %c0_2] : memref<128x81xbf16, #tpu.memory_space<vmem>>, vector<128x81xbf16>
    %2 = arith.maximumf %0, %1 : vector<128x81xbf16>
    %c0_3 = arith.constant 0 : index
    %c0_4 = arith.constant 0 : index
    %3 = vector.load %arg2[%c0_3, %c0_4] : memref<128x81xbf16, #tpu.memory_space<vmem>>, vector<128x81xbf16>
    %c0_5 = arith.constant 0 : index
    %c0_6 = arith.constant 0 : index
    %4 = vector.load %arg3[%c0_5, %c0_6] : memref<128x81xbf16, #tpu.memory_space<vmem>>, vector<128x81xbf16>
    %5 = arith.maximumf %3, %4 : vector<128x81xbf16>
    %6 = arith.maximumf %2, %5 : vector<128x81xbf16>
    %7 = arith.extf %6 : vector<128x81xbf16> to vector<128x81xf32>
    %c0_7 = arith.constant 0 : index
    %c0_8 = arith.constant 0 : index
    %8 = vector.load %arg4[%c0_7, %c0_8] : memref<128x1xf32, #tpu.memory_space<vmem>>, vector<128x1xf32>
    %9 = vector.broadcast %8 : vector<128x1xf32> to vector<128x81xf32>
    %10 = arith.mulf %7, %9 : vector<128x81xf32>
    %c0_9 = arith.constant 0 : index
    %c0_10 = arith.constant 0 : index
    %11 = vector.load %arg5[%c0_9, %c0_10] : memref<128x1xf32, #tpu.memory_space<vmem>>, vector<128x1xf32>
    %12 = vector.broadcast %11 : vector<128x1xf32> to vector<128x81xf32>
    %13 = arith.addf %10, %12 : vector<128x81xf32>
    %14 = arith.truncf %13 : vector<128x81xf32> to vector<128x81xbf16>
    %c0_11 = arith.constant 0 : index
    %c0_12 = arith.constant 0 : index
    %15 = vector.load %arg6[%c0_11, %c0_12] : memref<128x81xbf16, #tpu.memory_space<vmem>>, vector<128x81xbf16>
    tpu.vector_store %arg6[%c0_11, %c0_12], %14 {strides = array<i32>} : memref<128x81xbf16, #tpu.memory_space<vmem>>, vector<128x81xbf16>,
    return
  }
}

module attributes {stable_mosaic.version = 11 : i64} {
  func.func @_conv_mm_kernel(%arg0: i32, %arg1: memref<64x576xbf16, #tpu.memory_space<vmem>>, %arg2: memref<576x128xbf16, #tpu.memory_space<vmem>>, %arg3: memref<64x1xf32, #tpu.memory_space<vmem>>, %arg4: memref<64x128xbf16, #tpu.memory_space<vmem>>) attributes {dimension_semantics = [#tpu.dimension_semantics<parallel>], iteration_bounds = array<i64: 1>, scalar_prefetch = 0 : i64, scratch_operands = 0 : i64, tpu.core_type = #tpu.core_type<tc>, window_params = [{pipeline_mode = #tpu.pipeline_mode<synchronous>, transform_indices = @transform_0, window_bounds = array<i64: 64, 576>}, {transform_indices = @transform_1, window_bounds = array<i64: 576, 128>}, {pipeline_mode = #tpu.pipeline_mode<synchronous>, transform_indices = @transform_2, window_bounds = array<i64: 64, 1>}, {transform_indices = @transform_3, window_bounds = array<i64: 64, 128>}]} {
    %c0 = arith.constant 0 : index
    %c0_0 = arith.constant 0 : index
    %0 = vector.load %arg1[%c0, %c0_0] : memref<64x576xbf16, #tpu.memory_space<vmem>>, vector<64x576xbf16>
    %1 = arith.extf %0 : vector<64x576xbf16> to vector<64x576xf32>
    %c0_1 = arith.constant 0 : index
    %c0_2 = arith.constant 0 : index
    %2 = vector.load %arg2[%c0_1, %c0_2] : memref<576x128xbf16, #tpu.memory_space<vmem>>, vector<576x128xbf16>
    %3 = arith.extf %2 : vector<576x128xbf16> to vector<576x128xf32>
    %cst = arith.constant dense<0.000000e+00> : vector<64x128xf32>
    %4 = tpu.matmul %1, %3, %cst {dimension_numbers = #tpu.dot_dimension_numbers<[1], [0], [0], [1], [0, 0, 1, 1], [], []>} : vector<64x576xf32>, vector<576x128xf32>, vector<64x128xf32> -> vector<64x128xf32>
    %c0_3 = arith.constant 0 : index
    %c0_4 = arith.constant 0 : index
    %5 = vector.load %arg3[%c0_3, %c0_4] : memref<64x1xf32, #tpu.memory_space<vmem>>, vector<64x1xf32>
    %6 = vector.broadcast %5 : vector<64x1xf32> to vector<64x128xf32>
    %7 = arith.addf %4, %6 : vector<64x128xf32>
    %8 = arith.truncf %7 : vector<64x128xf32> to vector<64x128xbf16>
    %c0_5 = arith.constant 0 : index
    %c0_6 = arith.constant 0 : index
    %9 = vector.load %arg4[%c0_5, %c0_6] : memref<64x128xbf16, #tpu.memory_space<vmem>>, vector<64x128xbf16>
    tpu.vector_store %arg4[%c0_5, %c0_6], %8 {strides = array<i32>} : memref<64x128xbf16, #tpu.memory_space<vmem>>, vector<64x128xbf16>,
    return
  }
  func.func @transform_0(%arg0: i32) -> (i32, i32) {
    %c0_i32 = arith.constant 0 : i32
    %c0_i32_0 = arith.constant 0 : i32
    %c0_i32_1 = arith.constant 0 : i32
    return %c0_i32, %c0_i32_0 : i32, i32
  }
  func.func @transform_1(%arg0: i32) -> (i32, i32) {
    %c0_i32 = arith.constant 0 : i32
    %c0_i32_0 = arith.constant 0 : i32
    return %c0_i32, %arg0 : i32, i32
  }
  func.func @transform_2(%arg0: i32) -> (i32, i32) {
    %c0_i32 = arith.constant 0 : i32
    %c0_i32_0 = arith.constant 0 : i32
    %c0_i32_1 = arith.constant 0 : i32
    return %c0_i32, %c0_i32_0 : i32, i32
  }
  func.func @transform_3(%arg0: i32) -> (i32, i32) {
    %c0_i32 = arith.constant 0 : i32
    %c0_i32_0 = arith.constant 0 : i32
    return %c0_i32, %arg0 : i32, i32
  }
}

module attributes {stable_mosaic.version = 11 : i64} {
  func.func @_fc_head_kernel(%arg0: memref<8x1600xbf16, #tpu.memory_space<vmem>>, %arg1: memref<1600x512xbf16, #tpu.memory_space<vmem>>, %arg2: memref<1x512xf32, #tpu.memory_space<vmem>>, %arg3: memref<512x256xbf16, #tpu.memory_space<vmem>>, %arg4: memref<1x256xf32, #tpu.memory_space<vmem>>, %arg5: memref<256x128xbf16, #tpu.memory_space<vmem>>, %arg6: memref<1x128xf32, #tpu.memory_space<vmem>>, %arg7: memref<8x128xf32, #tpu.memory_space<vmem>>) attributes {dimension_semantics = [], scalar_prefetch = 0 : i64, scratch_operands = 0 : i64, tpu.core_type = #tpu.core_type<tc>} {
    %c0 = arith.constant 0 : index
    %c0_0 = arith.constant 0 : index
    %0 = vector.load %arg0[%c0, %c0_0] : memref<8x1600xbf16, #tpu.memory_space<vmem>>, vector<8x1600xbf16>
    %1 = arith.extf %0 : vector<8x1600xbf16> to vector<8x1600xf32>
    %c0_1 = arith.constant 0 : index
    %c0_2 = arith.constant 0 : index
    %2 = vector.load %arg1[%c0_1, %c0_2] : memref<1600x512xbf16, #tpu.memory_space<vmem>>, vector<1600x512xbf16>
    %3 = arith.extf %2 : vector<1600x512xbf16> to vector<1600x512xf32>
    %cst = arith.constant dense<0.000000e+00> : vector<8x512xf32>
    %4 = tpu.matmul %1, %3, %cst {dimension_numbers = #tpu.dot_dimension_numbers<[1], [0], [0], [1], [0, 0, 1, 1], [], []>} : vector<8x1600xf32>, vector<1600x512xf32>, vector<8x512xf32> -> vector<8x512xf32>
    %c0_3 = arith.constant 0 : index
    %c0_4 = arith.constant 0 : index
    %5 = vector.load %arg2[%c0_3, %c0_4] : memref<1x512xf32, #tpu.memory_space<vmem>>, vector<1x512xf32>
    %6 = vector.broadcast %5 : vector<1x512xf32> to vector<8x512xf32>
    %7 = arith.addf %4, %6 : vector<8x512xf32>
    %c0_5 = arith.constant 0 : index
    %c0_6 = arith.constant 0 : index
    %8 = vector.load %arg3[%c0_5, %c0_6] : memref<512x256xbf16, #tpu.memory_space<vmem>>, vector<512x256xbf16>
    %9 = arith.extf %8 : vector<512x256xbf16> to vector<512x256xf32>
    %cst_7 = arith.constant dense<0.000000e+00> : vector<8x256xf32>
    %10 = tpu.matmul %7, %9, %cst_7 {dimension_numbers = #tpu.dot_dimension_numbers<[1], [0], [0], [1], [0, 0, 1, 1], [], []>} : vector<8x512xf32>, vector<512x256xf32>, vector<8x256xf32> -> vector<8x256xf32>
    %c0_8 = arith.constant 0 : index
    %c0_9 = arith.constant 0 : index
    %11 = vector.load %arg4[%c0_8, %c0_9] : memref<1x256xf32, #tpu.memory_space<vmem>>, vector<1x256xf32>
    %12 = vector.broadcast %11 : vector<1x256xf32> to vector<8x256xf32>
    %13 = arith.addf %10, %12 : vector<8x256xf32>
    %c0_10 = arith.constant 0 : index
    %c0_11 = arith.constant 0 : index
    %14 = vector.load %arg5[%c0_10, %c0_11] : memref<256x128xbf16, #tpu.memory_space<vmem>>, vector<256x128xbf16>
    %15 = arith.extf %14 : vector<256x128xbf16> to vector<256x128xf32>
    %cst_12 = arith.constant dense<0.000000e+00> : vector<8x128xf32>
    %16 = tpu.matmul %13, %15, %cst_12 {dimension_numbers = #tpu.dot_dimension_numbers<[1], [0], [0], [1], [0, 0, 1, 1], [], []>} : vector<8x256xf32>, vector<256x128xf32>, vector<8x128xf32> -> vector<8x128xf32>
    %c0_13 = arith.constant 0 : index
    %c0_14 = arith.constant 0 : index
    %17 = vector.load %arg6[%c0_13, %c0_14] : memref<1x128xf32, #tpu.memory_space<vmem>>, vector<1x128xf32>
    %18 = vector.broadcast %17 : vector<1x128xf32> to vector<8x128xf32>
    %19 = arith.addf %16, %18 : vector<8x128xf32>
    %20 = tpu.iota {dimensions = array<i32: 1>} : vector<8x128xi32>
    %c4_i32 = arith.constant 4 : i32
    %21 = vector.broadcast %c4_i32 : i32 to vector<8x128xi32>
    %22 = arith.cmpi slt, %20, %21 : vector<8x128xi32>
    %cst_15 = arith.constant -1.000000e+30 : f32
    %23 = vector.broadcast %cst_15 : f32 to vector<8x128xf32>
    %24 = arith.select %22, %19, %23 : vector<8x128xi1>, vector<8x128xf32>
    %cst_16 = arith.constant dense<0xFF800000> : vector<8xf32>
    %25 = vector.multi_reduction <maximumf>, %24, %cst_16 [1] : vector<8x128xf32> to vector<8xf32>
    %26 = vector.shape_cast %25 : vector<8xf32> to vector<8x1xf32>
    %27 = vector.broadcast %26 : vector<8x1xf32> to vector<8x128xf32>
    %28 = arith.subf %24, %27 : vector<8x128xf32>
    %29 = math.exp %28 : vector<8x128xf32>
    %cst_17 = arith.constant dense<0.000000e+00> : vector<8xf32>
    %30 = vector.multi_reduction <add>, %29, %cst_17 [1] : vector<8x128xf32> to vector<8xf32>
    %31 = vector.shape_cast %30 : vector<8xf32> to vector<8x1xf32>
    %32 = math.log %31 : vector<8x1xf32>
    %33 = vector.broadcast %32 : vector<8x1xf32> to vector<8x128xf32>
    %34 = arith.subf %28, %33 : vector<8x128xf32>
    %c0_18 = arith.constant 0 : index
    %c0_19 = arith.constant 0 : index
    %35 = vector.load %arg7[%c0_18, %c0_19] : memref<8x128xf32, #tpu.memory_space<vmem>>, vector<8x128xf32>
    tpu.vector_store %arg7[%c0_18, %c0_19], %34 {strides = array<i32>} : memref<8x128xf32, #tpu.memory_space<vmem>>, vector<8x128xf32>,
    return
  }
}

</mosaic_0001>

<bundles_post_ra>
// kernel: net_forward.7
= control target key start
LH: loop header
LB: loop body
LE: loop exit
PB: predicated region body
PF: predicated region fallthrough
CT: control target
= control target key end

     0   :  { %s5034_s18 = smov 0   ;;  %s5036_s19 = smov 0   ;;  %s6299_s0 = inlined_call_operand.vmem [shape: bf16[16,32], index: 0, kind: input, shape index: {}]   ;;  %s6300_s1 = inlined_call_operand.vmem [shape: bf16[32,45312], index: 1, kind: input, shape index: {}]   ;;  %s6301_s2 = inlined_call_operand.vmem [shape: f32[16,1], index: 2, kind: input, shape index: {}]   ;;  %s6302_s3 = inlined_call_operand.vmem [shape: f32[16,1], index: 3, kind: input, shape index: {}]   ;;  %s6303_s4 = inlined_call_operand.vmem [shape: f32[16,1], index: 4, kind: input, shape index: {}]   ;;  %s6304_s5 = inlined_call_operand.vmem [shape: bf16[16,45312], index: 5, kind: output, shape index: {}]  }
   0x1   :  { %s5038_s20 = smov 0  }
   0x2 LB: > { %s4187_s21 = sadd.s32 4294967295, %s5000_s20   ;;  %s5051_s22 = sadd.s32 1, %s5000_s20   ;;  %s5000_s20 = sphi %s5038_s20, %s6308_s20   ;;  %s4996_s19 = sphi %s5036_s19, %s6307_s19   ;;  %s4992_s18 = sphi %s5034_s18, %s6306_s18  }
   0x3   : > { %s40_s23 = ssub.s32 %s5000_s20, %s5051_s22  ;;  %s43_s24 = sadd.s32 1, %s4996_s19 }
   0x4   : > { %p41_p0 = scmp.eq.s32.totalorder %s40_s23, 0  ;;  %p50_p1 = scmp.ne.s32.totalorder %s4996_s19, %s4992_s18 }
   0x5   : > { %p51_p2 = scmp.eq.s32.totalorder %s5000_s20, 0  ;;  %p143_p3 = scmp.eq.s32.totalorder %s4187_s21, 5 }
   0x6   : > { %s5062_s25 = scalar_select %p41_p0, %s4996_s19, %s43_s24  }
   0x7   : > { %p52_p4 = por %p51_p2, %p50_p1  ;;  %p5064_p5 = por %p143_p3, %p50_p1 }
   0x8   : > { %p4190_p6 = scmp.ge.s32.totalorder %s5000_s20, 6 }
   0xa   : > { %177 = sbr.rel (%p4190_p6) target bundleno = 82 (0x52), region = 32 }
  0x11   : > { %180 = sbr.rel (!%p52_p4) target bundleno = 82 (0x52), region = 36  ;;  %s182_s27 = sand.u32 (%p52_p4), 1, %s4996_s19  }
  0x12   : > { %s4328_s28 = smul.u32 (%p52_p4), 236, %s5000_s20 }
  0x13   : > { %s4771_s29 = smul.u32 (%p52_p4), 944, %s182_s27 }
  0x14   : > { %s5074_s7 = scalar_lea.vmem (%p52_p4), %s6300_s1, %s4328_s28 }
  0x15   : > { %v202_v0 = vld [vmem:[%s5074_s7] sm:$0xff] (%p52_p4)  ;;  %v204_v1 = vld [vmem:[%s5074_s7 + $0x8] sm:$0xff] (%p52_p4)  ;;  %v206_v2 = vld [vmem:[%s5074_s7 + $0x10] sm:$0xff] (%p52_p4)  ;;  %s5079_s8 = scalar_lea.vmem (%p52_p4), [#allocation2], %s4771_s29 }
  0x16   : > { %203 = vst [vmem:[%s5079_s8] sm:$0xff] (%p52_p4), %v202_v0  ;;  %205 = vst [vmem:[%s5079_s8 + $0x8] sm:$0xff] (%p52_p4), %v204_v1  ;;  %v208_v3 = vld [vmem:[%s5074_s7 + $0x18] sm:$0xff] (%p52_p4)  ;;  %v210_v4 = vld [vmem:[%s5074_s7 + $0x20] sm:$0xff] (%p52_p4) }
  0x17   : > { %207 = vst [vmem:[%s5079_s8 + $0x10] sm:$0xff] (%p52_p4), %v206_v2  ;;  %v212_v5 = vld [vmem:[%s5074_s7 + $0x28] sm:$0xff] (%p52_p4)  ;;  %209 = vst [vmem:[%s5079_s8 + $0x18] sm:$0xff] (%p52_p4), %v208_v3  ;;  %v214_v6 = vld [vmem:[%s5074_s7 + $0x30] sm:$0xff] (%p52_p4) }
  0x18   : > { %211 = vst [vmem:[%s5079_s8 + $0x20] sm:$0xff] %v210_v4  ;;  %213 = vst [vmem:[%s5079_s8 + $0x28] sm:$0xff] %v212_v5  ;;  %v216_v7 = vld [vmem:[%s5074_s7 + $0x38] sm:$0xff]  ;;  %v218_v8 = vld [vmem:[%s5074_s7 + $0x40] sm:$0xff] }
  0x19   : > { %215 = vst [vmem:[%s5079_s8 + $0x30] sm:$0xff] %v214_v6  ;;  %217 = vst [vmem:[%s5079_s8 + $0x38] sm:$0xff] %v216_v7  ;;  %v220_v9 = vld [vmem:[%s5074_s7 + $0x48] sm:$0xff]  ;;  %v222_v10 = vld [vmem:[%s5074_s7 + $0x50] sm:$0xff] }
  0x1a   : > { %219 = vst [vmem:[%s5079_s8 + $0x40] sm:$0xff] %v218_v8  ;;  %v224_v11 = vld [vmem:[%s5074_s7 + $0x58] sm:$0xff]  ;;  %221 = vst [vmem:[%s5079_s8 + $0x48] sm:$0xff] %v220_v9  ;;  %v226_v12 = vld [vmem:[%s5074_s7 + $0x60] sm:$0xff] }
  0x1b   : > { %223 = vst [vmem:[%s5079_s8 + $0x50] sm:$0xff] %v222_v10  ;;  %225 = vst [vmem:[%s5079_s8 + $0x58] sm:$0xff] %v224_v11  ;;  %v228_v13 = vld [vmem:[%s5074_s7 + $0x68] sm:$0xff]  ;;  %v230_v14 = vld [vmem:[%s5074_s7 + $0x70] sm:$0xff] }
  0x1c   : > { %227 = vst [vmem:[%s5079_s8 + $0x60] sm:$0xff] %v226_v12  ;;  %229 = vst [vmem:[%s5079_s8 + $0x68] sm:$0xff] %v228_v13  ;;  %v232_v15 = vld [vmem:[%s5074_s7 + $0x78] sm:$0xff]  ;;  %v234_v16 = vld [vmem:[%s5074_s7 + $0x80] sm:$0xff] }
  0x1d   : > { %231 = vst [vmem:[%s5079_s8 + $0x70] sm:$0xff] %v230_v14  ;;  %v236_v17 = vld [vmem:[%s5074_s7 + $0x88] sm:$0xff]  ;;  %233 = vst [vmem:[%s5079_s8 + $0x78] sm:$0xff] %v232_v15  ;;  %v238_v18 = vld [vmem:[%s5074_s7 + $0x90] sm:$0xff] }
  0x1e   : > { %235 = vst [vmem:[%s5079_s8 + $0x80] sm:$0xff] %v234_v16  ;;  %237 = vst [vmem:[%s5079_s8 + $0x88] sm:$0xff] %v236_v17  ;;  %v240_v19 = vld [vmem:[%s5074_s7 + $0x98] sm:$0xff]  ;;  %v242_v20 = vld [vmem:[%s5074_s7 + $0xa0] sm:$0xff] }
  0x1f   : > { %239 = vst [vmem:[%s5079_s8 + $0x90] sm:$0xff] %v238_v18  ;;  %241 = vst [vmem:[%s5079_s8 + $0x98] sm:$0xff] %v240_v19  ;;  %v244_v21 = vld [vmem:[%s5074_s7 + $0xa8] sm:$0xff]  ;;  %v246_v22 = vld [vmem:[%s5074_s7 + $0xb0] sm:$0xff] }
  0x20   : > { %243 = vst [vmem:[%s5079_s8 + $0xa0] sm:$0xff] %v242_v20  ;;  %v248_v23 = vld [vmem:[%s5074_s7 + $0xb8] sm:$0xff]  ;;  %245 = vst [vmem:[%s5079_s8 + $0xa8] sm:$0xff] %v244_v21  ;;  %v250_v24 = vld [vmem:[%s5074_s7 + $0xc0] sm:$0xff] }
  0x21   : > { %247 = vst [vmem:[%s5079_s8 + $0xb0] sm:$0xff] %v246_v22  ;;  %249 = vst [vmem:[%s5079_s8 + $0xb8] sm:$0xff] %v248_v23  ;;  %v252_v25 = vld [vmem:[%s5074_s7 + $0xc8] sm:$0xff]  ;;  %v254_v26 = vld [vmem:[%s5074_s7 + $0xd0] sm:$0xff] }
  0x22   : > { %251 = vst [vmem:[%s5079_s8 + $0xc0] sm:$0xff] %v250_v24  ;;  %253 = vst [vmem:[%s5079_s8 + $0xc8] sm:$0xff] %v252_v25  ;;  %v256_v27 = vld [vmem:[%s5074_s7 + $0xd8] sm:$0xff]  ;;  %v258_v28 = vld [vmem:[%s5074_s7 + $0xe0] sm:$0xff] }
  0x23   : > { %255 = vst [vmem:[%s5079_s8 + $0xd0] sm:$0xff] %v254_v26  ;;  %v260_v29 = vld [vmem:[%s5074_s7 + $0x588] sm:$0xff]  ;;  %257 = vst [vmem:[%s5079_s8 + $0xd8] sm:$0xff] %v256_v27  ;;  %v262_v30 = vld [vmem:[%s5074_s7 + $0x590] sm:$0xff] }
  0x24   : > { %259 = vst [vmem:[%s5079_s8 + $0xe0] sm:$0xff] %v258_v28  ;;  %261 = vst [vmem:[%s5079_s8 + $0xec] sm:$0xff] %v260_v29  ;;  %v264_v31 = vld [vmem:[%s5074_s7 + $0x598] sm:$0xff]  ;;  %v266_v32 = vld [vmem:[%s5074_s7 + $0x5a0] sm:$0xff] }
  0x25   : > { %263 = vst [vmem:[%s5079_s8 + $0xf4] sm:$0xff] %v262_v30  ;;  %265 = vst [vmem:[%s5079_s8 + $0xfc] sm:$0xff] %v264_v31  ;;  %v268_v33 = vld [vmem:[%s5074_s7 + $0x5a8] sm:$0xff]  ;;  %v270_v34 = vld [vmem:[%s5074_s7 + $0x5b0] sm:$0xff] }
  0x26   : > { %267 = vst [vmem:[%s5079_s8 + $0x104] sm:$0xff] %v266_v32  ;;  %v272_v35 = vld [vmem:[%s5074_s7 + $0x5b8] sm:$0xff]  ;;  %269 = vst [vmem:[%s5079_s8 + $0x10c] sm:$0xff] %v268_v33  ;;  %v274_v36 = vld [vmem:[%s5074_s7 + $0x5c0] sm:$0xff] }
  0x27   : > { %271 = vst [vmem:[%s5079_s8 + $0x114] sm:$0xff] %v270_v34  ;;  %273 = vst [vmem:[%s5079_s8 + $0x11c] sm:$0xff] %v272_v35  ;;  %v276_v37 = vld [vmem:[%s5074_s7 + $0x5c8] sm:$0xff]  ;;  %v278_v38 = vld [vmem:[%s5074_s7 + $0x5d0] sm:$0xff] }
  0x28   : > { %275 = vst [vmem:[%s5079_s8 + $0x124] sm:$0xff] %v274_v36  ;;  %277 = vst [vmem:[%s5079_s8 + $0x12c] sm:$0xff] %v276_v37  ;;  %v280_v39 = vld [vmem:[%s5074_s7 + $0x5d8] sm:$0xff]  ;;  %v282_v40 = vld [vmem:[%s5074_s7 + $0x5e0] sm:$0xff] }
  0x29   : > { %279 = vst [vmem:[%s5079_s8 + $0x134] sm:$0xff] %v278_v38  ;;  %v284_v41 = vld [vmem:[%s5074_s7 + $0x5e8] sm:$0xff]  ;;  %281 = vst [vmem:[%s5079_s8 + $0x13c] sm:$0xff] %v280_v39  ;;  %v286_v42 = vld [vmem:[%s5074_s7 + $0x5f0] sm:$0xff] }
  0x2a   : > { %283 = vst [vmem:[%s5079_s8 + $0x144] sm:$0xff] %v282_v40  ;;  %285 = vst [vmem:[%s5079_s8 + $0x14c] sm:$0xff] %v284_v41  ;;  %v288_v43 = vld [vmem:[%s5074_s7 + $0x5f8] sm:$0xff]  ;;  %v290_v44 = vld [vmem:[%s5074_s7 + $0x600] sm:$0xff] }
  0x2b   : > { %287 = vst [vmem:[%s5079_s8 + $0x154] sm:$0xff] %v286_v42  ;;  %289 = vst [vmem:[%s5079_s8 + $0x15c] sm:$0xff] %v288_v43  ;;  %v292_v45 = vld [vmem:[%s5074_s7 + $0x608] sm:$0xff]  ;;  %v294_v46 = vld [vmem:[%s5074_s7 + $0x610] sm:$0xff] }
  0x2c   : > { %291 = vst [vmem:[%s5079_s8 + $0x164] sm:$0xff] %v290_v44  ;;  %v296_v47 = vld [vmem:[%s5074_s7 + $0x618] sm:$0xff]  ;;  %293 = vst [vmem:[%s5079_s8 + $0x16c] sm:$0xff] %v292_v45  ;;  %v298_v48 = vld [vmem:[%s5074_s7 + $0x620] sm:$0xff] }
  0x2d   : > { %295 = vst [vmem:[%s5079_s8 + $0x174] sm:$0xff] %v294_v46  ;;  %297 = vst [vmem:[%s5079_s8 + $0x17c] sm:$0xff] %v296_v47  ;;  %v300_v49 = vld [vmem:[%s5074_s7 + $0x628] sm:$0xff]  ;;  %v302_v50 = vld [vmem:[%s5074_s7 + $0x630] sm:$0xff] }
  0x2e   : > { %299 = vst [vmem:[%s5079_s8 + $0x184] sm:$0xff] %v298_v48  ;;  %301 = vst [vmem:[%s5079_s8 + $0x18c] sm:$0xff] %v300_v49  ;;  %v304_v51 = vld [vmem:[%s5074_s7 + $0x638] sm:$0xff]  ;;  %v306_v52 = vld [vmem:[%s5074_s7 + $0x640] sm:$0xff] }
  0x2f   : > { %303 = vst [vmem:[%s5079_s8 + $0x194] sm:$0xff] %v302_v50  ;;  %v308_v53 = vld [vmem:[%s5074_s7 + $0x648] sm:$0xff]  ;;  %305 = vst [vmem:[%s5079_s8 + $0x19c] sm:$0xff] %v304_v51  ;;  %v310_v54 = vld [vmem:[%s5074_s7 + $0x650] sm:$0xff] }
  0x30   : > { %307 = vst [vmem:[%s5079_s8 + $0x1a4] sm:$0xff] %v306_v52  ;;  %309 = vst [vmem:[%s5079_s8 + $0x1ac] sm:$0xff] %v308_v53  ;;  %v312_v55 = vld [vmem:[%s5074_s7 + $0x658] sm:$0xff]  ;;  %v314_v56 = vld [vmem:[%s5074_s7 + $0x660] sm:$0xff] }
  0x31   : > { %311 = vst [vmem:[%s5079_s8 + $0x1b4] sm:$0xff] %v310_v54  ;;  %313 = vst [vmem:[%s5079_s8 + $0x1bc] sm:$0xff] %v312_v55  ;;  %v316_v57 = vld [vmem:[%s5074_s7 + $0x668] sm:$0xff]  ;;  %v318_v58 = vld [vmem:[%s5074_s7 + $0xb10] sm:$0xff] }
  0x32   : > { %315 = vst [vmem:[%s5079_s8 + $0x1c4] sm:$0xff] %v314_v56  ;;  %v320_v59 = vld [vmem:[%s5074_s7 + $0xb18] sm:$0xff]  ;;  %317 = vst [vmem:[%s5079_s8 + $0x1cc] sm:$0xff] %v316_v57  ;;  %v322_v60 = vld [vmem:[%s5074_s7 + $0xb20] sm:$0xff] }
  0x33   : > { %319 = vst [vmem:[%s5079_s8 + $0x1d8] sm:$0xff] %v318_v58  ;;  %321 = vst [vmem:[%s5079_s8 + $0x1e0] sm:$0xff] %v320_v59  ;;  %v324_v61 = vld [vmem:[%s5074_s7 + $0xb28] sm:$0xff]  ;;  %v326_v62 = vld [vmem:[%s5074_s7 + $0xb30] sm:$0xff] }
  0x34   : > { %323 = vst [vmem:[%s5079_s8 + $0x1e8] sm:$0xff] %v322_v60  ;;  %325 = vst [vmem:[%s5079_s8 + $0x1f0] sm:$0xff] %v324_v61  ;;  %v328_v63 = vld [vmem:[%s5074_s7 + $0xb38] sm:$0xff]  ;;  %v330_v0 = vld [vmem:[%s5074_s7 + $0xb40] sm:$0xff] }
  0x35   : > { %327 = vst [vmem:[%s5079_s8 + $0x1f8] sm:$0xff] %v326_v62  ;;  %v332_v1 = vld [vmem:[%s5074_s7 + $0xb48] sm:$0xff]  ;;  %329 = vst [vmem:[%s5079_s8 + $0x200] sm:$0xff] %v328_v63  ;;  %v334_v2 = vld [vmem:[%s5074_s7 + $0xb50] sm:$0xff] }
  0x36   : > { %331 = vst [vmem:[%s5079_s8 + $0x208] sm:$0xff] %v330_v0  ;;  %333 = vst [vmem:[%s5079_s8 + $0x210] sm:$0xff] %v332_v1  ;;  %v336_v3 = vld [vmem:[%s5074_s7 + $0xb58] sm:$0xff]  ;;  %v338_v4 = vld [vmem:[%s5074_s7 + $0xb60] sm:$0xff] }
  0x37   : > { %335 = vst [vmem:[%s5079_s8 + $0x218] sm:$0xff] %v334_v2  ;;  %337 = vst [vmem:[%s5079_s8 + $0x220] sm:$0xff] %v336_v3  ;;  %v340_v5 = vld [vmem:[%s5074_s7 + $0xb68] sm:$0xff]  ;;  %v342_v6 = vld [vmem:[%s5074_s7 + $0xb70] sm:$0xff] }
  0x38   : > { %339 = vst [vmem:[%s5079_s8 + $0x228] sm:$0xff] %v338_v4  ;;  %v344_v7 = vld [vmem:[%s5074_s7 + $0xb78] sm:$0xff]  ;;  %341 = vst [vmem:[%s5079_s8 + $0x230] sm:$0xff] %v340_v5  ;;  %v346_v8 = vld [vmem:[%s5074_s7 + $0xb80] sm:$0xff] }
  0x39   : > { %343 = vst [vmem:[%s5079_s8 + $0x238] sm:$0xff] %v342_v6  ;;  %345 = vst [vmem:[%s5079_s8 + $0x240] sm:$0xff] %v344_v7  ;;  %v348_v9 = vld [vmem:[%s5074_s7 + $0xb88] sm:$0xff]  ;;  %v350_v10 = vld [vmem:[%s5074_s7 + $0xb90] sm:$0xff] }
  0x3a   : > { %347 = vst [vmem:[%s5079_s8 + $0x248] sm:$0xff] %v346_v8  ;;  %349 = vst [vmem:[%s5079_s8 + $0x250] sm:$0xff] %v348_v9  ;;  %v352_v11 = vld [vmem:[%s5074_s7 + $0xb98] sm:$0xff]  ;;  %v354_v12 = vld [vmem:[%s5074_s7 + $0xba0] sm:$0xff] }
  0x3b   : > { %351 = vst [vmem:[%s5079_s8 + $0x258] sm:$0xff] %v350_v10  ;;  %v356_v13 = vld [vmem:[%s5074_s7 + $0xba8] sm:$0xff]  ;;  %353 = vst [vmem:[%s5079_s8 + $0x260] sm:$0xff] %v352_v11  ;;  %v358_v14 = vld [vmem:[%s5074_s7 + $0xbb0] sm:$0xff] }
  0x3c   : > { %355 = vst [vmem:[%s5079_s8 + $0x268] sm:$0xff] %v354_v12  ;;  %357 = vst [vmem:[%s5079_s8 + $0x270] sm:$0xff] %v356_v13  ;;  %v360_v15 = vld [vmem:[%s5074_s7 + $0xbb8] sm:$0xff]  ;;  %v362_v16 = vld [vmem:[%s5074_s7 + $0xbc0] sm:$0xff] }
  0x3d   : > { %359 = vst [vmem:[%s5079_s8 + $0x278] sm:$0xff] %v358_v14  ;;  %361 = vst [vmem:[%s5079_s8 + $0x280] sm:$0xff] %v360_v15  ;;  %v364_v17 = vld [vmem:[%s5074_s7 + $0xbc8] sm:$0xff]  ;;  %v366_v18 = vld [vmem:[%s5074_s7 + $0xbd0] sm:$0xff] }
  0x3e   : > { %363 = vst [vmem:[%s5079_s8 + $0x288] sm:$0xff] %v362_v16  ;;  %v368_v19 = vld [vmem:[%s5074_s7 + $0xbd8] sm:$0xff]  ;;  %365 = vst [vmem:[%s5079_s8 + $0x290] sm:$0xff] %v364_v17  ;;  %v370_v20 = vld [vmem:[%s5074_s7 + $0xbe0] sm:$0xff] }
  0x3f   : > { %367 = vst [vmem:[%s5079_s8 + $0x298] sm:$0xff] %v366_v18  ;;  %369 = vst [vmem:[%s5079_s8 + $0x2a0] sm:$0xff] %v368_v19  ;;  %v372_v21 = vld [vmem:[%s5074_s7 + $0xbe8] sm:$0xff]  ;;  %v374_v22 = vld [vmem:[%s5074_s7 + $0xbf0] sm:$0xff] }
  0x40   : > { %371 = vst [vmem:[%s5079_s8 + $0x2a8] sm:$0xff] %v370_v20  ;;  %373 = vst [vmem:[%s5079_s8 + $0x2b0] sm:$0xff] %v372_v21  ;;  %v376_v23 = vld [vmem:[%s5074_s7 + $0x1098] sm:$0xff]  ;;  %v378_v24 = vld [vmem:[%s5074_s7 + $0x10a0] sm:$0xff] }
  0x41   : > { %375 = vst [vmem:[%s5079_s8 + $0x2b8] sm:$0xff] %v374_v22  ;;  %v380_v25 = vld [vmem:[%s5074_s7 + $0x10a8] sm:$0xff]  ;;  %377 = vst [vmem:[%s5079_s8 + $0x2c4] sm:$0xff] %v376_v23  ;;  %v382_v26 = vld [vmem:[%s5074_s7 + $0x10b0] sm:$0xff] }
  0x42   : > { %379 = vst [vmem:[%s5079_s8 + $0x2cc] sm:$0xff] %v378_v24  ;;  %381 = vst [vmem:[%s5079_s8 + $0x2d4] sm:$0xff] %v380_v25  ;;  %v384_v27 = vld [vmem:[%s5074_s7 + $0x10b8] sm:$0xff]  ;;  %v386_v28 = vld [vmem:[%s5074_s7 + $0x10c0] sm:$0xff] }
  0x43   : > { %383 = vst [vmem:[%s5079_s8 + $0x2dc] sm:$0xff] %v382_v26  ;;  %385 = vst [vmem:[%s5079_s8 + $0x2e4] sm:$0xff] %v384_v27  ;;  %v388_v29 = vld [vmem:[%s5074_s7 + $0x10c8] sm:$0xff]  ;;  %v390_v30 = vld [vmem:[%s5074_s7 + $0x10d0] sm:$0xff] }
  0x44   : > { %387 = vst [vmem:[%s5079_s8 + $0x2ec] sm:$0xff] %v386_v28  ;;  %v392_v31 = vld [vmem:[%s5074_s7 + $0x10d8] sm:$0xff]  ;;  %389 = vst [vmem:[%s5079_s8 + $0x2f4] sm:$0xff] %v388_v29  ;;  %v394_v32 = vld [vmem:[%s5074_s7 + $0x10e0] sm:$0xff] }
  0x45   : > { %391 = vst [vmem:[%s5079_s8 + $0x2fc] sm:$0xff] %v390_v30  ;;  %393 = vst [vmem:[%s5079_s8 + $0x304] sm:$0xff] %v392_v31  ;;  %v396_v33 = vld [vmem:[%s5074_s7 + $0x10e8] sm:$0xff]  ;;  %v398_v34 = vld [vmem:[%s5074_s7 + $0x10f0] sm:$0xff] }
  0x46   : > { %395 = vst [vmem:[%s5079_s8 + $0x30c] sm:$0xff] %v394_v32  ;;  %397 = vst [vmem:[%s5079_s8 + $0x314] sm:$0xff] %v396_v33  ;;  %v400_v35 = vld [vmem:[%s5074_s7 + $0x10f8] sm:$0xff]  ;;  %v402_v36 = vld [vmem:[%s5074_s7 + $0x1100] sm:$0xff] }
  0x47   : > { %399 = vst [vmem:[%s5079_s8 + $0x31c] sm:$0xff] %v398_v34  ;;  %v404_v37 = vld [vmem:[%s5074_s7 + $0x1108] sm:$0xff]  ;;  %401 = vst [vmem:[%s5079_s8 + $0x324] sm:$0xff] %v400_v35  ;;  %v406_v38 = vld [vmem:[%s5074_s7 + $0x1110] sm:$0xff] }
  0x48   : > { %403 = vst [vmem:[%s5079_s8 + $0x32c] sm:$0xff] %v402_v36  ;;  %405 = vst [vmem:[%s5079_s8 + $0x334] sm:$0xff] %v404_v37  ;;  %v408_v39 = vld [vmem:[%s5074_s7 + $0x1118] sm:$0xff]  ;;  %v410_v40 = vld [vmem:[%s5074_s7 + $0x1120] sm:$0xff] }
  0x49   : > { %407 = vst [vmem:[%s5079_s8 + $0x33c] sm:$0xff] %v406_v38  ;;  %409 = vst [vmem:[%s5079_s8 + $0x344] sm:$0xff] %v408_v39  ;;  %v412_v41 = vld [vmem:[%s5074_s7 + $0x1128] sm:$0xff]  ;;  %v414_v42 = vld [vmem:[%s5074_s7 + $0x1130] sm:$0xff] }
  0x4a   : > { %411 = vst [vmem:[%s5079_s8 + $0x34c] sm:$0xff] %v410_v40  ;;  %v416_v43 = vld [vmem:[%s5074_s7 + $0x1138] sm:$0xff]  ;;  %413 = vst [vmem:[%s5079_s8 + $0x354] sm:$0xff] %v412_v41  ;;  %v418_v44 = vld [vmem:[%s5074_s7 + $0x1140] sm:$0xff] }
  0x4b   : > { %415 = vst [vmem:[%s5079_s8 + $0x35c] sm:$0xff] %v414_v42  ;;  %417 = vst [vmem:[%s5079_s8 + $0x364] sm:$0xff] %v416_v43  ;;  %v420_v45 = vld [vmem:[%s5074_s7 + $0x1148] sm:$0xff]  ;;  %v422_v46 = vld [vmem:[%s5074_s7 + $0x1150] sm:$0xff] }
  0x4c   : > { %419 = vst [vmem:[%s5079_s8 + $0x36c] sm:$0xff] %v418_v44  ;;  %421 = vst [vmem:[%s5079_s8 + $0x374] sm:$0xff] %v420_v45  ;;  %v424_v47 = vld [vmem:[%s5074_s7 + $0x1158] sm:$0xff]  ;;  %v426_v48 = vld [vmem:[%s5074_s7 + $0x1160] sm:$0xff] }
  0x4d   : > { %423 = vst [vmem:[%s5079_s8 + $0x37c] sm:$0xff] %v422_v46  ;;  %v428_v49 = vld [vmem:[%s5074_s7 + $0x1168] sm:$0xff]  ;;  %425 = vst [vmem:[%s5079_s8 + $0x384] sm:$0xff] %v424_v47  ;;  %v430_v50 = vld [vmem:[%s5074_s7 + $0x1170] sm:$0xff] }
  0x4e   : > { %427 = vst [vmem:[%s5079_s8 + $0x38c] sm:$0xff] %v426_v48  ;;  %429 = vst [vmem:[%s5079_s8 + $0x394] sm:$0xff] %v428_v49  ;;  %v432_v51 = vld [vmem:[%s5074_s7 + $0x1178] sm:$0xff]  ;;  %v4192_v52 = vld [vmem:[%s5074_s7 + $0xe8] sm:$0xf] }
  0x4f   : > { %431 = vst [vmem:[%s5079_s8 + $0x39c] sm:$0xff] %v430_v50  ;;  %433 = vst [vmem:[%s5079_s8 + $0x3a4] sm:$0xff] %v432_v51  ;;  %v4194_v53 = vld [vmem:[%s5074_s7 + $0x670] sm:$0xf]  ;;  %v4196_v54 = vld [vmem:[%s5074_s7 + $0xbf8] sm:$0xf] }
  0x50   : > { %4193 = vst [vmem:[%s5079_s8 + $0xe8] sm:$0xf] %v4192_v52  ;;  %v4198_v55 = vld [vmem:[%s5074_s7 + $0x1180] sm:$0xf]  ;;  %4195 = vst [vmem:[%s5079_s8 + $0x1d4] sm:$0xf] %v4194_v53 }
  0x51   : > { %4197 = vst [vmem:[%s5079_s8 + $0x2c0] sm:$0xf] %v4196_v54  ;;  %4199 = vst [vmem:[%s5079_s8 + $0x3ac] sm:$0xf] %v4198_v55 }
  0x52 PF: > { %p4200_p7 = scmp.ge.s32.totalorder %s5000_s20, 1  ;;  %p453_p8 = scmp.lt.s32.totalorder %s5000_s20, 7 }
  0x54   : > { %p454_p9 = pnand %p4200_p7, %p453_p8 }
  0x55   : > { %s460_s9 = sand.u32 (!%p454_p9), 1, %s4992_s18   ;;  %v848_v56 = vld [vmem:[%s6301_s2] sm:$0xff] (!%p454_p9)  ;;  %v5002_v57 = vmov (!%p454_p9), 0.0   ;;  %v5003_v59 = vmov (!%p454_p9), 0   ;;  %v849_v60 = vld [vmem:[%s6301_s2 + $0x8] sm:$0xff] (!%p454_p9)  ;;  %vm860_vm0 = vcmask (!%p454_p9), 261120  }
  0x56   : > { %457 = sbr.rel (%p454_p9) target bundleno = 471 (0x1d7), region = 62  ;;  %931 = vmatprep.mubr.f32.mxu0 (!%p454_p9), %v5002_v57  ;;  %1008 = vmatprep.mubr.f32.mxu1 (!%p454_p9), %v5002_v57  ;;  %v3293_v58 = vld [vmem:[%s6302_s3] sm:$0xff] (!%p454_p9)  ;;  %v3294_v62 = vld [vmem:[%s6302_s3 + $0x8] sm:$0xff] (!%p454_p9) }
  0x57   : > { %s4772_s12 = smul.u32 (!%p454_p9), 944, %s460_s9  ;;  %4800 = vset.pattern.permute.xlu0 (!%p454_p9), %v5003_v59  ;;  %4801 = vset.pattern.permute.xlu1 (!%p454_p9), %v5003_v59  ;;  %v4391_v2 = vld [vmem:[%s6299_s0] sm:$0xff] (!%p454_p9)   ;;  %v3424_v9 = vld [vmem:[%s6303_s4 + $0x8] sm:$0xff] (!%p454_p9) }
  0x58   : > { %852 = vperm.xlu0 (!%p454_p9), %4800, %v848_v56   ;;  %3297 = vperm.xlu1 (!%p454_p9), %4801, %v3293_v58   ;;  %v3423_v3 = vld [vmem:[%s6303_s4] sm:$0xff] (!%p454_p9)  ;;  %v5357_v10 = vunpack.c.l.bf16 (!%p454_p9), %v4391_v2  ;;  %v5368_v16 = vunpack.c.h.bf16 (!%p454_p9), %v4391_v2  ;;  %s5664_s8 = smul.u32 (!%p454_p9), 472, %s460_s9 }
  0x59   : > { %s5334_s17 = scalar_lea.vmem (!%p454_p9), [#allocation2], %s4772_s12 }
  0x5a   : > { %v4802_v61 = vld [vmem:[%s5334_s17 + $0x4] ss:$236 sps:$4 sm:$0xff] (!%p454_p9)   ;;  %v4804_v63 = vld [vmem:[%s5334_s17 + $0xc] ss:$236 sps:$4 sm:$0xff] (!%p454_p9)   ;;  %v4807_v1 = vld [vmem:[%s5334_s17 + $0x8] ss:$236 sps:$4 sm:$0xff] (!%p454_p9)  }
  0x5b   : > { %4412 = vmatprep.subr.bf16.mxu0 (!%p454_p9), %v4802_v61  ;;  %v4806_v0 = vld [vmem:[%s5334_s17] ss:$236 sps:$4 sm:$0xff] (!%p454_p9)   ;;  %4420 = vmatprep.subr.bf16.mxu1 (!%p454_p9), %v4804_v63  ;;  %v4808_v4 = vld [vmem:[%s5334_s17 + $0x1dc] ss:$236 sps:$4 sm:$0xff] (!%p454_p9)   ;;  %v4810_v5 = vld [vmem:[%s5334_s17 + $0x1e4] ss:$236 sps:$4 sm:$0xff] (!%p454_p9)  }
  0x5c   : > { %857 = vperm.xlu0 (!%p454_p9), %4800, %v849_v60   ;;  %4414 = vmatpush1.bf16.msra.mxu0 (!%p454_p9), %v4806_v0  ;;  %v4812_v6 = vld [vmem:[%s5334_s17 + $0x1d8] ss:$236 sps:$4 sm:$0xff] (!%p454_p9)   ;;  %v4813_v7 = vld [vmem:[%s5334_s17 + $0x1e0] ss:$236 sps:$4 sm:$0xff] (!%p454_p9)   ;;  %v4816_v11 = vld [vmem:[%s5334_s17 + $0x10] ss:$236 sps:$4 sm:$0xff] (!%p454_p9)  }
  0x5d   : > { %4422 = vmatpush1.bf16.msra.mxu1 %v4807_v1  ;;  %4416 = vmatprep.subr.bf16.mxu0 %v4808_v4  ;;  %v4814_v8 = vld [vmem:[%s5334_s17 + $0x14] ss:$236 sps:$4 sm:$0xff]   ;;  %v4817_v12 = vld [vmem:[%s5334_s17 + $0x1c] ss:$236 sps:$4 sm:$0xff]   ;;  %v4819_v13 = vld [vmem:[%s5334_s17 + $0x18] ss:$236 sps:$4 sm:$0xff]  }
  0x5e   : > { %3302 = vperm.xlu1 %4801, %v3294_v62   ;;  %4424 = vmatprep.subr.bf16.mxu1 %v4810_v5  ;;  %v4820_v14 = vld [vmem:[%s5334_s17 + $0x1ec] ss:$236 sps:$4 sm:$0xff]   ;;  %v4823_v15 = vld [vmem:[%s5334_s17 + $0x1f4] ss:$236 sps:$4 sm:$0xff]   ;;  %v4825_v18 = vld [vmem:[%s5334_s17 + $0x1f0] ss:$236 sps:$4 sm:$0xff]  }
  0x5f   : > { %v4822_v17 = vld [vmem:[%s5334_s17 + $0x1e8] ss:$236 sps:$4 sm:$0xff]   ;;  %v4826_v19 = vld [vmem:[%s5334_s17 + $0x24] ss:$236 sps:$4 sm:$0xff]   ;;  %v4829_v20 = vld [vmem:[%s5334_s17 + $0x2c] ss:$236 sps:$4 sm:$0xff]  }
  0x60   : > { %3427 = vperm.xlu0 %4800, %v3423_v3   ;;  %4418 = vmatpush1.bf16.msra.mxu0 %v4812_v6  ;;  %v4828_v21 = vld [vmem:[%s5334_s17 + $0x20] ss:$236 sps:$4 sm:$0xff]   ;;  %v4831_v22 = vld [vmem:[%s5334_s17 + $0x28] ss:$236 sps:$4 sm:$0xff]   ;;  %v4835_v24 = vld [vmem:[%s5334_s17 + $0x204] ss:$236 sps:$4 sm:$0xff]  }
  0x61   : > { %4426 = vmatpush1.bf16.msra.mxu1 %v4813_v7  ;;  %4428 = vmatprep.subr.bf16.mxu0 %v4814_v8  ;;  %v4832_v23 = vld [vmem:[%s5334_s17 + $0x1fc] ss:$236 sps:$4 sm:$0xff]   ;;  %v4834_v25 = vld [vmem:[%s5334_s17 + $0x1f8] ss:$236 sps:$4 sm:$0xff]   ;;  %v4837_v26 = vld [vmem:[%s5334_s17 + $0x200] ss:$236 sps:$4 sm:$0xff]  }
  0x62   : > { %4436 = vmatprep.subr.bf16.mxu1 %v4817_v12  ;;  %3432 = vperm.xlu1 %4801, %v3424_v9   ;;  %v4838_v27 = vld [vmem:[%s5334_s17 + $0x34] ss:$236 sps:$4 sm:$0xff]   ;;  %v4841_v28 = vld [vmem:[%s5334_s17 + $0x3c] ss:$236 sps:$4 sm:$0xff]   ;;  %v4843_v30 = vld [vmem:[%s5334_s17 + $0x38] ss:$236 sps:$4 sm:$0xff]  }
  0x63   : > { %4201 = vmatmul.mubr.msk.f32.vlgmr.msra.gmra.mrb[0].mxu0 %vm860_vm0, %v5357_v10  ;;  %v4840_v29 = vld [vmem:[%s5334_s17 + $0x30] ss:$236 sps:$4 sm:$0xff]   ;;  %v4844_v31 = vld [vmem:[%s5334_s17 + $0x20c] ss:$236 sps:$4 sm:$0xff]   ;;  %v4847_v32 = vld [vmem:[%s5334_s17 + $0x214] ss:$236 sps:$4 sm:$0xff]  }
  0x64   : > { %4203 = vmatmul.mubr.msk.f32.vlgmr.msra.gmra.mrb[0].mxu1 %vm860_vm0, %v5357_v10  ;;  %4430 = vmatpush1.bf16.msra.mxu0 %v4816_v11  ;;  %v4846_v33 = vld [vmem:[%s5334_s17 + $0x208] ss:$236 sps:$4 sm:$0xff]   ;;  %v4849_v34 = vld [vmem:[%s5334_s17 + $0x210] ss:$236 sps:$4 sm:$0xff]   ;;  %v4853_v36 = vld [vmem:[%s5334_s17 + $0x4c] ss:$236 sps:$4 sm:$0xff]  }
  0x65   : > { %4438 = vmatpush1.bf16.msra.mxu1 %v4819_v13  ;;  %937 = vmatprep.mubr.f32.mxu0 %v5002_v57  ;;  %v4850_v35 = vld [vmem:[%s5334_s17 + $0x44] ss:$236 sps:$4 sm:$0xff]   ;;  %v4852_v37 = vld [vmem:[%s5334_s17 + $0x40] ss:$236 sps:$4 sm:$0xff]   ;;  %v4855_v38 = vld [vmem:[%s5334_s17 + $0x48] ss:$236 sps:$4 sm:$0xff]  }
  0x66   : > { %1014 = vmatprep.mubr.f32.mxu1 %v5002_v57  ;;  %4432 = vmatprep.subr.bf16.mxu0 %v4820_v14  ;;  %v4856_v39 = vld [vmem:[%s5334_s17 + $0x21c] ss:$236 sps:$4 sm:$0xff]   ;;  %v4859_v40 = vld [vmem:[%s5334_s17 + $0x224] ss:$236 sps:$4 sm:$0xff]   ;;  %v4861_v42 = vld [vmem:[%s5334_s17 + $0x220] ss:$236 sps:$4 sm:$0xff]  }
  0x67   : > { %4440 = vmatprep.subr.bf16.mxu1 %v4823_v15  ;;  %4202 = vmatmul.mubr.msk.f32.gmra.mrb[2].mxu0 %vm860_vm0, %v5368_v16  ;;  %v4858_v41 = vld [vmem:[%s5334_s17 + $0x218] ss:$236 sps:$4 sm:$0xff]   ;;  %v4862_v43 = vld [vmem:[%s5334_s17 + $0x54] ss:$236 sps:$4 sm:$0xff]   ;;  %v4865_v44 = vld [vmem:[%s5334_s17 + $0x5c] ss:$236 sps:$4 sm:$0xff]  }
  0x68   : > { %4204 = vmatmul.mubr.msk.f32.gmra.mrb[2].mxu1 %vm860_vm0, %v5368_v16  ;;  %4434 = vmatpush1.bf16.msra.mxu0 %v4822_v17  ;;  %v4864_v45 = vld [vmem:[%s5334_s17 + $0x50] ss:$236 sps:$4 sm:$0xff]   ;;  %v4867_v46 = vld [vmem:[%s5334_s17 + $0x58] ss:$236 sps:$4 sm:$0xff]   ;;  %v4871_v48 = vld [vmem:[%s5334_s17 + $0x234] ss:$236 sps:$4 sm:$0xff]  }
  0x69   : > { %4442 = vmatpush1.bf16.msra.mxu1 %v4825_v18  ;;  %1085 = vmatprep.mubr.f32.mxu0 %v5002_v57  ;;  %v4868_v47 = vld [vmem:[%s5334_s17 + $0x22c] ss:$236 sps:$4 sm:$0xff]   ;;  %v4870_v49 = vld [vmem:[%s5334_s17 + $0x228] ss:$236 sps:$4 sm:$0xff]   ;;  %v4873_v50 = vld [vmem:[%s5334_s17 + $0x230] ss:$236 sps:$4 sm:$0xff]  }
  0x6a   : > { %1162 = vmatprep.mubr.f32.mxu1 %v5002_v57  ;;  %4444 = vmatprep.subr.bf16.mxu0 %v4826_v19  ;;  %v4874_v51 = vld [vmem:[%s5334_s17 + $0x64] ss:$236 sps:$4 sm:$0xff]   ;;  %v4877_v52 = vld [vmem:[%s5334_s17 + $0x6c] ss:$236 sps:$4 sm:$0xff]   ;;  %v4879_v54 = vld [vmem:[%s5334_s17 + $0x68] ss:$236 sps:$4 sm:$0xff]  }
  0x6b   : > { %4452 = vmatprep.subr.bf16.mxu1 %v4829_v20  ;;  %4205 = vmatmul.mubr.msk.f32.vlgmr.msra.gmra.mrb[4].mxu0 %vm860_vm0, %v5357_v10  ;;  %v4876_v53 = vld [vmem:[%s5334_s17 + $0x60] ss:$236 sps:$4 sm:$0xff]   ;;  %v4880_v55 = vld [vmem:[%s5334_s17 + $0x23c] ss:$236 sps:$4 sm:$0xff]   ;;  %v4883_v56 = vld [vmem:[%s5334_s17 + $0x244] ss:$236 sps:$4 sm:$0xff]  }
  0x6c   : > { %4207 = vmatmul.mubr.msk.f32.vlgmr.msra.gmra.mrb[4].mxu1 %vm860_vm0, %v5357_v10  ;;  %4446 = vmatpush1.bf16.msra.mxu0 %v4828_v21  ;;  %v4882_v58 = vld [vmem:[%s5334_s17 + $0x238] ss:$236 sps:$4 sm:$0xff]   ;;  %v4885_v59 = vld [vmem:[%s5334_s17 + $0x240] ss:$236 sps:$4 sm:$0xff]   ;;  %v4889_v61 = vld [vmem:[%s5334_s17 + $0x7c] ss:$236 sps:$4 sm:$0xff]  }
  0x6d   : > { %4454 = vmatpush1.bf16.msra.mxu1 %v4831_v22  ;;  %1091 = vmatprep.mubr.f32.mxu0 %v5002_v57  ;;  %v4886_v60 = vld [vmem:[%s5334_s17 + $0x74] ss:$236 sps:$4 sm:$0xff]   ;;  %v4888_v62 = vld [vmem:[%s5334_s17 + $0x70] ss:$236 sps:$4 sm:$0xff]   ;;  %v4891_v63 = vld [vmem:[%s5334_s17 + $0x78] ss:$236 sps:$4 sm:$0xff]  }
  0x6e   : > { %1168 = vmatprep.mubr.f32.mxu1 %v5002_v57  ;;  %4448 = vmatprep.subr.bf16.mxu0 %v4832_v23  ;;  %v4892_v0 = vld [vmem:[%s5334_s17 + $0x24c] ss:$236 sps:$4 sm:$0xff]   ;;  %v4895_v1 = vld [vmem:[%s5334_s17 + $0x254] ss:$236 sps:$4 sm:$0xff]   ;;  %v4897_v3 = vld [vmem:[%s5334_s17 + $0x250] ss:$236 sps:$4 sm:$0xff]  }
  0x6f   : > { %4456 = vmatprep.subr.bf16.mxu1 %v4835_v24  ;;  %4206 = vmatmul.mubr.msk.f32.gmra.mrb[6].mxu0 %vm860_vm0, %v5368_v16  ;;  %v4894_v2 = vld [vmem:[%s5334_s17 + $0x248] ss:$236 sps:$4 sm:$0xff]   ;;  %v4898_v4 = vld [vmem:[%s5334_s17 + $0x84] ss:$236 sps:$4 sm:$0xff]   ;;  %v4901_v5 = vld [vmem:[%s5334_s17 + $0x8c] ss:$236 sps:$4 sm:$0xff]  }
  0x70   : > { %4208 = vmatmul.mubr.msk.f32.gmra.mrb[6].mxu1 %vm860_vm0, %v5368_v16  ;;  %4450 = vmatpush1.bf16.msra.mxu0 %v4834_v25  ;;  %v4900_v6 = vld [vmem:[%s5334_s17 + $0x80] ss:$236 sps:$4 sm:$0xff]   ;;  %v4903_v7 = vld [vmem:[%s5334_s17 + $0x88] ss:$236 sps:$4 sm:$0xff]   ;;  %v4907_v9 = vld [vmem:[%s5334_s17 + $0x264] ss:$236 sps:$4 sm:$0xff]  }
  0x71   : > { %4458 = vmatpush1.bf16.msra.mxu1 %v4837_v26  ;;  %1239 = vmatprep.mubr.f32.mxu0 %v5002_v57  ;;  %v4904_v8 = vld [vmem:[%s5334_s17 + $0x25c] ss:$236 sps:$4 sm:$0xff]   ;;  %v4906_v11 = vld [vmem:[%s5334_s17 + $0x258] ss:$236 sps:$4 sm:$0xff]   ;;  %v4909_v12 = vld [vmem:[%s5334_s17 + $0x260] ss:$236 sps:$4 sm:$0xff]  }
  0x72   : > { %1316 = vmatprep.mubr.f32.mxu1 %v5002_v57  ;;  %4460 = vmatprep.subr.bf16.mxu0 %v4838_v27  ;;  %v4910_v13 = vld [vmem:[%s5334_s17 + $0x94] ss:$236 sps:$4 sm:$0xff]   ;;  %v4913_v14 = vld [vmem:[%s5334_s17 + $0x9c] ss:$236 sps:$4 sm:$0xff]   ;;  %v4915_v17 = vld [vmem:[%s5334_s17 + $0x98] ss:$236 sps:$4 sm:$0xff]  }
  0x73   : > { %4468 = vmatprep.subr.bf16.mxu1 %v4841_v28  ;;  %4209 = vmatmul.mubr.msk.f32.vlgmr.msra.gmra.mrb[8].mxu0 %vm860_vm0, %v5357_v10  ;;  %v4912_v15 = vld [vmem:[%s5334_s17 + $0x90] ss:$236 sps:$4 sm:$0xff]   ;;  %v4916_v18 = vld [vmem:[%s5334_s17 + $0x26c] ss:$236 sps:$4 sm:$0xff]   ;;  %v4919_v19 = vld [vmem:[%s5334_s17 + $0x274] ss:$236 sps:$4 sm:$0xff]  }
  0x74   : > { %4211 = vmatmul.mubr.msk.f32.vlgmr.msra.gmra.mrb[8].mxu1 %vm860_vm0, %v5357_v10  ;;  %4462 = vmatpush1.bf16.msra.mxu0 %v4840_v29  ;;  %v4918_v20 = vld [vmem:[%s5334_s17 + $0x268] ss:$236 sps:$4 sm:$0xff]   ;;  %v4921_v21 = vld [vmem:[%s5334_s17 + $0x270] ss:$236 sps:$4 sm:$0xff]   ;;  %v4925_v23 = vld [vmem:[%s5334_s17 + $0xac] ss:$236 sps:$4 sm:$0xff]  }
  0x75   : > { %4470 = vmatpush1.bf16.msra.mxu1 %v4843_v30  ;;  %1245 = vmatprep.mubr.f32.mxu0 %v5002_v57  ;;  %v4922_v22 = vld [vmem:[%s5334_s17 + $0xa4] ss:$236 sps:$4 sm:$0xff]   ;;  %v4924_v24 = vld [vmem:[%s5334_s17 + $0xa0] ss:$236 sps:$4 sm:$0xff]   ;;  %v4927_v25 = vld [vmem:[%s5334_s17 + $0xa8] ss:$236 sps:$4 sm:$0xff]  }
  0x76   : > { %1322 = vmatprep.mubr.f32.mxu1 %v5002_v57  ;;  %4464 = vmatprep.subr.bf16.mxu0 %v4844_v31  ;;  %v4928_v26 = vld [vmem:[%s5334_s17 + $0x27c] ss:$236 sps:$4 sm:$0xff]   ;;  %v4931_v27 = vld [vmem:[%s5334_s17 + $0x284] ss:$236 sps:$4 sm:$0xff]   ;;  %v4933_v29 = vld [vmem:[%s5334_s17 + $0x280] ss:$236 sps:$4 sm:$0xff]  }
  0x77   : > { %4472 = vmatprep.subr.bf16.mxu1 %v4847_v32  ;;  %4210 = vmatmul.mubr.msk.f32.gmra.mrb[10].mxu0 %vm860_vm0, %v5368_v16  ;;  %v4930_v28 = vld [vmem:[%s5334_s17 + $0x278] ss:$236 sps:$4 sm:$0xff]   ;;  %v4934_v30 = vld [vmem:[%s5334_s17 + $0xb4] ss:$236 sps:$4 sm:$0xff]   ;;  %v4937_v31 = vld [vmem:[%s5334_s17 + $0xbc] ss:$236 sps:$4 sm:$0xff]  }
  0x78   : > { %4212 = vmatmul.mubr.msk.f32.gmra.mrb[10].mxu1 %vm860_vm0, %v5368_v16  ;;  %4466 = vmatpush1.bf16.msra.mxu0 %v4846_v33  ;;  %v4936_v32 = vld [vmem:[%s5334_s17 + $0xb0] ss:$236 sps:$4 sm:$0xff]   ;;  %v4939_v33 = vld [vmem:[%s5334_s17 + $0xb8] ss:$236 sps:$4 sm:$0xff]   ;;  %s5688_s18 = scalar_lea.vmem [#allocation3], %s5664_s8  ;;  %s4389_s9 = smul.u32 (%p5064_p5), 236, %s4187_s21 }
  0x79   : > { %4474 = vmatpush1.bf16.msra.mxu1 %v4849_v34  ;;  %1393 = vmatprep.mubr.f32.mxu0 %v5002_v57  ;;  %v4940_v34 = vld [vmem:[%s5334_s17 + $0x28c] ss:$236 sps:$4 sm:$0xff]  }
  0x7a   : > { %1470 = vmatprep.mubr.f32.mxu1 %v5002_v57  ;;  %4476 = vmatprep.subr.bf16.mxu0 %v4850_v35  ;;  %v4943_v35 = vld [vmem:[%s5334_s17 + $0x294] ss:$236 sps:$4 sm:$0xff]   ;;  %s6173_s10 = scalar_lea.vmem (%p5064_p5), %s6304_s5, %s4389_s9 }
  0x7b   : > { %4484 = vmatprep.subr.bf16.mxu1 %v4853_v36  ;;  %4213 = vmatmul.mubr.msk.f32.vlgmr.msra.gmra.mrb[12].mxu0 %vm860_vm0, %v5357_v10  ;;  %v4942_v36 = vld [vmem:[%s5334_s17 + $0x288] ss:$236 sps:$4 sm:$0xff]  }
  0x7c   : > { %4215 = vmatmul.mubr.msk.f32.vlgmr.msra.gmra.mrb[12].mxu1 %vm860_vm0, %v5357_v10  ;;  %4478 = vmatpush1.bf16.msra.mxu0 %v4852_v37  ;;  %v4945_v37 = vld [vmem:[%s5334_s17 + $0x290] ss:$236 sps:$4 sm:$0xff]  }
  0x7d   : > { %4486 = vmatpush1.bf16.msra.mxu1 %v4855_v38  ;;  %1399 = vmatprep.mubr.f32.mxu0 %v5002_v57  ;;  %v4946_v38 = vld [vmem:[%s5334_s17 + $0xc4] ss:$236 sps:$4 sm:$0xff]  }
  0x7e   : > { %1476 = vmatprep.mubr.f32.mxu1 %v5002_v57  ;;  %4480 = vmatprep.subr.bf16.mxu0 %v4856_v39  ;;  %v4949_v39 = vld [vmem:[%s5334_s17 + $0xcc] ss:$236 sps:$4 sm:$0xff]  }
  0x7f   : > { %4488 = vmatprep.subr.bf16.mxu1 %v4859_v40  ;;  %4214 = vmatmul.mubr.msk.f32.gmra.mrb[14].mxu0 %vm860_vm0, %v5368_v16  ;;  %v4948_v40 = vld [vmem:[%s5334_s17 + $0xc0] ss:$236 sps:$4 sm:$0xff]  }
  0x80   : > { %4216 = vmatmul.mubr.msk.f32.gmra.mrb[14].mxu1 %vm860_vm0, %v5368_v16  ;;  %4482 = vmatpush1.bf16.msra.mxu0 %v4858_v41  ;;  %v4951_v41 = vld [vmem:[%s5334_s17 + $0xc8] ss:$236 sps:$4 sm:$0xff]  }
  0x81   : > { %4490 = vmatpush1.bf16.msra.mxu1 %v4861_v42  ;;  %1547 = vmatprep.mubr.f32.mxu0 %v5002_v57  ;;  %v4952_v42 = vld [vmem:[%s5334_s17 + $0x29c] ss:$236 sps:$4 sm:$0xff]  }
  0x82   : > { %1624 = vmatprep.mubr.f32.mxu1 %v5002_v57  ;;  %4492 = vmatprep.subr.bf16.mxu0 %v4862_v43  ;;  %v4955_v43 = vld [vmem:[%s5334_s17 + $0x2a4] ss:$236 sps:$4 sm:$0xff]  }
  0x83   : > { %4500 = vmatprep.subr.bf16.mxu1 %v4865_v44  ;;  %4217 = vmatmul.mubr.msk.f32.vlgmr.msra.gmra.mrb[16].mxu0 %vm860_vm0, %v5357_v10  ;;  %v4954_v44 = vld [vmem:[%s5334_s17 + $0x298] ss:$236 sps:$4 sm:$0xff]  }
  0x84   : > { %4219 = vmatmul.mubr.msk.f32.vlgmr.msra.gmra.mrb[16].mxu1 %vm860_vm0, %v5357_v10  ;;  %4494 = vmatpush1.bf16.msra.mxu0 %v4864_v45  ;;  %v4957_v45 = vld [vmem:[%s5334_s17 + $0x2a0] ss:$236 sps:$4 sm:$0xff]  }
  0x85   : > { %4502 = vmatpush1.bf16.msra.mxu1 %v4867_v46  ;;  %1553 = vmatprep.mubr.f32.mxu0 %v5002_v57  ;;  %v4958_v46 = vld [vmem:[%s5334_s17 + $0xd4] ss:$236 sps:$4 sm:$0xff]  }
  0x86   : > { %1630 = vmatprep.mubr.f32.mxu1 %v5002_v57  ;;  %4496 = vmatprep.subr.bf16.mxu0 %v4868_v47  ;;  %v4961_v47 = vld [vmem:[%s5334_s17 + $0xdc] ss:$236 sps:$4 sm:$0xff]  }
  0x87   : > { %4504 = vmatprep.subr.bf16.mxu1 %v4871_v48  ;;  %4218 = vmatmul.mubr.msk.f32.gmra.mrb[18].mxu0 %vm860_vm0, %v5368_v16  ;;  %v4960_v48 = vld [vmem:[%s5334_s17 + $0xd0] ss:$236 sps:$4 sm:$0xff]  }
  0x88   : > { %4220 = vmatmul.mubr.msk.f32.gmra.mrb[18].mxu1 %vm860_vm0, %v5368_v16  ;;  %4498 = vmatpush1.bf16.msra.mxu0 %v4870_v49  ;;  %v4963_v49 = vld [vmem:[%s5334_s17 + $0xd8] ss:$236 sps:$4 sm:$0xff]  }
  0x89   : > { %4506 = vmatpush1.bf16.msra.mxu1 %v4873_v50  ;;  %1701 = vmatprep.mubr.f32.mxu0 %v5002_v57  ;;  %v4964_v50 = vld [vmem:[%s5334_s17 + $0x2ac] ss:$236 sps:$4 sm:$0xff]  }
  0x8a   : > { %1778 = vmatprep.mubr.f32.mxu1 %v5002_v57  ;;  %4508 = vmatprep.subr.bf16.mxu0 %v4874_v51  ;;  %v4967_v51 = vld [vmem:[%s5334_s17 + $0x2b4] ss:$236 sps:$4 sm:$0xff]  }
  0x8b   : > { %4516 = vmatprep.subr.bf16.mxu1 %v4877_v52  ;;  %4221 = vmatmul.mubr.msk.f32.vlgmr.msra.gmra.mrb[20].mxu0 %vm860_vm0, %v5357_v10  ;;  %v4966_v52 = vld [vmem:[%s5334_s17 + $0x2a8] ss:$236 sps:$4 sm:$0xff]  }
  0x8c   : > { %4223 = vmatmul.mubr.msk.f32.vlgmr.msra.gmra.mrb[20].mxu1 %vm860_vm0, %v5357_v10  ;;  %4510 = vmatpush1.bf16.msra.mxu0 %v4876_v53  ;;  %v4969_v53 = vld [vmem:[%s5334_s17 + $0x2b0] ss:$236 sps:$4 sm:$0xff]  }
  0x8d   : > { %4518 = vmatpush1.bf16.msra.mxu1 %v4879_v54  ;;  %1707 = vmatprep.mubr.f32.mxu0 %v5002_v57  ;;  %v4970_v54 = vld [vmem:[%s5334_s17 + $0xe4] ss:$236 sps:$4 sm:$0xff]  }
  0x8e   : > { %1784 = vmatprep.mubr.f32.mxu1 %v5002_v57  ;;  %4512 = vmatprep.subr.bf16.mxu0 %v4880_v55  ;;  %v4973_v55 = vld [vmem:[%s5334_s17 + $0xe8] ss:$236 sps:$4 sm:$0xff]  }
  0x8f   : > { %4520 = vmatprep.subr.bf16.mxu1 %v4883_v56  ;;  %4222 = vmatmul.mubr.msk.f32.gmra.mrb[22].mxu0 %vm860_vm0, %v5368_v16  ;;  %v4972_v56 = vld [vmem:[%s5334_s17 + $0xe0] ss:$236 sps:$4 sm:$0xff]  }
  0x90   : > { %4224 = vmatmul.mubr.msk.f32.gmra.mrb[22].mxu1 %vm860_vm0, %v5368_v16  ;;  %4514 = vmatpush1.bf16.msra.mxu0 %v4882_v58  ;;  %v4974_v58 = vld [vmem:[%s5334_s17 + $0x2bc] ss:$236 sps:$4 sm:$0xff]  }
  0x91   : > { %4522 = vmatpush1.bf16.msra.mxu1 %v4885_v59  ;;  %1855 = vmatprep.mubr.f32.mxu0 %v5002_v57  ;;  %v4977_v59 = vld [vmem:[%s5334_s17 + $0x2c0] ss:$236 sps:$4 sm:$0xff]  }
  0x92   : > { %1932 = vmatprep.mubr.f32.mxu1 %v5002_v57  ;;  %4524 = vmatprep.subr.bf16.mxu0 %v4886_v60  ;;  %v4976_v60 = vld [vmem:[%s5334_s17 + $0x2b8] ss:$236 sps:$4 sm:$0xff]  }
  0x93   : > { %4532 = vmatprep.subr.bf16.mxu1 %v4889_v61  ;;  %4225 = vmatmul.mubr.msk.f32.vlgmr.msra.gmra.mrb[24].mxu0 %vm860_vm0, %v5357_v10 }
  0x94   : > { %4227 = vmatmul.mubr.msk.f32.vlgmr.msra.gmra.mrb[24].mxu1 %vm860_vm0, %v5357_v10  ;;  %4526 = vmatpush1.bf16.msra.mxu0 %v4888_v62 }
  0x95   : > { %4534 = vmatpush1.bf16.msra.mxu1 %v4891_v63  ;;  %1861 = vmatprep.mubr.f32.mxu0 %v5002_v57 }
  0x96   : > { %1938 = vmatprep.mubr.f32.mxu1 %v5002_v57  ;;  %4528 = vmatprep.subr.bf16.mxu0 %v4892_v0 }
  0x97   : > { %4536 = vmatprep.subr.bf16.mxu1 %v4895_v1  ;;  %4226 = vmatmul.mubr.msk.f32.gmra.mrb[26].mxu0 %vm860_vm0, %v5368_v16 }
  0x98   : > { %4228 = vmatmul.mubr.msk.f32.gmra.mrb[26].mxu1 %vm860_vm0, %v5368_v16  ;;  %4530 = vmatpush1.bf16.msra.mxu0 %v4894_v2 }
  0x99   : > { %4538 = vmatpush1.bf16.msra.mxu1 %v4897_v3  ;;  %2009 = vmatprep.mubr.f32.mxu0 %v5002_v57 }
  0x9a   : > { %2086 = vmatprep.mubr.f32.mxu1 %v5002_v57  ;;  %4540 = vmatprep.subr.bf16.mxu0 %v4898_v4 }
  0x9b   : > { %4548 = vmatprep.subr.bf16.mxu1 %v4901_v5  ;;  %4229 = vmatmul.mubr.msk.f32.vlgmr.msra.gmra.mrb[28].mxu0 %vm860_vm0, %v5357_v10 }
  0x9c   : > { %4231 = vmatmul.mubr.msk.f32.vlgmr.msra.gmra.mrb[28].mxu1 %vm860_vm0, %v5357_v10  ;;  %4542 = vmatpush1.bf16.msra.mxu0 %v4900_v6 }
  0x9d   : > { %4550 = vmatpush1.bf16.msra.mxu1 %v4903_v7  ;;  %2015 = vmatprep.mubr.f32.mxu0 %v5002_v57 }
  0x9e   : > { %2092 = vmatprep.mubr.f32.mxu1 %v5002_v57  ;;  %4544 = vmatprep.subr.bf16.mxu0 %v4904_v8 }
  0x9f   : > { %4552 = vmatprep.subr.bf16.mxu1 %v4907_v9  ;;  %4230 = vmatmul.mubr.msk.f32.gmra.mrb[30].mxu0 %vm860_vm0, %v5368_v16 }
  0xa0   : > { %4232 = vmatmul.mubr.msk.f32.gmra.mrb[30].mxu1 %vm860_vm0, %v5368_v16  ;;  %4546 = vmatpush1.bf16.msra.mxu0 %v4906_v11 }
  0xa1   : > { %4554 = vmatpush1.bf16.msra.mxu1 %v4909_v12  ;;  %2163 = vmatprep.mubr.f32.mxu0 %v5002_v57 }
  0xa2   : > { %2240 = vmatprep.mubr.f32.mxu1 %v5002_v57  ;;  %4556 = vmatprep.subr.bf16.mxu0 %v4910_v13 }
  0xa3   : > { %4564 = vmatprep.subr.bf16.mxu1 %v4913_v14  ;;  %4233 = vmatmul.mubr.msk.f32.vlgmr.msra.gmra.mrb[32].mxu0 %vm860_vm0, %v5357_v10 }
  0xa4   : > { %4235 = vmatmul.mubr.msk.f32.vlgmr.msra.gmra.mrb[32].mxu1 %vm860_vm0, %v5357_v10  ;;  %4558 = vmatpush1.bf16.msra.mxu0 %v4912_v15 }
  0xa5   : > { %4566 = vmatpush1.bf16.msra.mxu1 %v4915_v17  ;;  %2169 = vmatprep.mubr.f32.mxu0 %v5002_v57 }
  0xa6   : > { %2246 = vmatprep.mubr.f32.mxu1 %v5002_v57  ;;  %4560 = vmatprep.subr.bf16.mxu0 %v4916_v18 }
  0xa7   : > { %4568 = vmatprep.subr.bf16.mxu1 %v4919_v19  ;;  %4234 = vmatmul.mubr.msk.f32.gmra.mrb[34].mxu0 %vm860_vm0, %v5368_v16 }
  0xa8   : > { %4236 = vmatmul.mubr.msk.f32.gmra.mrb[34].mxu1 %vm860_vm0, %v5368_v16  ;;  %4562 = vmatpush1.bf16.msra.mxu0 %v4918_v20 }
  0xa9   : > { %4570 = vmatpush1.bf16.msra.mxu1 %v4921_v21  ;;  %2317 = vmatprep.mubr.f32.mxu0 %v5002_v57 }
  0xaa   : > { %2394 = vmatprep.mubr.f32.mxu1 %v5002_v57  ;;  %4572 = vmatprep.subr.bf16.mxu0 %v4922_v22 }
  0xab   : > { %4580 = vmatprep.subr.bf16.mxu1 %v4925_v23  ;;  %4237 = vmatmul.mubr.msk.f32.vlgmr.msra.gmra.mrb[36].mxu0 %vm860_vm0, %v5357_v10 }
  0xac   : > { %4239 = vmatmul.mubr.msk.f32.vlgmr.msra.gmra.mrb[36].mxu1 %vm860_vm0, %v5357_v10  ;;  %4574 = vmatpush1.bf16.msra.mxu0 %v4924_v24 }
  0xad   : > { %4582 = vmatpush1.bf16.msra.mxu1 %v4927_v25  ;;  %2323 = vmatprep.mubr.f32.mxu0 %v5002_v57 }
  0xae   : > { %2400 = vmatprep.mubr.f32.mxu1 %v5002_v57  ;;  %4576 = vmatprep.subr.bf16.mxu0 %v4928_v26 }
  0xaf   : > { %4584 = vmatprep.subr.bf16.mxu1 %v4931_v27  ;;  %4238 = vmatmul.mubr.msk.f32.gmra.mrb[38].mxu0 %vm860_vm0, %v5368_v16 }
  0xb0   : > { %4240 = vmatmul.mubr.msk.f32.gmra.mrb[38].mxu1 %vm860_vm0, %v5368_v16  ;;  %4578 = vmatpush1.bf16.msra.mxu0 %v4930_v28 }
  0xb1   : > { %4586 = vmatpush1.bf16.msra.mxu1 %v4933_v29  ;;  %2471 = vmatprep.mubr.f32.mxu0 %v5002_v57 }
  0xb2   : > { %2548 = vmatprep.mubr.f32.mxu1 %v5002_v57  ;;  %4588 = vmatprep.subr.bf16.mxu0 %v4934_v30 }
  0xb3   : > { %4596 = vmatprep.subr.bf16.mxu1 %v4937_v31  ;;  %4241 = vmatmul.mubr.msk.f32.vlgmr.msra.gmra.mrb[40].mxu0 %vm860_vm0, %v5357_v10 }
  0xb4   : > { %4243 = vmatmul.mubr.msk.f32.vlgmr.msra.gmra.mrb[40].mxu1 %vm860_vm0, %v5357_v10  ;;  %4590 = vmatpush1.bf16.msra.mxu0 %v4936_v32 }
  0xb5   : > { %4598 = vmatpush1.bf16.msra.mxu1 %v4939_v33  ;;  %2477 = vmatprep.mubr.f32.mxu0 %v5002_v57 }
  0xb6   : > { %2554 = vmatprep.mubr.f32.mxu1 %v5002_v57  ;;  %4592 = vmatprep.subr.bf16.mxu0 %v4940_v34 }
  0xb7   : > { %4600 = vmatprep.subr.bf16.mxu1 %v4943_v35  ;;  %4242 = vmatmul.mubr.msk.f32.gmra.mrb[42].mxu0 %vm860_vm0, %v5368_v16 }
  0xb8   : > { %4244 = vmatmul.mubr.msk.f32.gmra.mrb[42].mxu1 %vm860_vm0, %v5368_v16  ;;  %4594 = vmatpush1.bf16.msra.mxu0 %v4942_v36 }
  0xb9   : > { %4602 = vmatpush1.bf16.msra.mxu1 %v4945_v37  ;;  %2625 = vmatprep.mubr.f32.mxu0 %v5002_v57 }
  0xba   : > { %2702 = vmatprep.mubr.f32.mxu1 %v5002_v57  ;;  %4604 = vmatprep.subr.bf16.mxu0 %v4946_v38 }
  0xbb   : > { %4612 = vmatprep.subr.bf16.mxu1 %v4949_v39  ;;  %4245 = vmatmul.mubr.msk.f32.vlgmr.msra.gmra.mrb[44].mxu0 %vm860_vm0, %v5357_v10 }
  0xbc   : > { %4247 = vmatmul.mubr.msk.f32.vlgmr.msra.gmra.mrb[44].mxu1 %vm860_vm0, %v5357_v10  ;;  %4606 = vmatpush1.bf16.msra.mxu0 %v4948_v40 }
  0xbd   : > { %4614 = vmatpush1.bf16.msra.mxu1 %v4951_v41  ;;  %2631 = vmatprep.mubr.f32.mxu0 %v5002_v57 }
  0xbe   : > { %2708 = vmatprep.mubr.f32.mxu1 %v5002_v57  ;;  %4608 = vmatprep.subr.bf16.mxu0 %v4952_v42 }
  0xbf   : > { %4616 = vmatprep.subr.bf16.mxu1 %v4955_v43  ;;  %4246 = vmatmul.mubr.msk.f32.gmra.mrb[46].mxu0 %vm860_vm0, %v5368_v16 }
  0xc0   : > { %4248 = vmatmul.mubr.msk.f32.gmra.mrb[46].mxu1 %vm860_vm0, %v5368_v16  ;;  %4610 = vmatpush1.bf16.msra.mxu0 %v4954_v44 }
  0xc1   : > { %4618 = vmatpush1.bf16.msra.mxu1 %v4957_v45  ;;  %2779 = vmatprep.mubr.f32.mxu0 %v5002_v57 }
  0xc2   : > { %2856 = vmatprep.mubr.f32.mxu1 %v5002_v57  ;;  %4620 = vmatprep.subr.bf16.mxu0 %v4958_v46 }
  0xc3   : > { %4628 = vmatprep.subr.bf16.mxu1 %v4961_v47  ;;  %4249 = vmatmul.mubr.msk.f32.vlgmr.msra.gmra.mrb[48].mxu0 %vm860_vm0, %v5357_v10 }
  0xc4   : > { %4251 = vmatmul.mubr.msk.f32.vlgmr.msra.gmra.mrb[48].mxu1 %vm860_vm0, %v5357_v10  ;;  %4622 = vmatpush1.bf16.msra.mxu0 %v4960_v48 }
  0xc5   : > { %4630 = vmatpush1.bf16.msra.mxu1 %v4963_v49  ;;  %2785 = vmatprep.mubr.f32.mxu0 %v5002_v57 }
  0xc6   : > { %2862 = vmatprep.mubr.f32.mxu1 %v5002_v57  ;;  %4624 = vmatprep.subr.bf16.mxu0 %v4964_v50 }
  0xc7   : > { %4632 = vmatprep.subr.bf16.mxu1 %v4967_v51  ;;  %4250 = vmatmul.mubr.msk.f32.gmra.mrb[50].mxu0 %vm860_vm0, %v5368_v16 }
  0xc8   : > { %4252 = vmatmul.mubr.msk.f32.gmra.mrb[50].mxu1 %vm860_vm0, %v5368_v16  ;;  %4626 = vmatpush1.bf16.msra.mxu0 %v4966_v52 }
  0xc9   : > { %4634 = vmatpush1.bf16.msra.mxu1 %v4969_v53  ;;  %2933 = vmatprep.mubr.f32.mxu0 %v5002_v57 }
  0xca   : > { %3010 = vmatprep.mubr.f32.mxu1 %v5002_v57  ;;  %4636 = vmatprep.subr.bf16.mxu0 %v4970_v54 }
  0xcb   : > { %4644 = vmatprep.subr.bf16.mxu1 %v4973_v55  ;;  %4253 = vmatmul.mubr.msk.f32.vlgmr.msra.gmra.mrb[52].mxu0 %vm860_vm0, %v5357_v10 }
  0xcc   : > { %4255 = vmatmul.mubr.msk.f32.vlgmr.msra.gmra.mrb[52].mxu1 %vm860_vm0, %v5357_v10  ;;  %4638 = vmatpush1.bf16.msra.mxu0 %v4972_v56 }
  0xcd   : > { %4646 = vmatpush3.bf16.msra.mxu1 %v4973_v55  ;;  %2939 = vmatprep.mubr.f32.mxu0 %v5002_v57 }
  0xce   : > { %3016 = vmatprep.mubr.f32.mxu1 %v5002_v57  ;;  %4640 = vmatprep.subr.bf16.mxu0 %v4974_v58 }
  0xcf   : > { %4648 = vmatprep.subr.bf16.mxu1 %v4977_v59  ;;  %4254 = vmatmul.mubr.msk.f32.gmra.mrb[54].mxu0 %vm860_vm0, %v5368_v16 }
  0xd0   : > { %4256 = vmatmul.mubr.msk.f32.gmra.mrb[54].mxu1 %vm860_vm0, %v5368_v16  ;;  %4642 = vmatpush1.bf16.msra.mxu0 %v4976_v60 }
  0xd1   : > { %4650 = vmatpush3.bf16.msra.mxu1 %v4977_v59  ;;  %3087 = vmatprep.mubr.f32.mxu0 %v5002_v57 }
  0xd2   : > { %4408 = vmatprep.mubr.msk.f32.mxu1 %vm860_vm0, %v5357_v10 }
  0xd3   : > { %4257 = vmatmul.mubr.msk.f32.vlgmr.msra.gmra.mrb[56].mxu0 %vm860_vm0, %v5357_v10 }
  0xd4   : > { %4409 = vmatmul.mubr.msk.f32.vlgmr.msra.gmra.mrb[56].mxu1 %vm860_vm0, %v5368_v16  ;;  %3093 = vmatprep.mubr.f32.mxu0 %v5002_v57 }
  0xd7   : > { %4258 = vmatmul.mubr.msk.f32.gmra.mrb[58].mxu0 %vm860_vm0, %v5368_v16  ;;  %v5646_v61 = vpop.permute.xlu0 %852  ;;  %v5648_v62 = vpop.permute.xlu1 %3297 }
  0xdb   : > { %v5650_v63 = vpop.permute.xlu0 %857 }
  0xdd   : > { %v5652_v0 = vpop.permute.xlu1 %3302 }
  0xdf   : > { %v5658_v8 = vpop.permute.xlu0 %3427 }
  0xe1   : > { %v5674_v29 = vpop.permute.xlu1 %3432 }
 0x136   : > { %v933_v1 = vpop.f32.mrb[0].mxu0 }
 0x137   : > { %v1010_v2 = vpop.f32.mrb[0].mxu1  ;;  %v934_v10 = vadd.f32 %v933_v1, %v5646_v61  ;;  %v935_v3 = vpop.f32.mrb[1].mxu0 }
 0x138   : > { %v1011_v4 = vadd.f32 %v1010_v2, %v5646_v61  ;;  %v1012_v57 = vpop.f32.mrb[1].mxu1  ;;  %v936_v5 = vadd.f32 %v935_v3, %v5646_v61 }
 0x139   : > { %v1013_v16 = vadd.f32 %v1012_v57, %v5646_v61  ;;  %v3175_v6 = vmax.f32 %v934_v10, 0.0 }
 0x13a   : > { %v3177_v7 = vmax.f32 %v1011_v4, 0.0  ;;  %v3176_v9 = vmax.f32 %v936_v5, 0.0  ;;  %v939_v11 = vpop.f32.mrb[2].mxu0 }
 0x13b   : > { %v3178_v12 = vmax.f32 %v1013_v16, 0.0  ;;  %v1016_v13 = vpop.f32.mrb[2].mxu1  ;;  %v940_v14 = vadd.f32 %v939_v11, %v5650_v63  ;;  %v941_v17 = vpop.f32.mrb[3].mxu0  ;;  %v3305_v18 = vmul.f32 %v5648_v62, %v3175_v6 }
 0x13c   : > { %v3307_v15 = vmul.f32 %v5648_v62, %v3177_v7  ;;  %v1017_v19 = vadd.f32 %v1016_v13, %v5650_v63  ;;  %v1018_v20 = vpop.f32.mrb[3].mxu1  ;;  %v942_v21 = vadd.f32 %v941_v17, %v5650_v63  ;;  %v3306_v23 = vmul.f32 %v5648_v62, %v3176_v9 }
 0x13d   : > { %v3308_v22 = vmul.f32 %v5648_v62, %v3178_v12  ;;  %v1019_v24 = vadd.f32 %v1018_v20, %v5650_v63  ;;  %v3234_v25 = vmax.f32 %v940_v14, 0.0  ;;  %v3435_v26 = vadd.f32 %v5658_v8, %v3305_v18 }
 0x13e   : > { %v3437_v27 = vadd.f32 %v5658_v8, %v3307_v15  ;;  %v3236_v28 = vmax.f32 %v1017_v19, 0.0  ;;  %v3235_v30 = vmax.f32 %v942_v21, 0.0  ;;  %v3436_v31 = vadd.f32 %v5658_v8, %v3306_v23  ;;  %v1087_v33 = vpop.f32.mrb[4].mxu0 }
 0x13f   : > { %v3438_v32 = vadd.f32 %v5658_v8, %v3308_v22  ;;  %v3237_v34 = vmax.f32 %v1019_v24, 0.0  ;;  %v1164_v35 = vpop.f32.mrb[4].mxu1  ;;  %v1088_v37 = vadd.f32 %v1087_v33, %v5646_v61  ;;  %v1089_v38 = vpop.f32.mrb[5].mxu0  ;;  %v3364_v39 = vmul.f32 %v5652_v0, %v3234_v25 }
 0x140   : > { %v3366_v36 = vmul.f32 %v5652_v0, %v3236_v28  ;;  %v1165_v40 = vadd.f32 %v1164_v35, %v5646_v61  ;;  %v1166_v41 = vpop.f32.mrb[5].mxu1  ;;  %v4329_v42 = vpack.c.bf16 %v3436_v31, %v3435_v26  ;;  %v1090_v45 = vadd.f32 %v1089_v38, %v5646_v61 }
 0x141   : > { %v4330_v43 = vpack.c.bf16 %v3438_v32, %v3437_v27  ;;  %v3367_v44 = vmul.f32 %v5652_v0, %v3237_v34  ;;  %v3179_v46 = vmax.f32 %v1088_v37, 0.0  ;;  %v3365_v47 = vmul.f32 %v5652_v0, %v3235_v30 }
 0x142   : > { %v3494_v48 = vadd.f32 %v5674_v29, %v3364_v39  ;;  %v3496_v49 = vadd.f32 %v5674_v29, %v3366_v36  ;;  %3909 = vst [vmem:[%s5688_s18] sm:$0xff] %v4329_v42  ;;  %v3180_v50 = vmax.f32 %v1090_v45, 0.0  ;;  %v1093_v52 = vpop.f32.mrb[6].mxu0  ;;  %v3181_v53 = vmax.f32 %v1165_v40, 0.0 }
 0x143   : > { %3910 = vst [vmem:[%s5688_s18 + $0x8] sm:$0xff] %v4330_v43  ;;  %v3497_v51 = vadd.f32 %v5674_v29, %v3367_v44  ;;  %v1167_v54 = vadd.f32 %v1166_v41, %v5646_v61  ;;  %v1170_v55 = vpop.f32.mrb[6].mxu1  ;;  %v3309_v56 = vmul.f32 %v5648_v62, %v3179_v46  ;;  %v3495_v58 = vadd.f32 %v5674_v29, %v3365_v47  ;;  %v1095_v60 = vpop.f32.mrb[7].mxu0 }
 0x144   : > { %v1094_v59 = vadd.f32 %v1093_v52, %v5650_v63  ;;  %v1171_v1 = vadd.f32 %v1170_v55, %v5650_v63  ;;  %v1172_v2 = vpop.f32.mrb[7].mxu1  ;;  %v3310_v10 = vmul.f32 %v5648_v62, %v3180_v50  ;;  %v3311_v4 = vmul.f32 %v5648_v62, %v3181_v53 }
 0x145   : > { %v4360_v3 = vpack.c.bf16 %v3497_v51, %v3496_v49  ;;  %v1096_v57 = vadd.f32 %v1095_v60, %v5650_v63  ;;  %v3439_v5 = vadd.f32 %v5658_v8, %v3309_v56  ;;  %v4359_v16 = vpack.c.bf16 %v3495_v58, %v3494_v48 }
 0x146   : > { %v3238_v6 = vmax.f32 %v1094_v59, 0.0  ;;  %v3182_v7 = vmax.f32 %v1167_v54, 0.0  ;;  %v3440_v9 = vadd.f32 %v5658_v8, %v3310_v10  ;;  %v3441_v11 = vadd.f32 %v5658_v8, %v3311_v4  ;;  %v1241_v14 = vpop.f32.mrb[8].mxu0 }
 0x147   : > { %3940 = vst [vmem:[%s5688_s18 + $0xf4] sm:$0xff] %v4360_v3  ;;  %v3239_v12 = vmax.f32 %v1096_v57, 0.0  ;;  %v3240_v13 = vmax.f32 %v1171_v1, 0.0  ;;  %v1318_v15 = vpop.f32.mrb[8].mxu1  ;;  %3939 = vst [vmem:[%s5688_s18 + $0xec] sm:$0xff] %v4359_v16  ;;  %v1242_v19 = vadd.f32 %v1241_v14, %v5646_v61  ;;  %v1173_v20 = vadd.f32 %v1172_v2, %v5650_v63  ;;  %v1243_v21 = vpop.f32.mrb[9].mxu0 }
 0x148   : > { %v3368_v17 = vmul.f32 %v5652_v0, %v3238_v6  ;;  %v3312_v18 = vmul.f32 %v5648_v62, %v3182_v7  ;;  %v1320_v22 = vpop.f32.mrb[9].mxu1  ;;  %v4331_v23 = vpack.c.bf16 %v3440_v9, %v3439_v5  ;;  %v1244_v26 = vadd.f32 %v1243_v21, %v5646_v61 }
 0x149   : > { %v3369_v24 = vmul.f32 %v5652_v0, %v3239_v12  ;;  %v3370_v25 = vmul.f32 %v5652_v0, %v3240_v13  ;;  %v3183_v30 = vmax.f32 %v1242_v19, 0.0  ;;  %v3241_v31 = vmax.f32 %v1173_v20, 0.0 }
 0x14a   : > { %v3498_v27 = vadd.f32 %v5674_v29, %v3368_v17  ;;  %v3442_v28 = vadd.f32 %v5658_v8, %v3312_v18  ;;  %3911 = vst [vmem:[%s5688_s18 + $0x10] sm:$0xff] %v4331_v23  ;;  %v3184_v34 = vmax.f32 %v1244_v26, 0.0  ;;  %v1247_v35 = vpop.f32.mrb[10].mxu0  ;;  %v1319_v36 = vadd.f32 %v1318_v15, %v5646_v61 }
 0x14b   : > { %v3499_v32 = vadd.f32 %v5674_v29, %v3369_v24  ;;  %v3500_v33 = vadd.f32 %v5674_v29, %v3370_v25  ;;  %v1324_v37 = vpop.f32.mrb[10].mxu1  ;;  %v3313_v39 = vmul.f32 %v5648_v62, %v3183_v30  ;;  %v3371_v40 = vmul.f32 %v5652_v0, %v3241_v31  ;;  %v1249_v42 = vpop.f32.mrb[11].mxu0 }
 0x14c   : > { %v4332_v38 = vpack.c.bf16 %v3442_v28, %v3441_v11  ;;  %v1248_v41 = vadd.f32 %v1247_v35, %v5650_v63  ;;  %v1326_v43 = vpop.f32.mrb[11].mxu1  ;;  %v3314_v45 = vmul.f32 %v5648_v62, %v3184_v34  ;;  %v3185_v46 = vmax.f32 %v1319_v36, 0.0 }
 0x14d   : > { %v4361_v44 = vpack.c.bf16 %v3499_v32, %v3498_v27  ;;  %v1250_v47 = vadd.f32 %v1249_v42, %v5650_v63  ;;  %v3443_v48 = vadd.f32 %v5658_v8, %v3313_v39  ;;  %v3501_v49 = vadd.f32 %v5674_v29, %v3371_v40 }
 0x14e   : > { %3912 = vst [vmem:[%s5688_s18 + $0x18] sm:$0xff] %v4332_v38  ;;  %v3242_v50 = vmax.f32 %v1248_v41, 0.0  ;;  %v1321_v51 = vadd.f32 %v1320_v22, %v5646_v61  ;;  %v3444_v52 = vadd.f32 %v5658_v8, %v3314_v45  ;;  %v3315_v53 = vmul.f32 %v5648_v62, %v3185_v46  ;;  %v1395_v56 = vpop.f32.mrb[12].mxu0 }
 0x14f   : > { %3941 = vst [vmem:[%s5688_s18 + $0xfc] sm:$0xff] %v4361_v44  ;;  %v3243_v54 = vmax.f32 %v1250_v47, 0.0  ;;  %v1325_v55 = vadd.f32 %v1324_v37, %v5650_v63  ;;  %v1472_v58 = vpop.f32.mrb[12].mxu1  ;;  %v4362_v59 = vpack.c.bf16 %v3501_v49, %v3500_v33  ;;  %v1396_v2 = vadd.f32 %v1395_v56, %v5646_v61  ;;  %v1397_v10 = vpop.f32.mrb[13].mxu0 }
 0x150   : > { %v3372_v60 = vmul.f32 %v5652_v0, %v3242_v50  ;;  %v3186_v1 = vmax.f32 %v1321_v51, 0.0  ;;  %v1474_v3 = vpop.f32.mrb[13].mxu1  ;;  %v4333_v4 = vpack.c.bf16 %v3444_v52, %v3443_v48  ;;  %v3445_v57 = vadd.f32 %v5658_v8, %v3315_v53 }
 0x151   : > { %v3373_v5 = vmul.f32 %v5652_v0, %v3243_v54  ;;  %v3244_v16 = vmax.f32 %v1325_v55, 0.0  ;;  %3942 = vst [vmem:[%s5688_s18 + $0x104] sm:$0xff] %v4362_v59  ;;  %v3187_v9 = vmax.f32 %v1396_v2, 0.0  ;;  %v1327_v11 = vadd.f32 %v1326_v43, %v5650_v63 }
 0x152   : > { %v3502_v6 = vadd.f32 %v5674_v29, %v3372_v60  ;;  %v3316_v7 = vmul.f32 %v5648_v62, %v3186_v1  ;;  %3913 = vst [vmem:[%s5688_s18 + $0x20] sm:$0xff] %v4333_v4  ;;  %v1398_v14 = vadd.f32 %v1397_v10, %v5646_v61  ;;  %v1401_v15 = vpop.f32.mrb[14].mxu0  ;;  %v1473_v17 = vadd.f32 %v1472_v58, %v5646_v61 }
 0x153   : > { %v3503_v12 = vadd.f32 %v5674_v29, %v3373_v5  ;;  %v3374_v13 = vmul.f32 %v5652_v0, %v3244_v16  ;;  %v1478_v18 = vpop.f32.mrb[14].mxu1  ;;  %v3317_v20 = vmul.f32 %v5648_v62, %v3187_v9  ;;  %v3245_v21 = vmax.f32 %v1327_v11, 0.0  ;;  %v1403_v23 = vpop.f32.mrb[15].mxu0 }
 0x154   : > { %v3446_v19 = vadd.f32 %v5658_v8, %v3316_v7  ;;  %v1402_v22 = vadd.f32 %v1401_v15, %v5650_v63  ;;  %v1480_v24 = vpop.f32.mrb[15].mxu1  ;;  %v3188_v27 = vmax.f32 %v1398_v14, 0.0  ;;  %v3189_v28 = vmax.f32 %v1473_v17, 0.0 }
 0x155   : > { %v4363_v25 = vpack.c.bf16 %v3503_v12, %v3502_v6  ;;  %v3504_v26 = vadd.f32 %v5674_v29, %v3374_v13  ;;  %v3447_v31 = vadd.f32 %v5658_v8, %v3317_v20  ;;  %v3375_v32 = vmul.f32 %v5652_v0, %v3245_v21 }
 0x156   : > { %v4334_v30 = vpack.c.bf16 %v3446_v19, %v3445_v57  ;;  %v3246_v33 = vmax.f32 %v1402_v22, 0.0  ;;  %v3318_v34 = vmul.f32 %v5648_v62, %v3188_v27  ;;  %v3319_v35 = vmul.f32 %v5648_v62, %v3189_v28  ;;  %v1549_v38 = vpop.f32.mrb[16].mxu0 }
 0x157   : > { %3943 = vst [vmem:[%s5688_s18 + $0x10c] sm:$0xff] %v4363_v25  ;;  %v1404_v36 = vadd.f32 %v1403_v23, %v5650_v63  ;;  %v1475_v37 = vadd.f32 %v1474_v3, %v5646_v61  ;;  %v1626_v39 = vpop.f32.mrb[16].mxu1  ;;  %v3505_v40 = vadd.f32 %v5674_v29, %v3375_v32  ;;  %v1479_v42 = vadd.f32 %v1478_v18, %v5650_v63  ;;  %v1551_v44 = vpop.f32.mrb[17].mxu0 }
 0x158   : > { %3914 = vst [vmem:[%s5688_s18 + $0x28] sm:$0xff] %v4334_v30  ;;  %v3376_v41 = vmul.f32 %v5652_v0, %v3246_v33  ;;  %v1550_v43 = vadd.f32 %v1549_v38, %v5646_v61  ;;  %v1628_v45 = vpop.f32.mrb[17].mxu1  ;;  %v3448_v46 = vadd.f32 %v5658_v8, %v3318_v34  ;;  %v3449_v47 = vadd.f32 %v5658_v8, %v3319_v35 }
 0x159   : > { %v3247_v48 = vmax.f32 %v1404_v36, 0.0  ;;  %v3190_v49 = vmax.f32 %v1475_v37, 0.0  ;;  %v4364_v50 = vpack.c.bf16 %v3505_v40, %v3504_v26  ;;  %v3248_v52 = vmax.f32 %v1479_v42, 0.0 }
 0x15a   : > { %v3506_v51 = vadd.f32 %v5674_v29, %v3376_v41  ;;  %v3191_v53 = vmax.f32 %v1550_v43, 0.0  ;;  %v4335_v54 = vpack.c.bf16 %v3448_v46, %v3447_v31  ;;  %v1481_v58 = vadd.f32 %v1480_v24, %v5650_v63  ;;  %v1555_v59 = vpop.f32.mrb[18].mxu0 }
 0x15b   : > { %v3377_v55 = vmul.f32 %v5652_v0, %v3247_v48  ;;  %v3320_v56 = vmul.f32 %v5648_v62, %v3190_v49  ;;  %v1632_v60 = vpop.f32.mrb[18].mxu1  ;;  %3944 = vst [vmem:[%s5688_s18 + $0x114] sm:$0xff] %v4364_v50  ;;  %v3378_v1 = vmul.f32 %v5652_v0, %v3248_v52  ;;  %v1552_v10 = vadd.f32 %v1551_v44, %v5646_v61  ;;  %v1557_v4 = vpop.f32.mrb[19].mxu0 }
 0x15c   : > { %v3321_v2 = vmul.f32 %v5648_v62, %v3191_v53  ;;  %v1556_v3 = vadd.f32 %v1555_v59, %v5650_v63  ;;  %v1634_v57 = vpop.f32.mrb[19].mxu1  ;;  %3915 = vst [vmem:[%s5688_s18 + $0x30] sm:$0xff] %v4335_v54  ;;  %v3249_v6 = vmax.f32 %v1481_v58, 0.0  ;;  %v1627_v7 = vadd.f32 %v1626_v39, %v5646_v61 }
 0x15d   : > { %v3507_v5 = vadd.f32 %v5674_v29, %v3377_v55  ;;  %v3450_v16 = vadd.f32 %v5658_v8, %v3320_v56  ;;  %v3508_v9 = vadd.f32 %v5674_v29, %v3378_v1  ;;  %v3192_v12 = vmax.f32 %v1552_v10, 0.0 }
 0x15e   : > { %v3451_v11 = vadd.f32 %v5658_v8, %v3321_v2  ;;  %v3250_v13 = vmax.f32 %v1556_v3, 0.0  ;;  %v3379_v17 = vmul.f32 %v5652_v0, %v3249_v6  ;;  %v3193_v18 = vmax.f32 %v1627_v7, 0.0  ;;  %v1703_v19 = vpop.f32.mrb[20].mxu0 }
 0x15f   : > { %v4365_v14 = vpack.c.bf16 %v3507_v5, %v3506_v51  ;;  %v4336_v15 = vpack.c.bf16 %v3450_v16, %v3449_v47  ;;  %v1780_v20 = vpop.f32.mrb[20].mxu1  ;;  %v3322_v21 = vmul.f32 %v5648_v62, %v3192_v12  ;;  %v1558_v23 = vadd.f32 %v1557_v4, %v5650_v63  ;;  %v1705_v25 = vpop.f32.mrb[21].mxu0 }
 0x160   : > { %v3380_v22 = vmul.f32 %v5652_v0, %v3250_v13  ;;  %v1629_v24 = vadd.f32 %v1628_v45, %v5646_v61  ;;  %v1782_v26 = vpop.f32.mrb[21].mxu1  ;;  %v3509_v27 = vadd.f32 %v5674_v29, %v3379_v17  ;;  %v3323_v28 = vmul.f32 %v5648_v62, %v3193_v18 }
 0x161   : > { %3945 = vst [vmem:[%s5688_s18 + $0x11c] sm:$0xff] %v4365_v14  ;;  %3916 = vst [vmem:[%s5688_s18 + $0x38] sm:$0xff] %v4336_v15  ;;  %v1633_v30 = vadd.f32 %v1632_v60, %v5650_v63  ;;  %v1704_v31 = vadd.f32 %v1703_v19, %v5646_v61  ;;  %v3452_v32 = vadd.f32 %v5658_v8, %v3322_v21  ;;  %v3251_v34 = vmax.f32 %v1558_v23, 0.0 }
 0x162   : > { %v3510_v33 = vadd.f32 %v5674_v29, %v3380_v22  ;;  %v3194_v35 = vmax.f32 %v1629_v24, 0.0  ;;  %v4366_v36 = vpack.c.bf16 %v3509_v27, %v3508_v9  ;;  %v3453_v37 = vadd.f32 %v5658_v8, %v3323_v28  ;;  %v1709_v40 = vpop.f32.mrb[22].mxu0 }
 0x163   : > { %v3252_v38 = vmax.f32 %v1633_v30, 0.0  ;;  %v3195_v39 = vmax.f32 %v1704_v31, 0.0  ;;  %v1786_v41 = vpop.f32.mrb[22].mxu1  ;;  %v4337_v42 = vpack.c.bf16 %v3452_v32, %v3451_v11  ;;  %v3381_v43 = vmul.f32 %v5652_v0, %v3251_v34  ;;  %v1711_v46 = vpop.f32.mrb[23].mxu0 }
 0x164   : > { %v3324_v44 = vmul.f32 %v5648_v62, %v3194_v35  ;;  %v1635_v45 = vadd.f32 %v1634_v57, %v5650_v63  ;;  %v1788_v47 = vpop.f32.mrb[23].mxu1  ;;  %3946 = vst [vmem:[%s5688_s18 + $0x124] sm:$0xff] %v4366_v36  ;;  %v1706_v50 = vadd.f32 %v1705_v25, %v5646_v61  ;;  %v1710_v51 = vadd.f32 %v1709_v40, %v5650_v63 }
 0x165   : > { %v3382_v48 = vmul.f32 %v5652_v0, %v3252_v38  ;;  %v3325_v49 = vmul.f32 %v5648_v62, %v3195_v39  ;;  %3917 = vst [vmem:[%s5688_s18 + $0x40] sm:$0xff] %v4337_v42  ;;  %v3511_v52 = vadd.f32 %v5674_v29, %v3381_v43  ;;  %v1781_v55 = vadd.f32 %v1780_v20, %v5646_v61 }
 0x166   : > { %v3454_v53 = vadd.f32 %v5658_v8, %v3324_v44  ;;  %v3253_v54 = vmax.f32 %v1635_v45, 0.0  ;;  %v3196_v59 = vmax.f32 %v1706_v50, 0.0  ;;  %v3254_v60 = vmax.f32 %v1710_v51, 0.0  ;;  %v1857_v1 = vpop.f32.mrb[24].mxu0 }
 0x167   : > { %v3512_v56 = vadd.f32 %v5674_v29, %v3382_v48  ;;  %v3455_v58 = vadd.f32 %v5658_v8, %v3325_v49  ;;  %v1934_v2 = vpop.f32.mrb[24].mxu1  ;;  %v4367_v10 = vpack.c.bf16 %v3511_v52, %v3510_v33  ;;  %v3197_v57 = vmax.f32 %v1781_v55, 0.0  ;;  %v1859_v5 = vpop.f32.mrb[25].mxu0 }
 0x168   : > { %v4338_v3 = vpack.c.bf16 %v3454_v53, %v3453_v37  ;;  %v3383_v4 = vmul.f32 %v5652_v0, %v3253_v54  ;;  %v1936_v16 = vpop.f32.mrb[25].mxu1  ;;  %v3326_v6 = vmul.f32 %v5648_v62, %v3196_v59  ;;  %v3384_v7 = vmul.f32 %v5652_v0, %v3254_v60 }
 0x169   : > { %v1712_v9 = vadd.f32 %v1711_v46, %v5650_v63  ;;  %v1783_v11 = vadd.f32 %v1782_v26, %v5646_v61  ;;  %3947 = vst [vmem:[%s5688_s18 + $0x12c] sm:$0xff] %v4367_v10  ;;  %v3327_v13 = vmul.f32 %v5648_v62, %v3197_v57  ;;  %v1787_v14 = vadd.f32 %v1786_v41, %v5650_v63 }
 0x16a   : > { %3918 = vst [vmem:[%s5688_s18 + $0x48] sm:$0xff] %v4338_v3  ;;  %v3513_v12 = vadd.f32 %v5674_v29, %v3383_v4  ;;  %v1858_v15 = vadd.f32 %v1857_v1, %v5646_v61  ;;  %v3456_v17 = vadd.f32 %v5658_v8, %v3326_v6  ;;  %v3514_v18 = vadd.f32 %v5674_v29, %v3384_v7  ;;  %v1863_v21 = vpop.f32.mrb[26].mxu0 }
 0x16b   : > { %v3255_v19 = vmax.f32 %v1712_v9, 0.0  ;;  %v3198_v20 = vmax.f32 %v1783_v11, 0.0  ;;  %v1940_v22 = vpop.f32.mrb[26].mxu1  ;;  %v3457_v24 = vadd.f32 %v5658_v8, %v3327_v13  ;;  %v3256_v25 = vmax.f32 %v1787_v14, 0.0  ;;  %v1865_v27 = vpop.f32.mrb[27].mxu0 }
 0x16c   : > { %v4368_v23 = vpack.c.bf16 %v3513_v12, %v3512_v56  ;;  %v3199_v26 = vmax.f32 %v1858_v15, 0.0  ;;  %v1942_v28 = vpop.f32.mrb[27].mxu1  ;;  %v4339_v30 = vpack.c.bf16 %v3456_v17, %v3455_v58  ;;  %v1789_v33 = vadd.f32 %v1788_v47, %v5650_v63 }
 0x16d   : > { %v3385_v31 = vmul.f32 %v5652_v0, %v3255_v19  ;;  %v3328_v32 = vmul.f32 %v5648_v62, %v3198_v20  ;;  %v3386_v34 = vmul.f32 %v5652_v0, %v3256_v25  ;;  %v1860_v36 = vadd.f32 %v1859_v5, %v5646_v61 }
 0x16e   : > { %3948 = vst [vmem:[%s5688_s18 + $0x134] sm:$0xff] %v4368_v23  ;;  %v3329_v35 = vmul.f32 %v5648_v62, %v3199_v26  ;;  %v1864_v37 = vadd.f32 %v1863_v21, %v5650_v63  ;;  %3919 = vst [vmem:[%s5688_s18 + $0x50] sm:$0xff] %v4339_v30  ;;  %v3257_v40 = vmax.f32 %v1789_v33, 0.0  ;;  %v1935_v41 = vadd.f32 %v1934_v2, %v5646_v61  ;;  %v2011_v42 = vpop.f32.mrb[28].mxu0 }
 0x16f   : > { %v3515_v38 = vadd.f32 %v5674_v29, %v3385_v31  ;;  %v3458_v39 = vadd.f32 %v5658_v8, %v3328_v32  ;;  %v2088_v43 = vpop.f32.mrb[28].mxu1  ;;  %v3516_v44 = vadd.f32 %v5674_v29, %v3386_v34  ;;  %v3200_v46 = vmax.f32 %v1860_v36, 0.0  ;;  %v2013_v48 = vpop.f32.mrb[29].mxu0 }
 0x170   : > { %v3459_v45 = vadd.f32 %v5658_v8, %v3329_v35  ;;  %v3258_v47 = vmax.f32 %v1864_v37, 0.0  ;;  %v2090_v49 = vpop.f32.mrb[29].mxu1  ;;  %v3387_v52 = vmul.f32 %v5652_v0, %v3257_v40  ;;  %v3201_v53 = vmax.f32 %v1935_v41, 0.0 }
 0x171   : > { %v4369_v50 = vpack.c.bf16 %v3515_v38, %v3514_v18  ;;  %v4340_v51 = vpack.c.bf16 %v3458_v39, %v3457_v24  ;;  %v3330_v54 = vmul.f32 %v5648_v62, %v3200_v46  ;;  %v1866_v56 = vadd.f32 %v1865_v27, %v5650_v63 }
 0x172   : > { %v3388_v55 = vmul.f32 %v5652_v0, %v3258_v47  ;;  %v1937_v58 = vadd.f32 %v1936_v16, %v5646_v61  ;;  %v3517_v59 = vadd.f32 %v5674_v29, %v3387_v52  ;;  %v3331_v60 = vmul.f32 %v5648_v62, %v3201_v53  ;;  %v2017_v10 = vpop.f32.mrb[30].mxu0 }
 0x173   : > { %3949 = vst [vmem:[%s5688_s18 + $0x13c] sm:$0xff] %v4369_v50  ;;  %3920 = vst [vmem:[%s5688_s18 + $0x58] sm:$0xff] %v4340_v51  ;;  %v1941_v1 = vadd.f32 %v1940_v22, %v5650_v63  ;;  %v2012_v2 = vadd.f32 %v2011_v42, %v5646_v61  ;;  %v2094_v3 = vpop.f32.mrb[30].mxu1  ;;  %v3460_v4 = vadd.f32 %v5658_v8, %v3330_v54  ;;  %v3259_v5 = vmax.f32 %v1866_v56, 0.0  ;;  %v2019_v16 = vpop.f32.mrb[31].mxu0 }
 0x174   : > { %v3518_v57 = vadd.f32 %v5674_v29, %v3388_v55  ;;  %v3202_v6 = vmax.f32 %v1937_v58, 0.0  ;;  %v2096_v7 = vpop.f32.mrb[31].mxu1  ;;  %v4370_v9 = vpack.c.bf16 %v3517_v59, %v3516_v44  ;;  %v3461_v11 = vadd.f32 %v5658_v8, %v3331_v60 }
 0x175   : > { %v3260_v12 = vmax.f32 %v1941_v1, 0.0  ;;  %v3203_v13 = vmax.f32 %v2012_v2, 0.0  ;;  %v4341_v14 = vpack.c.bf16 %v3460_v4, %v3459_v45  ;;  %v3389_v15 = vmul.f32 %v5652_v0, %v3259_v5 }
 0x176   : > { %v3332_v17 = vmul.f32 %v5648_v62, %v3202_v6  ;;  %v1943_v18 = vadd.f32 %v1942_v28, %v5650_v63  ;;  %3950 = vst [vmem:[%s5688_s18 + $0x144] sm:$0xff] %v4370_v9  ;;  %v2014_v21 = vadd.f32 %v2013_v48, %v5646_v61  ;;  %v2018_v22 = vadd.f32 %v2017_v10, %v5650_v63  ;;  %v2165_v23 = vpop.f32.mrb[32].mxu0 }
 0x177   : > { %v3390_v19 = vmul.f32 %v5652_v0, %v3260_v12  ;;  %v3333_v20 = vmul.f32 %v5648_v62, %v3203_v13  ;;  %v2242_v24 = vpop.f32.mrb[32].mxu1  ;;  %3921 = vst [vmem:[%s5688_s18 + $0x60] sm:$0xff] %v4341_v14  ;;  %v3519_v25 = vadd.f32 %v5674_v29, %v3389_v15  ;;  %v2089_v30 = vadd.f32 %v2088_v43, %v5646_v61  ;;  %v2167_v28 = vpop.f32.mrb[33].mxu0 }
 0x178   : > { %v3462_v26 = vadd.f32 %v5658_v8, %v3332_v17  ;;  %v3261_v27 = vmax.f32 %v1943_v18, 0.0  ;;  %v2244_v31 = vpop.f32.mrb[33].mxu1  ;;  %v3204_v34 = vmax.f32 %v2014_v21, 0.0  ;;  %v3262_v35 = vmax.f32 %v2018_v22, 0.0 }
 0x179   : > { %v3520_v32 = vadd.f32 %v5674_v29, %v3390_v19  ;;  %v3463_v33 = vadd.f32 %v5658_v8, %v3333_v20  ;;  %v4371_v36 = vpack.c.bf16 %v3519_v25, %v3518_v57  ;;  %v3205_v39 = vmax.f32 %v2089_v30, 0.0 }
 0x17a   : > { %v4342_v37 = vpack.c.bf16 %v3462_v26, %v3461_v11  ;;  %v3391_v38 = vmul.f32 %v5652_v0, %v3261_v27  ;;  %v3334_v40 = vmul.f32 %v5648_v62, %v3204_v34  ;;  %v3392_v41 = vmul.f32 %v5652_v0, %v3262_v35  ;;  %v2171_v44 = vpop.f32.mrb[34].mxu0 }
 0x17b   : > { %v2020_v42 = vadd.f32 %v2019_v16, %v5650_v63  ;;  %v2091_v43 = vadd.f32 %v2090_v49, %v5646_v61  ;;  %v2248_v45 = vpop.f32.mrb[34].mxu1  ;;  %3951 = vst [vmem:[%s5688_s18 + $0x14c] sm:$0xff] %v4371_v36  ;;  %v3335_v47 = vmul.f32 %v5648_v62, %v3205_v39  ;;  %v2095_v48 = vadd.f32 %v2094_v3, %v5650_v63  ;;  %v2173_v51 = vpop.f32.mrb[35].mxu0 }
 0x17c   : > { %3922 = vst [vmem:[%s5688_s18 + $0x68] sm:$0xff] %v4342_v37  ;;  %v3521_v46 = vadd.f32 %v5674_v29, %v3391_v38  ;;  %v2166_v50 = vadd.f32 %v2165_v23, %v5646_v61  ;;  %v2250_v52 = vpop.f32.mrb[35].mxu1  ;;  %v3464_v53 = vadd.f32 %v5658_v8, %v3334_v40  ;;  %v3522_v54 = vadd.f32 %v5674_v29, %v3392_v41 }
 0x17d   : > { %v3263_v49 = vmax.f32 %v2020_v42, 0.0  ;;  %v3206_v55 = vmax.f32 %v2091_v43, 0.0  ;;  %v3465_v58 = vadd.f32 %v5658_v8, %v3335_v47  ;;  %v3264_v59 = vmax.f32 %v2095_v48, 0.0 }
 0x17e   : > { %v4372_v56 = vpack.c.bf16 %v3521_v46, %v3520_v32  ;;  %v3207_v60 = vmax.f32 %v2166_v50, 0.0  ;;  %v4343_v1 = vpack.c.bf16 %v3464_v53, %v3463_v33  ;;  %v2097_v3 = vadd.f32 %v2096_v7, %v5650_v63  ;;  %v2319_v4 = vpop.f32.mrb[36].mxu0 }
 0x17f   : > { %v3393_v2 = vmul.f32 %v5652_v0, %v3263_v49  ;;  %v3336_v10 = vmul.f32 %v5648_v62, %v3206_v55  ;;  %v2396_v57 = vpop.f32.mrb[36].mxu1  ;;  %v3394_v5 = vmul.f32 %v5652_v0, %v3264_v59  ;;  %v2168_v16 = vadd.f32 %v2167_v28, %v5646_v61  ;;  %v2321_v11 = vpop.f32.mrb[37].mxu0 }
 0x180   : > { %3952 = vst [vmem:[%s5688_s18 + $0x154] sm:$0xff] %v4372_v56  ;;  %v3337_v6 = vmul.f32 %v5648_v62, %v3207_v60  ;;  %v2172_v9 = vadd.f32 %v2171_v44, %v5650_v63  ;;  %v5884_v12 = vpop.f32.mrb[37].mxu1  ;;  %3923 = vst [vmem:[%s5688_s18 + $0x70] sm:$0xff] %v4343_v1  ;;  %v3265_v7 = vmax.f32 %v2097_v3, 0.0  ;;  %v2243_v15 = vadd.f32 %v2242_v24, %v5646_v61 }
 0x181   : > { %v3523_v13 = vadd.f32 %v5674_v29, %v3393_v2  ;;  %v3466_v14 = vadd.f32 %v5658_v8, %v3336_v10  ;;  %v3524_v17 = vadd.f32 %v5674_v29, %v3394_v5  ;;  %v3208_v19 = vmax.f32 %v2168_v16, 0.0 }
 0x182   : > { %v3467_v18 = vadd.f32 %v5658_v8, %v3337_v6  ;;  %v3266_v20 = vmax.f32 %v2172_v9, 0.0  ;;  %v3395_v23 = vmul.f32 %v5652_v0, %v3265_v7  ;;  %v3209_v25 = vmax.f32 %v2243_v15, 0.0  ;;  %v2325_v26 = vpop.f32.mrb[38].mxu0 }
 0x183   : > { %v4373_v21 = vpack.c.bf16 %v3523_v13, %v3522_v54  ;;  %v4344_v22 = vpack.c.bf16 %v3466_v14, %v3465_v58  ;;  %v2402_v27 = vpop.f32.mrb[38].mxu1  ;;  %v3338_v30 = vmul.f32 %v5648_v62, %v3208_v19  ;;  %v2174_v24 = vadd.f32 %v2173_v51, %v5650_v63  ;;  %v2327_v33 = vpop.f32.mrb[39].mxu0 }
 0x184   : > { %v3396_v28 = vmul.f32 %v5652_v0, %v3266_v20  ;;  %v2245_v32 = vadd.f32 %v2244_v31, %v5646_v61  ;;  %v5897_v34 = vpop.f32.mrb[39].mxu1  ;;  %v3525_v35 = vadd.f32 %v5674_v29, %v3395_v23  ;;  %v3339_v36 = vmul.f32 %v5648_v62, %v3209_v25 }
 0x185   : > { %3953 = vst [vmem:[%s5688_s18 + $0x15c] sm:$0xff] %v4373_v21  ;;  %3924 = vst [vmem:[%s5688_s18 + $0x78] sm:$0xff] %v4344_v22  ;;  %v2249_v37 = vadd.f32 %v2248_v45, %v5650_v63  ;;  %v2320_v38 = vadd.f32 %v2319_v4, %v5646_v61  ;;  %v3468_v39 = vadd.f32 %v5658_v8, %v3338_v30  ;;  %v3267_v41 = vmax.f32 %v2174_v24, 0.0 }
 0x186   : > { %v3526_v40 = vadd.f32 %v5674_v29, %v3396_v28  ;;  %v3210_v31 = vmax.f32 %v2245_v32, 0.0  ;;  %v4374_v42 = vpack.c.bf16 %v3525_v35, %v3524_v17  ;;  %v3469_v43 = vadd.f32 %v5658_v8, %v3339_v36  ;;  %v2473_v47 = vpop.f32.mrb[40].mxu0 }
 0x187   : > { %v3268_v44 = vmax.f32 %v2249_v37, 0.0  ;;  %v3211_v46 = vmax.f32 %v2320_v38, 0.0  ;;  %v5908_v48 = vpop.f32.mrb[40].mxu1  ;;  %v4345_v50 = vpack.c.bf16 %v3468_v39, %v3467_v18  ;;  %v3397_v45 = vmul.f32 %v5652_v0, %v3267_v41  ;;  %v2475_v54 = vpop.f32.mrb[41].mxu0 }
 0x188   : > { %v3340_v51 = vmul.f32 %v5648_v62, %v3210_v31  ;;  %v2251_v53 = vadd.f32 %v2250_v52, %v5650_v63  ;;  %v5913_v49 = vpop.f32.mrb[41].mxu1  ;;  %3954 = vst [vmem:[%s5688_s18 + $0x164] sm:$0xff] %v4374_v42  ;;  %v2322_v58 = vadd.f32 %v2321_v11, %v5646_v61  ;;  %v2326_v59 = vadd.f32 %v2325_v26, %v5650_v63 }
 0x189   : > { %v3398_v55 = vmul.f32 %v5652_v0, %v3268_v44  ;;  %v3341_v56 = vmul.f32 %v5648_v62, %v3211_v46  ;;  %3925 = vst [vmem:[%s5688_s18 + $0x80] sm:$0xff] %v4345_v50  ;;  %v3527_v60 = vadd.f32 %v5674_v29, %v3397_v45  ;;  %v2397_v52 = vadd.f32 %v2396_v57, %v5646_v61 }
 0x18a   : > { %v3470_v1 = vadd.f32 %v5658_v8, %v3340_v51  ;;  %v3269_v2 = vmax.f32 %v2251_v53, 0.0  ;;  %v3212_v4 = vmax.f32 %v2322_v58, 0.0  ;;  %v3270_v5 = vmax.f32 %v2326_v59, 0.0  ;;  %v2479_v6 = vpop.f32.mrb[42].mxu0 }
 0x18b   : > { %v3528_v10 = vadd.f32 %v5674_v29, %v3398_v55  ;;  %v3471_v3 = vadd.f32 %v5658_v8, %v3341_v56  ;;  %v5926_v16 = vpop.f32.mrb[42].mxu1  ;;  %v4375_v9 = vpack.c.bf16 %v3527_v60, %v3526_v40  ;;  %v3213_v14 = vmax.f32 %v2397_v52, 0.0  ;;  %v2481_v7 = vpop.f32.mrb[43].mxu0 }
 0x18c   : > { %v4346_v11 = vpack.c.bf16 %v3470_v1, %v3469_v43  ;;  %v3399_v13 = vmul.f32 %v5652_v0, %v3269_v2  ;;  %v5929_v15 = vpop.f32.mrb[43].mxu1  ;;  %v3342_v57 = vmul.f32 %v5648_v62, %v3212_v4  ;;  %v3400_v17 = vmul.f32 %v5652_v0, %v3270_v5 }
 0x18d   : > { %v2328_v18 = vadd.f32 %v2327_v33, %v5650_v63  ;;  %v2399_v19 = vadd.f32 %v5884_v12, %v5646_v61  ;;  %3955 = vst [vmem:[%s5688_s18 + $0x16c] sm:$0xff] %v4375_v9  ;;  %v3343_v21 = vmul.f32 %v5648_v62, %v3213_v14  ;;  %v2403_v22 = vadd.f32 %v2402_v27, %v5650_v63 }
 0x18e   : > { %3926 = vst [vmem:[%s5688_s18 + $0x88] sm:$0xff] %v4346_v11  ;;  %v3529_v20 = vadd.f32 %v5674_v29, %v3399_v13  ;;  %v2474_v23 = vadd.f32 %v2473_v47, %v5646_v61  ;;  %v3472_v25 = vadd.f32 %v5658_v8, %v3342_v57  ;;  %v3530_v26 = vadd.f32 %v5674_v29, %v3400_v17  ;;  %v2627_v24 = vpop.f32.mrb[44].mxu0 }
 0x18f   : > { %v3271_v30 = vmax.f32 %v2328_v18, 0.0  ;;  %v3214_v28 = vmax.f32 %v2399_v19, 0.0  ;;  %v5944_v32 = vpop.f32.mrb[44].mxu1  ;;  %v3473_v33 = vadd.f32 %v5658_v8, %v3343_v21  ;;  %v3272_v35 = vmax.f32 %v2403_v22, 0.0  ;;  %v2629_v37 = vpop.f32.mrb[45].mxu0 }
 0x190   : > { %v4376_v12 = vpack.c.bf16 %v3529_v20, %v3528_v10  ;;  %v3215_v36 = vmax.f32 %v2474_v23, 0.0  ;;  %v5947_v27 = vpop.f32.mrb[45].mxu1  ;;  %v4347_v38 = vpack.c.bf16 %v3472_v25, %v3471_v3  ;;  %v2405_v41 = vadd.f32 %v5897_v34, %v5650_v63 }
 0x191   : > { %v3401_v39 = vmul.f32 %v5652_v0, %v3271_v30  ;;  %v3344_v40 = vmul.f32 %v5648_v62, %v3214_v28  ;;  %v3402_v31 = vmul.f32 %v5652_v0, %v3272_v35  ;;  %v2476_v43 = vadd.f32 %v2475_v54, %v5646_v61 }
 0x192   : > { %3956 = vst [vmem:[%s5688_s18 + $0x174] sm:$0xff] %v4376_v12  ;;  %v3345_v42 = vmul.f32 %v5648_v62, %v3215_v36  ;;  %v2480_v44 = vadd.f32 %v2479_v6, %v5650_v63  ;;  %3927 = vst [vmem:[%s5688_s18 + $0x90] sm:$0xff] %v4347_v38  ;;  %v3273_v50 = vmax.f32 %v2405_v41, 0.0  ;;  %v2551_v45 = vadd.f32 %v5908_v48, %v5646_v61  ;;  %v2633_v51 = vpop.f32.mrb[46].mxu0 }
 0x193   : > { %v3531_v46 = vadd.f32 %v5674_v29, %v3401_v39  ;;  %v3474_v47 = vadd.f32 %v5658_v8, %v3344_v40  ;;  %v5963_v34 = vpop.f32.mrb[46].mxu1  ;;  %v3532_v53 = vadd.f32 %v5674_v29, %v3402_v31  ;;  %v3216_v55 = vmax.f32 %v2476_v43, 0.0  ;;  %v2635_v58 = vpop.f32.mrb[47].mxu0 }
 0x194   : > { %v3475_v54 = vadd.f32 %v5658_v8, %v3345_v42  ;;  %v3274_v56 = vmax.f32 %v2480_v44, 0.0  ;;  %v5967_v59 = vpop.f32.mrb[47].mxu1  ;;  %v3403_v2 = vmul.f32 %v5652_v0, %v3273_v50  ;;  %v3217_v52 = vmax.f32 %v2551_v45, 0.0 }
 0x195   : > { %v4377_v60 = vpack.c.bf16 %v3531_v46, %v3530_v26  ;;  %v4348_v1 = vpack.c.bf16 %v3474_v47, %v3473_v33  ;;  %v3346_v48 = vmul.f32 %v5648_v62, %v3216_v55  ;;  %v2482_v3 = vadd.f32 %v2481_v7, %v5650_v63 }
 0x196   : > { %v3404_v10 = vmul.f32 %v5652_v0, %v3274_v56  ;;  %v2553_v4 = vadd.f32 %v5913_v49, %v5646_v61  ;;  %v3533_v5 = vadd.f32 %v5674_v29, %v3403_v2  ;;  %v3347_v6 = vmul.f32 %v5648_v62, %v3217_v52  ;;  %v2781_v13 = vpop.f32.mrb[48].mxu0 }
 0x197   : > { %3957 = vst [vmem:[%s5688_s18 + $0x17c] sm:$0xff] %v4377_v60  ;;  %3928 = vst [vmem:[%s5688_s18 + $0x98] sm:$0xff] %v4348_v1  ;;  %v2557_v9 = vadd.f32 %v5926_v16, %v5650_v63  ;;  %v2628_v11 = vadd.f32 %v2627_v24, %v5646_v61  ;;  %v5982_v14 = vpop.f32.mrb[48].mxu1  ;;  %v3476_v7 = vadd.f32 %v5658_v8, %v3346_v48  ;;  %v3275_v49 = vmax.f32 %v2482_v3, 0.0  ;;  %v5986_v18 = vpop.f32.mrb[49].mxu0 }
 0x198   : > { %v3534_v57 = vadd.f32 %v5674_v29, %v3404_v10  ;;  %v3218_v17 = vmax.f32 %v2553_v4, 0.0  ;;  %v5988_v19 = vpop.f32.mrb[49].mxu1  ;;  %v4378_v20 = vpack.c.bf16 %v3533_v5, %v3532_v53  ;;  %v3477_v16 = vadd.f32 %v5658_v8, %v3347_v6 }
 0x199   : > { %v3276_v21 = vmax.f32 %v2557_v9, 0.0  ;;  %v3219_v22 = vmax.f32 %v2628_v11, 0.0  ;;  %v4349_v23 = vpack.c.bf16 %v3476_v7, %v3475_v54  ;;  %v3405_v25 = vmul.f32 %v5652_v0, %v3275_v49 }
 0x19a   : > { %v3348_v26 = vmul.f32 %v5648_v62, %v3218_v17  ;;  %v2559_v30 = vadd.f32 %v5929_v15, %v5650_v63  ;;  %3958 = vst [vmem:[%s5688_s18 + $0x184] sm:$0xff] %v4378_v20  ;;  %v2630_v12 = vadd.f32 %v2629_v37, %v5646_v61  ;;  %v2634_v33 = vadd.f32 %v2633_v51, %v5650_v63  ;;  %v2787_v35 = vpop.f32.mrb[50].mxu0 }
 0x19b   : > { %v3406_v28 = vmul.f32 %v5652_v0, %v3276_v21  ;;  %v3349_v24 = vmul.f32 %v5648_v62, %v3219_v22  ;;  %v6000_v36 = vpop.f32.mrb[50].mxu1  ;;  %3929 = vst [vmem:[%s5688_s18 + $0xa0] sm:$0xff] %v4349_v23  ;;  %v3535_v38 = vadd.f32 %v5674_v29, %v3405_v25  ;;  %v2705_v15 = vadd.f32 %v5944_v32, %v5646_v61  ;;  %v2789_v41 = vpop.f32.mrb[51].mxu0 }
 0x19c   : > { %v3478_v39 = vadd.f32 %v5658_v8, %v3348_v26  ;;  %v3277_v40 = vmax.f32 %v2559_v30, 0.0  ;;  %v6007_v31 = vpop.f32.mrb[51].mxu1  ;;  %v3220_v43 = vmax.f32 %v2630_v12, 0.0  ;;  %v3278_v44 = vmax.f32 %v2634_v33, 0.0 }
 0x19d   : > { %v3536_v37 = vadd.f32 %v5674_v29, %v3406_v28  ;;  %v3479_v42 = vadd.f32 %v5658_v8, %v3349_v24  ;;  %v4379_v46 = vpack.c.bf16 %v3535_v38, %v3534_v57  ;;  %v3221_v45 = vmax.f32 %v2705_v15, 0.0 }
 0x19e   : > { %v4350_v47 = vpack.c.bf16 %v3478_v39, %v3477_v16  ;;  %v3407_v50 = vmul.f32 %v5652_v0, %v3277_v40  ;;  %v3350_v51 = vmul.f32 %v5648_v62, %v3220_v43  ;;  %v3408_v32 = vmul.f32 %v5652_v0, %v3278_v44  ;;  %v2935_v55 = vpop.f32.mrb[52].mxu0 }
 0x19f   : > { %v2636_v53 = vadd.f32 %v2635_v58, %v5650_v63  ;;  %v2707_v54 = vadd.f32 %v5947_v27, %v5646_v61  ;;  %v6017_v56 = vpop.f32.mrb[52].mxu1  ;;  %3959 = vst [vmem:[%s5688_s18 + $0x18c] sm:$0xff] %v4379_v46  ;;  %v3351_v1 = vmul.f32 %v5648_v62, %v3221_v45  ;;  %v2711_v2 = vadd.f32 %v5963_v34, %v5650_v63  ;;  %v6026_v48 = vpop.f32.mrb[53].mxu0 }
 0x1a0   : > { %3930 = vst [vmem:[%s5688_s18 + $0xa8] sm:$0xff] %v4350_v47  ;;  %v3537_v60 = vadd.f32 %v5674_v29, %v3407_v50  ;;  %v2782_v52 = vadd.f32 %v2781_v13, %v5646_v61  ;;  %v6028_v58 = vpop.f32.mrb[53].mxu1  ;;  %v3480_v27 = vadd.f32 %v5658_v8, %v3350_v51  ;;  %v3538_v10 = vadd.f32 %v5674_v29, %v3408_v32 }
 0x1a1   : > { %v3279_v3 = vmax.f32 %v2636_v53, 0.0  ;;  %v3222_v4 = vmax.f32 %v2707_v54, 0.0  ;;  %v3481_v6 = vadd.f32 %v5658_v8, %v3351_v1  ;;  %v3280_v9 = vmax.f32 %v2711_v2, 0.0 }
 0x1a2   : > { %v4380_v5 = vpack.c.bf16 %v3537_v60, %v3536_v37  ;;  %v3223_v11 = vmax.f32 %v2782_v52, 0.0  ;;  %v4351_v34 = vpack.c.bf16 %v3480_v27, %v3479_v42  ;;  %v2713_v57 = vadd.f32 %v5967_v59, %v5650_v63  ;;  %v2941_v49 = vpop.f32.mrb[54].mxu0 }
 0x1a3   : > { %v3409_v13 = vmul.f32 %v5652_v0, %v3279_v3  ;;  %v3352_v7 = vmul.f32 %v5648_v62, %v3222_v4  ;;  %v6037_v17 = vpop.f32.mrb[54].mxu1  ;;  %v3410_v20 = vmul.f32 %v5652_v0, %v3280_v9  ;;  %v2784_v21 = vadd.f32 %v5986_v18, %v5646_v61  ;;  %v6045_v23 = vpop.f32.mrb[55].mxu0 }
 0x1a4   : > { %3960 = vst [vmem:[%s5688_s18 + $0x194] sm:$0xff] %v4380_v5  ;;  %v3353_v16 = vmul.f32 %v5648_v62, %v3223_v11  ;;  %v2788_v22 = vadd.f32 %v2787_v35, %v5650_v63  ;;  %v6047_v25 = vpop.f32.mrb[55].mxu1  ;;  %3931 = vst [vmem:[%s5688_s18 + $0xb0] sm:$0xff] %v4351_v34  ;;  %v3281_v30 = vmax.f32 %v2713_v57, 0.0  ;;  %v2859_v28 = vadd.f32 %v5982_v14, %v5646_v61 }
 0x1a5   : > { %v3539_v59 = vadd.f32 %v5674_v29, %v3409_v13  ;;  %v3482_v26 = vadd.f32 %v5658_v8, %v3352_v7  ;;  %v3540_v24 = vadd.f32 %v5674_v29, %v3410_v20  ;;  %v3224_v12 = vmax.f32 %v2784_v21, 0.0 }
 0x1a6   : > { %v3483_v18 = vadd.f32 %v5658_v8, %v3353_v16  ;;  %v3282_v33 = vmax.f32 %v2788_v22, 0.0  ;;  %v3411_v39 = vmul.f32 %v5652_v0, %v3281_v30  ;;  %v3225_v40 = vmax.f32 %v2859_v28, 0.0  ;;  %v6057_v15 = vpop.f32.mrb[56].mxu0 }
 0x1a7   : > { %v4381_v35 = vpack.c.bf16 %v3539_v59, %v3538_v10  ;;  %v4352_v38 = vpack.c.bf16 %v3482_v26, %v3481_v6  ;;  %v6059_v37 = vpop.f32.mrb[56].mxu1  ;;  %v3354_v42 = vmul.f32 %v5648_v62, %v3224_v12  ;;  %v2790_v43 = vadd.f32 %v2789_v41, %v5650_v63  ;;  %v6066_v46 = vpop.f32.mrb[57].mxu0 }
 0x1a8   : > { %v3412_v14 = vmul.f32 %v5652_v0, %v3282_v33  ;;  %v2861_v44 = vadd.f32 %v5988_v19, %v5646_v61  ;;  %v6068_v47 = vpop.f32.mrb[57].mxu1  ;;  %v3541_v50 = vadd.f32 %v5674_v29, %v3411_v39  ;;  %v3355_v45 = vmul.f32 %v5648_v62, %v3225_v40 }
 0x1a9   : > { %3961 = vst [vmem:[%s5688_s18 + $0x19c] sm:$0xff] %v4381_v35  ;;  %3932 = vst [vmem:[%s5688_s18 + $0xb8] sm:$0xff] %v4352_v38  ;;  %v2865_v51 = vadd.f32 %v6000_v36, %v5650_v63  ;;  %v2936_v32 = vadd.f32 %v2935_v55, %v5646_v61  ;;  %v3484_v41 = vadd.f32 %v5658_v8, %v3354_v42  ;;  %v3283_v53 = vmax.f32 %v2790_v43, 0.0 }
 0x1aa   : > { %v3542_v19 = vadd.f32 %v5674_v29, %v3412_v14  ;;  %v3226_v54 = vmax.f32 %v2861_v44, 0.0  ;;  %v4382_v60 = vpack.c.bf16 %v3541_v50, %v3540_v24  ;;  %v3485_v1 = vadd.f32 %v5658_v8, %v3355_v45  ;;  %v6080_v27 = vpop.f32.mrb[58].mxu0 }
 0x1ab   : > { %v3284_v2 = vmax.f32 %v2865_v51, 0.0  ;;  %v3227_v52 = vmax.f32 %v2936_v32, 0.0  ;;  %v4353_v10 = vpack.c.bf16 %v3484_v41, %v3483_v18  ;;  %v3413_v36 = vmul.f32 %v5652_v0, %v3283_v53  ;;  %v6086_v4 = vpop.f32.mrb[59].mxu0 }
 0x1ac   : > { %v3356_v3 = vmul.f32 %v5648_v62, %v3226_v54  ;;  %v2867_v55 = vadd.f32 %v6007_v31, %v5650_v63  ;;  %3962 = vst [vmem:[%s5688_s18 + $0x1a4] sm:$0xff] %v4382_v60  ;;  %v2938_v9 = vadd.f32 %v6026_v48, %v5646_v61  ;;  %v3013_v11 = vadd.f32 %v6017_v56, %v5646_v61 }
 0x1ad   : > { %v3414_v5 = vmul.f32 %v5652_v0, %v3284_v2  ;;  %v3357_v6 = vmul.f32 %v5648_v62, %v3227_v52  ;;  %3933 = vst [vmem:[%s5688_s18 + $0xc0] sm:$0xff] %v4353_v10  ;;  %v3543_v34 = vadd.f32 %v5674_v29, %v3413_v36  ;;  %v2942_v7 = vadd.f32 %v2941_v49, %v5650_v63 }
 0x1ae   : > { %v3486_v13 = vadd.f32 %v5658_v8, %v3356_v3  ;;  %v3285_v31 = vmax.f32 %v2867_v55, 0.0  ;;  %v3228_v16 = vmax.f32 %v2938_v9, 0.0  ;;  %v3229_v21 = vmax.f32 %v3013_v11, 0.0 }
 0x1af   : > { %v3544_v57 = vadd.f32 %v5674_v29, %v3414_v5  ;;  %v3487_v20 = vadd.f32 %v5658_v8, %v3357_v6  ;;  %v4383_v48 = vpack.c.bf16 %v3543_v34, %v3542_v19  ;;  %v3286_v59 = vmax.f32 %v2942_v7, 0.0 }
 0x1b0   : > { %v4354_v22 = vpack.c.bf16 %v3486_v13, %v3485_v1  ;;  %v3415_v56 = vmul.f32 %v5652_v0, %v3285_v31  ;;  %v3358_v26 = vmul.f32 %v5648_v62, %v3228_v16  ;;  %v3359_v30 = vmul.f32 %v5648_v62, %v3229_v21  ;;  %v3999_v21 = vld [vmem:[%s5688_s18 + $0x18] sm:$0xff] (%p5064_p5) }
 0x1b1   : > { %v3015_v28 = vadd.f32 %v6028_v58, %v5646_v61  ;;  %v2944_v49 = vadd.f32 %v6045_v23, %v5650_v63  ;;  %3963 = vst [vmem:[%s5688_s18 + $0x1ac] sm:$0xff] %v4383_v48  ;;  %v3416_v18 = vmul.f32 %v5652_v0, %v3286_v59  ;;  %v3019_v12 = vadd.f32 %v6037_v17, %v5650_v63  ;;  %v4001_v48 = vld [vmem:[%s5688_s18 + $0x20] sm:$0xff] (%p5064_p5)  ;;  %v4007_v59 = vld [vmem:[%s5688_s18 + $0x38] sm:$0xff] (%p5064_p5) }
 0x1b2   : > { %3934 = vst [vmem:[%s5688_s18 + $0xc8] sm:$0xff] %v4354_v22  ;;  %v3545_v24 = vadd.f32 %v5674_v29, %v3415_v56  ;;  %v3021_v33 = vadd.f32 %v6047_v25, %v5650_v63  ;;  %v3488_v35 = vadd.f32 %v5658_v8, %v3358_v26  ;;  %v3489_v58 = vadd.f32 %v5658_v8, %v3359_v30  ;;  %v4003_v22 = vld [vmem:[%s5688_s18 + $0x28] sm:$0xff] (%p5064_p5)  ;;  %v4005_v56 = vld [vmem:[%s5688_s18 + $0x30] sm:$0xff] (%p5064_p5)  ;;  %v4009_v26 = vld [vmem:[%s5688_s18 + $0x40] sm:$0xff] (%p5064_p5) }
 0x1b3   : > { %v3230_v38 = vmax.f32 %v3015_v28, 0.0  ;;  %v3287_v23 = vmax.f32 %v2944_v49, 0.0  ;;  %v3546_v40 = vadd.f32 %v5674_v29, %v3416_v18  ;;  %v3288_v42 = vmax.f32 %v3019_v12, 0.0  ;;  %4000 = vst [vmem:[%s6173_s10 + $0x18] sm:$0xff] (%p5064_p5), %v3999_v21  ;;  %4002 = vst [vmem:[%s6173_s10 + $0x20] sm:$0xff] (%p5064_p5), %v4001_v48  ;;  %v4011_v30 = vld [vmem:[%s5688_s18 + $0x48] sm:$0xff] (%p5064_p5) }
 0x1b4   : > { %v4384_v39 = vpack.c.bf16 %v3545_v24, %v3544_v57  ;;  %v3289_v14 = vmax.f32 %v3021_v33, 0.0  ;;  %v4355_v43 = vpack.c.bf16 %v3488_v35, %v3487_v20  ;;  %v3090_v25 = vadd.f32 %v6057_v15, %v5646_v61  ;;  %4004 = vst [vmem:[%s6173_s10 + $0x28] sm:$0xff] (%p5064_p5), %v4003_v22  ;;  %4006 = vst [vmem:[%s6173_s10 + $0x30] sm:$0xff] (%p5064_p5), %v4005_v56  ;;  %v4013_v28 = vld [vmem:[%s5688_s18 + $0x50] sm:$0xff] (%p5064_p5)  ;;  %v4015_v49 = vld [vmem:[%s5688_s18 + $0x58] sm:$0xff] (%p5064_p5) }
 0x1b5   : > { %v3360_v44 = vmul.f32 %v5648_v62, %v3230_v38  ;;  %v3417_v17 = vmul.f32 %v5652_v0, %v3287_v23  ;;  %v3418_v50 = vmul.f32 %v5652_v0, %v3288_v42  ;;  %v3172_v51 = vadd.f32 %v6059_v37, %v5650_v63  ;;  %4008 = vst [vmem:[%s6173_s10 + $0x38] sm:$0xff] (%p5064_p5), %v4007_v59  ;;  %v4017_v24 = vld [vmem:[%s5688_s18 + $0x60] sm:$0xff] (%p5064_p5)  ;;  %v4019_v18 = vld [vmem:[%s5688_s18 + $0x68] sm:$0xff] (%p5064_p5)  ;;  %v4021_v12 = vld [vmem:[%s5688_s18 + $0x70] sm:$0xff] (%p5064_p5) }
 0x1b6   : > { %3964 = vst [vmem:[%s5688_s18 + $0x1b4] sm:$0xff] %v4384_v39  ;;  %v3419_v45 = vmul.f32 %v5652_v0, %v3289_v14  ;;  %v3092_v32 = vadd.f32 %v6066_v46, %v5646_v61  ;;  %3935 = vst [vmem:[%s5688_s18 + $0xd0] sm:$0xff] %v4355_v43  ;;  %v3231_v53 = vmax.f32 %v3090_v25, 0.0  ;;  %v3167_v15 = vadd.f32 %v6068_v47, %v5646_v61  ;;  %v4023_v33 = vld [vmem:[%s5688_s18 + $0x78] sm:$0xff] (%p5064_p5)  ;;  %v4025_v35 = vld [vmem:[%s5688_s18 + $0x80] sm:$0xff] (%p5064_p5) }
 0x1b7   : > { %v3490_v41 = vadd.f32 %v5658_v8, %v3360_v44  ;;  %v3547_v19 = vadd.f32 %v5674_v29, %v3417_v17  ;;  %v3548_v54 = vadd.f32 %v5674_v29, %v3418_v50  ;;  %v3292_v37 = vmax.f32 %v3172_v51, 0.0  ;;  %4010 = vst [vmem:[%s6173_s10 + $0x40] sm:$0xff] (%p5064_p5), %v4009_v26  ;;  %4012 = vst [vmem:[%s6173_s10 + $0x48] sm:$0xff] (%p5064_p5), %v4011_v30  ;;  %v4029_v38 = vld [vmem:[%s5688_s18 + $0x90] sm:$0xff] (%p5064_p5)  ;;  %v4031_v23 = vld [vmem:[%s5688_s18 + $0x98] sm:$0xff] (%p5064_p5) }
 0x1b8   : > { %v3549_v60 = vadd.f32 %v5674_v29, %v3419_v45  ;;  %v3232_v1 = vmax.f32 %v3092_v32, 0.0  ;;  %v3361_v52 = vmul.f32 %v5648_v62, %v3231_v53  ;;  %v3233_v10 = vmax.f32 %v3167_v15, 0.0  ;;  %4014 = vst [vmem:[%s6173_s10 + $0x50] sm:$0xff] (%p5064_p5), %v4013_v28  ;;  %4016 = vst [vmem:[%s6173_s10 + $0x58] sm:$0xff] (%p5064_p5), %v4015_v49  ;;  %v4033_v39 = vld [vmem:[%s5688_s18 + $0xa0] sm:$0xff] (%p5064_p5)  ;;  %v4037_v42 = vld [vmem:[%s5688_s18 + $0xb0] sm:$0xff] (%p5064_p5) }
 0x1b9   : > { %v4356_v2 = vpack.c.bf16 %v3490_v41, %v3489_v58  ;;  %v4385_v46 = vpack.c.bf16 %v3547_v19, %v3546_v40  ;;  %v3422_v3 = vmul.f32 %v5652_v0, %v3292_v37  ;;  %v3096_v61 = vadd.f32 %v6080_v27, %v5650_v63  ;;  %4018 = vst [vmem:[%s6173_s10 + $0x60] sm:$0xff] (%p5064_p5), %v4017_v24  ;;  %v4027_v58 = vld [vmem:[%s5688_s18 + $0x88] sm:$0xff] (%p5064_p5)  ;;  %v4039_v14 = vld [vmem:[%s5688_s18 + $0xb8] sm:$0xff] (%p5064_p5)  ;;  %v4041_v43 = vld [vmem:[%s5688_s18 + $0xc0] sm:$0xff] (%p5064_p5) }
 0x1ba   : > { %v4386_v36 = vpack.c.bf16 %v3549_v60, %v3548_v54  ;;  %v3362_v55 = vmul.f32 %v5648_v62, %v3232_v1  ;;  %v3491_v47 = vadd.f32 %v5658_v8, %v3361_v52  ;;  %v3363_v5 = vmul.f32 %v5648_v62, %v3233_v10  ;;  %4020 = vst [vmem:[%s6173_s10 + $0x68] sm:$0xff] (%p5064_p5), %v4019_v18  ;;  %v4035_v40 = vld [vmem:[%s5688_s18 + $0xa8] sm:$0xff] (%p5064_p5)  ;;  %v4053_v51 = vld [vmem:[%s5688_s18 + $0xf4] sm:$0xff] (%p5064_p5)  ;;  %v4055_v32 = vld [vmem:[%s5688_s18 + $0xfc] sm:$0xff] (%p5064_p5) }
 0x1bb   : > { %3936 = vst [vmem:[%s5688_s18 + $0xd8] sm:$0xff] %v4356_v2  ;;  %3965 = vst [vmem:[%s5688_s18 + $0x1bc] sm:$0xff] %v4385_v46  ;;  %v3098_v6 = vadd.f32 %v6086_v4, %v5650_v63  ;;  %v3552_v9 = vadd.f32 %v5674_v29, %v3422_v3  ;;  %v3290_v34 = vmax.f32 %v3096_v61, 0.0  ;;  %v4043_v44 = vld [vmem:[%s5688_s18 + $0xc8] sm:$0xff] (%p5064_p5)  ;;  %v4061_v53 = vld [vmem:[%s5688_s18 + $0x114] sm:$0xff] (%p5064_p5) }
 0x1bc   : > { %3966 = vst [vmem:[%s5688_s18 + $0x1c4] sm:$0xff] %v4386_v36  ;;  %v3492_v11 = vadd.f32 %v5658_v8, %v3362_v55  ;;  %v3493_v27 = vadd.f32 %v5658_v8, %v3363_v5  ;;  %v3995_v8 = vld [vmem:[%s5688_s18 + $0x8] sm:$0xff] (%p5064_p5)  ;;  %4022 = vst [vmem:[%s6173_s10 + $0x70] sm:$0xff] (%p5064_p5), %v4021_v12  ;;  %v4063_v15 = vld [vmem:[%s5688_s18 + $0x11c] sm:$0xff] (%p5064_p5) }
 0x1bd   : > { %v3291_v13 = vmax.f32 %v3098_v6, 0.0  ;;  %v4388_v31 = vpack.c.bf16 %v3552_v9, %v3552_v9  ;;  %v3420_v57 = vmul.f32 %v5652_v0, %v3290_v34  ;;  %3996 = vst [vmem:[%s6173_s10 + $0x8] sm:$0xff] (%p5064_p5), %v3995_v8  ;;  %4024 = vst [vmem:[%s6173_s10 + $0x78] sm:$0xff] (%p5064_p5), %v4023_v33  ;;  %v4045_v17 = vld [vmem:[%s5688_s18 + $0xd0] sm:$0xff] (%p5064_p5)  ;;  %v4057_v41 = vld [vmem:[%s5688_s18 + $0x104] sm:$0xff] (%p5064_p5) }
 0x1be   : > { %v4357_v7 = vpack.c.bf16 %v3492_v11, %v3491_v47  ;;  %v4358_v20 = vpack.c.bf16 %v3493_v27, %v3493_v27  ;;  %4026 = vst [vmem:[%s6173_s10 + $0x80] sm:$0xff] (%p5064_p5), %v4025_v35  ;;  %4028 = vst [vmem:[%s6173_s10 + $0x88] sm:$0xff] (%p5064_p5), %v4027_v58  ;;  %v4051_v45 = vld [vmem:[%s5688_s18 + $0xec] sm:$0xff] (%p5064_p5)  ;;  %v4065_v54 = vld [vmem:[%s5688_s18 + $0x124] sm:$0xff] (%p5064_p5) }
 0x1bf   : > { %v3421_v62 = vmul.f32 %v5652_v0, %v3291_v13  ;;  %3968 = vst [vmem:[%s5688_s18 + $0x1d4] sm:$0xf] %v4388_v31  ;;  %v3550_v63 = vadd.f32 %v5674_v29, %v3420_v57  ;;  %3975 = sbr.rel (!%p5064_p5) target bundleno = 471 (0x1d7), region = 70  ;;  %v3993_v0 = vld [vmem:[%s5688_s18] sm:$0xff] (%p5064_p5)  ;;  %4030 = vst [vmem:[%s6173_s10 + $0x90] sm:$0xff] (%p5064_p5), %v4029_v38  ;;  %v4059_v19 = vld [vmem:[%s5688_s18 + $0x10c] sm:$0xff] (%p5064_p5) }
 0x1c0   : > { %3937 = vst [vmem:[%s5688_s18 + $0xe0] sm:$0xff] %v4357_v7  ;;  %3938 = vst [vmem:[%s5688_s18 + $0xe8] sm:$0xf] %v4358_v20  ;;  %v4067_v60 = vld [vmem:[%s5688_s18 + $0x12c] sm:$0xff] (%p5064_p5)  ;;  %v4069_v37 = vld [vmem:[%s5688_s18 + $0x134] sm:$0xff] (%p5064_p5) }
 0x1c1   : > { %v3551_v4 = vadd.f32 %v5674_v29, %v3421_v62  ;;  %v3997_v29 = vld [vmem:[%s5688_s18 + $0x10] sm:$0xff] (%p5064_p5)  ;;  %3994 = vst [vmem:[%s6173_s10] sm:$0xff] (%p5064_p5), %v3993_v0  ;;  %4032 = vst [vmem:[%s6173_s10 + $0x98] sm:$0xff] (%p5064_p5), %v4031_v23  ;;  %v4071_v1 = vld [vmem:[%s5688_s18 + $0x13c] sm:$0xff] (%p5064_p5) }
 0x1c2   : > { %3998 = vst [vmem:[%s6173_s10 + $0x10] sm:$0xff] (%p5064_p5), %v3997_v29  ;;  %4034 = vst [vmem:[%s6173_s10 + $0xa0] sm:$0xff] (%p5064_p5), %v4033_v39  ;;  %v4047_v25 = vld [vmem:[%s5688_s18 + $0xd8] sm:$0xff] (%p5064_p5)  ;;  %v4073_v2 = vld [vmem:[%s5688_s18 + $0x144] sm:$0xff] (%p5064_p5) }
 0x1c3   : > { %v4387_v16 = vpack.c.bf16 %v3551_v4, %v3550_v63  ;;  %4036 = vst [vmem:[%s6173_s10 + $0xa8] sm:$0xff] (%p5064_p5), %v4035_v40  ;;  %4038 = vst [vmem:[%s6173_s10 + $0xb0] sm:$0xff] (%p5064_p5), %v4037_v42  ;;  %v4075_v46 = vld [vmem:[%s5688_s18 + $0x14c] sm:$0xff] (%p5064_p5)  ;;  %v4077_v52 = vld [vmem:[%s5688_s18 + $0x154] sm:$0xff] (%p5064_p5) }
 0x1c4   : > { %4040 = vst [vmem:[%s6173_s10 + $0xb8] sm:$0xff] (%p5064_p5), %v4039_v14  ;;  %4042 = vst [vmem:[%s6173_s10 + $0xc0] sm:$0xff] (%p5064_p5), %v4041_v43  ;;  %v4079_v10 = vld [vmem:[%s5688_s18 + $0x15c] sm:$0xff] (%p5064_p5)  ;;  %v4081_v36 = vld [vmem:[%s5688_s18 + $0x164] sm:$0xff] (%p5064_p5) }
 0x1c5   : > { %3967 = vst [vmem:[%s5688_s18 + $0x1cc] sm:$0xff] %v4387_v16  ;;  %4044 = vst [vmem:[%s6173_s10 + $0xc8] sm:$0xff] (%p5064_p5), %v4043_v44  ;;  %v4083_v3 = vld [vmem:[%s5688_s18 + $0x16c] sm:$0xff] (%p5064_p5)  ;;  %v4085_v55 = vld [vmem:[%s5688_s18 + $0x174] sm:$0xff] (%p5064_p5) }
 0x1c6   : > { %4046 = vst [vmem:[%s6173_s10 + $0xd0] sm:$0xff] %v4045_v17  ;;  %4048 = vst [vmem:[%s6173_s10 + $0xd8] sm:$0xff] %v4047_v25  ;;  %v4087_v61 = vld [vmem:[%s5688_s18 + $0x17c] sm:$0xff]  ;;  %v4089_v47 = vld [vmem:[%s5688_s18 + $0x184] sm:$0xff] }
 0x1c7   : > { %v4049_v50 = vld [vmem:[%s5688_s18 + $0xe0] sm:$0xff]  ;;  %4052 = vst [vmem:[%s6173_s10 + $0x588] sm:$0xff] %v4051_v45  ;;  %4054 = vst [vmem:[%s6173_s10 + $0x590] sm:$0xff] %v4053_v51  ;;  %v4091_v5 = vld [vmem:[%s5688_s18 + $0x18c] sm:$0xff] }
 0x1c8   : > { %4050 = vst [vmem:[%s6173_s10 + $0xe0] sm:$0xff] %v4049_v50  ;;  %4056 = vst [vmem:[%s6173_s10 + $0x598] sm:$0xff] %v4055_v32  ;;  %v4093_v6 = vld [vmem:[%s5688_s18 + $0x194] sm:$0xff]  ;;  %v4095_v9 = vld [vmem:[%s5688_s18 + $0x19c] sm:$0xff] }
 0x1c9   : > { %4058 = vst [vmem:[%s6173_s10 + $0x5a0] sm:$0xff] %v4057_v41  ;;  %4060 = vst [vmem:[%s6173_s10 + $0x5a8] sm:$0xff] %v4059_v19  ;;  %v4097_v11 = vld [vmem:[%s5688_s18 + $0x1a4] sm:$0xff]  ;;  %v4099_v34 = vld [vmem:[%s5688_s18 + $0x1ac] sm:$0xff] }
 0x1ca   : > { %4062 = vst [vmem:[%s6173_s10 + $0x5b0] sm:$0xff] %v4061_v53  ;;  %4064 = vst [vmem:[%s6173_s10 + $0x5b8] sm:$0xff] %v4063_v15  ;;  %v4101_v27 = vld [vmem:[%s5688_s18 + $0x1b4] sm:$0xff]  ;;  %v4103_v13 = vld [vmem:[%s5688_s18 + $0x1bc] sm:$0xff] }
 0x1cb   : > { %4066 = vst [vmem:[%s6173_s10 + $0x5c0] sm:$0xff] %v4065_v54  ;;  %4068 = vst [vmem:[%s6173_s10 + $0x5c8] sm:$0xff] %v4067_v60  ;;  %v4105_v31 = vld [vmem:[%s5688_s18 + $0x1c4] sm:$0xff]  ;;  %v4324_v20 = vld [vmem:[%s5688_s18 + $0x1d4] sm:$0xf] }
 0x1cc   : > { %4070 = vst [vmem:[%s6173_s10 + $0x5d0] sm:$0xff] %v4069_v37  ;;  %4072 = vst [vmem:[%s6173_s10 + $0x5d8] sm:$0xff] %v4071_v1  ;;  %v4107_v7 = vld [vmem:[%s5688_s18 + $0x1cc] sm:$0xff]  ;;  %v4322_v57 = vld [vmem:[%s5688_s18 + $0xe8] sm:$0xf] }
 0x1cd   : > { %4074 = vst [vmem:[%s6173_s10 + $0x5e0] sm:$0xff] %v4073_v2  ;;  %4076 = vst [vmem:[%s6173_s10 + $0x5e8] sm:$0xff] %v4075_v46 }
 0x1ce   : > { %4078 = vst [vmem:[%s6173_s10 + $0x5f0] sm:$0xff] %v4077_v52  ;;  %4080 = vst [vmem:[%s6173_s10 + $0x5f8] sm:$0xff] %v4079_v10 }
 0x1cf   : > { %4082 = vst [vmem:[%s6173_s10 + $0x600] sm:$0xff] %v4081_v36  ;;  %4084 = vst [vmem:[%s6173_s10 + $0x608] sm:$0xff] %v4083_v3 }
 0x1d0   : > { %4086 = vst [vmem:[%s6173_s10 + $0x610] sm:$0xff] %v4085_v55  ;;  %4088 = vst [vmem:[%s6173_s10 + $0x618] sm:$0xff] %v4087_v61 }
 0x1d1   : > { %4090 = vst [vmem:[%s6173_s10 + $0x620] sm:$0xff] %v4089_v47  ;;  %4092 = vst [vmem:[%s6173_s10 + $0x628] sm:$0xff] %v4091_v5 }
 0x1d2   : > { %4094 = vst [vmem:[%s6173_s10 + $0x630] sm:$0xff] %v4093_v6  ;;  %4096 = vst [vmem:[%s6173_s10 + $0x638] sm:$0xff] %v4095_v9 }
 0x1d3   : > { %4098 = vst [vmem:[%s6173_s10 + $0x640] sm:$0xff] %v4097_v11  ;;  %4100 = vst [vmem:[%s6173_s10 + $0x648] sm:$0xff] %v4099_v34 }
 0x1d4   : > { %4102 = vst [vmem:[%s6173_s10 + $0x650] sm:$0xff] %v4101_v27  ;;  %4104 = vst [vmem:[%s6173_s10 + $0x658] sm:$0xff] %v4103_v13 }
 0x1d5   : > { %4106 = vst [vmem:[%s6173_s10 + $0x660] sm:$0xff] %v4105_v31  ;;  %4108 = vst [vmem:[%s6173_s10 + $0x668] sm:$0xff] %v4107_v7 }
 0x1d6   : > { %4323 = vst [vmem:[%s6173_s10 + $0xe8] sm:$0xf] %v4322_v57  ;;  %4325 = vst [vmem:[%s6173_s10 + $0x670] sm:$0xf] %v4324_v20 }
 0x1d7 PF: > { %p12_p10 = scmp.ge.s32.totalorder %s5051_s22, 8   ;;  %s6306_s18 = smov %s4996_s19 }
 0x1d8   : > { %s6307_s19 = smov %s5062_s25  ;;  %s6308_s20 = smov %s5051_s22 }
 0x1d9   :  { %14 = sbr.rel (!%p12_p10) target bundleno = 2 (0x2), region = 139 }

// kernel: net_forward.8
= control target key start
LH: loop header
LB: loop body
LE: loop exit
PB: predicated region body
PF: predicated region fallthrough
CT: control target
= control target key end

     0   :  { %s5511_s18 = smov 0   ;;  %s5513_s19 = smov 0   ;;  %s7210_s0 = inlined_call_operand.vmem [shape: bf16[32,144], index: 0, kind: input, shape index: {}]   ;;  %s7211_s1 = inlined_call_operand.vmem [shape: bf16[144,11520], index: 1, kind: input, shape index: {}]   ;;  %s7212_s2 = inlined_call_operand.vmem [shape: f32[32,1], index: 2, kind: input, shape index: {}]   ;;  %s7213_s3 = inlined_call_operand.vmem [shape: f32[32,1], index: 3, kind: input, shape index: {}]   ;;  %s7214_s4 = inlined_call_operand.vmem [shape: f32[32,1], index: 4, kind: input, shape index: {}]   ;;  %s7215_s5 = inlined_call_operand.vmem [shape: bf16[32,11520], index: 5, kind: output, shape index: {}]  }
   0x1   :  { %s5515_s20 = smov 0  }
   0x2 LB: > { %s4002_s21 = sadd.s32 4294967295, %s5478_s20   ;;  %s5528_s22 = sadd.s32 1, %s5478_s20   ;;  %s5478_s20 = sphi %s5515_s20, %s7219_s20   ;;  %s5474_s19 = sphi %s5513_s19, %s7218_s19   ;;  %s5470_s18 = sphi %s5511_s18, %s7217_s18  }
   0x3   : > { %s40_s23 = ssub.s32 %s5478_s20, %s5528_s22  ;;  %s43_s24 = sadd.s32 1, %s5474_s19 }
   0x4   : > { %p41_p0 = scmp.eq.s32.totalorder %s40_s23, 0  ;;  %p50_p1 = scmp.ne.s32.totalorder %s5474_s19, %s5470_s18 }
   0x5   : > { %p51_p2 = scmp.eq.s32.totalorder %s5478_s20, 0  ;;  %p143_p3 = scmp.eq.s32.totalorder %s4002_s21, 2 }
   0x6   : > { %s5539_s25 = scalar_select %p41_p0, %s5474_s19, %s43_s24  }
   0x7   : > { %p52_p4 = por %p51_p2, %p50_p1  ;;  %p5541_p5 = por %p143_p3, %p50_p1 }
   0x8   : > { %p4005_p6 = scmp.ge.s32.totalorder %s5478_s20, 3 }
   0xa   : > { %177 = sbr.rel (%p4005_p6) target bundleno = 157 (0x9d), region = 32 }
  0x11   : > { %180 = sbr.rel (!%p52_p4) target bundleno = 157 (0x9d), region = 36  ;;  %s182_s27 = sand.u32 (%p52_p4), 1, %s5474_s19  }
  0x12   : > { %s4131_s28 = smul.u32 (%p52_p4), 120, %s5478_s20 }
  0x13   : > { %s5021_s29 = smul.u32 (%p52_p4), 2160, %s182_s27 }
  0x14   : > { %s5551_s7 = scalar_lea.vmem (%p52_p4), %s7211_s1, %s4131_s28 }
  0x15   : > { %v200_v0 = vld [vmem:[%s5551_s7] sm:$0xff] (%p52_p4)  ;;  %v202_v1 = vld [vmem:[%s5551_s7 + $0x8] sm:$0xff] (%p52_p4)  ;;  %v204_v2 = vld [vmem:[%s5551_s7 + $0x10] sm:$0xff] (%p52_p4)  ;;  %s5556_s8 = scalar_lea.vmem (%p52_p4), [#allocation2], %s5021_s29 }
  0x16   : > { %201 = vst [vmem:[%s5556_s8] sm:$0xff] (%p52_p4), %v200_v0  ;;  %203 = vst [vmem:[%s5556_s8 + $0x8] sm:$0xff] (%p52_p4), %v202_v1  ;;  %v206_v3 = vld [vmem:[%s5551_s7 + $0x18] sm:$0xff] (%p52_p4)  ;;  %v208_v4 = vld [vmem:[%s5551_s7 + $0x20] sm:$0xff] (%p52_p4) }
  0x17   : > { %205 = vst [vmem:[%s5556_s8 + $0x10] sm:$0xff] (%p52_p4), %v204_v2  ;;  %v210_v5 = vld [vmem:[%s5551_s7 + $0x28] sm:$0xff] (%p52_p4)  ;;  %207 = vst [vmem:[%s5556_s8 + $0x18] sm:$0xff] (%p52_p4), %v206_v3  ;;  %v212_v6 = vld [vmem:[%s5551_s7 + $0x30] sm:$0xff] (%p52_p4) }
  0x18   : > { %209 = vst [vmem:[%s5556_s8 + $0x20] sm:$0xff] %v208_v4  ;;  %211 = vst [vmem:[%s5556_s8 + $0x28] sm:$0xff] %v210_v5  ;;  %v214_v7 = vld [vmem:[%s5551_s7 + $0x38] sm:$0xff]  ;;  %v216_v8 = vld [vmem:[%s5551_s7 + $0x40] sm:$0xff] }
  0x19   : > { %213 = vst [vmem:[%s5556_s8 + $0x30] sm:$0xff] %v212_v6  ;;  %215 = vst [vmem:[%s5556_s8 + $0x38] sm:$0xff] %v214_v7  ;;  %v218_v9 = vld [vmem:[%s5551_s7 + $0x48] sm:$0xff]  ;;  %v220_v10 = vld [vmem:[%s5551_s7 + $0x50] sm:$0xff] }
  0x1a   : > { %217 = vst [vmem:[%s5556_s8 + $0x40] sm:$0xff] %v216_v8  ;;  %v222_v11 = vld [vmem:[%s5551_s7 + $0x58] sm:$0xff]  ;;  %219 = vst [vmem:[%s5556_s8 + $0x48] sm:$0xff] %v218_v9  ;;  %v224_v12 = vld [vmem:[%s5551_s7 + $0x60] sm:$0xff] }
  0x1b   : > { %221 = vst [vmem:[%s5556_s8 + $0x50] sm:$0xff] %v220_v10  ;;  %223 = vst [vmem:[%s5556_s8 + $0x58] sm:$0xff] %v222_v11  ;;  %v226_v13 = vld [vmem:[%s5551_s7 + $0x68] sm:$0xff]  ;;  %v228_v14 = vld [vmem:[%s5551_s7 + $0x70] sm:$0xff] }
  0x1c   : > { %225 = vst [vmem:[%s5556_s8 + $0x60] sm:$0xff] %v224_v12  ;;  %227 = vst [vmem:[%s5556_s8 + $0x68] sm:$0xff] %v226_v13  ;;  %v230_v15 = vld [vmem:[%s5551_s7 + $0x168] sm:$0xff]  ;;  %v232_v16 = vld [vmem:[%s5551_s7 + $0x170] sm:$0xff] }
  0x1d   : > { %229 = vst [vmem:[%s5556_s8 + $0x70] sm:$0xff] %v228_v14  ;;  %v234_v17 = vld [vmem:[%s5551_s7 + $0x178] sm:$0xff]  ;;  %231 = vst [vmem:[%s5556_s8 + $0x78] sm:$0xff] %v230_v15  ;;  %v236_v18 = vld [vmem:[%s5551_s7 + $0x180] sm:$0xff] }
  0x1e   : > { %233 = vst [vmem:[%s5556_s8 + $0x80] sm:$0xff] %v232_v16  ;;  %235 = vst [vmem:[%s5556_s8 + $0x88] sm:$0xff] %v234_v17  ;;  %v238_v19 = vld [vmem:[%s5551_s7 + $0x188] sm:$0xff]  ;;  %v240_v20 = vld [vmem:[%s5551_s7 + $0x190] sm:$0xff] }
  0x1f   : > { %237 = vst [vmem:[%s5556_s8 + $0x90] sm:$0xff] %v236_v18  ;;  %239 = vst [vmem:[%s5556_s8 + $0x98] sm:$0xff] %v238_v19  ;;  %v242_v21 = vld [vmem:[%s5551_s7 + $0x198] sm:$0xff]  ;;  %v244_v22 = vld [vmem:[%s5551_s7 + $0x1a0] sm:$0xff] }
  0x20   : > { %241 = vst [vmem:[%s5556_s8 + $0xa0] sm:$0xff] %v240_v20  ;;  %v246_v23 = vld [vmem:[%s5551_s7 + $0x1a8] sm:$0xff]  ;;  %243 = vst [vmem:[%s5556_s8 + $0xa8] sm:$0xff] %v242_v21  ;;  %v248_v24 = vld [vmem:[%s5551_s7 + $0x1b0] sm:$0xff] }
  0x21   : > { %245 = vst [vmem:[%s5556_s8 + $0xb0] sm:$0xff] %v244_v22  ;;  %247 = vst [vmem:[%s5556_s8 + $0xb8] sm:$0xff] %v246_v23  ;;  %v250_v25 = vld [vmem:[%s5551_s7 + $0x1b8] sm:$0xff]  ;;  %v252_v26 = vld [vmem:[%s5551_s7 + $0x1c0] sm:$0xff] }
  0x22   : > { %249 = vst [vmem:[%s5556_s8 + $0xc0] sm:$0xff] %v248_v24  ;;  %251 = vst [vmem:[%s5556_s8 + $0xc8] sm:$0xff] %v250_v25  ;;  %v254_v27 = vld [vmem:[%s5551_s7 + $0x1c8] sm:$0xff]  ;;  %v256_v28 = vld [vmem:[%s5551_s7 + $0x1d0] sm:$0xff] }
  0x23   : > { %253 = vst [vmem:[%s5556_s8 + $0xd0] sm:$0xff] %v252_v26  ;;  %v258_v29 = vld [vmem:[%s5551_s7 + $0x1d8] sm:$0xff]  ;;  %255 = vst [vmem:[%s5556_s8 + $0xd8] sm:$0xff] %v254_v27  ;;  %v260_v30 = vld [vmem:[%s5551_s7 + $0x2d0] sm:$0xff] }
  0x24   : > { %257 = vst [vmem:[%s5556_s8 + $0xe0] sm:$0xff] %v256_v28  ;;  %259 = vst [vmem:[%s5556_s8 + $0xe8] sm:$0xff] %v258_v29  ;;  %v262_v31 = vld [vmem:[%s5551_s7 + $0x2d8] sm:$0xff]  ;;  %v264_v32 = vld [vmem:[%s5551_s7 + $0x2e0] sm:$0xff] }
  0x25   : > { %261 = vst [vmem:[%s5556_s8 + $0xf0] sm:$0xff] %v260_v30  ;;  %263 = vst [vmem:[%s5556_s8 + $0xf8] sm:$0xff] %v262_v31  ;;  %v266_v33 = vld [vmem:[%s5551_s7 + $0x2e8] sm:$0xff]  ;;  %v268_v34 = vld [vmem:[%s5551_s7 + $0x2f0] sm:$0xff] }
  0x26   : > { %265 = vst [vmem:[%s5556_s8 + $0x100] sm:$0xff] %v264_v32  ;;  %v270_v35 = vld [vmem:[%s5551_s7 + $0x2f8] sm:$0xff]  ;;  %267 = vst [vmem:[%s5556_s8 + $0x108] sm:$0xff] %v266_v33  ;;  %v272_v36 = vld [vmem:[%s5551_s7 + $0x300] sm:$0xff] }
  0x27   : > { %269 = vst [vmem:[%s5556_s8 + $0x110] sm:$0xff] %v268_v34  ;;  %271 = vst [vmem:[%s5556_s8 + $0x118] sm:$0xff] %v270_v35  ;;  %v274_v37 = vld [vmem:[%s5551_s7 + $0x308] sm:$0xff]  ;;  %v276_v38 = vld [vmem:[%s5551_s7 + $0x310] sm:$0xff] }
  0x28   : > { %273 = vst [vmem:[%s5556_s8 + $0x120] sm:$0xff] %v272_v36  ;;  %275 = vst [vmem:[%s5556_s8 + $0x128] sm:$0xff] %v274_v37  ;;  %v278_v39 = vld [vmem:[%s5551_s7 + $0x318] sm:$0xff]  ;;  %v280_v40 = vld [vmem:[%s5551_s7 + $0x320] sm:$0xff] }
  0x29   : > { %277 = vst [vmem:[%s5556_s8 + $0x130] sm:$0xff] %v276_v38  ;;  %v282_v41 = vld [vmem:[%s5551_s7 + $0x328] sm:$0xff]  ;;  %279 = vst [vmem:[%s5556_s8 + $0x138] sm:$0xff] %v278_v39  ;;  %v284_v42 = vld [vmem:[%s5551_s7 + $0x330] sm:$0xff] }
  0x2a   : > { %281 = vst [vmem:[%s5556_s8 + $0x140] sm:$0xff] %v280_v40  ;;  %283 = vst [vmem:[%s5556_s8 + $0x148] sm:$0xff] %v282_v41  ;;  %v286_v43 = vld [vmem:[%s5551_s7 + $0x338] sm:$0xff]  ;;  %v288_v44 = vld [vmem:[%s5551_s7 + $0x340] sm:$0xff] }
  0x2b   : > { %285 = vst [vmem:[%s5556_s8 + $0x150] sm:$0xff] %v284_v42  ;;  %287 = vst [vmem:[%s5556_s8 + $0x158] sm:$0xff] %v286_v43  ;;  %v290_v45 = vld [vmem:[%s5551_s7 + $0x438] sm:$0xff]  ;;  %v292_v46 = vld [vmem:[%s5551_s7 + $0x440] sm:$0xff] }
  0x2c   : > { %289 = vst [vmem:[%s5556_s8 + $0x160] sm:$0xff] %v288_v44  ;;  %v294_v47 = vld [vmem:[%s5551_s7 + $0x448] sm:$0xff]  ;;  %291 = vst [vmem:[%s5556_s8 + $0x168] sm:$0xff] %v290_v45  ;;  %v296_v48 = vld [vmem:[%s5551_s7 + $0x450] sm:$0xff] }
  0x2d   : > { %293 = vst [vmem:[%s5556_s8 + $0x170] sm:$0xff] %v292_v46  ;;  %295 = vst [vmem:[%s5556_s8 + $0x178] sm:$0xff] %v294_v47  ;;  %v298_v49 = vld [vmem:[%s5551_s7 + $0x458] sm:$0xff]  ;;  %v300_v50 = vld [vmem:[%s5551_s7 + $0x460] sm:$0xff] }
  0x2e   : > { %297 = vst [vmem:[%s5556_s8 + $0x180] sm:$0xff] %v296_v48  ;;  %299 = vst [vmem:[%s5556_s8 + $0x188] sm:$0xff] %v298_v49  ;;  %v302_v51 = vld [vmem:[%s5551_s7 + $0x468] sm:$0xff]  ;;  %v304_v52 = vld [vmem:[%s5551_s7 + $0x470] sm:$0xff] }
  0x2f   : > { %301 = vst [vmem:[%s5556_s8 + $0x190] sm:$0xff] %v300_v50  ;;  %v306_v53 = vld [vmem:[%s5551_s7 + $0x478] sm:$0xff]  ;;  %303 = vst [vmem:[%s5556_s8 + $0x198] sm:$0xff] %v302_v51  ;;  %v308_v54 = vld [vmem:[%s5551_s7 + $0x480] sm:$0xff] }
  0x30   : > { %305 = vst [vmem:[%s5556_s8 + $0x1a0] sm:$0xff] %v304_v52  ;;  %307 = vst [vmem:[%s5556_s8 + $0x1a8] sm:$0xff] %v306_v53  ;;  %v310_v55 = vld [vmem:[%s5551_s7 + $0x488] sm:$0xff]  ;;  %v312_v56 = vld [vmem:[%s5551_s7 + $0x490] sm:$0xff] }
  0x31   : > { %309 = vst [vmem:[%s5556_s8 + $0x1b0] sm:$0xff] %v308_v54  ;;  %311 = vst [vmem:[%s5556_s8 + $0x1b8] sm:$0xff] %v310_v55  ;;  %v314_v57 = vld [vmem:[%s5551_s7 + $0x498] sm:$0xff]  ;;  %v316_v58 = vld [vmem:[%s5551_s7 + $0x4a0] sm:$0xff] }
  0x32   : > { %313 = vst [vmem:[%s5556_s8 + $0x1c0] sm:$0xff] %v312_v56  ;;  %v318_v59 = vld [vmem:[%s5551_s7 + $0x4a8] sm:$0xff]  ;;  %315 = vst [vmem:[%s5556_s8 + $0x1c8] sm:$0xff] %v314_v57  ;;  %v320_v60 = vld [vmem:[%s5551_s7 + $0x5a0] sm:$0xff] }
  0x33   : > { %317 = vst [vmem:[%s5556_s8 + $0x1d0] sm:$0xff] %v316_v58  ;;  %319 = vst [vmem:[%s5556_s8 + $0x1d8] sm:$0xff] %v318_v59  ;;  %v322_v61 = vld [vmem:[%s5551_s7 + $0x5a8] sm:$0xff]  ;;  %v324_v62 = vld [vmem:[%s5551_s7 + $0x5b0] sm:$0xff] }
  0x34   : > { %321 = vst [vmem:[%s5556_s8 + $0x1e0] sm:$0xff] %v320_v60  ;;  %323 = vst [vmem:[%s5556_s8 + $0x1e8] sm:$0xff] %v322_v61  ;;  %v326_v63 = vld [vmem:[%s5551_s7 + $0x5b8] sm:$0xff]  ;;  %v328_v0 = vld [vmem:[%s5551_s7 + $0x5c0] sm:$0xff] }
  0x35   : > { %325 = vst [vmem:[%s5556_s8 + $0x1f0] sm:$0xff] %v324_v62  ;;  %v330_v1 = vld [vmem:[%s5551_s7 + $0x5c8] sm:$0xff]  ;;  %327 = vst [vmem:[%s5556_s8 + $0x1f8] sm:$0xff] %v326_v63  ;;  %v332_v2 = vld [vmem:[%s5551_s7 + $0x5d0] sm:$0xff] }
  0x36   : > { %329 = vst [vmem:[%s5556_s8 + $0x200] sm:$0xff] %v328_v0  ;;  %331 = vst [vmem:[%s5556_s8 + $0x208] sm:$0xff] %v330_v1  ;;  %v334_v3 = vld [vmem:[%s5551_s7 + $0x5d8] sm:$0xff]  ;;  %v336_v4 = vld [vmem:[%s5551_s7 + $0x5e0] sm:$0xff] }
  0x37   : > { %333 = vst [vmem:[%s5556_s8 + $0x210] sm:$0xff] %v332_v2  ;;  %335 = vst [vmem:[%s5556_s8 + $0x218] sm:$0xff] %v334_v3  ;;  %v338_v5 = vld [vmem:[%s5551_s7 + $0x5e8] sm:$0xff]  ;;  %v340_v6 = vld [vmem:[%s5551_s7 + $0x5f0] sm:$0xff] }
  0x38   : > { %337 = vst [vmem:[%s5556_s8 + $0x220] sm:$0xff] %v336_v4  ;;  %v342_v7 = vld [vmem:[%s5551_s7 + $0x5f8] sm:$0xff]  ;;  %339 = vst [vmem:[%s5556_s8 + $0x228] sm:$0xff] %v338_v5  ;;  %v344_v8 = vld [vmem:[%s5551_s7 + $0x600] sm:$0xff] }
  0x39   : > { %341 = vst [vmem:[%s5556_s8 + $0x230] sm:$0xff] %v340_v6  ;;  %343 = vst [vmem:[%s5556_s8 + $0x238] sm:$0xff] %v342_v7  ;;  %v346_v9 = vld [vmem:[%s5551_s7 + $0x608] sm:$0xff]  ;;  %v348_v10 = vld [vmem:[%s5551_s7 + $0x610] sm:$0xff] }
  0x3a   : > { %345 = vst [vmem:[%s5556_s8 + $0x240] sm:$0xff] %v344_v8  ;;  %347 = vst [vmem:[%s5556_s8 + $0x248] sm:$0xff] %v346_v9  ;;  %v350_v11 = vld [vmem:[%s5551_s7 + $0x708] sm:$0xff]  ;;  %v352_v12 = vld [vmem:[%s5551_s7 + $0x710] sm:$0xff] }
  0x3b   : > { %349 = vst [vmem:[%s5556_s8 + $0x250] sm:$0xff] %v348_v10  ;;  %v354_v13 = vld [vmem:[%s5551_s7 + $0x718] sm:$0xff]  ;;  %351 = vst [vmem:[%s5556_s8 + $0x258] sm:$0xff] %v350_v11  ;;  %v356_v14 = vld [vmem:[%s5551_s7 + $0x720] sm:$0xff] }
  0x3c   : > { %353 = vst [vmem:[%s5556_s8 + $0x260] sm:$0xff] %v352_v12  ;;  %355 = vst [vmem:[%s5556_s8 + $0x268] sm:$0xff] %v354_v13  ;;  %v358_v15 = vld [vmem:[%s5551_s7 + $0x728] sm:$0xff]  ;;  %v360_v16 = vld [vmem:[%s5551_s7 + $0x730] sm:$0xff] }
  0x3d   : > { %357 = vst [vmem:[%s5556_s8 + $0x270] sm:$0xff] %v356_v14  ;;  %359 = vst [vmem:[%s5556_s8 + $0x278] sm:$0xff] %v358_v15  ;;  %v362_v17 = vld [vmem:[%s5551_s7 + $0x738] sm:$0xff]  ;;  %v364_v18 = vld [vmem:[%s5551_s7 + $0x740] sm:$0xff] }
  0x3e   : > { %361 = vst [vmem:[%s5556_s8 + $0x280] sm:$0xff] %v360_v16  ;;  %v366_v19 = vld [vmem:[%s5551_s7 + $0x748] sm:$0xff]  ;;  %363 = vst [vmem:[%s5556_s8 + $0x288] sm:$0xff] %v362_v17  ;;  %v368_v20 = vld [vmem:[%s5551_s7 + $0x750] sm:$0xff] }
  0x3f   : > { %365 = vst [vmem:[%s5556_s8 + $0x290] sm:$0xff] %v364_v18  ;;  %367 = vst [vmem:[%s5556_s8 + $0x298] sm:$0xff] %v366_v19  ;;  %v370_v21 = vld [vmem:[%s5551_s7 + $0x758] sm:$0xff]  ;;  %v372_v22 = vld [vmem:[%s5551_s7 + $0x760] sm:$0xff] }
  0x40   : > { %369 = vst [vmem:[%s5556_s8 + $0x2a0] sm:$0xff] %v368_v20  ;;  %371 = vst [vmem:[%s5556_s8 + $0x2a8] sm:$0xff] %v370_v21  ;;  %v374_v23 = vld [vmem:[%s5551_s7 + $0x768] sm:$0xff]  ;;  %v376_v24 = vld [vmem:[%s5551_s7 + $0x770] sm:$0xff] }
  0x41   : > { %373 = vst [vmem:[%s5556_s8 + $0x2b0] sm:$0xff] %v372_v22  ;;  %v378_v25 = vld [vmem:[%s5551_s7 + $0x778] sm:$0xff]  ;;  %375 = vst [vmem:[%s5556_s8 + $0x2b8] sm:$0xff] %v374_v23  ;;  %v380_v26 = vld [vmem:[%s5551_s7 + $0x870] sm:$0xff] }
  0x42   : > { %377 = vst [vmem:[%s5556_s8 + $0x2c0] sm:$0xff] %v376_v24  ;;  %379 = vst [vmem:[%s5556_s8 + $0x2c8] sm:$0xff] %v378_v25  ;;  %v382_v27 = vld [vmem:[%s5551_s7 + $0x878] sm:$0xff]  ;;  %v384_v28 = vld [vmem:[%s5551_s7 + $0x880] sm:$0xff] }
  0x43   : > { %381 = vst [vmem:[%s5556_s8 + $0x2d0] sm:$0xff] %v380_v26  ;;  %383 = vst [vmem:[%s5556_s8 + $0x2d8] sm:$0xff] %v382_v27  ;;  %v386_v29 = vld [vmem:[%s5551_s7 + $0x888] sm:$0xff]  ;;  %v388_v30 = vld [vmem:[%s5551_s7 + $0x890] sm:$0xff] }
  0x44   : > { %385 = vst [vmem:[%s5556_s8 + $0x2e0] sm:$0xff] %v384_v28  ;;  %v390_v31 = vld [vmem:[%s5551_s7 + $0x898] sm:$0xff]  ;;  %387 = vst [vmem:[%s5556_s8 + $0x2e8] sm:$0xff] %v386_v29  ;;  %v392_v32 = vld [vmem:[%s5551_s7 + $0x8a0] sm:$0xff] }
  0x45   : > { %389 = vst [vmem:[%s5556_s8 + $0x2f0] sm:$0xff] %v388_v30  ;;  %391 = vst [vmem:[%s5556_s8 + $0x2f8] sm:$0xff] %v390_v31  ;;  %v394_v33 = vld [vmem:[%s5551_s7 + $0x8a8] sm:$0xff]  ;;  %v396_v34 = vld [vmem:[%s5551_s7 + $0x8b0] sm:$0xff] }
  0x46   : > { %393 = vst [vmem:[%s5556_s8 + $0x300] sm:$0xff] %v392_v32  ;;  %395 = vst [vmem:[%s5556_s8 + $0x308] sm:$0xff] %v394_v33  ;;  %v398_v35 = vld [vmem:[%s5551_s7 + $0x8b8] sm:$0xff]  ;;  %v400_v36 = vld [vmem:[%s5551_s7 + $0x8c0] sm:$0xff] }
  0x47   : > { %397 = vst [vmem:[%s5556_s8 + $0x310] sm:$0xff] %v396_v34  ;;  %v402_v37 = vld [vmem:[%s5551_s7 + $0x8c8] sm:$0xff]  ;;  %399 = vst [vmem:[%s5556_s8 + $0x318] sm:$0xff] %v398_v35  ;;  %v404_v38 = vld [vmem:[%s5551_s7 + $0x8d0] sm:$0xff] }
  0x48   : > { %401 = vst [vmem:[%s5556_s8 + $0x320] sm:$0xff] %v400_v36  ;;  %403 = vst [vmem:[%s5556_s8 + $0x328] sm:$0xff] %v402_v37  ;;  %v406_v39 = vld [vmem:[%s5551_s7 + $0x8d8] sm:$0xff]  ;;  %v408_v40 = vld [vmem:[%s5551_s7 + $0x8e0] sm:$0xff] }
  0x49   : > { %405 = vst [vmem:[%s5556_s8 + $0x330] sm:$0xff] %v404_v38  ;;  %407 = vst [vmem:[%s5556_s8 + $0x338] sm:$0xff] %v406_v39  ;;  %v410_v41 = vld [vmem:[%s5551_s7 + $0x9d8] sm:$0xff]  ;;  %v412_v42 = vld [vmem:[%s5551_s7 + $0x9e0] sm:$0xff] }
  0x4a   : > { %409 = vst [vmem:[%s5556_s8 + $0x340] sm:$0xff] %v408_v40  ;;  %v414_v43 = vld [vmem:[%s5551_s7 + $0x9e8] sm:$0xff]  ;;  %411 = vst [vmem:[%s5556_s8 + $0x348] sm:$0xff] %v410_v41  ;;  %v416_v44 = vld [vmem:[%s5551_s7 + $0x9f0] sm:$0xff] }
  0x4b   : > { %413 = vst [vmem:[%s5556_s8 + $0x350] sm:$0xff] %v412_v42  ;;  %415 = vst [vmem:[%s5556_s8 + $0x358] sm:$0xff] %v414_v43  ;;  %v418_v45 = vld [vmem:[%s5551_s7 + $0x9f8] sm:$0xff]  ;;  %v420_v46 = vld [vmem:[%s5551_s7 + $0xa00] sm:$0xff] }
  0x4c   : > { %417 = vst [vmem:[%s5556_s8 + $0x360] sm:$0xff] %v416_v44  ;;  %419 = vst [vmem:[%s5556_s8 + $0x368] sm:$0xff] %v418_v45  ;;  %v422_v47 = vld [vmem:[%s5551_s7 + $0xa08] sm:$0xff]  ;;  %v424_v48 = vld [vmem:[%s5551_s7 + $0xa10] sm:$0xff] }
  0x4d   : > { %421 = vst [vmem:[%s5556_s8 + $0x370] sm:$0xff] %v420_v46  ;;  %v426_v49 = vld [vmem:[%s5551_s7 + $0xa18] sm:$0xff]  ;;  %423 = vst [vmem:[%s5556_s8 + $0x378] sm:$0xff] %v422_v47  ;;  %v428_v50 = vld [vmem:[%s5551_s7 + $0xa20] sm:$0xff] }
  0x4e   : > { %425 = vst [vmem:[%s5556_s8 + $0x380] sm:$0xff] %v424_v48  ;;  %427 = vst [vmem:[%s5556_s8 + $0x388] sm:$0xff] %v426_v49  ;;  %v430_v51 = vld [vmem:[%s5551_s7 + $0xa28] sm:$0xff]  ;;  %v432_v52 = vld [vmem:[%s5551_s7 + $0xa30] sm:$0xff] }
  0x4f   : > { %429 = vst [vmem:[%s5556_s8 + $0x390] sm:$0xff] %v428_v50  ;;  %431 = vst [vmem:[%s5556_s8 + $0x398] sm:$0xff] %v430_v51  ;;  %v434_v53 = vld [vmem:[%s5551_s7 + $0xa38] sm:$0xff]  ;;  %v436_v54 = vld [vmem:[%s5551_s7 + $0xa40] sm:$0xff] }
  0x50   : > { %433 = vst [vmem:[%s5556_s8 + $0x3a0] sm:$0xff] %v432_v52  ;;  %v438_v55 = vld [vmem:[%s5551_s7 + $0xa48] sm:$0xff]  ;;  %435 = vst [vmem:[%s5556_s8 + $0x3a8] sm:$0xff] %v434_v53  ;;  %v440_v56 = vld [vmem:[%s5551_s7 + $0xb40] sm:$0xff] }
  0x51   : > { %437 = vst [vmem:[%s5556_s8 + $0x3b0] sm:$0xff] %v436_v54  ;;  %439 = vst [vmem:[%s5556_s8 + $0x3b8] sm:$0xff] %v438_v55  ;;  %v442_v57 = vld [vmem:[%s5551_s7 + $0xb48] sm:$0xff]  ;;  %v444_v58 = vld [vmem:[%s5551_s7 + $0xb50] sm:$0xff] }
  0x52   : > { %441 = vst [vmem:[%s5556_s8 + $0x3c0] sm:$0xff] %v440_v56  ;;  %443 = vst [vmem:[%s5556_s8 + $0x3c8] sm:$0xff] %v442_v57  ;;  %v446_v59 = vld [vmem:[%s5551_s7 + $0xb58] sm:$0xff]  ;;  %v448_v60 = vld [vmem:[%s5551_s7 + $0xb60] sm:$0xff] }
  0x53   : > { %445 = vst [vmem:[%s5556_s8 + $0x3d0] sm:$0xff] %v444_v58  ;;  %v450_v61 = vld [vmem:[%s5551_s7 + $0xb68] sm:$0xff]  ;;  %447 = vst [vmem:[%s5556_s8 + $0x3d8] sm:$0xff] %v446_v59  ;;  %v452_v62 = vld [vmem:[%s5551_s7 + $0xb70] sm:$0xff] }
  0x54   : > { %449 = vst [vmem:[%s5556_s8 + $0x3e0] sm:$0xff] %v448_v60  ;;  %451 = vst [vmem:[%s5556_s8 + $0x3e8] sm:$0xff] %v450_v61  ;;  %v454_v63 = vld [vmem:[%s5551_s7 + $0xb78] sm:$0xff]  ;;  %v456_v0 = vld [vmem:[%s5551_s7 + $0xb80] sm:$0xff] }
  0x55   : > { %453 = vst [vmem:[%s5556_s8 + $0x3f0] sm:$0xff] %v452_v62  ;;  %455 = vst [vmem:[%s5556_s8 + $0x3f8] sm:$0xff] %v454_v63  ;;  %v458_v1 = vld [vmem:[%s5551_s7 + $0xb88] sm:$0xff]  ;;  %v460_v2 = vld [vmem:[%s5551_s7 + $0xb90] sm:$0xff] }
  0x56   : > { %457 = vst [vmem:[%s5556_s8 + $0x400] sm:$0xff] %v456_v0  ;;  %v462_v3 = vld [vmem:[%s5551_s7 + $0xb98] sm:$0xff]  ;;  %459 = vst [vmem:[%s5556_s8 + $0x408] sm:$0xff] %v458_v1  ;;  %v464_v4 = vld [vmem:[%s5551_s7 + $0xba0] sm:$0xff] }
  0x57   : > { %461 = vst [vmem:[%s5556_s8 + $0x410] sm:$0xff] %v460_v2  ;;  %463 = vst [vmem:[%s5556_s8 + $0x418] sm:$0xff] %v462_v3  ;;  %v466_v5 = vld [vmem:[%s5551_s7 + $0xba8] sm:$0xff]  ;;  %v468_v6 = vld [vmem:[%s5551_s7 + $0xbb0] sm:$0xff] }
  0x58   : > { %465 = vst [vmem:[%s5556_s8 + $0x420] sm:$0xff] %v464_v4  ;;  %467 = vst [vmem:[%s5556_s8 + $0x428] sm:$0xff] %v466_v5  ;;  %v470_v7 = vld [vmem:[%s5551_s7 + $0xca8] sm:$0xff]  ;;  %v472_v8 = vld [vmem:[%s5551_s7 + $0xcb0] sm:$0xff] }
  0x59   : > { %469 = vst [vmem:[%s5556_s8 + $0x430] sm:$0xff] %v468_v6  ;;  %v474_v9 = vld [vmem:[%s5551_s7 + $0xcb8] sm:$0xff]  ;;  %471 = vst [vmem:[%s5556_s8 + $0x438] sm:$0xff] %v470_v7  ;;  %v476_v10 = vld [vmem:[%s5551_s7 + $0xcc0] sm:$0xff] }
  0x5a   : > { %473 = vst [vmem:[%s5556_s8 + $0x440] sm:$0xff] %v472_v8  ;;  %475 = vst [vmem:[%s5556_s8 + $0x448] sm:$0xff] %v474_v9  ;;  %v478_v11 = vld [vmem:[%s5551_s7 + $0xcc8] sm:$0xff]  ;;  %v480_v12 = vld [vmem:[%s5551_s7 + $0xcd0] sm:$0xff] }
  0x5b   : > { %477 = vst [vmem:[%s5556_s8 + $0x450] sm:$0xff] %v476_v10  ;;  %479 = vst [vmem:[%s5556_s8 + $0x458] sm:$0xff] %v478_v11  ;;  %v482_v13 = vld [vmem:[%s5551_s7 + $0xcd8] sm:$0xff]  ;;  %v484_v14 = vld [vmem:[%s5551_s7 + $0xce0] sm:$0xff] }
  0x5c   : > { %481 = vst [vmem:[%s5556_s8 + $0x460] sm:$0xff] %v480_v12  ;;  %v486_v15 = vld [vmem:[%s5551_s7 + $0xce8] sm:$0xff]  ;;  %483 = vst [vmem:[%s5556_s8 + $0x468] sm:$0xff] %v482_v13  ;;  %v488_v16 = vld [vmem:[%s5551_s7 + $0xcf0] sm:$0xff] }
  0x5d   : > { %485 = vst [vmem:[%s5556_s8 + $0x470] sm:$0xff] %v484_v14  ;;  %487 = vst [vmem:[%s5556_s8 + $0x478] sm:$0xff] %v486_v15  ;;  %v490_v17 = vld [vmem:[%s5551_s7 + $0xcf8] sm:$0xff]  ;;  %v492_v18 = vld [vmem:[%s5551_s7 + $0xd00] sm:$0xff] }
  0x5e   : > { %489 = vst [vmem:[%s5556_s8 + $0x480] sm:$0xff] %v488_v16  ;;  %491 = vst [vmem:[%s5556_s8 + $0x488] sm:$0xff] %v490_v17  ;;  %v494_v19 = vld [vmem:[%s5551_s7 + $0xd08] sm:$0xff]  ;;  %v496_v20 = vld [vmem:[%s5551_s7 + $0xd10] sm:$0xff] }
  0x5f   : > { %493 = vst [vmem:[%s5556_s8 + $0x490] sm:$0xff] %v492_v18  ;;  %v498_v21 = vld [vmem:[%s5551_s7 + $0xd18] sm:$0xff]  ;;  %495 = vst [vmem:[%s5556_s8 + $0x498] sm:$0xff] %v494_v19  ;;  %v500_v22 = vld [vmem:[%s5551_s7 + $0xe10] sm:$0xff] }
  0x60   : > { %497 = vst [vmem:[%s5556_s8 + $0x4a0] sm:$0xff] %v496_v20  ;;  %499 = vst [vmem:[%s5556_s8 + $0x4a8] sm:$0xff] %v498_v21  ;;  %v502_v23 = vld [vmem:[%s5551_s7 + $0xe18] sm:$0xff]  ;;  %v504_v24 = vld [vmem:[%s5551_s7 + $0xe20] sm:$0xff] }
  0x61   : > { %501 = vst [vmem:[%s5556_s8 + $0x4b0] sm:$0xff] %v500_v22  ;;  %503 = vst [vmem:[%s5556_s8 + $0x4b8] sm:$0xff] %v502_v23  ;;  %v506_v25 = vld [vmem:[%s5551_s7 + $0xe28] sm:$0xff]  ;;  %v508_v26 = vld [vmem:[%s5551_s7 + $0xe30] sm:$0xff] }
  0x62   : > { %505 = vst [vmem:[%s5556_s8 + $0x4c0] sm:$0xff] %v504_v24  ;;  %v510_v27 = vld [vmem:[%s5551_s7 + $0xe38] sm:$0xff]  ;;  %507 = vst [vmem:[%s5556_s8 + $0x4c8] sm:$0xff] %v506_v25  ;;  %v512_v28 = vld [vmem:[%s5551_s7 + $0xe40] sm:$0xff] }
  0x63   : > { %509 = vst [vmem:[%s5556_s8 + $0x4d0] sm:$0xff] %v508_v26  ;;  %511 = vst [vmem:[%s5556_s8 + $0x4d8] sm:$0xff] %v510_v27  ;;  %v514_v29 = vld [vmem:[%s5551_s7 + $0xe48] sm:$0xff]  ;;  %v516_v30 = vld [vmem:[%s5551_s7 + $0xe50] sm:$0xff] }
  0x64   : > { %513 = vst [vmem:[%s5556_s8 + $0x4e0] sm:$0xff] %v512_v28  ;;  %515 = vst [vmem:[%s5556_s8 + $0x4e8] sm:$0xff] %v514_v29  ;;  %v518_v31 = vld [vmem:[%s5551_s7 + $0xe58] sm:$0xff]  ;;  %v520_v32 = vld [vmem:[%s5551_s7 + $0xe60] sm:$0xff] }
  0x65   : > { %517 = vst [vmem:[%s5556_s8 + $0x4f0] sm:$0xff] %v516_v30  ;;  %v522_v33 = vld [vmem:[%s5551_s7 + $0xe68] sm:$0xff]  ;;  %519 = vst [vmem:[%s5556_s8 + $0x4f8] sm:$0xff] %v518_v31  ;;  %v524_v34 = vld [vmem:[%s5551_s7 + $0xe70] sm:$0xff] }
  0x66   : > { %521 = vst [vmem:[%s5556_s8 + $0x500] sm:$0xff] %v520_v32  ;;  %523 = vst [vmem:[%s5556_s8 + $0x508] sm:$0xff] %v522_v33  ;;  %v526_v35 = vld [vmem:[%s5551_s7 + $0xe78] sm:$0xff]  ;;  %v528_v36 = vld [vmem:[%s5551_s7 + $0xe80] sm:$0xff] }
  0x67   : > { %525 = vst [vmem:[%s5556_s8 + $0x510] sm:$0xff] %v524_v34  ;;  %527 = vst [vmem:[%s5556_s8 + $0x518] sm:$0xff] %v526_v35  ;;  %v530_v37 = vld [vmem:[%s5551_s7 + $0xf78] sm:$0xff]  ;;  %v532_v38 = vld [vmem:[%s5551_s7 + $0xf80] sm:$0xff] }
  0x68   : > { %529 = vst [vmem:[%s5556_s8 + $0x520] sm:$0xff] %v528_v36  ;;  %v534_v39 = vld [vmem:[%s5551_s7 + $0xf88] sm:$0xff]  ;;  %531 = vst [vmem:[%s5556_s8 + $0x528] sm:$0xff] %v530_v37  ;;  %v536_v40 = vld [vmem:[%s5551_s7 + $0xf90] sm:$0xff] }
  0x69   : > { %533 = vst [vmem:[%s5556_s8 + $0x530] sm:$0xff] %v532_v38  ;;  %535 = vst [vmem:[%s5556_s8 + $0x538] sm:$0xff] %v534_v39  ;;  %v538_v41 = vld [vmem:[%s5551_s7 + $0xf98] sm:$0xff]  ;;  %v540_v42 = vld [vmem:[%s5551_s7 + $0xfa0] sm:$0xff] }
  0x6a   : > { %537 = vst [vmem:[%s5556_s8 + $0x540] sm:$0xff] %v536_v40  ;;  %539 = vst [vmem:[%s5556_s8 + $0x548] sm:$0xff] %v538_v41  ;;  %v542_v43 = vld [vmem:[%s5551_s7 + $0xfa8] sm:$0xff]  ;;  %v544_v44 = vld [vmem:[%s5551_s7 + $0xfb0] sm:$0xff] }
  0x6b   : > { %541 = vst [vmem:[%s5556_s8 + $0x550] sm:$0xff] %v540_v42  ;;  %v546_v45 = vld [vmem:[%s5551_s7 + $0xfb8] sm:$0xff]  ;;  %543 = vst [vmem:[%s5556_s8 + $0x558] sm:$0xff] %v542_v43  ;;  %v548_v46 = vld [vmem:[%s5551_s7 + $0xfc0] sm:$0xff] }
  0x6c   : > { %545 = vst [vmem:[%s5556_s8 + $0x560] sm:$0xff] %v544_v44  ;;  %547 = vst [vmem:[%s5556_s8 + $0x568] sm:$0xff] %v546_v45  ;;  %v550_v47 = vld [vmem:[%s5551_s7 + $0xfc8] sm:$0xff]  ;;  %v552_v48 = vld [vmem:[%s5551_s7 + $0xfd0] sm:$0xff] }
  0x6d   : > { %549 = vst [vmem:[%s5556_s8 + $0x570] sm:$0xff] %v548_v46  ;;  %551 = vst [vmem:[%s5556_s8 + $0x578] sm:$0xff] %v550_v47  ;;  %v554_v49 = vld [vmem:[%s5551_s7 + $0xfd8] sm:$0xff]  ;;  %v556_v50 = vld [vmem:[%s5551_s7 + $0xfe0] sm:$0xff] }
  0x6e   : > { %553 = vst [vmem:[%s5556_s8 + $0x580] sm:$0xff] %v552_v48  ;;  %v558_v51 = vld [vmem:[%s5551_s7 + $0xfe8] sm:$0xff]  ;;  %555 = vst [vmem:[%s5556_s8 + $0x588] sm:$0xff] %v554_v49  ;;  %v560_v52 = vld [vmem:[%s5551_s7 + $0x10e0] sm:$0xff] }
  0x6f   : > { %557 = vst [vmem:[%s5556_s8 + $0x590] sm:$0xff] %v556_v50  ;;  %559 = vst [vmem:[%s5556_s8 + $0x598] sm:$0xff] %v558_v51  ;;  %v562_v53 = vld [vmem:[%s5551_s7 + $0x10e8] sm:$0xff]  ;;  %v564_v54 = vld [vmem:[%s5551_s7 + $0x10f0] sm:$0xff] }
  0x70   : > { %561 = vst [vmem:[%s5556_s8 + $0x5a0] sm:$0xff] %v560_v52  ;;  %563 = vst [vmem:[%s5556_s8 + $0x5a8] sm:$0xff] %v562_v53  ;;  %v566_v55 = vld [vmem:[%s5551_s7 + $0x10f8] sm:$0xff]  ;;  %v568_v56 = vld [vmem:[%s5551_s7 + $0x1100] sm:$0xff] }
  0x71   : > { %565 = vst [vmem:[%s5556_s8 + $0x5b0] sm:$0xff] %v564_v54  ;;  %v570_v57 = vld [vmem:[%s5551_s7 + $0x1108] sm:$0xff]  ;;  %567 = vst [vmem:[%s5556_s8 + $0x5b8] sm:$0xff] %v566_v55  ;;  %v572_v58 = vld [vmem:[%s5551_s7 + $0x1110] sm:$0xff] }
  0x72   : > { %569 = vst [vmem:[%s5556_s8 + $0x5c0] sm:$0xff] %v568_v56  ;;  %571 = vst [vmem:[%s5556_s8 + $0x5c8] sm:$0xff] %v570_v57  ;;  %v574_v59 = vld [vmem:[%s5551_s7 + $0x1118] sm:$0xff]  ;;  %v576_v60 = vld [vmem:[%s5551_s7 + $0x1120] sm:$0xff] }
  0x73   : > { %573 = vst [vmem:[%s5556_s8 + $0x5d0] sm:$0xff] %v572_v58  ;;  %575 = vst [vmem:[%s5556_s8 + $0x5d8] sm:$0xff] %v574_v59  ;;  %v578_v61 = vld [vmem:[%s5551_s7 + $0x1128] sm:$0xff]  ;;  %v580_v62 = vld [vmem:[%s5551_s7 + $0x1130] sm:$0xff] }
  0x74   : > { %577 = vst [vmem:[%s5556_s8 + $0x5e0] sm:$0xff] %v576_v60  ;;  %v582_v63 = vld [vmem:[%s5551_s7 + $0x1138] sm:$0xff]  ;;  %579 = vst [vmem:[%s5556_s8 + $0x5e8] sm:$0xff] %v578_v61  ;;  %v584_v0 = vld [vmem:[%s5551_s7 + $0x1140] sm:$0xff] }
  0x75   : > { %581 = vst [vmem:[%s5556_s8 + $0x5f0] sm:$0xff] %v580_v62  ;;  %583 = vst [vmem:[%s5556_s8 + $0x5f8] sm:$0xff] %v582_v63  ;;  %v586_v1 = vld [vmem:[%s5551_s7 + $0x1148] sm:$0xff]  ;;  %v588_v2 = vld [vmem:[%s5551_s7 + $0x1150] sm:$0xff] }
  0x76   : > { %585 = vst [vmem:[%s5556_s8 + $0x600] sm:$0xff] %v584_v0  ;;  %587 = vst [vmem:[%s5556_s8 + $0x608] sm:$0xff] %v586_v1  ;;  %v590_v3 = vld [vmem:[%s5551_s7 + $0x1248] sm:$0xff]  ;;  %v592_v4 = vld [vmem:[%s5551_s7 + $0x1250] sm:$0xff] }
  0x77   : > { %589 = vst [vmem:[%s5556_s8 + $0x610] sm:$0xff] %v588_v2  ;;  %v594_v5 = vld [vmem:[%s5551_s7 + $0x1258] sm:$0xff]  ;;  %591 = vst [vmem:[%s5556_s8 + $0x618] sm:$0xff] %v590_v3  ;;  %v596_v6 = vld [vmem:[%s5551_s7 + $0x1260] sm:$0xff] }
  0x78   : > { %593 = vst [vmem:[%s5556_s8 + $0x620] sm:$0xff] %v592_v4  ;;  %595 = vst [vmem:[%s5556_s8 + $0x628] sm:$0xff] %v594_v5  ;;  %v598_v7 = vld [vmem:[%s5551_s7 + $0x1268] sm:$0xff]  ;;  %v600_v8 = vld [vmem:[%s5551_s7 + $0x1270] sm:$0xff] }
  0x79   : > { %597 = vst [vmem:[%s5556_s8 + $0x630] sm:$0xff] %v596_v6  ;;  %599 = vst [vmem:[%s5556_s8 + $0x638] sm:$0xff] %v598_v7  ;;  %v602_v9 = vld [vmem:[%s5551_s7 + $0x1278] sm:$0xff]  ;;  %v604_v10 = vld [vmem:[%s5551_s7 + $0x1280] sm:$0xff] }
  0x7a   : > { %601 = vst [vmem:[%s5556_s8 + $0x640] sm:$0xff] %v600_v8  ;;  %v606_v11 = vld [vmem:[%s5551_s7 + $0x1288] sm:$0xff]  ;;  %603 = vst [vmem:[%s5556_s8 + $0x648] sm:$0xff] %v602_v9  ;;  %v608_v12 = vld [vmem:[%s5551_s7 + $0x1290] sm:$0xff] }
  0x7b   : > { %605 = vst [vmem:[%s5556_s8 + $0x650] sm:$0xff] %v604_v10  ;;  %607 = vst [vmem:[%s5556_s8 + $0x658] sm:$0xff] %v606_v11  ;;  %v610_v13 = vld [vmem:[%s5551_s7 + $0x1298] sm:$0xff]  ;;  %v612_v14 = vld [vmem:[%s5551_s7 + $0x12a0] sm:$0xff] }
  0x7c   : > { %609 = vst [vmem:[%s5556_s8 + $0x660] sm:$0xff] %v608_v12  ;;  %611 = vst [vmem:[%s5556_s8 + $0x668] sm:$0xff] %v610_v13  ;;  %v614_v15 = vld [vmem:[%s5551_s7 + $0x12a8] sm:$0xff]  ;;  %v616_v16 = vld [vmem:[%s5551_s7 + $0x12b0] sm:$0xff] }
  0x7d   : > { %613 = vst [vmem:[%s5556_s8 + $0x670] sm:$0xff] %v612_v14  ;;  %v618_v17 = vld [vmem:[%s5551_s7 + $0x12b8] sm:$0xff]  ;;  %615 = vst [vmem:[%s5556_s8 + $0x678] sm:$0xff] %v614_v15  ;;  %v620_v18 = vld [vmem:[%s5551_s7 + $0x13b0] sm:$0xff] }
  0x7e   : > { %617 = vst [vmem:[%s5556_s8 + $0x680] sm:$0xff] %v616_v16  ;;  %619 = vst [vmem:[%s5556_s8 + $0x688] sm:$0xff] %v618_v17  ;;  %v622_v19 = vld [vmem:[%s5551_s7 + $0x13b8] sm:$0xff]  ;;  %v624_v20 = vld [vmem:[%s5551_s7 + $0x13c0] sm:$0xff] }
  0x7f   : > { %621 = vst [vmem:[%s5556_s8 + $0x690] sm:$0xff] %v620_v18  ;;  %623 = vst [vmem:[%s5556_s8 + $0x698] sm:$0xff] %v622_v19  ;;  %v626_v21 = vld [vmem:[%s5551_s7 + $0x13c8] sm:$0xff]  ;;  %v628_v22 = vld [vmem:[%s5551_s7 + $0x13d0] sm:$0xff] }
  0x80   : > { %625 = vst [vmem:[%s5556_s8 + $0x6a0] sm:$0xff] %v624_v20  ;;  %v630_v23 = vld [vmem:[%s5551_s7 + $0x13d8] sm:$0xff]  ;;  %627 = vst [vmem:[%s5556_s8 + $0x6a8] sm:$0xff] %v626_v21  ;;  %v632_v24 = vld [vmem:[%s5551_s7 + $0x13e0] sm:$0xff] }
  0x81   : > { %629 = vst [vmem:[%s5556_s8 + $0x6b0] sm:$0xff] %v628_v22  ;;  %631 = vst [vmem:[%s5556_s8 + $0x6b8] sm:$0xff] %v630_v23  ;;  %v634_v25 = vld [vmem:[%s5551_s7 + $0x13e8] sm:$0xff]  ;;  %v636_v26 = vld [vmem:[%s5551_s7 + $0x13f0] sm:$0xff] }
  0x82   : > { %633 = vst [vmem:[%s5556_s8 + $0x6c0] sm:$0xff] %v632_v24  ;;  %635 = vst [vmem:[%s5556_s8 + $0x6c8] sm:$0xff] %v634_v25  ;;  %v638_v27 = vld [vmem:[%s5551_s7 + $0x13f8] sm:$0xff]  ;;  %v640_v28 = vld [vmem:[%s5551_s7 + $0x1400] sm:$0xff] }
  0x83   : > { %637 = vst [vmem:[%s5556_s8 + $0x6d0] sm:$0xff] %v636_v26  ;;  %v642_v29 = vld [vmem:[%s5551_s7 + $0x1408] sm:$0xff]  ;;  %639 = vst [vmem:[%s5556_s8 + $0x6d8] sm:$0xff] %v638_v27  ;;  %v644_v30 = vld [vmem:[%s5551_s7 + $0x1410] sm:$0xff] }
  0x84   : > { %641 = vst [vmem:[%s5556_s8 + $0x6e0] sm:$0xff] %v640_v28  ;;  %643 = vst [vmem:[%s5556_s8 + $0x6e8] sm:$0xff] %v642_v29  ;;  %v646_v31 = vld [vmem:[%s5551_s7 + $0x1418] sm:$0xff]  ;;  %v648_v32 = vld [vmem:[%s5551_s7 + $0x1420] sm:$0xff] }
  0x85   : > { %645 = vst [vmem:[%s5556_s8 + $0x6f0] sm:$0xff] %v644_v30  ;;  %647 = vst [vmem:[%s5556_s8 + $0x6f8] sm:$0xff] %v646_v31  ;;  %v650_v33 = vld [vmem:[%s5551_s7 + $0x1518] sm:$0xff]  ;;  %v652_v34 = vld [vmem:[%s5551_s7 + $0x1520] sm:$0xff] }
  0x86   : > { %649 = vst [vmem:[%s5556_s8 + $0x700] sm:$0xff] %v648_v32  ;;  %v654_v35 = vld [vmem:[%s5551_s7 + $0x1528] sm:$0xff]  ;;  %651 = vst [vmem:[%s5556_s8 + $0x708] sm:$0xff] %v650_v33  ;;  %v656_v36 = vld [vmem:[%s5551_s7 + $0x1530] sm:$0xff] }
  0x87   : > { %653 = vst [vmem:[%s5556_s8 + $0x710] sm:$0xff] %v652_v34  ;;  %655 = vst [vmem:[%s5556_s8 + $0x718] sm:$0xff] %v654_v35  ;;  %v658_v37 = vld [vmem:[%s5551_s7 + $0x1538] sm:$0xff]  ;;  %v660_v38 = vld [vmem:[%s5551_s7 + $0x1540] sm:$0xff] }
  0x88   : > { %657 = vst [vmem:[%s5556_s8 + $0x720] sm:$0xff] %v656_v36  ;;  %659 = vst [vmem:[%s5556_s8 + $0x728] sm:$0xff] %v658_v37  ;;  %v662_v39 = vld [vmem:[%s5551_s7 + $0x1548] sm:$0xff]  ;;  %v664_v40 = vld [vmem:[%s5551_s7 + $0x1550] sm:$0xff] }
  0x89   : > { %661 = vst [vmem:[%s5556_s8 + $0x730] sm:$0xff] %v660_v38  ;;  %v666_v41 = vld [vmem:[%s5551_s7 + $0x1558] sm:$0xff]  ;;  %663 = vst [vmem:[%s5556_s8 + $0x738] sm:$0xff] %v662_v39  ;;  %v668_v42 = vld [vmem:[%s5551_s7 + $0x1560] sm:$0xff] }
  0x8a   : > { %665 = vst [vmem:[%s5556_s8 + $0x740] sm:$0xff] %v664_v40  ;;  %667 = vst [vmem:[%s5556_s8 + $0x748] sm:$0xff] %v666_v41  ;;  %v670_v43 = vld [vmem:[%s5551_s7 + $0x1568] sm:$0xff]  ;;  %v672_v44 = vld [vmem:[%s5551_s7 + $0x1570] sm:$0xff] }
  0x8b   : > { %669 = vst [vmem:[%s5556_s8 + $0x750] sm:$0xff] %v668_v42  ;;  %671 = vst [vmem:[%s5556_s8 + $0x758] sm:$0xff] %v670_v43  ;;  %v674_v45 = vld [vmem:[%s5551_s7 + $0x1578] sm:$0xff]  ;;  %v676_v46 = vld [vmem:[%s5551_s7 + $0x1580] sm:$0xff] }
  0x8c   : > { %673 = vst [vmem:[%s5556_s8 + $0x760] sm:$0xff] %v672_v44  ;;  %v678_v47 = vld [vmem:[%s5551_s7 + $0x1588] sm:$0xff]  ;;  %675 = vst [vmem:[%s5556_s8 + $0x768] sm:$0xff] %v674_v45  ;;  %v680_v48 = vld [vmem:[%s5551_s7 + $0x1680] sm:$0xff] }
  0x8d   : > { %677 = vst [vmem:[%s5556_s8 + $0x770] sm:$0xff] %v676_v46  ;;  %679 = vst [vmem:[%s5556_s8 + $0x778] sm:$0xff] %v678_v47  ;;  %v682_v49 = vld [vmem:[%s5551_s7 + $0x1688] sm:$0xff]  ;;  %v684_v50 = vld [vmem:[%s5551_s7 + $0x1690] sm:$0xff] }
  0x8e   : > { %681 = vst [vmem:[%s5556_s8 + $0x780] sm:$0xff] %v680_v48  ;;  %683 = vst [vmem:[%s5556_s8 + $0x788] sm:$0xff] %v682_v49  ;;  %v686_v51 = vld [vmem:[%s5551_s7 + $0x1698] sm:$0xff]  ;;  %v688_v52 = vld [vmem:[%s5551_s7 + $0x16a0] sm:$0xff] }
  0x8f   : > { %685 = vst [vmem:[%s5556_s8 + $0x790] sm:$0xff] %v684_v50  ;;  %v690_v53 = vld [vmem:[%s5551_s7 + $0x16a8] sm:$0xff]  ;;  %687 = vst [vmem:[%s5556_s8 + $0x798] sm:$0xff] %v686_v51  ;;  %v692_v54 = vld [vmem:[%s5551_s7 + $0x16b0] sm:$0xff] }
  0x90   : > { %689 = vst [vmem:[%s5556_s8 + $0x7a0] sm:$0xff] %v688_v52  ;;  %691 = vst [vmem:[%s5556_s8 + $0x7a8] sm:$0xff] %v690_v53  ;;  %v694_v55 = vld [vmem:[%s5551_s7 + $0x16b8] sm:$0xff]  ;;  %v696_v56 = vld [vmem:[%s5551_s7 + $0x16c0] sm:$0xff] }
  0x91   : > { %693 = vst [vmem:[%s5556_s8 + $0x7b0] sm:$0xff] %v692_v54  ;;  %695 = vst [vmem:[%s5556_s8 + $0x7b8] sm:$0xff] %v694_v55  ;;  %v698_v57 = vld [vmem:[%s5551_s7 + $0x16c8] sm:$0xff]  ;;  %v700_v58 = vld [vmem:[%s5551_s7 + $0x16d0] sm:$0xff] }
  0x92   : > { %697 = vst [vmem:[%s5556_s8 + $0x7c0] sm:$0xff] %v696_v56  ;;  %v702_v59 = vld [vmem:[%s5551_s7 + $0x16d8] sm:$0xff]  ;;  %699 = vst [vmem:[%s5556_s8 + $0x7c8] sm:$0xff] %v698_v57  ;;  %v704_v60 = vld [vmem:[%s5551_s7 + $0x16e0] sm:$0xff] }
  0x93   : > { %701 = vst [vmem:[%s5556_s8 + $0x7d0] sm:$0xff] %v700_v58  ;;  %703 = vst [vmem:[%s5556_s8 + $0x7d8] sm:$0xff] %v702_v59  ;;  %v706_v61 = vld [vmem:[%s5551_s7 + $0x16e8] sm:$0xff]  ;;  %v708_v62 = vld [vmem:[%s5551_s7 + $0x16f0] sm:$0xff] }
  0x94   : > { %705 = vst [vmem:[%s5556_s8 + $0x7e0] sm:$0xff] %v704_v60  ;;  %707 = vst [vmem:[%s5556_s8 + $0x7e8] sm:$0xff] %v706_v61  ;;  %v710_v63 = vld [vmem:[%s5551_s7 + $0x17e8] sm:$0xff]  ;;  %v712_v0 = vld [vmem:[%s5551_s7 + $0x17f0] sm:$0xff] }
  0x95   : > { %709 = vst [vmem:[%s5556_s8 + $0x7f0] sm:$0xff] %v708_v62  ;;  %v714_v1 = vld [vmem:[%s5551_s7 + $0x17f8] sm:$0xff]  ;;  %711 = vst [vmem:[%s5556_s8 + $0x7f8] sm:$0xff] %v710_v63  ;;  %v716_v2 = vld [vmem:[%s5551_s7 + $0x1800] sm:$0xff] }
  0x96   : > { %713 = vst [vmem:[%s5556_s8 + $0x800] sm:$0xff] %v712_v0  ;;  %715 = vst [vmem:[%s5556_s8 + $0x808] sm:$0xff] %v714_v1  ;;  %v718_v3 = vld [vmem:[%s5551_s7 + $0x1808] sm:$0xff]  ;;  %v720_v4 = vld [vmem:[%s5551_s7 + $0x1810] sm:$0xff] }
  0x97   : > { %717 = vst [vmem:[%s5556_s8 + $0x810] sm:$0xff] %v716_v2  ;;  %719 = vst [vmem:[%s5556_s8 + $0x818] sm:$0xff] %v718_v3  ;;  %v722_v5 = vld [vmem:[%s5551_s7 + $0x1818] sm:$0xff]  ;;  %v724_v6 = vld [vmem:[%s5551_s7 + $0x1820] sm:$0xff] }
  0x98   : > { %721 = vst [vmem:[%s5556_s8 + $0x820] sm:$0xff] %v720_v4  ;;  %v726_v7 = vld [vmem:[%s5551_s7 + $0x1828] sm:$0xff]  ;;  %723 = vst [vmem:[%s5556_s8 + $0x828] sm:$0xff] %v722_v5  ;;  %v728_v8 = vld [vmem:[%s5551_s7 + $0x1830] sm:$0xff] }
  0x99   : > { %725 = vst [vmem:[%s5556_s8 + $0x830] sm:$0xff] %v724_v6  ;;  %727 = vst [vmem:[%s5556_s8 + $0x838] sm:$0xff] %v726_v7  ;;  %v730_v9 = vld [vmem:[%s5551_s7 + $0x1838] sm:$0xff]  ;;  %v732_v10 = vld [vmem:[%s5551_s7 + $0x1840] sm:$0xff] }
  0x9a   : > { %729 = vst [vmem:[%s5556_s8 + $0x840] sm:$0xff] %v728_v8  ;;  %731 = vst [vmem:[%s5556_s8 + $0x848] sm:$0xff] %v730_v9  ;;  %v734_v11 = vld [vmem:[%s5551_s7 + $0x1848] sm:$0xff]  ;;  %v736_v12 = vld [vmem:[%s5551_s7 + $0x1850] sm:$0xff] }
  0x9b   : > { %733 = vst [vmem:[%s5556_s8 + $0x850] sm:$0xff] %v732_v10  ;;  %v738_v13 = vld [vmem:[%s5551_s7 + $0x1858] sm:$0xff]  ;;  %735 = vst [vmem:[%s5556_s8 + $0x858] sm:$0xff] %v734_v11 }
  0x9c   : > { %737 = vst [vmem:[%s5556_s8 + $0x860] sm:$0xff] %v736_v12  ;;  %739 = vst [vmem:[%s5556_s8 + $0x868] sm:$0xff] %v738_v13 }
  0x9d PF: > { %p4007_p7 = scmp.ge.s32.totalorder %s5478_s20, 1  ;;  %p744_p8 = scmp.lt.s32.totalorder %s5478_s20, 4 }
  0x9f   : > { %p745_p9 = pnand %p4007_p7, %p744_p8 }
  0xa0   : > { %s751_s9 = sand.u32 (!%p745_p9), 1, %s5470_s18   ;;  %v6101_v14 = vld [vmem:[%s7210_s0] sm:$0xff] (!%p745_p9)  ;;  %vm1625_vm0 = vcmask (!%p745_p9), 130048   ;;  %v5480_v16 = vmov (!%p745_p9), 0   ;;  %v1602_v18 = vld [vmem:[%s7212_s2 + $0x8] sm:$0xff] (!%p745_p9)  ;;  %v3095_v28 = vld [vmem:[%s7213_s3 + $0x10] sm:$0xff] (!%p745_p9) }
  0xa1   : > { %748 = sbr.rel (%p745_p9) target bundleno = 693 (0x2b5), region = 59  ;;  %v6106_v15 = vunpack.c.h.bf16 (!%p745_p9), %v6101_v14  ;;  %5049 = vset.pattern.permute.xlu0 (!%p745_p9), %v5480_v16  ;;  %v1601_v17 = vld [vmem:[%s7212_s2] sm:$0xff] (!%p745_p9)  ;;  %5050 = vset.pattern.permute.xlu1 (!%p745_p9), %v5480_v16  ;;  %v780_v59 = vld [vmem:[%s7210_s0 + $0x8] sm:$0xff] (!%p745_p9)  ;;  %v6168_v60 = vunpack.c.l.bf16 (!%p745_p9), %v6101_v14  ;;  %v781_v2 = vld [vmem:[%s7210_s0 + $0x10] sm:$0xff] (!%p745_p9) }
  0xa2   : > { %s5022_s12 = smul.u32 (!%p745_p9), 2160, %s751_s9  ;;  %1607 = vperm.xlu0 (!%p745_p9), %5049, %v1601_v17   ;;  %v3093_v21 = vld [vmem:[%s7213_s3] sm:$0xff] (!%p745_p9)  ;;  %v6174_v1 = vunpack.c.h.bf16 (!%p745_p9), %v780_v59  ;;  %v6183_v5 = vunpack.c.l.bf16 (!%p745_p9), %v780_v59  ;;  %v6191_v8 = vunpack.c.h.bf16 (!%p745_p9), %v781_v2  ;;  %v782_v9 = vld [vmem:[%s7210_s0 + $0x18] sm:$0xff] (!%p745_p9)  ;;  %v6200_v12 = vunpack.c.l.bf16 (!%p745_p9), %v781_v2 }
  0xa3   : > { %4008 = vmatprep.mubr.msk.f32.mxu0 (!%p745_p9), %vm1625_vm0, %v6106_v15  ;;  %4012 = vmatprep.mubr.msk.f32.mxu1 (!%p745_p9), %vm1625_vm0, %v6106_v15  ;;  %v6208_v16 = vunpack.c.h.bf16 (!%p745_p9), %v782_v9  ;;  %s6601_s11 = smul.u32 (!%p745_p9), 480, %s751_s9 }
  0xa4   : > { %s6118_s17 = scalar_lea.vmem (!%p745_p9), [#allocation2], %s5022_s12 }
  0xa5   : > { %v5051_v19 = vld [vmem:[%s6118_s17 + $0x4] ss:$120 sps:$4 sm:$0xff] (!%p745_p9)   ;;  %v5055_v22 = vld [vmem:[%s6118_s17] ss:$120 sps:$4 sm:$0xff] (!%p745_p9)   ;;  %v5057_v24 = vld [vmem:[%s6118_s17 + $0xf4] ss:$120 sps:$4 sm:$0xff] (!%p745_p9)  }
  0xa6   : > { %v5053_v20 = vld [vmem:[%s6118_s17 + $0xc] ss:$120 sps:$4 sm:$0xff] (!%p745_p9)   ;;  %4194 = vmatprep.subr.bf16.mxu0 (!%p745_p9), %v5051_v19  ;;  %v5056_v23 = vld [vmem:[%s6118_s17 + $0x8] ss:$120 sps:$4 sm:$0xff] (!%p745_p9)   ;;  %1612 = vperm.xlu0 (!%p745_p9), %5049, %v1602_v18   ;;  %v5059_v25 = vld [vmem:[%s6118_s17 + $0xfc] ss:$120 sps:$4 sm:$0xff] (!%p745_p9)   ;;  %v6214_v19 = vunpack.c.l.bf16 (!%p745_p9), %v782_v9 }
  0xa7   : > { %4230 = vmatprep.subr.bf16.mxu1 (!%p745_p9), %v5053_v20  ;;  %4196 = vmatpush1.bf16.msra.mxu0 (!%p745_p9), %v5055_v22  ;;  %v5061_v26 = vld [vmem:[%s6118_s17 + $0xf0] ss:$120 sps:$4 sm:$0xff] (!%p745_p9)   ;;  %v5063_v29 = vld [vmem:[%s6118_s17 + $0x1e4] ss:$120 sps:$4 sm:$0xff] (!%p745_p9)   ;;  %v5067_v31 = vld [vmem:[%s6118_s17 + $0x1e0] ss:$120 sps:$4 sm:$0xff] (!%p745_p9)  }
  0xa8   : > { %4232 = vmatpush1.bf16.msra.mxu1 %v5056_v23  ;;  %4198 = vmatprep.subr.bf16.mxu0 %v5057_v24  ;;  %v5062_v27 = vld [vmem:[%s6118_s17 + $0xf8] ss:$120 sps:$4 sm:$0xff]   ;;  %v5065_v30 = vld [vmem:[%s6118_s17 + $0x1ec] ss:$120 sps:$4 sm:$0xff]   ;;  %v5068_v32 = vld [vmem:[%s6118_s17 + $0x1e8] ss:$120 sps:$4 sm:$0xff]  }
  0xa9   : > { %4234 = vmatprep.subr.bf16.mxu1 %v5059_v25  ;;  %v5069_v33 = vld [vmem:[%s6118_s17 + $0x2d4] ss:$120 sps:$4 sm:$0xff]   ;;  %v5073_v35 = vld [vmem:[%s6118_s17 + $0x2d0] ss:$120 sps:$4 sm:$0xff]   ;;  %v5075_v37 = vld [vmem:[%s6118_s17 + $0x3c4] ss:$120 sps:$4 sm:$0xff]  }
  0xaa   : > { %3099 = vperm.xlu0 %5049, %v3093_v21   ;;  %v5071_v34 = vld [vmem:[%s6118_s17 + $0x2dc] ss:$120 sps:$4 sm:$0xff]   ;;  %v5074_v36 = vld [vmem:[%s6118_s17 + $0x2d8] ss:$120 sps:$4 sm:$0xff]   ;;  %v5077_v38 = vld [vmem:[%s6118_s17 + $0x3cc] ss:$120 sps:$4 sm:$0xff]  }
  0xab   : > { %4200 = vmatpush1.bf16.msra.mxu0 %v5061_v26  ;;  %v5079_v39 = vld [vmem:[%s6118_s17 + $0x3c0] ss:$120 sps:$4 sm:$0xff]   ;;  %v5081_v41 = vld [vmem:[%s6118_s17 + $0x4b4] ss:$120 sps:$4 sm:$0xff]   ;;  %v5085_v43 = vld [vmem:[%s6118_s17 + $0x4b0] ss:$120 sps:$4 sm:$0xff]  }
  0xac   : > { %4236 = vmatpush1.bf16.msra.mxu1 %v5062_v27  ;;  %4202 = vmatprep.subr.bf16.mxu0 %v5063_v29  ;;  %v5080_v40 = vld [vmem:[%s6118_s17 + $0x3c8] ss:$120 sps:$4 sm:$0xff]   ;;  %v5083_v42 = vld [vmem:[%s6118_s17 + $0x4bc] ss:$120 sps:$4 sm:$0xff]   ;;  %v5086_v44 = vld [vmem:[%s6118_s17 + $0x4b8] ss:$120 sps:$4 sm:$0xff]  }
  0xad   : > { %4238 = vmatprep.subr.bf16.mxu1 %v5065_v30  ;;  %v5087_v45 = vld [vmem:[%s6118_s17 + $0x5a4] ss:$120 sps:$4 sm:$0xff]   ;;  %v5091_v47 = vld [vmem:[%s6118_s17 + $0x5a0] ss:$120 sps:$4 sm:$0xff]   ;;  %v5093_v49 = vld [vmem:[%s6118_s17 + $0x694] ss:$120 sps:$4 sm:$0xff]  }
  0xae   : > { %3109 = vperm.xlu0 %5049, %v3095_v28   ;;  %v5089_v46 = vld [vmem:[%s6118_s17 + $0x5ac] ss:$120 sps:$4 sm:$0xff]   ;;  %v5092_v48 = vld [vmem:[%s6118_s17 + $0x5a8] ss:$120 sps:$4 sm:$0xff]   ;;  %v5095_v50 = vld [vmem:[%s6118_s17 + $0x69c] ss:$120 sps:$4 sm:$0xff]  }
  0xaf   : > { %4204 = vmatpush1.bf16.msra.mxu0 %v5067_v31  ;;  %v5097_v51 = vld [vmem:[%s6118_s17 + $0x690] ss:$120 sps:$4 sm:$0xff]   ;;  %v5099_v53 = vld [vmem:[%s6118_s17 + $0x784] ss:$120 sps:$4 sm:$0xff]   ;;  %v5103_v55 = vld [vmem:[%s6118_s17 + $0x780] ss:$120 sps:$4 sm:$0xff]  }
  0xb0   : > { %4240 = vmatpush1.bf16.msra.mxu1 %v5068_v32  ;;  %4206 = vmatprep.subr.bf16.mxu0 %v5069_v33  ;;  %v5098_v52 = vld [vmem:[%s6118_s17 + $0x698] ss:$120 sps:$4 sm:$0xff]   ;;  %v5101_v54 = vld [vmem:[%s6118_s17 + $0x78c] ss:$120 sps:$4 sm:$0xff]   ;;  %v5104_v56 = vld [vmem:[%s6118_s17 + $0x788] ss:$120 sps:$4 sm:$0xff]  }
  0xb1   : > { %4242 = vmatprep.subr.bf16.mxu1 %v5071_v34  ;;  %v5105_v57 = vld [vmem:[%s6118_s17 + $0x14] ss:$120 sps:$4 sm:$0xff]   ;;  %v5107_v61 = vld [vmem:[%s6118_s17 + $0x10] ss:$120 sps:$4 sm:$0xff]   ;;  %v5111_v63 = vld [vmem:[%s6118_s17 + $0x104] ss:$120 sps:$4 sm:$0xff]  }
  0xb2   : > { %v5108_v58 = vld [vmem:[%s6118_s17 + $0x1c] ss:$120 sps:$4 sm:$0xff]   ;;  %v5110_v62 = vld [vmem:[%s6118_s17 + $0x18] ss:$120 sps:$4 sm:$0xff]   ;;  %v5114_v0 = vld [vmem:[%s6118_s17 + $0x10c] ss:$120 sps:$4 sm:$0xff]  }
  0xb3   : > { %4208 = vmatpush1.bf16.msra.mxu0 %v5073_v35  ;;  %v5113_v3 = vld [vmem:[%s6118_s17 + $0x100] ss:$120 sps:$4 sm:$0xff]   ;;  %v5117_v6 = vld [vmem:[%s6118_s17 + $0x1f4] ss:$120 sps:$4 sm:$0xff]   ;;  %v5119_v10 = vld [vmem:[%s6118_s17 + $0x1f0] ss:$120 sps:$4 sm:$0xff]  }
  0xb4   : > { %4244 = vmatpush1.bf16.msra.mxu1 %v5074_v36  ;;  %4210 = vmatprep.subr.bf16.mxu0 %v5075_v37  ;;  %v5116_v4 = vld [vmem:[%s6118_s17 + $0x108] ss:$120 sps:$4 sm:$0xff]   ;;  %v5120_v7 = vld [vmem:[%s6118_s17 + $0x1fc] ss:$120 sps:$4 sm:$0xff]   ;;  %v5122_v11 = vld [vmem:[%s6118_s17 + $0x1f8] ss:$120 sps:$4 sm:$0xff]  }
  0xb5   : > { %4246 = vmatprep.subr.bf16.mxu1 %v5077_v38  ;;  %v5123_v13 = vld [vmem:[%s6118_s17 + $0x2e4] ss:$120 sps:$4 sm:$0xff]   ;;  %v5125_v17 = vld [vmem:[%s6118_s17 + $0x2e0] ss:$120 sps:$4 sm:$0xff]   ;;  %v5129_v20 = vld [vmem:[%s6118_s17 + $0x3d4] ss:$120 sps:$4 sm:$0xff]  }
  0xb6   : > { %v5126_v14 = vld [vmem:[%s6118_s17 + $0x2ec] ss:$120 sps:$4 sm:$0xff]   ;;  %v5128_v18 = vld [vmem:[%s6118_s17 + $0x2e8] ss:$120 sps:$4 sm:$0xff]   ;;  %v5132_v21 = vld [vmem:[%s6118_s17 + $0x3dc] ss:$120 sps:$4 sm:$0xff]  }
  0xb7   : > { %4212 = vmatpush1.bf16.msra.mxu0 %v5079_v39  ;;  %v5131_v22 = vld [vmem:[%s6118_s17 + $0x3d0] ss:$120 sps:$4 sm:$0xff]   ;;  %v5135_v24 = vld [vmem:[%s6118_s17 + $0x4c4] ss:$120 sps:$4 sm:$0xff]   ;;  %v5137_v26 = vld [vmem:[%s6118_s17 + $0x4c0] ss:$120 sps:$4 sm:$0xff]  }
  0xb8   : > { %4248 = vmatpush1.bf16.msra.mxu1 %v5080_v40  ;;  %4214 = vmatprep.subr.bf16.mxu0 %v5081_v41  ;;  %v5134_v23 = vld [vmem:[%s6118_s17 + $0x3d8] ss:$120 sps:$4 sm:$0xff]   ;;  %v5138_v25 = vld [vmem:[%s6118_s17 + $0x4cc] ss:$120 sps:$4 sm:$0xff]   ;;  %v5140_v27 = vld [vmem:[%s6118_s17 + $0x4c8] ss:$120 sps:$4 sm:$0xff]  }
  0xb9   : > { %4250 = vmatprep.subr.bf16.mxu1 %v5083_v42  ;;  %v5141_v28 = vld [vmem:[%s6118_s17 + $0x5b4] ss:$120 sps:$4 sm:$0xff]   ;;  %v5143_v30 = vld [vmem:[%s6118_s17 + $0x5b0] ss:$120 sps:$4 sm:$0xff]   ;;  %v5147_v32 = vld [vmem:[%s6118_s17 + $0x6a4] ss:$120 sps:$4 sm:$0xff]  }
  0xba   : > { %v5144_v29 = vld [vmem:[%s6118_s17 + $0x5bc] ss:$120 sps:$4 sm:$0xff]   ;;  %v5146_v31 = vld [vmem:[%s6118_s17 + $0x5b8] ss:$120 sps:$4 sm:$0xff]   ;;  %v5150_v33 = vld [vmem:[%s6118_s17 + $0x6ac] ss:$120 sps:$4 sm:$0xff]  }
  0xbb   : > { %4216 = vmatpush1.bf16.msra.mxu0 %v5085_v43  ;;  %v5149_v34 = vld [vmem:[%s6118_s17 + $0x6a0] ss:$120 sps:$4 sm:$0xff]   ;;  %v5153_v36 = vld [vmem:[%s6118_s17 + $0x794] ss:$120 sps:$4 sm:$0xff]   ;;  %v5155_v38 = vld [vmem:[%s6118_s17 + $0x790] ss:$120 sps:$4 sm:$0xff]  }
  0xbc   : > { %4252 = vmatpush1.bf16.msra.mxu1 %v5086_v44  ;;  %4218 = vmatprep.subr.bf16.mxu0 %v5087_v45  ;;  %v5152_v35 = vld [vmem:[%s6118_s17 + $0x6a8] ss:$120 sps:$4 sm:$0xff]   ;;  %v5156_v37 = vld [vmem:[%s6118_s17 + $0x79c] ss:$120 sps:$4 sm:$0xff]   ;;  %v5158_v39 = vld [vmem:[%s6118_s17 + $0x798] ss:$120 sps:$4 sm:$0xff]  }
  0xbd   : > { %4254 = vmatprep.subr.bf16.mxu1 %v5089_v46  ;;  %v5159_v40 = vld [vmem:[%s6118_s17 + $0x24] ss:$120 sps:$4 sm:$0xff]   ;;  %v5161_v42 = vld [vmem:[%s6118_s17 + $0x20] ss:$120 sps:$4 sm:$0xff]   ;;  %v5165_v44 = vld [vmem:[%s6118_s17 + $0x114] ss:$120 sps:$4 sm:$0xff]  }
  0xbe   : > { %v5162_v41 = vld [vmem:[%s6118_s17 + $0x2c] ss:$120 sps:$4 sm:$0xff]   ;;  %v5164_v43 = vld [vmem:[%s6118_s17 + $0x28] ss:$120 sps:$4 sm:$0xff]   ;;  %v5168_v45 = vld [vmem:[%s6118_s17 + $0x11c] ss:$120 sps:$4 sm:$0xff]  }
  0xbf   : > { %4220 = vmatpush1.bf16.msra.mxu0 %v5091_v47  ;;  %v5167_v46 = vld [vmem:[%s6118_s17 + $0x110] ss:$120 sps:$4 sm:$0xff]   ;;  %s6632_s18 = scalar_lea.vmem [#allocation3], %s6601_s11  ;;  %s4192_s9 = smul.u32 (%p5541_p5), 120, %s4002_s21 }
  0xc0   : > { %4256 = vmatpush1.bf16.msra.mxu1 %v5092_v48  ;;  %4222 = vmatprep.subr.bf16.mxu0 %v5093_v49  ;;  %v5170_v47 = vld [vmem:[%s6118_s17 + $0x118] ss:$120 sps:$4 sm:$0xff]   ;;  %v5171_v48 = vld [vmem:[%s6118_s17 + $0x204] ss:$120 sps:$4 sm:$0xff]   ;;  %v5188_v59 = vld [vmem:[%s6118_s17 + $0x3e8] ss:$120 sps:$4 sm:$0xff]  }
  0xc1   : > { %4258 = vmatprep.subr.bf16.mxu1 %v5095_v50  ;;  %v5174_v49 = vld [vmem:[%s6118_s17 + $0x20c] ss:$120 sps:$4 sm:$0xff]   ;;  %v5173_v50 = vld [vmem:[%s6118_s17 + $0x200] ss:$120 sps:$4 sm:$0xff]   ;;  %v5191_v2 = vld [vmem:[%s6118_s17 + $0x4d0] ss:$120 sps:$4 sm:$0xff]  }
  0xc2   : > { %v1604_v9 = vld [vmem:[%s7212_s2 + $0x18] sm:$0xff] }
  0xc3   : > { %4224 = vmatpush1.bf16.msra.mxu0 %v5097_v51  ;;  %v5176_v51 = vld [vmem:[%s6118_s17 + $0x208] ss:$120 sps:$4 sm:$0xff]  }
  0xc4   : > { %4260 = vmatpush1.bf16.msra.mxu1 %v5098_v52  ;;  %4226 = vmatprep.subr.bf16.mxu0 %v5099_v53  ;;  %v5177_v52 = vld [vmem:[%s6118_s17 + $0x2f4] ss:$120 sps:$4 sm:$0xff]  }
  0xc5   : > { %4262 = vmatprep.subr.bf16.mxu1 %v5101_v54  ;;  %v5180_v53 = vld [vmem:[%s6118_s17 + $0x2fc] ss:$120 sps:$4 sm:$0xff]   ;;  %v5179_v54 = vld [vmem:[%s6118_s17 + $0x2f0] ss:$120 sps:$4 sm:$0xff]  }
  0xc7   : > { %4228 = vmatpush1.bf16.msra.mxu0 %v5103_v55  ;;  %v5182_v55 = vld [vmem:[%s6118_s17 + $0x2f8] ss:$120 sps:$4 sm:$0xff]  }
  0xc8   : > { %4264 = vmatpush1.bf16.msra.mxu1 %v5104_v56  ;;  %4266 = vmatprep.subr.bf16.mxu0 %v5105_v57  ;;  %v5183_v56 = vld [vmem:[%s6118_s17 + $0x3e4] ss:$120 sps:$4 sm:$0xff]  }
  0xc9   : > { %4302 = vmatprep.subr.bf16.mxu1 %v5108_v58  ;;  %v5186_v57 = vld [vmem:[%s6118_s17 + $0x3ec] ss:$120 sps:$4 sm:$0xff]   ;;  %v5185_v58 = vld [vmem:[%s6118_s17 + $0x3e0] ss:$120 sps:$4 sm:$0xff]  }
  0xca   : > { %1703 = vmatmul.mubr.f32.vlgmr.msra.gmra.mrb[0].mxu0 %v6168_v60 }
  0xcb   : > { %1792 = vmatmul.mubr.f32.vlgmr.msra.gmra.mrb[0].mxu1 %v6168_v60  ;;  %4268 = vmatpush1.bf16.msra.mxu0 %v5107_v61  ;;  %v3237_v61 = vld [vmem:[%s7214_s4] sm:$0xff] }
  0xcc   : > { %4304 = vmatpush1.bf16.msra.mxu1 %v5110_v62  ;;  %4270 = vmatprep.subr.bf16.mxu0 %v5111_v63  ;;  %v5189_v62 = vld [vmem:[%s6118_s17 + $0x4d4] ss:$120 sps:$4 sm:$0xff]  }
  0xcd   : > { %4306 = vmatprep.subr.bf16.mxu1 %v5114_v0  ;;  %4009 = vmatprep.mubr.msk.f32.mxu0 %vm1625_vm0, %v6174_v1  ;;  %v5192_v63 = vld [vmem:[%s6118_s17 + $0x4dc] ss:$120 sps:$4 sm:$0xff]  }
  0xce   : > { %4013 = vmatprep.mubr.msk.f32.mxu1 %vm1625_vm0, %v6174_v1  ;;  %1709 = vmatmul.mubr.f32.gmra.mrb[2].mxu0 %v6183_v5  ;;  %v1603_v0 = vld [vmem:[%s7212_s2 + $0x10] sm:$0xff] }
  0xcf   : > { %1798 = vmatmul.mubr.f32.gmra.mrb[2].mxu1 %v6183_v5  ;;  %4272 = vmatpush1.bf16.msra.mxu0 %v5113_v3  ;;  %v5194_v3 = vld [vmem:[%s6118_s17 + $0x4d8] ss:$120 sps:$4 sm:$0xff]  }
  0xd0   : > { %4308 = vmatpush1.bf16.msra.mxu1 %v5116_v4  ;;  %4274 = vmatprep.subr.bf16.mxu0 %v5117_v6  ;;  %v5195_v4 = vld [vmem:[%s6118_s17 + $0x5c4] ss:$120 sps:$4 sm:$0xff]  }
  0xd1   : > { %4310 = vmatprep.subr.bf16.mxu1 %v5120_v7  ;;  %4010 = vmatprep.mubr.msk.f32.mxu0 %vm1625_vm0, %v6191_v8  ;;  %v5198_v6 = vld [vmem:[%s6118_s17 + $0x5cc] ss:$120 sps:$4 sm:$0xff]   ;;  %v5197_v7 = vld [vmem:[%s6118_s17 + $0x5c0] ss:$120 sps:$4 sm:$0xff]  }
  0xd2   : > { %4014 = vmatprep.mubr.msk.f32.mxu1 %vm1625_vm0, %v6191_v8  ;;  %1715 = vmatmul.mubr.f32.gmra.mrb[4].mxu0 %v6200_v12 }
  0xd3   : > { %1804 = vmatmul.mubr.f32.gmra.mrb[4].mxu1 %v6200_v12  ;;  %4276 = vmatpush1.bf16.msra.mxu0 %v5119_v10  ;;  %v5200_v10 = vld [vmem:[%s6118_s17 + $0x5c8] ss:$120 sps:$4 sm:$0xff]  }
  0xd4   : > { %4312 = vmatpush1.bf16.msra.mxu1 %v5122_v11  ;;  %4278 = vmatprep.subr.bf16.mxu0 %v5123_v13  ;;  %v5201_v11 = vld [vmem:[%s6118_s17 + $0x6b4] ss:$120 sps:$4 sm:$0xff]  }
  0xd5   : > { %4314 = vmatprep.subr.bf16.mxu1 %v5126_v14  ;;  %4011 = vmatprep.mubr.msk.f32.mxu0 %vm1625_vm0, %v6208_v16  ;;  %v5204_v13 = vld [vmem:[%s6118_s17 + $0x6bc] ss:$120 sps:$4 sm:$0xff]   ;;  %v5203_v14 = vld [vmem:[%s6118_s17 + $0x6b0] ss:$120 sps:$4 sm:$0xff]  }
  0xd6   : > { %4015 = vmatprep.mubr.msk.f32.mxu1 %vm1625_vm0, %v6208_v16  ;;  %1721 = vmatmul.mubr.f32.gmra.mrb[6].mxu0 %v6214_v19 }
  0xd7   : > { %1810 = vmatmul.mubr.f32.gmra.mrb[6].mxu1 %v6214_v19  ;;  %4280 = vmatpush1.bf16.msra.mxu0 %v5125_v17  ;;  %v3094_v17 = vld [vmem:[%s7213_s3 + $0x8] sm:$0xff] }
  0xd8   : > { %4316 = vmatpush1.bf16.msra.mxu1 %v5128_v18  ;;  %4282 = vmatprep.subr.bf16.mxu0 %v5129_v20  ;;  %v5206_v18 = vld [vmem:[%s6118_s17 + $0x6b8] ss:$120 sps:$4 sm:$0xff]   ;;  %v5207_v20 = vld [vmem:[%s6118_s17 + $0x7a4] ss:$120 sps:$4 sm:$0xff]  }
  0xd9   : > { %4318 = vmatprep.subr.bf16.mxu1 %v5132_v21  ;;  %4016 = vmatprep.mubr.msk.f32.mxu0 %vm1625_vm0, %v6106_v15  ;;  %v5210_v21 = vld [vmem:[%s6118_s17 + $0x7ac] ss:$120 sps:$4 sm:$0xff]  }
  0xda   : > { %4020 = vmatprep.mubr.msk.f32.mxu1 %vm1625_vm0, %v6106_v15  ;;  %3243 = vperm.xlu0 %5049, %v3237_v61   ;;  %v5261_v61 = vld [vmem:[%s6118_s17 + $0x7b4] ss:$120 sps:$4 sm:$0xff]  }
  0xdb   : > { %4284 = vmatpush1.bf16.msra.mxu0 %v5131_v22  ;;  %1617 = vperm.xlu1 %5050, %v1603_v0   ;;  %v3096_v22 = vld [vmem:[%s7213_s3 + $0x18] sm:$0xff] }
  0xdc   : > { %4320 = vmatpush1.bf16.msra.mxu1 %v5134_v23  ;;  %4286 = vmatprep.subr.bf16.mxu0 %v5135_v24  ;;  %v5209_v23 = vld [vmem:[%s6118_s17 + $0x7a0] ss:$120 sps:$4 sm:$0xff]  }
  0xdd   : > { %4322 = vmatprep.subr.bf16.mxu1 %v5138_v25  ;;  %v5212_v24 = vld [vmem:[%s6118_s17 + $0x7a8] ss:$120 sps:$4 sm:$0xff]   ;;  %v5213_v25 = vld [vmem:[%s6118_s17 + $0x34] ss:$120 sps:$4 sm:$0xff]   ;;  %v5266_v0 = vld [vmem:[%s6118_s17 + $0x7b8] ss:$120 sps:$4 sm:$0xff]  }
  0xdf   : > { %4288 = vmatpush1.bf16.msra.mxu0 %v5137_v26  ;;  %1622 = vperm.xlu1 %5050, %v1604_v9   ;;  %v5216_v26 = vld [vmem:[%s6118_s17 + $0x3c] ss:$120 sps:$4 sm:$0xff]  }
  0xe0   : > { %4324 = vmatpush1.bf16.msra.mxu1 %v5140_v27  ;;  %4290 = vmatprep.subr.bf16.mxu0 %v5141_v28  ;;  %v3239_v27 = vld [vmem:[%s7214_s4 + $0x10] sm:$0xff] }
  0xe1   : > { %4326 = vmatprep.subr.bf16.mxu1 %v5144_v29  ;;  %v5215_v28 = vld [vmem:[%s6118_s17 + $0x30] ss:$120 sps:$4 sm:$0xff]   ;;  %3253 = vperm.xlu0 %5049, %v3239_v27   ;;  %v5276_v9 = vld [vmem:[%s6118_s17 + $0x13c] ss:$120 sps:$4 sm:$0xff]  }
  0xe2   : > { %v3238_v29 = vld [vmem:[%s7214_s4 + $0x8] sm:$0xff] }
  0xe3   : > { %4292 = vmatpush1.bf16.msra.mxu0 %v5143_v30  ;;  %3104 = vperm.xlu1 %5050, %v3094_v17   ;;  %v5218_v30 = vld [vmem:[%s6118_s17 + $0x38] ss:$120 sps:$4 sm:$0xff]   ;;  %v5296_v27 = vld [vmem:[%s6118_s17 + $0x408] ss:$120 sps:$4 sm:$0xff]  }
  0xe4   : > { %4328 = vmatpush1.bf16.msra.mxu1 %v5146_v31  ;;  %4294 = vmatprep.subr.bf16.mxu0 %v5147_v32  ;;  %v5219_v31 = vld [vmem:[%s6118_s17 + $0x124] ss:$120 sps:$4 sm:$0xff]   ;;  %v5281_v17 = vld [vmem:[%s6118_s17 + $0x220] ss:$120 sps:$4 sm:$0xff]  }
  0xe5   : > { %4330 = vmatprep.subr.bf16.mxu1 %v5150_v33  ;;  %v5222_v32 = vld [vmem:[%s6118_s17 + $0x12c] ss:$120 sps:$4 sm:$0xff]   ;;  %v5221_v33 = vld [vmem:[%s6118_s17 + $0x120] ss:$120 sps:$4 sm:$0xff]  }
  0xe7   : > { %4296 = vmatpush1.bf16.msra.mxu0 %v5149_v34  ;;  %3114 = vperm.xlu1 %5050, %v3096_v22   ;;  %v5224_v34 = vld [vmem:[%s6118_s17 + $0x128] ss:$120 sps:$4 sm:$0xff]  }
  0xe8   : > { %4332 = vmatpush1.bf16.msra.mxu1 %v5152_v35  ;;  %4298 = vmatprep.subr.bf16.mxu0 %v5153_v36  ;;  %v5225_v35 = vld [vmem:[%s6118_s17 + $0x214] ss:$120 sps:$4 sm:$0xff]   ;;  %v5287_v22 = vld [vmem:[%s6118_s17 + $0x310] ss:$120 sps:$4 sm:$0xff]  }
  0xe9   : > { %4334 = vmatprep.subr.bf16.mxu1 %v5156_v37  ;;  %v5228_v36 = vld [vmem:[%s6118_s17 + $0x21c] ss:$120 sps:$4 sm:$0xff]   ;;  %v5227_v37 = vld [vmem:[%s6118_s17 + $0x210] ss:$120 sps:$4 sm:$0xff]  }
  0xeb   : > { %4300 = vmatpush1.bf16.msra.mxu0 %v5155_v38  ;;  %3248 = vperm.xlu1 %5050, %v3238_v29   ;;  %v5230_v38 = vld [vmem:[%s6118_s17 + $0x218] ss:$120 sps:$4 sm:$0xff]   ;;  %v5300_v29 = vld [vmem:[%s6118_s17 + $0x4fc] ss:$120 sps:$4 sm:$0xff]  }
  0xec   : > { %4336 = vmatpush1.bf16.msra.mxu1 %v5158_v39  ;;  %4338 = vmatprep.subr.bf16.mxu0 %v5159_v40  ;;  %v5231_v39 = vld [vmem:[%s6118_s17 + $0x304] ss:$120 sps:$4 sm:$0xff]  }
  0xed   : > { %4374 = vmatprep.subr.bf16.mxu1 %v5162_v41  ;;  %v5234_v40 = vld [vmem:[%s6118_s17 + $0x30c] ss:$120 sps:$4 sm:$0xff]   ;;  %v5233_v41 = vld [vmem:[%s6118_s17 + $0x300] ss:$120 sps:$4 sm:$0xff]  }
  0xee   : > { %1881 = vmatmul.mubr.f32.vlgmr.msra.gmra.mrb[8].mxu0 %v6168_v60 }
  0xef   : > { %1970 = vmatmul.mubr.f32.vlgmr.msra.gmra.mrb[8].mxu1 %v6168_v60  ;;  %4340 = vmatpush1.bf16.msra.mxu0 %v5161_v42  ;;  %v5236_v42 = vld [vmem:[%s6118_s17 + $0x308] ss:$120 sps:$4 sm:$0xff]  }
  0xf0   : > { %4376 = vmatpush1.bf16.msra.mxu1 %v5164_v43  ;;  %4342 = vmatprep.subr.bf16.mxu0 %v5165_v44  ;;  %v5237_v43 = vld [vmem:[%s6118_s17 + $0x3f4] ss:$120 sps:$4 sm:$0xff]  }
  0xf1   : > { %4378 = vmatprep.subr.bf16.mxu1 %v5168_v45  ;;  %4017 = vmatprep.mubr.msk.f32.mxu0 %vm1625_vm0, %v6174_v1  ;;  %v5240_v44 = vld [vmem:[%s6118_s17 + $0x3fc] ss:$120 sps:$4 sm:$0xff]   ;;  %v5239_v45 = vld [vmem:[%s6118_s17 + $0x3f0] ss:$120 sps:$4 sm:$0xff]  }
  0xf2   : > { %4021 = vmatprep.mubr.msk.f32.mxu1 %vm1625_vm0, %v6174_v1  ;;  %1887 = vmatmul.mubr.f32.gmra.mrb[10].mxu0 %v6183_v5 }
  0xf3   : > { %1976 = vmatmul.mubr.f32.gmra.mrb[10].mxu1 %v6183_v5  ;;  %4344 = vmatpush1.bf16.msra.mxu0 %v5167_v46  ;;  %v5242_v46 = vld [vmem:[%s6118_s17 + $0x3f8] ss:$120 sps:$4 sm:$0xff]  }
  0xf4   : > { %4380 = vmatpush1.bf16.msra.mxu1 %v5170_v47  ;;  %4346 = vmatprep.subr.bf16.mxu0 %v5171_v48  ;;  %v5243_v47 = vld [vmem:[%s6118_s17 + $0x4e4] ss:$120 sps:$4 sm:$0xff]  }
  0xf5   : > { %4382 = vmatprep.subr.bf16.mxu1 %v5174_v49  ;;  %4018 = vmatprep.mubr.msk.f32.mxu0 %vm1625_vm0, %v6191_v8  ;;  %v3240_v48 = vld [vmem:[%s7214_s4 + $0x18] sm:$0xff] }
  0xf6   : > { %4022 = vmatprep.mubr.msk.f32.mxu1 %vm1625_vm0, %v6191_v8  ;;  %1893 = vmatmul.mubr.f32.gmra.mrb[12].mxu0 %v6200_v12  ;;  %v5246_v49 = vld [vmem:[%s6118_s17 + $0x4ec] ss:$120 sps:$4 sm:$0xff]  }
  0xf7   : > { %1982 = vmatmul.mubr.f32.gmra.mrb[12].mxu1 %v6200_v12  ;;  %4348 = vmatpush1.bf16.msra.mxu0 %v5173_v50  ;;  %v5245_v50 = vld [vmem:[%s6118_s17 + $0x4e0] ss:$120 sps:$4 sm:$0xff]  }
  0xf8   : > { %4384 = vmatpush1.bf16.msra.mxu1 %v5176_v51  ;;  %4350 = vmatprep.subr.bf16.mxu0 %v5177_v52  ;;  %v5248_v51 = vld [vmem:[%s6118_s17 + $0x4e8] ss:$120 sps:$4 sm:$0xff]   ;;  %v5249_v52 = vld [vmem:[%s6118_s17 + $0x5d4] ss:$120 sps:$4 sm:$0xff]  }
  0xf9   : > { %4386 = vmatprep.subr.bf16.mxu1 %v5180_v53  ;;  %4019 = vmatprep.mubr.msk.f32.mxu0 %vm1625_vm0, %v6208_v16  ;;  %v5252_v53 = vld [vmem:[%s6118_s17 + $0x5dc] ss:$120 sps:$4 sm:$0xff]  }
  0xfa   : > { %4023 = vmatprep.mubr.msk.f32.mxu1 %vm1625_vm0, %v6208_v16  ;;  %1899 = vmatmul.mubr.f32.gmra.mrb[14].mxu0 %v6214_v19 }
  0xfb   : > { %1988 = vmatmul.mubr.f32.gmra.mrb[14].mxu1 %v6214_v19  ;;  %4352 = vmatpush1.bf16.msra.mxu0 %v5179_v54  ;;  %v5251_v54 = vld [vmem:[%s6118_s17 + $0x5d0] ss:$120 sps:$4 sm:$0xff]  }
  0xfc   : > { %4388 = vmatpush1.bf16.msra.mxu1 %v5182_v55  ;;  %4354 = vmatprep.subr.bf16.mxu0 %v5183_v56  ;;  %v5254_v55 = vld [vmem:[%s6118_s17 + $0x5d8] ss:$120 sps:$4 sm:$0xff]   ;;  %v5255_v56 = vld [vmem:[%s6118_s17 + $0x6c4] ss:$120 sps:$4 sm:$0xff]  }
  0xfd   : > { %4390 = vmatprep.subr.bf16.mxu1 %v5186_v57  ;;  %4024 = vmatprep.mubr.msk.f32.mxu0 %vm1625_vm0, %v6106_v15  ;;  %v5258_v57 = vld [vmem:[%s6118_s17 + $0x6cc] ss:$120 sps:$4 sm:$0xff]  }
  0xfe   : > { %4028 = vmatprep.mubr.msk.f32.mxu1 %vm1625_vm0, %v6106_v15  ;;  %3258 = vperm.xlu1 %5050, %v3240_v48   ;;  %v5327_v48 = vld [vmem:[%s6118_s17 + $0x144] ss:$120 sps:$4 sm:$0xff]  }
  0xff   : > { %4356 = vmatpush1.bf16.msra.mxu0 %v5185_v58  ;;  %v5257_v58 = vld [vmem:[%s6118_s17 + $0x6c0] ss:$120 sps:$4 sm:$0xff]  }
 0x100   : > { %4392 = vmatpush1.bf16.msra.mxu1 %v5188_v59  ;;  %4358 = vmatprep.subr.bf16.mxu0 %v5189_v62  ;;  %v5260_v59 = vld [vmem:[%s6118_s17 + $0x6c8] ss:$120 sps:$4 sm:$0xff]   ;;  %v5264_v62 = vld [vmem:[%s6118_s17 + $0x7bc] ss:$120 sps:$4 sm:$0xff]  }
 0x101   : > { %4394 = vmatprep.subr.bf16.mxu1 %v5192_v63  ;;  %v5263_v63 = vld [vmem:[%s6118_s17 + $0x7b0] ss:$120 sps:$4 sm:$0xff]  }
 0x103   : > { %4360 = vmatpush1.bf16.msra.mxu0 %v5191_v2  ;;  %v5267_v2 = vld [vmem:[%s6118_s17 + $0x44] ss:$120 sps:$4 sm:$0xff]  }
 0x104   : > { %4396 = vmatpush1.bf16.msra.mxu1 %v5194_v3  ;;  %4362 = vmatprep.subr.bf16.mxu0 %v5195_v4  ;;  %v5270_v3 = vld [vmem:[%s6118_s17 + $0x4c] ss:$120 sps:$4 sm:$0xff]   ;;  %v5269_v4 = vld [vmem:[%s6118_s17 + $0x40] ss:$120 sps:$4 sm:$0xff]  }
 0x105   : > { %4398 = vmatprep.subr.bf16.mxu1 %v5198_v6  ;;  %v5272_v6 = vld [vmem:[%s6118_s17 + $0x48] ss:$120 sps:$4 sm:$0xff]  }
 0x107   : > { %4364 = vmatpush1.bf16.msra.mxu0 %v5197_v7  ;;  %v5273_v7 = vld [vmem:[%s6118_s17 + $0x134] ss:$120 sps:$4 sm:$0xff]  }
 0x108   : > { %4400 = vmatpush1.bf16.msra.mxu1 %v5200_v10  ;;  %4366 = vmatprep.subr.bf16.mxu0 %v5201_v11  ;;  %v5275_v10 = vld [vmem:[%s6118_s17 + $0x130] ss:$120 sps:$4 sm:$0xff]  }
 0x109   : > { %4402 = vmatprep.subr.bf16.mxu1 %v5204_v13  ;;  %v5278_v11 = vld [vmem:[%s6118_s17 + $0x138] ss:$120 sps:$4 sm:$0xff]   ;;  %v5279_v13 = vld [vmem:[%s6118_s17 + $0x224] ss:$120 sps:$4 sm:$0xff]  }
 0x10b   : > { %4368 = vmatpush1.bf16.msra.mxu0 %v5203_v14  ;;  %v5282_v14 = vld [vmem:[%s6118_s17 + $0x22c] ss:$120 sps:$4 sm:$0xff]  }
 0x10c   : > { %4404 = vmatpush1.bf16.msra.mxu1 %v5206_v18  ;;  %4370 = vmatprep.subr.bf16.mxu0 %v5207_v20  ;;  %v5284_v18 = vld [vmem:[%s6118_s17 + $0x228] ss:$120 sps:$4 sm:$0xff]   ;;  %v5285_v20 = vld [vmem:[%s6118_s17 + $0x314] ss:$120 sps:$4 sm:$0xff]  }
 0x10d   : > { %4406 = vmatprep.subr.bf16.mxu1 %v5210_v21  ;;  %v5288_v21 = vld [vmem:[%s6118_s17 + $0x31c] ss:$120 sps:$4 sm:$0xff]  }
 0x10f   : > { %4372 = vmatpush1.bf16.msra.mxu0 %v5209_v23  ;;  %v5290_v23 = vld [vmem:[%s6118_s17 + $0x318] ss:$120 sps:$4 sm:$0xff]  }
 0x110   : > { %4408 = vmatpush1.bf16.msra.mxu1 %v5212_v24  ;;  %4410 = vmatprep.subr.bf16.mxu0 %v5213_v25  ;;  %v5291_v24 = vld [vmem:[%s6118_s17 + $0x404] ss:$120 sps:$4 sm:$0xff]  }
 0x111   : > { %4446 = vmatprep.subr.bf16.mxu1 %v5216_v26  ;;  %v5294_v25 = vld [vmem:[%s6118_s17 + $0x40c] ss:$120 sps:$4 sm:$0xff]   ;;  %v5293_v26 = vld [vmem:[%s6118_s17 + $0x400] ss:$120 sps:$4 sm:$0xff]  }
 0x112   : > { %2059 = vmatmul.mubr.f32.vlgmr.msra.gmra.mrb[16].mxu0 %v6168_v60 }
 0x113   : > { %2148 = vmatmul.mubr.f32.vlgmr.msra.gmra.mrb[16].mxu1 %v6168_v60  ;;  %4412 = vmatpush1.bf16.msra.mxu0 %v5215_v28  ;;  %v5297_v28 = vld [vmem:[%s6118_s17 + $0x4f4] ss:$120 sps:$4 sm:$0xff]  }
 0x114   : > { %4448 = vmatpush1.bf16.msra.mxu1 %v5218_v30  ;;  %4414 = vmatprep.subr.bf16.mxu0 %v5219_v31  ;;  %v5299_v30 = vld [vmem:[%s6118_s17 + $0x4f0] ss:$120 sps:$4 sm:$0xff]  }
 0x115   : > { %4450 = vmatprep.subr.bf16.mxu1 %v5222_v32  ;;  %4025 = vmatprep.mubr.msk.f32.mxu0 %vm1625_vm0, %v6174_v1  ;;  %v5302_v31 = vld [vmem:[%s6118_s17 + $0x4f8] ss:$120 sps:$4 sm:$0xff]   ;;  %v5303_v32 = vld [vmem:[%s6118_s17 + $0x5e4] ss:$120 sps:$4 sm:$0xff]  }
 0x116   : > { %4029 = vmatprep.mubr.msk.f32.mxu1 %vm1625_vm0, %v6174_v1  ;;  %2065 = vmatmul.mubr.f32.gmra.mrb[18].mxu0 %v6183_v5 }
 0x117   : > { %2154 = vmatmul.mubr.f32.gmra.mrb[18].mxu1 %v6183_v5  ;;  %4416 = vmatpush1.bf16.msra.mxu0 %v5221_v33  ;;  %v5306_v33 = vld [vmem:[%s6118_s17 + $0x5ec] ss:$120 sps:$4 sm:$0xff]  }
 0x118   : > { %4452 = vmatpush1.bf16.msra.mxu1 %v5224_v34  ;;  %4418 = vmatprep.subr.bf16.mxu0 %v5225_v35  ;;  %v5305_v34 = vld [vmem:[%s6118_s17 + $0x5e0] ss:$120 sps:$4 sm:$0xff]  }
 0x119   : > { %4454 = vmatprep.subr.bf16.mxu1 %v5228_v36  ;;  %4026 = vmatprep.mubr.msk.f32.mxu0 %vm1625_vm0, %v6191_v8  ;;  %v5308_v35 = vld [vmem:[%s6118_s17 + $0x5e8] ss:$120 sps:$4 sm:$0xff]   ;;  %v5309_v36 = vld [vmem:[%s6118_s17 + $0x6d4] ss:$120 sps:$4 sm:$0xff]  }
 0x11a   : > { %4030 = vmatprep.mubr.msk.f32.mxu1 %vm1625_vm0, %v6191_v8  ;;  %2071 = vmatmul.mubr.f32.gmra.mrb[20].mxu0 %v6200_v12 }
 0x11b   : > { %2160 = vmatmul.mubr.f32.gmra.mrb[20].mxu1 %v6200_v12  ;;  %4420 = vmatpush1.bf16.msra.mxu0 %v5227_v37  ;;  %v5312_v37 = vld [vmem:[%s6118_s17 + $0x6dc] ss:$120 sps:$4 sm:$0xff]  }
 0x11c   : > { %4456 = vmatpush1.bf16.msra.mxu1 %v5230_v38  ;;  %4422 = vmatprep.subr.bf16.mxu0 %v5231_v39  ;;  %v5311_v38 = vld [vmem:[%s6118_s17 + $0x6d0] ss:$120 sps:$4 sm:$0xff]  }
 0x11d   : > { %4458 = vmatprep.subr.bf16.mxu1 %v5234_v40  ;;  %4027 = vmatprep.mubr.msk.f32.mxu0 %vm1625_vm0, %v6208_v16  ;;  %v5314_v39 = vld [vmem:[%s6118_s17 + $0x6d8] ss:$120 sps:$4 sm:$0xff]   ;;  %v5315_v40 = vld [vmem:[%s6118_s17 + $0x7c4] ss:$120 sps:$4 sm:$0xff]  }
 0x11e   : > { %4031 = vmatprep.mubr.msk.f32.mxu1 %vm1625_vm0, %v6208_v16  ;;  %2077 = vmatmul.mubr.f32.gmra.mrb[22].mxu0 %v6214_v19 }
 0x11f   : > { %2166 = vmatmul.mubr.f32.gmra.mrb[22].mxu1 %v6214_v19  ;;  %4424 = vmatpush1.bf16.msra.mxu0 %v5233_v41  ;;  %v5318_v41 = vld [vmem:[%s6118_s17 + $0x7cc] ss:$120 sps:$4 sm:$0xff]  }
 0x120   : > { %4460 = vmatpush1.bf16.msra.mxu1 %v5236_v42  ;;  %4426 = vmatprep.subr.bf16.mxu0 %v5237_v43  ;;  %v5317_v42 = vld [vmem:[%s6118_s17 + $0x7c0] ss:$120 sps:$4 sm:$0xff]  }
 0x121   : > { %4462 = vmatprep.subr.bf16.mxu1 %v5240_v44  ;;  %4032 = vmatprep.mubr.msk.f32.mxu0 %vm1625_vm0, %v6106_v15  ;;  %v5320_v43 = vld [vmem:[%s6118_s17 + $0x7c8] ss:$120 sps:$4 sm:$0xff]   ;;  %v5321_v44 = vld [vmem:[%s6118_s17 + $0x54] ss:$120 sps:$4 sm:$0xff]  }
 0x122   : > { %4036 = vmatprep.mubr.msk.f32.mxu1 %vm1625_vm0, %v6106_v15 }
 0x123   : > { %4428 = vmatpush1.bf16.msra.mxu0 %v5239_v45  ;;  %v5324_v45 = vld [vmem:[%s6118_s17 + $0x5c] ss:$120 sps:$4 sm:$0xff]  }
 0x124   : > { %4464 = vmatpush1.bf16.msra.mxu1 %v5242_v46  ;;  %4430 = vmatprep.subr.bf16.mxu0 %v5243_v47  ;;  %v5323_v46 = vld [vmem:[%s6118_s17 + $0x50] ss:$120 sps:$4 sm:$0xff]  }
 0x125   : > { %4466 = vmatprep.subr.bf16.mxu1 %v5246_v49  ;;  %v5326_v47 = vld [vmem:[%s6118_s17 + $0x58] ss:$120 sps:$4 sm:$0xff]   ;;  %v5330_v49 = vld [vmem:[%s6118_s17 + $0x14c] ss:$120 sps:$4 sm:$0xff]  }
 0x127   : > { %4432 = vmatpush1.bf16.msra.mxu0 %v5245_v50  ;;  %v5329_v50 = vld [vmem:[%s6118_s17 + $0x140] ss:$120 sps:$4 sm:$0xff]  }
 0x128   : > { %4468 = vmatpush1.bf16.msra.mxu1 %v5248_v51  ;;  %4434 = vmatprep.subr.bf16.mxu0 %v5249_v52  ;;  %v5332_v51 = vld [vmem:[%s6118_s17 + $0x148] ss:$120 sps:$4 sm:$0xff]   ;;  %v5333_v52 = vld [vmem:[%s6118_s17 + $0x234] ss:$120 sps:$4 sm:$0xff]  }
 0x129   : > { %4470 = vmatprep.subr.bf16.mxu1 %v5252_v53  ;;  %v5336_v53 = vld [vmem:[%s6118_s17 + $0x23c] ss:$120 sps:$4 sm:$0xff]  }
 0x12b   : > { %4436 = vmatpush1.bf16.msra.mxu0 %v5251_v54  ;;  %v5335_v54 = vld [vmem:[%s6118_s17 + $0x230] ss:$120 sps:$4 sm:$0xff]  }
 0x12c   : > { %4472 = vmatpush1.bf16.msra.mxu1 %v5254_v55  ;;  %4438 = vmatprep.subr.bf16.mxu0 %v5255_v56  ;;  %v5338_v55 = vld [vmem:[%s6118_s17 + $0x238] ss:$120 sps:$4 sm:$0xff]   ;;  %v5339_v56 = vld [vmem:[%s6118_s17 + $0x324] ss:$120 sps:$4 sm:$0xff]  }
 0x12d   : > { %4474 = vmatprep.subr.bf16.mxu1 %v5258_v57  ;;  %v5342_v57 = vld [vmem:[%s6118_s17 + $0x32c] ss:$120 sps:$4 sm:$0xff]  }
 0x12f   : > { %4440 = vmatpush1.bf16.msra.mxu0 %v5257_v58  ;;  %v5341_v58 = vld [vmem:[%s6118_s17 + $0x320] ss:$120 sps:$4 sm:$0xff]  }
 0x130   : > { %4476 = vmatpush1.bf16.msra.mxu1 %v5260_v59  ;;  %4442 = vmatprep.subr.bf16.mxu0 %v5261_v61  ;;  %v5344_v59 = vld [vmem:[%s6118_s17 + $0x328] ss:$120 sps:$4 sm:$0xff]   ;;  %v5345_v61 = vld [vmem:[%s6118_s17 + $0x414] ss:$120 sps:$4 sm:$0xff]  }
 0x131   : > { %4478 = vmatprep.subr.bf16.mxu1 %v5264_v62  ;;  %v5348_v62 = vld [vmem:[%s6118_s17 + $0x41c] ss:$120 sps:$4 sm:$0xff]  }
 0x133   : > { %4444 = vmatpush1.bf16.msra.mxu0 %v5263_v63  ;;  %v5347_v63 = vld [vmem:[%s6118_s17 + $0x410] ss:$120 sps:$4 sm:$0xff]  }
 0x134   : > { %4480 = vmatpush1.bf16.msra.mxu1 %v5266_v0  ;;  %4482 = vmatprep.subr.bf16.mxu0 %v5267_v2  ;;  %v5350_v0 = vld [vmem:[%s6118_s17 + $0x418] ss:$120 sps:$4 sm:$0xff]   ;;  %v5351_v2 = vld [vmem:[%s6118_s17 + $0x504] ss:$120 sps:$4 sm:$0xff]  }
 0x135   : > { %4518 = vmatprep.subr.bf16.mxu1 %v5270_v3  ;;  %v5354_v3 = vld [vmem:[%s6118_s17 + $0x50c] ss:$120 sps:$4 sm:$0xff]  }
 0x136   : > { %2237 = vmatmul.mubr.f32.vlgmr.msra.gmra.mrb[24].mxu0 %v6168_v60 }
 0x137   : > { %2326 = vmatmul.mubr.f32.vlgmr.msra.gmra.mrb[24].mxu1 %v6168_v60  ;;  %4484 = vmatpush1.bf16.msra.mxu0 %v5269_v4  ;;  %v5353_v4 = vld [vmem:[%s6118_s17 + $0x500] ss:$120 sps:$4 sm:$0xff]  }
 0x138   : > { %4520 = vmatpush1.bf16.msra.mxu1 %v5272_v6  ;;  %4486 = vmatprep.subr.bf16.mxu0 %v5273_v7  ;;  %v5356_v6 = vld [vmem:[%s6118_s17 + $0x508] ss:$120 sps:$4 sm:$0xff]   ;;  %v5357_v7 = vld [vmem:[%s6118_s17 + $0x5f4] ss:$120 sps:$4 sm:$0xff]  }
 0x139   : > { %4522 = vmatprep.subr.bf16.mxu1 %v5276_v9  ;;  %4033 = vmatprep.mubr.msk.f32.mxu0 %vm1625_vm0, %v6174_v1  ;;  %v5360_v9 = vld [vmem:[%s6118_s17 + $0x5fc] ss:$120 sps:$4 sm:$0xff]  }
 0x13a   : > { %4037 = vmatprep.mubr.msk.f32.mxu1 %vm1625_vm0, %v6174_v1  ;;  %2243 = vmatmul.mubr.f32.gmra.mrb[26].mxu0 %v6183_v5 }
 0x13b   : > { %2332 = vmatmul.mubr.f32.gmra.mrb[26].mxu1 %v6183_v5  ;;  %4488 = vmatpush1.bf16.msra.mxu0 %v5275_v10  ;;  %v5359_v10 = vld [vmem:[%s6118_s17 + $0x5f0] ss:$120 sps:$4 sm:$0xff]  }
 0x13c   : > { %4524 = vmatpush1.bf16.msra.mxu1 %v5278_v11  ;;  %4490 = vmatprep.subr.bf16.mxu0 %v5279_v13  ;;  %v5362_v11 = vld [vmem:[%s6118_s17 + $0x5f8] ss:$120 sps:$4 sm:$0xff]   ;;  %v5363_v13 = vld [vmem:[%s6118_s17 + $0x6e4] ss:$120 sps:$4 sm:$0xff]  }
 0x13d   : > { %4526 = vmatprep.subr.bf16.mxu1 %v5282_v14  ;;  %4034 = vmatprep.mubr.msk.f32.mxu0 %vm1625_vm0, %v6191_v8  ;;  %v5366_v14 = vld [vmem:[%s6118_s17 + $0x6ec] ss:$120 sps:$4 sm:$0xff]  }
 0x13e   : > { %4038 = vmatprep.mubr.msk.f32.mxu1 %vm1625_vm0, %v6191_v8  ;;  %2249 = vmatmul.mubr.f32.gmra.mrb[28].mxu0 %v6200_v12 }
 0x13f   : > { %2338 = vmatmul.mubr.f32.gmra.mrb[28].mxu1 %v6200_v12  ;;  %4492 = vmatpush1.bf16.msra.mxu0 %v5281_v17  ;;  %v5365_v17 = vld [vmem:[%s6118_s17 + $0x6e0] ss:$120 sps:$4 sm:$0xff]  }
 0x140   : > { %4528 = vmatpush1.bf16.msra.mxu1 %v5284_v18  ;;  %4494 = vmatprep.subr.bf16.mxu0 %v5285_v20  ;;  %v5368_v18 = vld [vmem:[%s6118_s17 + $0x6e8] ss:$120 sps:$4 sm:$0xff]   ;;  %v5369_v20 = vld [vmem:[%s6118_s17 + $0x7d4] ss:$120 sps:$4 sm:$0xff]  }
 0x141   : > { %4530 = vmatprep.subr.bf16.mxu1 %v5288_v21  ;;  %4035 = vmatprep.mubr.msk.f32.mxu0 %vm1625_vm0, %v6208_v16  ;;  %v5372_v21 = vld [vmem:[%s6118_s17 + $0x7dc] ss:$120 sps:$4 sm:$0xff]  }
 0x142   : > { %4039 = vmatprep.mubr.msk.f32.mxu1 %vm1625_vm0, %v6208_v16  ;;  %2255 = vmatmul.mubr.f32.gmra.mrb[30].mxu0 %v6214_v19 }
 0x143   : > { %2344 = vmatmul.mubr.f32.gmra.mrb[30].mxu1 %v6214_v19  ;;  %4496 = vmatpush1.bf16.msra.mxu0 %v5287_v22  ;;  %v5371_v22 = vld [vmem:[%s6118_s17 + $0x7d0] ss:$120 sps:$4 sm:$0xff]  }
 0x144   : > { %4532 = vmatpush1.bf16.msra.mxu1 %v5290_v23  ;;  %4498 = vmatprep.subr.bf16.mxu0 %v5291_v24  ;;  %v5374_v23 = vld [vmem:[%s6118_s17 + $0x7d8] ss:$120 sps:$4 sm:$0xff]   ;;  %v5375_v24 = vld [vmem:[%s6118_s17 + $0x64] ss:$120 sps:$4 sm:$0xff]  }
 0x145   : > { %4534 = vmatprep.subr.bf16.mxu1 %v5294_v25  ;;  %4040 = vmatprep.mubr.msk.f32.mxu0 %vm1625_vm0, %v6106_v15  ;;  %v5378_v25 = vld [vmem:[%s6118_s17 + $0x6c] ss:$120 sps:$4 sm:$0xff]  }
 0x146   : > { %4044 = vmatprep.mubr.msk.f32.mxu1 %vm1625_vm0, %v6106_v15 }
 0x147   : > { %4500 = vmatpush1.bf16.msra.mxu0 %v5293_v26  ;;  %v5377_v26 = vld [vmem:[%s6118_s17 + $0x60] ss:$120 sps:$4 sm:$0xff]  }
 0x148   : > { %4536 = vmatpush1.bf16.msra.mxu1 %v5296_v27  ;;  %4502 = vmatprep.subr.bf16.mxu0 %v5297_v28  ;;  %v5380_v27 = vld [vmem:[%s6118_s17 + $0x68] ss:$120 sps:$4 sm:$0xff]   ;;  %v5381_v28 = vld [vmem:[%s6118_s17 + $0x154] ss:$120 sps:$4 sm:$0xff]  }
 0x149   : > { %4538 = vmatprep.subr.bf16.mxu1 %v5300_v29  ;;  %v5384_v29 = vld [vmem:[%s6118_s17 + $0x15c] ss:$120 sps:$4 sm:$0xff]  }
 0x14b   : > { %4504 = vmatpush1.bf16.msra.mxu0 %v5299_v30  ;;  %v5383_v30 = vld [vmem:[%s6118_s17 + $0x150] ss:$120 sps:$4 sm:$0xff]  }
 0x14c   : > { %4540 = vmatpush1.bf16.msra.mxu1 %v5302_v31  ;;  %4506 = vmatprep.subr.bf16.mxu0 %v5303_v32  ;;  %v5386_v31 = vld [vmem:[%s6118_s17 + $0x158] ss:$120 sps:$4 sm:$0xff]   ;;  %v5387_v32 = vld [vmem:[%s6118_s17 + $0x244] ss:$120 sps:$4 sm:$0xff]  }
 0x14d   : > { %4542 = vmatprep.subr.bf16.mxu1 %v5306_v33  ;;  %v5390_v33 = vld [vmem:[%s6118_s17 + $0x24c] ss:$120 sps:$4 sm:$0xff]  }
 0x14f   : > { %4508 = vmatpush1.bf16.msra.mxu0 %v5305_v34  ;;  %v5389_v34 = vld [vmem:[%s6118_s17 + $0x240] ss:$120 sps:$4 sm:$0xff]  }
 0x150   : > { %4544 = vmatpush1.bf16.msra.mxu1 %v5308_v35  ;;  %4510 = vmatprep.subr.bf16.mxu0 %v5309_v36  ;;  %v5392_v35 = vld [vmem:[%s6118_s17 + $0x248] ss:$120 sps:$4 sm:$0xff]   ;;  %v5393_v36 = vld [vmem:[%s6118_s17 + $0x334] ss:$120 sps:$4 sm:$0xff]  }
 0x151   : > { %4546 = vmatprep.subr.bf16.mxu1 %v5312_v37  ;;  %v5396_v37 = vld [vmem:[%s6118_s17 + $0x33c] ss:$120 sps:$4 sm:$0xff]  }
 0x153   : > { %4512 = vmatpush1.bf16.msra.mxu0 %v5311_v38  ;;  %v5395_v38 = vld [vmem:[%s6118_s17 + $0x330] ss:$120 sps:$4 sm:$0xff]  }
 0x154   : > { %4548 = vmatpush1.bf16.msra.mxu1 %v5314_v39  ;;  %4514 = vmatprep.subr.bf16.mxu0 %v5315_v40  ;;  %v5398_v39 = vld [vmem:[%s6118_s17 + $0x338] ss:$120 sps:$4 sm:$0xff]   ;;  %v5399_v40 = vld [vmem:[%s6118_s17 + $0x424] ss:$120 sps:$4 sm:$0xff]  }
 0x155   : > { %4550 = vmatprep.subr.bf16.mxu1 %v5318_v41  ;;  %v5402_v41 = vld [vmem:[%s6118_s17 + $0x42c] ss:$120 sps:$4 sm:$0xff]  }
 0x157   : > { %4516 = vmatpush1.bf16.msra.mxu0 %v5317_v42  ;;  %v6542_v42 = vpop.permute.xlu0 %1607 }
 0x158   : > { %4552 = vmatpush1.bf16.msra.mxu1 %v5320_v43  ;;  %4554 = vmatprep.subr.bf16.mxu0 %v5321_v44  ;;  %v5401_v44 = vld [vmem:[%s6118_s17 + $0x420] ss:$120 sps:$4 sm:$0xff]  }
 0x159   : > { %4590 = vmatprep.subr.bf16.mxu1 %v5324_v45  ;;  %v5404_v45 = vld [vmem:[%s6118_s17 + $0x428] ss:$120 sps:$4 sm:$0xff]  }
 0x15a   : > { %2415 = vmatmul.mubr.f32.vlgmr.msra.gmra.mrb[32].mxu0 %v6168_v60  ;;  %v6550_v43 = vpop.permute.xlu1 %1617 }
 0x15b   : > { %2504 = vmatmul.mubr.f32.vlgmr.msra.gmra.mrb[32].mxu1 %v6168_v60  ;;  %4556 = vmatpush1.bf16.msra.mxu0 %v5323_v46  ;;  %v5405_v46 = vld [vmem:[%s6118_s17 + $0x514] ss:$120 sps:$4 sm:$0xff]  }
 0x15c   : > { %4592 = vmatpush1.bf16.msra.mxu1 %v5326_v47  ;;  %4558 = vmatprep.subr.bf16.mxu0 %v5327_v48  ;;  %v5408_v47 = vld [vmem:[%s6118_s17 + $0x51c] ss:$120 sps:$4 sm:$0xff]   ;;  %v6560_v48 = vpop.permute.xlu0 %1612 }
 0x15d   : > { %4594 = vmatprep.subr.bf16.mxu1 %v5330_v49  ;;  %4041 = vmatprep.mubr.msk.f32.mxu0 %vm1625_vm0, %v6174_v1  ;;  %v5407_v49 = vld [vmem:[%s6118_s17 + $0x510] ss:$120 sps:$4 sm:$0xff]  }
 0x15e   : > { %4045 = vmatprep.mubr.msk.f32.mxu1 %vm1625_vm0, %v6174_v1  ;;  %2421 = vmatmul.mubr.f32.gmra.mrb[34].mxu0 %v6183_v5 }
 0x15f   : > { %2510 = vmatmul.mubr.f32.gmra.mrb[34].mxu1 %v6183_v5  ;;  %4560 = vmatpush1.bf16.msra.mxu0 %v5329_v50  ;;  %v5410_v50 = vld [vmem:[%s6118_s17 + $0x518] ss:$120 sps:$4 sm:$0xff]  }
 0x160   : > { %4596 = vmatpush1.bf16.msra.mxu1 %v5332_v51  ;;  %4562 = vmatprep.subr.bf16.mxu0 %v5333_v52  ;;  %v5411_v51 = vld [vmem:[%s6118_s17 + $0x604] ss:$120 sps:$4 sm:$0xff]  }
 0x161   : > { %4598 = vmatprep.subr.bf16.mxu1 %v5336_v53  ;;  %4042 = vmatprep.mubr.msk.f32.mxu0 %vm1625_vm0, %v6191_v8  ;;  %v5414_v52 = vld [vmem:[%s6118_s17 + $0x60c] ss:$120 sps:$4 sm:$0xff]   ;;  %v6566_v53 = vpop.permute.xlu1 %1622 }
 0x162   : > { %4046 = vmatprep.mubr.msk.f32.mxu1 %vm1625_vm0, %v6191_v8  ;;  %2427 = vmatmul.mubr.f32.gmra.mrb[36].mxu0 %v6200_v12 }
 0x163   : > { %2516 = vmatmul.mubr.f32.gmra.mrb[36].mxu1 %v6200_v12  ;;  %4564 = vmatpush1.bf16.msra.mxu0 %v5335_v54  ;;  %v5413_v54 = vld [vmem:[%s6118_s17 + $0x600] ss:$120 sps:$4 sm:$0xff]  }
 0x164   : > { %4600 = vmatpush1.bf16.msra.mxu1 %v5338_v55  ;;  %4566 = vmatprep.subr.bf16.mxu0 %v5339_v56  ;;  %v5416_v55 = vld [vmem:[%s6118_s17 + $0x608] ss:$120 sps:$4 sm:$0xff]   ;;  %v5417_v56 = vld [vmem:[%s6118_s17 + $0x6f4] ss:$120 sps:$4 sm:$0xff]  }
 0x165   : > { %4602 = vmatprep.subr.bf16.mxu1 %v5342_v57  ;;  %4043 = vmatprep.mubr.msk.f32.mxu0 %vm1625_vm0, %v6208_v16  ;;  %v5420_v57 = vld [vmem:[%s6118_s17 + $0x6fc] ss:$120 sps:$4 sm:$0xff]  }
 0x166   : > { %4047 = vmatprep.mubr.msk.f32.mxu1 %vm1625_vm0, %v6208_v16  ;;  %2433 = vmatmul.mubr.f32.gmra.mrb[38].mxu0 %v6214_v19 }
 0x167   : > { %2522 = vmatmul.mubr.f32.gmra.mrb[38].mxu1 %v6214_v19  ;;  %4568 = vmatpush1.bf16.msra.mxu0 %v5341_v58  ;;  %v6572_v58 = vpop.permute.xlu0 %3099 }
 0x168   : > { %4604 = vmatpush1.bf16.msra.mxu1 %v5344_v59  ;;  %4570 = vmatprep.subr.bf16.mxu0 %v5345_v61  ;;  %v6574_v59 = vpop.permute.xlu1 %3104  ;;  %v5419_v61 = vld [vmem:[%s6118_s17 + $0x6f0] ss:$120 sps:$4 sm:$0xff]  }
 0x169   : > { %4606 = vmatprep.subr.bf16.mxu1 %v5348_v62  ;;  %4048 = vmatprep.mubr.msk.f32.mxu0 %vm1625_vm0, %v6106_v15  ;;  %v5422_v62 = vld [vmem:[%s6118_s17 + $0x6f8] ss:$120 sps:$4 sm:$0xff]  }
 0x16a   : > { %4052 = vmatprep.mubr.msk.f32.mxu1 %vm1625_vm0, %v6106_v15 }
 0x16b   : > { %4572 = vmatpush1.bf16.msra.mxu0 %v5347_v63  ;;  %v5423_v63 = vld [vmem:[%s6118_s17 + $0x7e4] ss:$120 sps:$4 sm:$0xff]  }
 0x16c   : > { %4608 = vmatpush1.bf16.msra.mxu1 %v5350_v0  ;;  %4574 = vmatprep.subr.bf16.mxu0 %v5351_v2  ;;  %v5426_v0 = vld [vmem:[%s6118_s17 + $0x7ec] ss:$120 sps:$4 sm:$0xff]   ;;  %v6580_v2 = vpop.permute.xlu0 %3109 }
 0x16d   : > { %4610 = vmatprep.subr.bf16.mxu1 %v5354_v3  ;;  %v5425_v3 = vld [vmem:[%s6118_s17 + $0x7e0] ss:$120 sps:$4 sm:$0xff]  }
 0x16f   : > { %4576 = vmatpush1.bf16.msra.mxu0 %v5353_v4  ;;  %v5428_v4 = vld [vmem:[%s6118_s17 + $0x7e8] ss:$120 sps:$4 sm:$0xff]  }
 0x170   : > { %4612 = vmatpush1.bf16.msra.mxu1 %v5356_v6  ;;  %4578 = vmatprep.subr.bf16.mxu0 %v5357_v7  ;;  %v5429_v6 = vld [vmem:[%s6118_s17 + $0x74] ss:$120 sps:$4 sm:$0xff]   ;;  %v6585_v7 = vpop.permute.xlu1 %3114 }
 0x171   : > { %4614 = vmatprep.subr.bf16.mxu1 %v5360_v9 }
 0x173   : > { %4580 = vmatpush1.bf16.msra.mxu0 %v5359_v10 }
 0x174   : > { %4616 = vmatpush1.bf16.msra.mxu1 %v5362_v11  ;;  %4582 = vmatprep.subr.bf16.mxu0 %v5363_v13 }
 0x175   : > { %4618 = vmatprep.subr.bf16.mxu1 %v5366_v14 }
 0x177   : > { %4584 = vmatpush1.bf16.msra.mxu0 %v5365_v17 }
 0x178   : > { %4620 = vmatpush1.bf16.msra.mxu1 %v5368_v18  ;;  %4586 = vmatprep.subr.bf16.mxu0 %v5369_v20 }
 0x179   : > { %4622 = vmatprep.subr.bf16.mxu1 %v5372_v21  ;;  %v5431_v21 = vld [vmem:[%s6118_s17 + $0x70] ss:$120 sps:$4 sm:$0xff]  }
 0x17b   : > { %4588 = vmatpush1.bf16.msra.mxu0 %v5371_v22 }
 0x17c   : > { %4624 = vmatpush1.bf16.msra.mxu1 %v5374_v23  ;;  %4626 = vmatprep.subr.bf16.mxu0 %v5375_v24  ;;  %v6592_v24 = vpop.permute.xlu0 %3243 }
 0x17d   : > { %4662 = vmatprep.subr.bf16.mxu1 %v5378_v25  ;;  %v5432_v25 = vld [vmem:[%s6118_s17 + $0x164] ss:$120 sps:$4 sm:$0xff]  }
 0x17e   : > { %2593 = vmatmul.mubr.f32.vlgmr.msra.gmra.mrb[40].mxu0 %v6168_v60 }
 0x17f   : > { %2682 = vmatmul.mubr.f32.vlgmr.msra.gmra.mrb[40].mxu1 %v6168_v60  ;;  %4628 = vmatpush1.bf16.msra.mxu0 %v5377_v26 }
 0x180   : > { %4664 = vmatpush1.bf16.msra.mxu1 %v5380_v27  ;;  %4630 = vmatprep.subr.bf16.mxu0 %v5381_v28 }
 0x181   : > { %4666 = vmatprep.subr.bf16.mxu1 %v5384_v29  ;;  %4049 = vmatprep.mubr.msk.f32.mxu0 %vm1625_vm0, %v6174_v1 }
 0x182   : > { %4053 = vmatprep.mubr.msk.f32.mxu1 %vm1625_vm0, %v6174_v1  ;;  %2599 = vmatmul.mubr.f32.gmra.mrb[42].mxu0 %v6183_v5 }
 0x183   : > { %2688 = vmatmul.mubr.f32.gmra.mrb[42].mxu1 %v6183_v5  ;;  %4632 = vmatpush1.bf16.msra.mxu0 %v5383_v30 }
 0x184   : > { %4668 = vmatpush1.bf16.msra.mxu1 %v5386_v31  ;;  %4634 = vmatprep.subr.bf16.mxu0 %v5387_v32 }
 0x185   : > { %4670 = vmatprep.subr.bf16.mxu1 %v5390_v33  ;;  %4050 = vmatprep.mubr.msk.f32.mxu0 %vm1625_vm0, %v6191_v8 }
 0x186   : > { %4054 = vmatprep.mubr.msk.f32.mxu1 %vm1625_vm0, %v6191_v8  ;;  %2605 = vmatmul.mubr.f32.gmra.mrb[44].mxu0 %v6200_v12 }
 0x187   : > { %2694 = vmatmul.mubr.f32.gmra.mrb[44].mxu1 %v6200_v12  ;;  %4636 = vmatpush1.bf16.msra.mxu0 %v5389_v34 }
 0x188   : > { %4672 = vmatpush1.bf16.msra.mxu1 %v5392_v35  ;;  %4638 = vmatprep.subr.bf16.mxu0 %v5393_v36 }
 0x189   : > { %4674 = vmatprep.subr.bf16.mxu1 %v5396_v37  ;;  %4051 = vmatprep.mubr.msk.f32.mxu0 %vm1625_vm0, %v6208_v16  ;;  %v5434_v37 = vld [vmem:[%s6118_s17 + $0x160] ss:$120 sps:$4 sm:$0xff]  }
 0x18a   : > { %4055 = vmatprep.mubr.msk.f32.mxu1 %vm1625_vm0, %v6208_v16  ;;  %2611 = vmatmul.mubr.f32.gmra.mrb[46].mxu0 %v6214_v19 }
 0x18b   : > { %2700 = vmatmul.mubr.f32.gmra.mrb[46].mxu1 %v6214_v19  ;;  %4640 = vmatpush1.bf16.msra.mxu0 %v5395_v38 }
 0x18c   : > { %4676 = vmatpush1.bf16.msra.mxu1 %v5398_v39  ;;  %4642 = vmatprep.subr.bf16.mxu0 %v5399_v40 }
 0x18d   : > { %4678 = vmatprep.subr.bf16.mxu1 %v5402_v41  ;;  %4056 = vmatprep.mubr.msk.f32.mxu0 %vm1625_vm0, %v6106_v15  ;;  %v5435_v41 = vld [vmem:[%s6118_s17 + $0x254] ss:$120 sps:$4 sm:$0xff]  }
 0x18e   : > { %4060 = vmatprep.mubr.msk.f32.mxu1 %vm1625_vm0, %v6106_v15 }
 0x18f   : > { %4644 = vmatpush1.bf16.msra.mxu0 %v5401_v44 }
 0x190   : > { %4680 = vmatpush1.bf16.msra.mxu1 %v5404_v45  ;;  %4646 = vmatprep.subr.bf16.mxu0 %v5405_v46  ;;  %v6612_v46 = vpop.permute.xlu1 %3248 }
 0x191   : > { %4682 = vmatprep.subr.bf16.mxu1 %v5408_v47 }
 0x193   : > { %4648 = vmatpush1.bf16.msra.mxu0 %v5407_v49 }
 0x194   : > { %4684 = vmatpush1.bf16.msra.mxu1 %v5410_v50  ;;  %4650 = vmatprep.subr.bf16.mxu0 %v5411_v51 }
 0x195   : > { %4686 = vmatprep.subr.bf16.mxu1 %v5414_v52 }
 0x197   : > { %4652 = vmatpush1.bf16.msra.mxu0 %v5413_v54 }
 0x198   : > { %4688 = vmatpush1.bf16.msra.mxu1 %v5416_v55  ;;  %4654 = vmatprep.subr.bf16.mxu0 %v5417_v56 }
 0x199   : > { %4690 = vmatprep.subr.bf16.mxu1 %v5420_v57 }
 0x19b   : > { %4656 = vmatpush1.bf16.msra.mxu0 %v5419_v61 }
 0x19c   : > { %4692 = vmatpush1.bf16.msra.mxu1 %v5422_v62  ;;  %4658 = vmatprep.subr.bf16.mxu0 %v5423_v63 }
 0x19d   : > { %4694 = vmatprep.subr.bf16.mxu1 %v5426_v0  ;;  %v1704_v9 = vpop.f32.mrb[0].mxu0 }
 0x19e   : > { %v1793_v10 = vpop.f32.mrb[0].mxu1  ;;  %v1705_v11 = vadd.f32 %v1704_v9, %v6542_v42  ;;  %v1706_v14 = vpop.f32.mrb[1].mxu0 }
 0x19f   : > { %v1794_v13 = vadd.f32 %v1793_v10, %v6542_v42  ;;  %v1795_v17 = vpop.f32.mrb[1].mxu1  ;;  %v1707_v18 = vadd.f32 %v1706_v14, %v6542_v42  ;;  %4660 = vmatpush1.bf16.msra.mxu0 %v5425_v3  ;;  %v5438_v10 = vld [vmem:[%s6118_s17 + $0x344] ss:$120 sps:$4 sm:$0xff]  }
 0x1a0   : > { %v1796_v20 = vadd.f32 %v1795_v17, %v6542_v42  ;;  %4696 = vmatpush1.bf16.msra.mxu1 %v5428_v4  ;;  %v2973_v22 = vmax.f32 %v1705_v11, 0.0  ;;  %4698 = vmatprep.subr.bf16.mxu0 %v5429_v6  ;;  %v5437_v4 = vld [vmem:[%s6118_s17 + $0x250] ss:$120 sps:$4 sm:$0xff]  }
 0x1a1   : > { %v2975_v23 = vmax.f32 %v1794_v13, 0.0  ;;  %4733 = vmatprep.subr.bf16.mxu1 %v5429_v6  ;;  %v2974_v26 = vmax.f32 %v1707_v18, 0.0  ;;  %v1710_v28 = vpop.f32.mrb[2].mxu0 }
 0x1a2   : > { %v2976_v27 = vmax.f32 %v1796_v20, 0.0  ;;  %v1799_v29 = vpop.f32.mrb[2].mxu1  ;;  %v3117_v30 = vmul.f32 %v6572_v58, %v2973_v22  ;;  %2771 = vmatmul.mubr.f32.vlgmr.msra.gmra.mrb[48].mxu0 %v6168_v60  ;;  %v1711_v32 = vadd.f32 %v1710_v28, %v6560_v48  ;;  %v1712_v33 = vpop.f32.mrb[3].mxu0 }
 0x1a3   : > { %v3119_v31 = vmul.f32 %v6572_v58, %v2975_v23  ;;  %2860 = vmatmul.mubr.f32.vlgmr.msra.gmra.mrb[48].mxu1 %v6168_v60  ;;  %v1801_v34 = vpop.f32.mrb[3].mxu1  ;;  %v3118_v35 = vmul.f32 %v6572_v58, %v2974_v26  ;;  %4700 = vmatpush1.bf16.msra.mxu0 %v5431_v21  ;;  %v1800_v38 = vadd.f32 %v1799_v29, %v6560_v48 }
 0x1a4   : > { %v3120_v36 = vmul.f32 %v6572_v58, %v2976_v27  ;;  %4742 = vmatpush1.bf16.msra.mxu1 %v5431_v21  ;;  %v3261_v39 = vadd.f32 %v6592_v24, %v3117_v30  ;;  %4702 = vmatprep.subr.bf16.mxu0 %v5432_v25  ;;  %v3003_v44 = vmax.f32 %v1711_v32, 0.0  ;;  %v1713_v45 = vadd.f32 %v1712_v33, %v6560_v48 }
 0x1a5   : > { %v3263_v40 = vadd.f32 %v6592_v24, %v3119_v31  ;;  %4734 = vmatprep.subr.bf16.mxu1 %v5432_v25  ;;  %v3262_v47 = vadd.f32 %v6592_v24, %v3118_v35  ;;  %4057 = vmatprep.mubr.msk.f32.mxu0 %vm1625_vm0, %v6174_v1  ;;  %v3005_v50 = vmax.f32 %v1800_v38, 0.0  ;;  %v1802_v51 = vadd.f32 %v1801_v34, %v6560_v48  ;;  %v1716_v52 = vpop.f32.mrb[4].mxu0  ;;  %v5440_v31 = vld [vmem:[%s6118_s17 + $0x340] ss:$120 sps:$4 sm:$0xff]  }
 0x1a6   : > { %v3264_v49 = vadd.f32 %v6592_v24, %v3120_v36  ;;  %4061 = vmatprep.mubr.msk.f32.mxu1 %vm1625_vm0, %v6174_v1  ;;  %v1805_v54 = vpop.f32.mrb[4].mxu1  ;;  %2777 = vmatmul.mubr.f32.gmra.mrb[50].mxu0 %v6183_v5  ;;  %v3147_v55 = vmul.f32 %v6574_v59, %v3003_v44  ;;  %v3004_v56 = vmax.f32 %v1713_v45, 0.0  ;;  %v1717_v57 = vadd.f32 %v1716_v52, %v6550_v43  ;;  %v1718_v62 = vpop.f32.mrb[5].mxu0 }
 0x1a7   : > { %2866 = vmatmul.mubr.f32.gmra.mrb[50].mxu1 %v6183_v5  ;;  %v1806_v61 = vadd.f32 %v1805_v54, %v6550_v43  ;;  %v1807_v63 = vpop.f32.mrb[5].mxu1  ;;  %v4132_v0 = vpack.c.bf16 %v3262_v47, %v3261_v39  ;;  %4704 = vmatpush1.bf16.msra.mxu0 %v5434_v37  ;;  %v3149_v6 = vmul.f32 %v6574_v59, %v3005_v50  ;;  %v3006_v9 = vmax.f32 %v1802_v51, 0.0  ;;  %v6652_v36 = vpop.permute.xlu0 %3253 }
 0x1a8   : > { %v4133_v3 = vpack.c.bf16 %v3264_v49, %v3263_v40  ;;  %4743 = vmatpush1.bf16.msra.mxu1 %v5434_v37  ;;  %4706 = vmatprep.subr.bf16.mxu0 %v5435_v41  ;;  %v3148_v11 = vmul.f32 %v6574_v59, %v3004_v56  ;;  %v3033_v13 = vmax.f32 %v1717_v57, 0.0  ;;  %v1719_v17 = vadd.f32 %v1718_v62, %v6550_v43  ;;  %v5441_v37 = vld [vmem:[%s6118_s17 + $0x434] ss:$120 sps:$4 sm:$0xff]   ;;  %v6669_v54 = vpop.permute.xlu1 %3258 }
 0x1a9   : > { %4735 = vmatprep.subr.bf16.mxu1 %v5435_v41  ;;  %v3035_v14 = vmax.f32 %v1806_v61, 0.0  ;;  %3741 = vst [vmem:[%s6632_s18] sm:$0xff] %v4132_v0  ;;  %4058 = vmatprep.mubr.msk.f32.mxu0 %vm1625_vm0, %v6191_v8  ;;  %v3150_v18 = vmul.f32 %v6574_v59, %v3006_v9  ;;  %v1808_v20 = vadd.f32 %v1807_v63, %v6550_v43  ;;  %v1722_v22 = vpop.f32.mrb[6].mxu0  ;;  %v5444_v63 = vld [vmem:[%s6118_s17 + $0x524] ss:$120 sps:$4 sm:$0xff]  }
 0x1aa   : > { %3742 = vst [vmem:[%s6632_s18 + $0x8] sm:$0xff] %v4133_v3  ;;  %4062 = vmatprep.mubr.msk.f32.mxu1 %vm1625_vm0, %v6191_v8  ;;  %v3291_v21 = vadd.f32 %v6612_v46, %v3147_v55  ;;  %v1811_v23 = vpop.f32.mrb[6].mxu1  ;;  %2783 = vmatmul.mubr.f32.gmra.mrb[52].mxu0 %v6200_v12  ;;  %v3177_v25 = vmul.f32 %v6580_v2, %v3033_v13  ;;  %v3034_v27 = vmax.f32 %v1719_v17, 0.0  ;;  %v1724_v29 = vpop.f32.mrb[7].mxu0  ;;  %v5443_v55 = vld [vmem:[%s6118_s17 + $0x430] ss:$120 sps:$4 sm:$0xff]  }
 0x1ab   : > { %2872 = vmatmul.mubr.f32.gmra.mrb[52].mxu1 %v6200_v12  ;;  %v3179_v26 = vmul.f32 %v6580_v2, %v3035_v14  ;;  %v3292_v28 = vadd.f32 %v6612_v46, %v3148_v11  ;;  %v1813_v30 = vpop.f32.mrb[7].mxu1  ;;  %4708 = vmatpush1.bf16.msra.mxu0 %v5437_v4  ;;  %v3036_v32 = vmax.f32 %v1808_v20, 0.0  ;;  %v3293_v33 = vadd.f32 %v6612_v46, %v3149_v6  ;;  %v5446_v14 = vld [vmem:[%s6118_s17 + $0x520] ss:$120 sps:$4 sm:$0xff]  }
 0x1ac   : > { %4744 = vmatpush1.bf16.msra.mxu1 %v5437_v4  ;;  %v3294_v34 = vadd.f32 %v6612_v46, %v3150_v18  ;;  %v1723_v35 = vadd.f32 %v1722_v22, %v6566_v53  ;;  %4710 = vmatprep.subr.bf16.mxu0 %v5438_v10  ;;  %v3178_v38 = vmul.f32 %v6580_v2, %v3034_v27  ;;  %v5450_v22 = vld [vmem:[%s6118_s17 + $0x704] ss:$120 sps:$4 sm:$0xff]  }
 0x1ad   : > { %4736 = vmatprep.subr.bf16.mxu1 %v5438_v10  ;;  %v4147_v39 = vpack.c.bf16 %v3292_v28, %v3291_v21  ;;  %v1812_v40 = vadd.f32 %v1811_v23, %v6566_v53  ;;  %4059 = vmatprep.mubr.msk.f32.mxu0 %vm1625_vm0, %v6208_v16  ;;  %v3180_v41 = vmul.f32 %v6580_v2, %v3036_v32  ;;  %v5449_v21 = vld [vmem:[%s6118_s17 + $0x610] ss:$120 sps:$4 sm:$0xff]   ;;  %v5452_v23 = vld [vmem:[%s6118_s17 + $0x700] ss:$120 sps:$4 sm:$0xff]  }
 0x1ae   : > { %4063 = vmatprep.mubr.msk.f32.mxu1 %vm1625_vm0, %v6208_v16  ;;  %v4148_v44 = vpack.c.bf16 %v3294_v34, %v3293_v33  ;;  %v3063_v45 = vmax.f32 %v1723_v35, 0.0  ;;  %v1725_v47 = vadd.f32 %v1724_v29, %v6566_v53  ;;  %2789 = vmatmul.mubr.f32.gmra.mrb[54].mxu0 %v6214_v19  ;;  %v1814_v50 = vadd.f32 %v1813_v30, %v6566_v53 }
 0x1af   : > { %2878 = vmatmul.mubr.f32.gmra.mrb[54].mxu1 %v6214_v19  ;;  %3756 = vst [vmem:[%s6632_s18 + $0x78] sm:$0xff] %v4147_v39  ;;  %v3065_v49 = vmax.f32 %v1812_v40, 0.0  ;;  %v3321_v51 = vadd.f32 %v6652_v36, %v3177_v25  ;;  %v3322_v52 = vadd.f32 %v6652_v36, %v3178_v38  ;;  %4712 = vmatpush1.bf16.msra.mxu0 %v5440_v31  ;;  %v5453_v25 = vld [vmem:[%s6118_s17 + $0x7f4] ss:$120 sps:$4 sm:$0xff]  }
 0x1b0   : > { %4745 = vmatpush1.bf16.msra.mxu1 %v5440_v31  ;;  %3757 = vst [vmem:[%s6632_s18 + $0x80] sm:$0xff] %v4148_v44  ;;  %v3207_v56 = vmul.f32 %v6585_v7, %v3063_v45  ;;  %v3064_v57 = vmax.f32 %v1725_v47, 0.0  ;;  %v3323_v61 = vadd.f32 %v6652_v36, %v3179_v26  ;;  %v3324_v62 = vadd.f32 %v6652_v36, %v3180_v41  ;;  %v5455_v26 = vld [vmem:[%s6118_s17 + $0x7f0] ss:$120 sps:$4 sm:$0xff]  }
 0x1b1   : > { %4714 = vmatprep.subr.bf16.mxu0 %v5441_v37  ;;  %4737 = vmatprep.subr.bf16.mxu1 %v5441_v37  ;;  %v3209_v0 = vmul.f32 %v6585_v7, %v3065_v49  ;;  %v3066_v3 = vmax.f32 %v1814_v50, 0.0  ;;  %v4162_v4 = vpack.c.bf16 %v3322_v52, %v3321_v51 }
 0x1b2   : > { %v3208_v6 = vmul.f32 %v6585_v7, %v3064_v57  ;;  %v4163_v9 = vpack.c.bf16 %v3324_v62, %v3323_v61  ;;  %v3351_v10 = vadd.f32 %v6669_v54, %v3207_v56  ;;  %4064 = vmatprep.mubr.msk.f32.mxu0 %vm1625_vm0, %v6106_v15  ;;  %4066 = vmatprep.mubr.msk.f32.mxu1 %vm1625_vm0, %v6191_v8  ;;  %v5447_v15 = vld [vmem:[%s6118_s17 + $0x614] ss:$120 sps:$4 sm:$0xff]   ;;  %s7084_s17 = scalar_lea.vmem (%p5541_p5), %s7215_s5, %s4192_s9 }
 0x1b3   : > { %v3210_v11 = vmul.f32 %v6585_v7, %v3066_v3  ;;  %3771 = vst [vmem:[%s6632_s18 + $0xf0] sm:$0xff] %v4162_v4  ;;  %v3353_v13 = vadd.f32 %v6669_v54, %v3209_v0  ;;  %4716 = vmatpush1.bf16.msra.mxu0 %v5443_v55 }
 0x1b4   : > { %4746 = vmatpush1.bf16.msra.mxu1 %v5443_v55  ;;  %3772 = vst [vmem:[%s6632_s18 + $0xf8] sm:$0xff] %v4163_v9  ;;  %v3352_v17 = vadd.f32 %v6669_v54, %v3208_v6  ;;  %4718 = vmatprep.subr.bf16.mxu0 %v5444_v63 }
 0x1b5   : > { %4738 = vmatprep.subr.bf16.mxu1 %v5444_v63  ;;  %v3354_v8 = vadd.f32 %v6669_v54, %v3210_v11 }
 0x1b6   : > { %v4177_v18 = vpack.c.bf16 %v3352_v17, %v3351_v10 }
 0x1b7   : > { %v4178_v20 = vpack.c.bf16 %v3354_v8, %v3353_v13  ;;  %4720 = vmatpush1.bf16.msra.mxu0 %v5446_v14 }
 0x1b8   : > { %4747 = vmatpush1.bf16.msra.mxu1 %v5446_v14  ;;  %3786 = vst [vmem:[%s6632_s18 + $0x168] sm:$0xff] %v4177_v18  ;;  %4722 = vmatprep.subr.bf16.mxu0 %v5447_v15 }
 0x1b9   : > { %4739 = vmatprep.subr.bf16.mxu1 %v5447_v15  ;;  %3787 = vst [vmem:[%s6632_s18 + $0x170] sm:$0xff] %v4178_v20 }
 0x1bb   : > { %4724 = vmatpush1.bf16.msra.mxu0 %v5449_v21 }
 0x1bc   : > { %4748 = vmatpush1.bf16.msra.mxu1 %v5449_v21  ;;  %4726 = vmatprep.subr.bf16.mxu0 %v5450_v22 }
 0x1bd   : > { %4740 = vmatprep.subr.bf16.mxu1 %v5450_v22 }
 0x1bf   : > { %4728 = vmatpush1.bf16.msra.mxu0 %v5452_v23 }
 0x1c0   : > { %4749 = vmatpush1.bf16.msra.mxu1 %v5452_v23  ;;  %4730 = vmatprep.subr.bf16.mxu0 %v5453_v25 }
 0x1c1   : > { %4741 = vmatprep.subr.bf16.mxu1 %v5453_v25  ;;  %v1882_v27 = vpop.f32.mrb[8].mxu0 }
 0x1c2   : > { %v1971_v28 = vpop.f32.mrb[8].mxu1  ;;  %v1883_v29 = vadd.f32 %v1882_v27, %v6542_v42  ;;  %v1884_v31 = vpop.f32.mrb[9].mxu0 }
 0x1c3   : > { %v1972_v30 = vadd.f32 %v1971_v28, %v6542_v42  ;;  %v1973_v32 = vpop.f32.mrb[9].mxu1  ;;  %v1885_v33 = vadd.f32 %v1884_v31, %v6542_v42  ;;  %4732 = vmatpush1.bf16.msra.mxu0 %v5455_v26 }
 0x1c4   : > { %v1974_v34 = vadd.f32 %v1973_v32, %v6542_v42  ;;  %4750 = vmatpush1.bf16.msra.mxu1 %v5455_v26  ;;  %v2977_v35 = vmax.f32 %v1883_v29, 0.0 }
 0x1c5   : > { %v2979_v37 = vmax.f32 %v1972_v30, 0.0  ;;  %v2978_v38 = vmax.f32 %v1885_v33, 0.0  ;;  %v1888_v40 = vpop.f32.mrb[10].mxu0 }
 0x1c6   : > { %v2980_v39 = vmax.f32 %v1974_v34, 0.0  ;;  %v1977_v41 = vpop.f32.mrb[10].mxu1  ;;  %v3121_v44 = vmul.f32 %v6572_v58, %v2977_v35  ;;  %2949 = vmatmul.mubr.f32.vlgmr.msra.gmra.mrb[56].mxu0 %v6168_v60  ;;  %v1889_v47 = vadd.f32 %v1888_v40, %v6560_v48  ;;  %v1890_v49 = vpop.f32.mrb[11].mxu0 }
 0x1c7   : > { %v3123_v45 = vmul.f32 %v6572_v58, %v2979_v37  ;;  %2961 = vmatmul.mubr.f32.vlgmr.msra.gmra.mrb[56].mxu1 %v6200_v12  ;;  %v1979_v50 = vpop.f32.mrb[11].mxu1  ;;  %v3122_v51 = vmul.f32 %v6572_v58, %v2978_v38  ;;  %4065 = vmatprep.mubr.msk.f32.mxu0 %vm1625_vm0, %v6174_v1  ;;  %v1978_v55 = vadd.f32 %v1977_v41, %v6560_v48 }
 0x1c8   : > { %v3124_v52 = vmul.f32 %v6572_v58, %v2980_v39  ;;  %4067 = vmatprep.mubr.msk.f32.mxu1 %vm1625_vm0, %v6208_v16  ;;  %v3265_v60 = vadd.f32 %v6592_v24, %v3121_v44  ;;  %v3007_v56 = vmax.f32 %v1889_v47, 0.0  ;;  %v1891_v57 = vadd.f32 %v1890_v49, %v6560_v48 }
 0x1c9   : > { %v3267_v12 = vadd.f32 %v6592_v24, %v3123_v45  ;;  %v3266_v61 = vadd.f32 %v6592_v24, %v3122_v51  ;;  %v3009_v63 = vmax.f32 %v1978_v55, 0.0  ;;  %v1980_v0 = vadd.f32 %v1979_v50, %v6560_v48  ;;  %v1894_v1 = vpop.f32.mrb[12].mxu0 }
 0x1ca   : > { %v3268_v62 = vadd.f32 %v6592_v24, %v3124_v52  ;;  %v1983_v3 = vpop.f32.mrb[12].mxu1  ;;  %2955 = vmatmul.mubr.f32.gmra.mrb[58].mxu0 %v6183_v5  ;;  %v3151_v16 = vmul.f32 %v6574_v59, %v3007_v56  ;;  %v3008_v4 = vmax.f32 %v1891_v57, 0.0  ;;  %v1895_v6 = vadd.f32 %v1894_v1, %v6550_v43  ;;  %v1896_v10 = vpop.f32.mrb[13].mxu0 }
 0x1cb   : > { %2967 = vmatmul.mubr.f32.gmra.mrb[58].mxu1 %v6214_v19  ;;  %v1984_v9 = vadd.f32 %v1983_v3, %v6550_v43  ;;  %v1985_v11 = vpop.f32.mrb[13].mxu1  ;;  %v4134_v13 = vpack.c.bf16 %v3266_v61, %v3265_v60  ;;  %v3153_v17 = vmul.f32 %v6574_v59, %v3009_v63  ;;  %v3010_v15 = vmax.f32 %v1980_v0, 0.0 }
 0x1cc   : > { %v4135_v14 = vpack.c.bf16 %v3268_v62, %v3267_v12  ;;  %v3295_v5 = vadd.f32 %v6612_v46, %v3151_v16  ;;  %v3152_v8 = vmul.f32 %v6574_v59, %v3008_v4  ;;  %v3037_v19 = vmax.f32 %v1895_v6, 0.0 }
 0x1cd   : > { %v3039_v18 = vmax.f32 %v1984_v9, 0.0  ;;  %3743 = vst [vmem:[%s6632_s18 + $0x10] sm:$0xff] %v4134_v13  ;;  %v3297_v20 = vadd.f32 %v6612_v46, %v3153_v17  ;;  %v3154_v21 = vmul.f32 %v6574_v59, %v3010_v15  ;;  %v1897_v22 = vadd.f32 %v1896_v10, %v6550_v43  ;;  %v1900_v25 = vpop.f32.mrb[14].mxu0 }
 0x1ce   : > { %3744 = vst [vmem:[%s6632_s18 + $0x18] sm:$0xff] %v4135_v14  ;;  %v1986_v23 = vadd.f32 %v1985_v11, %v6550_v43  ;;  %v1989_v26 = vpop.f32.mrb[14].mxu1  ;;  %v3296_v27 = vadd.f32 %v6612_v46, %v3152_v8  ;;  %v3181_v28 = vmul.f32 %v6580_v2, %v3037_v19  ;;  %v1901_v30 = vadd.f32 %v1900_v25, %v6566_v53  ;;  %v1902_v31 = vpop.f32.mrb[15].mxu0 }
 0x1cf   : > { %v3183_v29 = vmul.f32 %v6580_v2, %v3039_v18  ;;  %v1991_v32 = vpop.f32.mrb[15].mxu1  ;;  %v3298_v33 = vadd.f32 %v6612_v46, %v3154_v21  ;;  %v3038_v34 = vmax.f32 %v1897_v22, 0.0  ;;  %v1990_v37 = vadd.f32 %v1989_v26, %v6566_v53 }
 0x1d0   : > { %v3040_v35 = vmax.f32 %v1986_v23, 0.0  ;;  %v4149_v38 = vpack.c.bf16 %v3296_v27, %v3295_v5  ;;  %v3325_v39 = vadd.f32 %v6652_v36, %v3181_v28  ;;  %v3067_v41 = vmax.f32 %v1901_v30, 0.0 }
 0x1d1   : > { %v3327_v40 = vadd.f32 %v6652_v36, %v3183_v29  ;;  %v4150_v44 = vpack.c.bf16 %v3298_v33, %v3297_v20  ;;  %v3182_v45 = vmul.f32 %v6580_v2, %v3038_v34  ;;  %v3069_v49 = vmax.f32 %v1990_v37, 0.0 }
 0x1d2   : > { %v3184_v47 = vmul.f32 %v6580_v2, %v3040_v35  ;;  %3758 = vst [vmem:[%s6632_s18 + $0x88] sm:$0xff] %v4149_v38  ;;  %v3211_v50 = vmul.f32 %v6585_v7, %v3067_v41  ;;  %v1903_v51 = vadd.f32 %v1902_v31, %v6566_v53  ;;  %v1992_v52 = vadd.f32 %v1991_v32, %v6566_v53 }
 0x1d3   : > { %3759 = vst [vmem:[%s6632_s18 + $0x90] sm:$0xff] %v4150_v44  ;;  %v3326_v55 = vadd.f32 %v6652_v36, %v3182_v45  ;;  %v3213_v12 = vmul.f32 %v6585_v7, %v3069_v49 }
 0x1d4   : > { %v3328_v60 = vadd.f32 %v6652_v36, %v3184_v47  ;;  %v3068_v56 = vmax.f32 %v1903_v51, 0.0  ;;  %v3070_v57 = vmax.f32 %v1992_v52, 0.0  ;;  %v3355_v63 = vadd.f32 %v6669_v54, %v3211_v50 }
 0x1d5   : > { %v4164_v61 = vpack.c.bf16 %v3326_v55, %v3325_v39  ;;  %v3357_v0 = vadd.f32 %v6669_v54, %v3213_v12 }
 0x1d6   : > { %v4165_v62 = vpack.c.bf16 %v3328_v60, %v3327_v40  ;;  %v3212_v1 = vmul.f32 %v6585_v7, %v3068_v56  ;;  %v3214_v3 = vmul.f32 %v6585_v7, %v3070_v57 }
 0x1d7   : > { %3773 = vst [vmem:[%s6632_s18 + $0x100] sm:$0xff] %v4164_v61 }
 0x1d8   : > { %3774 = vst [vmem:[%s6632_s18 + $0x108] sm:$0xff] %v4165_v62  ;;  %v3356_v16 = vadd.f32 %v6669_v54, %v3212_v1  ;;  %v3358_v4 = vadd.f32 %v6669_v54, %v3214_v3 }
 0x1da   : > { %v4179_v6 = vpack.c.bf16 %v3356_v16, %v3355_v63  ;;  %v4180_v9 = vpack.c.bf16 %v3358_v4, %v3357_v0 }
 0x1dc   : > { %3788 = vst [vmem:[%s6632_s18 + $0x178] sm:$0xff] %v4179_v6  ;;  %3789 = vst [vmem:[%s6632_s18 + $0x180] sm:$0xff] %v4180_v9 }
 0x1e5   : > { %v2060_v10 = vpop.f32.mrb[16].mxu0 }
 0x1e6   : > { %v2149_v11 = vpop.f32.mrb[16].mxu1  ;;  %v2061_v13 = vadd.f32 %v2060_v10, %v6542_v42  ;;  %v2062_v17 = vpop.f32.mrb[17].mxu0 }
 0x1e7   : > { %v2150_v14 = vadd.f32 %v2149_v11, %v6542_v42  ;;  %v2151_v15 = vpop.f32.mrb[17].mxu1  ;;  %v2063_v5 = vadd.f32 %v2062_v17, %v6542_v42 }
 0x1e8   : > { %v2152_v8 = vadd.f32 %v2151_v15, %v6542_v42  ;;  %v2981_v19 = vmax.f32 %v2061_v13, 0.0 }
 0x1e9   : > { %v2983_v18 = vmax.f32 %v2150_v14, 0.0  ;;  %v2982_v20 = vmax.f32 %v2063_v5, 0.0  ;;  %v2066_v22 = vpop.f32.mrb[18].mxu0 }
 0x1ea   : > { %v2984_v21 = vmax.f32 %v2152_v8, 0.0  ;;  %v2155_v23 = vpop.f32.mrb[18].mxu1  ;;  %v3125_v25 = vmul.f32 %v6572_v58, %v2981_v19  ;;  %v2067_v27 = vadd.f32 %v2066_v22, %v6560_v48  ;;  %v2068_v29 = vpop.f32.mrb[19].mxu0 }
 0x1eb   : > { %v3127_v26 = vmul.f32 %v6572_v58, %v2983_v18  ;;  %v2156_v28 = vadd.f32 %v2155_v23, %v6560_v48  ;;  %v2157_v30 = vpop.f32.mrb[19].mxu1  ;;  %v3126_v31 = vmul.f32 %v6572_v58, %v2982_v20  ;;  %v2069_v33 = vadd.f32 %v2068_v29, %v6560_v48 }
 0x1ec   : > { %v3128_v32 = vmul.f32 %v6572_v58, %v2984_v21  ;;  %v2158_v34 = vadd.f32 %v2157_v30, %v6560_v48  ;;  %v3269_v35 = vadd.f32 %v6592_v24, %v3125_v25  ;;  %v3011_v38 = vmax.f32 %v2067_v27, 0.0 }
 0x1ed   : > { %v3271_v37 = vadd.f32 %v6592_v24, %v3127_v26  ;;  %v3013_v39 = vmax.f32 %v2156_v28, 0.0  ;;  %v3270_v40 = vadd.f32 %v6592_v24, %v3126_v31  ;;  %v3012_v44 = vmax.f32 %v2069_v33, 0.0  ;;  %v2072_v47 = vpop.f32.mrb[20].mxu0 }
 0x1ee   : > { %v3272_v41 = vadd.f32 %v6592_v24, %v3128_v32  ;;  %v3014_v45 = vmax.f32 %v2158_v34, 0.0  ;;  %v2161_v49 = vpop.f32.mrb[20].mxu1  ;;  %v3155_v50 = vmul.f32 %v6574_v59, %v3011_v38  ;;  %v2073_v52 = vadd.f32 %v2072_v47, %v6550_v43  ;;  %v2074_v60 = vpop.f32.mrb[21].mxu0 }
 0x1ef   : > { %v3157_v51 = vmul.f32 %v6574_v59, %v3013_v39  ;;  %v2162_v55 = vadd.f32 %v2161_v49, %v6550_v43  ;;  %v2163_v12 = vpop.f32.mrb[21].mxu1  ;;  %v4136_v56 = vpack.c.bf16 %v3270_v40, %v3269_v35  ;;  %v3156_v61 = vmul.f32 %v6574_v59, %v3012_v44 }
 0x1f0   : > { %v4137_v57 = vpack.c.bf16 %v3272_v41, %v3271_v37  ;;  %v3158_v62 = vmul.f32 %v6574_v59, %v3014_v45  ;;  %v3299_v63 = vadd.f32 %v6612_v46, %v3155_v50  ;;  %v3041_v1 = vmax.f32 %v2073_v52, 0.0 }
 0x1f1   : > { %v3301_v0 = vadd.f32 %v6612_v46, %v3157_v51  ;;  %v3043_v3 = vmax.f32 %v2162_v55, 0.0  ;;  %3745 = vst [vmem:[%s6632_s18 + $0x20] sm:$0xff] %v4136_v56  ;;  %v3300_v16 = vadd.f32 %v6612_v46, %v3156_v61  ;;  %v2075_v6 = vadd.f32 %v2074_v60, %v6550_v43  ;;  %v2078_v10 = vpop.f32.mrb[22].mxu0 }
 0x1f2   : > { %3746 = vst [vmem:[%s6632_s18 + $0x28] sm:$0xff] %v4137_v57  ;;  %v3302_v4 = vadd.f32 %v6612_v46, %v3158_v62  ;;  %v2164_v9 = vadd.f32 %v2163_v12, %v6550_v43  ;;  %v2167_v11 = vpop.f32.mrb[22].mxu1  ;;  %v3185_v13 = vmul.f32 %v6580_v2, %v3041_v1  ;;  %v2079_v17 = vadd.f32 %v2078_v10, %v6566_v53  ;;  %v2080_v5 = vpop.f32.mrb[23].mxu0 }
 0x1f3   : > { %v3187_v14 = vmul.f32 %v6580_v2, %v3043_v3  ;;  %v2168_v15 = vadd.f32 %v2167_v11, %v6566_v53  ;;  %v2169_v8 = vpop.f32.mrb[23].mxu1  ;;  %v4151_v19 = vpack.c.bf16 %v3300_v16, %v3299_v63  ;;  %v3042_v20 = vmax.f32 %v2075_v6, 0.0 }
 0x1f4   : > { %v4152_v18 = vpack.c.bf16 %v3302_v4, %v3301_v0  ;;  %v3044_v21 = vmax.f32 %v2164_v9, 0.0  ;;  %v3329_v22 = vadd.f32 %v6652_v36, %v3185_v13  ;;  %v3071_v25 = vmax.f32 %v2079_v17, 0.0 }
 0x1f5   : > { %v3331_v23 = vadd.f32 %v6652_v36, %v3187_v14  ;;  %v3073_v26 = vmax.f32 %v2168_v15, 0.0  ;;  %3760 = vst [vmem:[%s6632_s18 + $0x98] sm:$0xff] %v4151_v19  ;;  %v3186_v27 = vmul.f32 %v6580_v2, %v3042_v20  ;;  %v2081_v29 = vadd.f32 %v2080_v5, %v6566_v53 }
 0x1f6   : > { %3761 = vst [vmem:[%s6632_s18 + $0xa0] sm:$0xff] %v4152_v18  ;;  %v3188_v28 = vmul.f32 %v6580_v2, %v3044_v21  ;;  %v2170_v30 = vadd.f32 %v2169_v8, %v6566_v53  ;;  %v3215_v31 = vmul.f32 %v6585_v7, %v3071_v25 }
 0x1f7   : > { %v3217_v32 = vmul.f32 %v6585_v7, %v3073_v26  ;;  %v3330_v33 = vadd.f32 %v6652_v36, %v3186_v27  ;;  %v3072_v35 = vmax.f32 %v2081_v29, 0.0 }
 0x1f8   : > { %v3332_v34 = vadd.f32 %v6652_v36, %v3188_v28  ;;  %v3074_v37 = vmax.f32 %v2170_v30, 0.0  ;;  %v3359_v38 = vadd.f32 %v6669_v54, %v3215_v31 }
 0x1f9   : > { %v3361_v39 = vadd.f32 %v6669_v54, %v3217_v32  ;;  %v4166_v40 = vpack.c.bf16 %v3330_v33, %v3329_v22  ;;  %v3216_v44 = vmul.f32 %v6585_v7, %v3072_v35 }
 0x1fa   : > { %v4167_v41 = vpack.c.bf16 %v3332_v34, %v3331_v23  ;;  %v3218_v45 = vmul.f32 %v6585_v7, %v3074_v37 }
 0x1fb   : > { %3775 = vst [vmem:[%s6632_s18 + $0x110] sm:$0xff] %v4166_v40  ;;  %v3360_v47 = vadd.f32 %v6669_v54, %v3216_v44 }
 0x1fc   : > { %3776 = vst [vmem:[%s6632_s18 + $0x118] sm:$0xff] %v4167_v41  ;;  %v3362_v49 = vadd.f32 %v6669_v54, %v3218_v45 }
 0x1fd   : > { %v4181_v50 = vpack.c.bf16 %v3360_v47, %v3359_v38 }
 0x1fe   : > { %v4182_v51 = vpack.c.bf16 %v3362_v49, %v3361_v39 }
 0x1ff   : > { %3790 = vst [vmem:[%s6632_s18 + $0x188] sm:$0xff] %v4181_v50 }
 0x200   : > { %3791 = vst [vmem:[%s6632_s18 + $0x190] sm:$0xff] %v4182_v51 }
 0x209   : > { %v2238_v52 = vpop.f32.mrb[24].mxu0 }
 0x20a   : > { %v2327_v55 = vpop.f32.mrb[24].mxu1  ;;  %v2239_v60 = vadd.f32 %v2238_v52, %v6542_v42  ;;  %v2240_v56 = vpop.f32.mrb[25].mxu0 }
 0x20b   : > { %v2328_v12 = vadd.f32 %v2327_v55, %v6542_v42  ;;  %v2329_v57 = vpop.f32.mrb[25].mxu1  ;;  %v2241_v61 = vadd.f32 %v2240_v56, %v6542_v42 }
 0x20c   : > { %v2330_v62 = vadd.f32 %v2329_v57, %v6542_v42  ;;  %v2985_v63 = vmax.f32 %v2239_v60, 0.0 }
 0x20d   : > { %v2987_v0 = vmax.f32 %v2328_v12, 0.0  ;;  %v2986_v1 = vmax.f32 %v2241_v61, 0.0  ;;  %v2244_v16 = vpop.f32.mrb[26].mxu0 }
 0x20e   : > { %v2988_v3 = vmax.f32 %v2330_v62, 0.0  ;;  %v2333_v4 = vpop.f32.mrb[26].mxu1  ;;  %v3129_v6 = vmul.f32 %v6572_v58, %v2985_v63  ;;  %v2245_v10 = vadd.f32 %v2244_v16, %v6560_v48  ;;  %v2246_v13 = vpop.f32.mrb[27].mxu0 }
 0x20f   : > { %v3131_v9 = vmul.f32 %v6572_v58, %v2987_v0  ;;  %v2334_v11 = vadd.f32 %v2333_v4, %v6560_v48  ;;  %v2335_v14 = vpop.f32.mrb[27].mxu1  ;;  %v3130_v17 = vmul.f32 %v6572_v58, %v2986_v1  ;;  %v2247_v5 = vadd.f32 %v2246_v13, %v6560_v48 }
 0x210   : > { %v3132_v15 = vmul.f32 %v6572_v58, %v2988_v3  ;;  %v2336_v8 = vadd.f32 %v2335_v14, %v6560_v48  ;;  %v3273_v19 = vadd.f32 %v6592_v24, %v3129_v6  ;;  %v3015_v20 = vmax.f32 %v2245_v10, 0.0 }
 0x211   : > { %v3275_v18 = vadd.f32 %v6592_v24, %v3131_v9  ;;  %v3017_v21 = vmax.f32 %v2334_v11, 0.0  ;;  %v3274_v22 = vadd.f32 %v6592_v24, %v3130_v17  ;;  %v3016_v25 = vmax.f32 %v2247_v5, 0.0  ;;  %v2250_v27 = vpop.f32.mrb[28].mxu0 }
 0x212   : > { %v3276_v23 = vadd.f32 %v6592_v24, %v3132_v15  ;;  %v3018_v26 = vmax.f32 %v2336_v8, 0.0  ;;  %v2339_v28 = vpop.f32.mrb[28].mxu1  ;;  %v3159_v29 = vmul.f32 %v6574_v59, %v3015_v20  ;;  %v2251_v31 = vadd.f32 %v2250_v27, %v6550_v43  ;;  %v2252_v33 = vpop.f32.mrb[29].mxu0 }
 0x213   : > { %v3161_v30 = vmul.f32 %v6574_v59, %v3017_v21  ;;  %v2340_v32 = vadd.f32 %v2339_v28, %v6550_v43  ;;  %v2341_v34 = vpop.f32.mrb[29].mxu1  ;;  %v4138_v35 = vpack.c.bf16 %v3274_v22, %v3273_v19  ;;  %v3160_v38 = vmul.f32 %v6574_v59, %v3016_v25 }
 0x214   : > { %v4139_v37 = vpack.c.bf16 %v3276_v23, %v3275_v18  ;;  %v3162_v39 = vmul.f32 %v6574_v59, %v3018_v26  ;;  %v3303_v40 = vadd.f32 %v6612_v46, %v3159_v29  ;;  %v3045_v44 = vmax.f32 %v2251_v31, 0.0 }
 0x215   : > { %v3305_v41 = vadd.f32 %v6612_v46, %v3161_v30  ;;  %v3047_v45 = vmax.f32 %v2340_v32, 0.0  ;;  %3747 = vst [vmem:[%s6632_s18 + $0x30] sm:$0xff] %v4138_v35  ;;  %v3304_v47 = vadd.f32 %v6612_v46, %v3160_v38  ;;  %v2253_v50 = vadd.f32 %v2252_v33, %v6550_v43  ;;  %v2256_v52 = vpop.f32.mrb[30].mxu0 }
 0x216   : > { %3748 = vst [vmem:[%s6632_s18 + $0x38] sm:$0xff] %v4139_v37  ;;  %v3306_v49 = vadd.f32 %v6612_v46, %v3162_v39  ;;  %v2342_v51 = vadd.f32 %v2341_v34, %v6550_v43  ;;  %v2345_v55 = vpop.f32.mrb[30].mxu1  ;;  %v3189_v60 = vmul.f32 %v6580_v2, %v3045_v44  ;;  %v2257_v56 = vadd.f32 %v2256_v52, %v6566_v53  ;;  %v2258_v61 = vpop.f32.mrb[31].mxu0 }
 0x217   : > { %v3191_v12 = vmul.f32 %v6580_v2, %v3047_v45  ;;  %v2346_v57 = vadd.f32 %v2345_v55, %v6566_v53  ;;  %v2347_v62 = vpop.f32.mrb[31].mxu1  ;;  %v4153_v63 = vpack.c.bf16 %v3304_v47, %v3303_v40  ;;  %v3046_v1 = vmax.f32 %v2253_v50, 0.0 }
 0x218   : > { %v4154_v0 = vpack.c.bf16 %v3306_v49, %v3305_v41  ;;  %v3048_v3 = vmax.f32 %v2342_v51, 0.0  ;;  %v3333_v16 = vadd.f32 %v6652_v36, %v3189_v60  ;;  %v3075_v6 = vmax.f32 %v2257_v56, 0.0 }
 0x219   : > { %v3335_v4 = vadd.f32 %v6652_v36, %v3191_v12  ;;  %v3077_v9 = vmax.f32 %v2346_v57, 0.0  ;;  %3762 = vst [vmem:[%s6632_s18 + $0xa8] sm:$0xff] %v4153_v63  ;;  %v3190_v10 = vmul.f32 %v6580_v2, %v3046_v1  ;;  %v2259_v13 = vadd.f32 %v2258_v61, %v6566_v53 }
 0x21a   : > { %3763 = vst [vmem:[%s6632_s18 + $0xb0] sm:$0xff] %v4154_v0  ;;  %v3192_v11 = vmul.f32 %v6580_v2, %v3048_v3  ;;  %v2348_v14 = vadd.f32 %v2347_v62, %v6566_v53  ;;  %v3219_v17 = vmul.f32 %v6585_v7, %v3075_v6 }
 0x21b   : > { %v3221_v15 = vmul.f32 %v6585_v7, %v3077_v9  ;;  %v3334_v5 = vadd.f32 %v6652_v36, %v3190_v10  ;;  %v3076_v19 = vmax.f32 %v2259_v13, 0.0 }
 0x21c   : > { %v3336_v8 = vadd.f32 %v6652_v36, %v3192_v11  ;;  %v3078_v18 = vmax.f32 %v2348_v14, 0.0  ;;  %v3363_v20 = vadd.f32 %v6669_v54, %v3219_v17 }
 0x21d   : > { %v3365_v21 = vadd.f32 %v6669_v54, %v3221_v15  ;;  %v4168_v22 = vpack.c.bf16 %v3334_v5, %v3333_v16  ;;  %v3220_v25 = vmul.f32 %v6585_v7, %v3076_v19 }
 0x21e   : > { %v4169_v23 = vpack.c.bf16 %v3336_v8, %v3335_v4  ;;  %v3222_v26 = vmul.f32 %v6585_v7, %v3078_v18 }
 0x21f   : > { %3777 = vst [vmem:[%s6632_s18 + $0x120] sm:$0xff] %v4168_v22  ;;  %v3364_v27 = vadd.f32 %v6669_v54, %v3220_v25 }
 0x220   : > { %3778 = vst [vmem:[%s6632_s18 + $0x128] sm:$0xff] %v4169_v23  ;;  %v3366_v28 = vadd.f32 %v6669_v54, %v3222_v26 }
 0x221   : > { %v4183_v29 = vpack.c.bf16 %v3364_v27, %v3363_v20 }
 0x222   : > { %v4184_v30 = vpack.c.bf16 %v3366_v28, %v3365_v21 }
 0x223   : > { %3792 = vst [vmem:[%s6632_s18 + $0x198] sm:$0xff] %v4183_v29 }
 0x224   : > { %3793 = vst [vmem:[%s6632_s18 + $0x1a0] sm:$0xff] %v4184_v30 }
 0x22d   : > { %v2416_v31 = vpop.f32.mrb[32].mxu0 }
 0x22e   : > { %v2505_v32 = vpop.f32.mrb[32].mxu1  ;;  %v2417_v33 = vadd.f32 %v2416_v31, %v6542_v42  ;;  %v2418_v35 = vpop.f32.mrb[33].mxu0 }
 0x22f   : > { %v2506_v34 = vadd.f32 %v2505_v32, %v6542_v42  ;;  %v2507_v37 = vpop.f32.mrb[33].mxu1  ;;  %v2419_v38 = vadd.f32 %v2418_v35, %v6542_v42 }
 0x230   : > { %v2508_v39 = vadd.f32 %v2507_v37, %v6542_v42  ;;  %v2989_v40 = vmax.f32 %v2417_v33, 0.0 }
 0x231   : > { %v2991_v41 = vmax.f32 %v2506_v34, 0.0  ;;  %v2990_v44 = vmax.f32 %v2419_v38, 0.0  ;;  %v2422_v47 = vpop.f32.mrb[34].mxu0 }
 0x232   : > { %v2992_v45 = vmax.f32 %v2508_v39, 0.0  ;;  %v2511_v49 = vpop.f32.mrb[34].mxu1  ;;  %v3133_v50 = vmul.f32 %v6572_v58, %v2989_v40  ;;  %v2423_v52 = vadd.f32 %v2422_v47, %v6560_v48  ;;  %v2424_v60 = vpop.f32.mrb[35].mxu0 }
 0x233   : > { %v3135_v51 = vmul.f32 %v6572_v58, %v2991_v41  ;;  %v2512_v55 = vadd.f32 %v2511_v49, %v6560_v48  ;;  %v2513_v12 = vpop.f32.mrb[35].mxu1  ;;  %v3134_v56 = vmul.f32 %v6572_v58, %v2990_v44  ;;  %v2425_v61 = vadd.f32 %v2424_v60, %v6560_v48 }
 0x234   : > { %v3136_v57 = vmul.f32 %v6572_v58, %v2992_v45  ;;  %v2514_v62 = vadd.f32 %v2513_v12, %v6560_v48  ;;  %v3277_v63 = vadd.f32 %v6592_v24, %v3133_v50  ;;  %v3019_v1 = vmax.f32 %v2423_v52, 0.0 }
 0x235   : > { %v3279_v0 = vadd.f32 %v6592_v24, %v3135_v51  ;;  %v3021_v3 = vmax.f32 %v2512_v55, 0.0  ;;  %v3278_v16 = vadd.f32 %v6592_v24, %v3134_v56  ;;  %v3020_v6 = vmax.f32 %v2425_v61, 0.0  ;;  %v2428_v10 = vpop.f32.mrb[36].mxu0 }
 0x236   : > { %v3280_v4 = vadd.f32 %v6592_v24, %v3136_v57  ;;  %v3022_v9 = vmax.f32 %v2514_v62, 0.0  ;;  %v2517_v11 = vpop.f32.mrb[36].mxu1  ;;  %v3163_v13 = vmul.f32 %v6574_v59, %v3019_v1  ;;  %v2429_v17 = vadd.f32 %v2428_v10, %v6550_v43  ;;  %v2430_v5 = vpop.f32.mrb[37].mxu0 }
 0x237   : > { %v3165_v14 = vmul.f32 %v6574_v59, %v3021_v3  ;;  %v2518_v15 = vadd.f32 %v2517_v11, %v6550_v43  ;;  %v2519_v8 = vpop.f32.mrb[37].mxu1  ;;  %v4140_v19 = vpack.c.bf16 %v3278_v16, %v3277_v63  ;;  %v3164_v20 = vmul.f32 %v6574_v59, %v3020_v6 }
 0x238   : > { %v4141_v18 = vpack.c.bf16 %v3280_v4, %v3279_v0  ;;  %v3166_v21 = vmul.f32 %v6574_v59, %v3022_v9  ;;  %v3307_v22 = vadd.f32 %v6612_v46, %v3163_v13  ;;  %v3049_v25 = vmax.f32 %v2429_v17, 0.0 }
 0x239   : > { %v3309_v23 = vadd.f32 %v6612_v46, %v3165_v14  ;;  %v3051_v26 = vmax.f32 %v2518_v15, 0.0  ;;  %3749 = vst [vmem:[%s6632_s18 + $0x40] sm:$0xff] %v4140_v19  ;;  %v3308_v27 = vadd.f32 %v6612_v46, %v3164_v20  ;;  %v2431_v29 = vadd.f32 %v2430_v5, %v6550_v43  ;;  %v2434_v31 = vpop.f32.mrb[38].mxu0 }
 0x23a   : > { %3750 = vst [vmem:[%s6632_s18 + $0x48] sm:$0xff] %v4141_v18  ;;  %v3310_v28 = vadd.f32 %v6612_v46, %v3166_v21  ;;  %v2520_v30 = vadd.f32 %v2519_v8, %v6550_v43  ;;  %v2523_v32 = vpop.f32.mrb[38].mxu1  ;;  %v3193_v33 = vmul.f32 %v6580_v2, %v3049_v25  ;;  %v2435_v35 = vadd.f32 %v2434_v31, %v6566_v53  ;;  %v2436_v38 = vpop.f32.mrb[39].mxu0 }
 0x23b   : > { %v3195_v34 = vmul.f32 %v6580_v2, %v3051_v26  ;;  %v2524_v37 = vadd.f32 %v2523_v32, %v6566_v53  ;;  %v2525_v39 = vpop.f32.mrb[39].mxu1  ;;  %v4155_v40 = vpack.c.bf16 %v3308_v27, %v3307_v22  ;;  %v3050_v44 = vmax.f32 %v2431_v29, 0.0 }
 0x23c   : > { %v4156_v41 = vpack.c.bf16 %v3310_v28, %v3309_v23  ;;  %v3052_v45 = vmax.f32 %v2520_v30, 0.0  ;;  %v3337_v47 = vadd.f32 %v6652_v36, %v3193_v33  ;;  %v3079_v50 = vmax.f32 %v2435_v35, 0.0 }
 0x23d   : > { %v3339_v49 = vadd.f32 %v6652_v36, %v3195_v34  ;;  %v3081_v51 = vmax.f32 %v2524_v37, 0.0  ;;  %3764 = vst [vmem:[%s6632_s18 + $0xb8] sm:$0xff] %v4155_v40  ;;  %v3194_v52 = vmul.f32 %v6580_v2, %v3050_v44  ;;  %v2437_v60 = vadd.f32 %v2436_v38, %v6566_v53 }
 0x23e   : > { %3765 = vst [vmem:[%s6632_s18 + $0xc0] sm:$0xff] %v4156_v41  ;;  %v3196_v55 = vmul.f32 %v6580_v2, %v3052_v45  ;;  %v2526_v12 = vadd.f32 %v2525_v39, %v6566_v53  ;;  %v3223_v56 = vmul.f32 %v6585_v7, %v3079_v50 }
 0x23f   : > { %v3225_v57 = vmul.f32 %v6585_v7, %v3081_v51  ;;  %v3338_v61 = vadd.f32 %v6652_v36, %v3194_v52  ;;  %v3080_v63 = vmax.f32 %v2437_v60, 0.0 }
 0x240   : > { %v3340_v62 = vadd.f32 %v6652_v36, %v3196_v55  ;;  %v3082_v0 = vmax.f32 %v2526_v12, 0.0  ;;  %v3367_v1 = vadd.f32 %v6669_v54, %v3223_v56 }
 0x241   : > { %v3369_v3 = vadd.f32 %v6669_v54, %v3225_v57  ;;  %v4170_v16 = vpack.c.bf16 %v3338_v61, %v3337_v47  ;;  %v3224_v6 = vmul.f32 %v6585_v7, %v3080_v63 }
 0x242   : > { %v4171_v4 = vpack.c.bf16 %v3340_v62, %v3339_v49  ;;  %v3226_v9 = vmul.f32 %v6585_v7, %v3082_v0 }
 0x243   : > { %3779 = vst [vmem:[%s6632_s18 + $0x130] sm:$0xff] %v4170_v16  ;;  %v3368_v10 = vadd.f32 %v6669_v54, %v3224_v6 }
 0x244   : > { %3780 = vst [vmem:[%s6632_s18 + $0x138] sm:$0xff] %v4171_v4  ;;  %v3370_v11 = vadd.f32 %v6669_v54, %v3226_v9 }
 0x245   : > { %v4185_v13 = vpack.c.bf16 %v3368_v10, %v3367_v1 }
 0x246   : > { %v4186_v14 = vpack.c.bf16 %v3370_v11, %v3369_v3 }
 0x247   : > { %3794 = vst [vmem:[%s6632_s18 + $0x1a8] sm:$0xff] %v4185_v13 }
 0x248   : > { %3795 = vst [vmem:[%s6632_s18 + $0x1b0] sm:$0xff] %v4186_v14 }
 0x251   : > { %v2594_v17 = vpop.f32.mrb[40].mxu0 }
 0x252   : > { %v2683_v15 = vpop.f32.mrb[40].mxu1  ;;  %v2595_v5 = vadd.f32 %v2594_v17, %v6542_v42  ;;  %v2596_v19 = vpop.f32.mrb[41].mxu0 }
 0x253   : > { %v2684_v8 = vadd.f32 %v2683_v15, %v6542_v42  ;;  %v2685_v18 = vpop.f32.mrb[41].mxu1  ;;  %v2597_v20 = vadd.f32 %v2596_v19, %v6542_v42 }
 0x254   : > { %v2686_v21 = vadd.f32 %v2685_v18, %v6542_v42  ;;  %v2993_v22 = vmax.f32 %v2595_v5, 0.0 }
 0x255   : > { %v2995_v23 = vmax.f32 %v2684_v8, 0.0  ;;  %v2994_v25 = vmax.f32 %v2597_v20, 0.0  ;;  %v2600_v27 = vpop.f32.mrb[42].mxu0 }
 0x256   : > { %v2996_v26 = vmax.f32 %v2686_v21, 0.0  ;;  %v2689_v28 = vpop.f32.mrb[42].mxu1  ;;  %v3137_v29 = vmul.f32 %v6572_v58, %v2993_v22  ;;  %v2601_v31 = vadd.f32 %v2600_v27, %v6560_v48  ;;  %v2602_v33 = vpop.f32.mrb[43].mxu0 }
 0x257   : > { %v3139_v30 = vmul.f32 %v6572_v58, %v2995_v23  ;;  %v2690_v32 = vadd.f32 %v2689_v28, %v6560_v48  ;;  %v2691_v34 = vpop.f32.mrb[43].mxu1  ;;  %v3138_v35 = vmul.f32 %v6572_v58, %v2994_v25  ;;  %v2603_v38 = vadd.f32 %v2602_v33, %v6560_v48 }
 0x258   : > { %v3140_v37 = vmul.f32 %v6572_v58, %v2996_v26  ;;  %v2692_v39 = vadd.f32 %v2691_v34, %v6560_v48  ;;  %v3281_v40 = vadd.f32 %v6592_v24, %v3137_v29  ;;  %v3023_v44 = vmax.f32 %v2601_v31, 0.0 }
 0x259   : > { %v3283_v41 = vadd.f32 %v6592_v24, %v3139_v30  ;;  %v3025_v45 = vmax.f32 %v2690_v32, 0.0  ;;  %v3282_v47 = vadd.f32 %v6592_v24, %v3138_v35  ;;  %v3024_v50 = vmax.f32 %v2603_v38, 0.0  ;;  %v2606_v52 = vpop.f32.mrb[44].mxu0 }
 0x25a   : > { %v3284_v49 = vadd.f32 %v6592_v24, %v3140_v37  ;;  %v3026_v51 = vmax.f32 %v2692_v39, 0.0  ;;  %v2695_v55 = vpop.f32.mrb[44].mxu1  ;;  %v3167_v60 = vmul.f32 %v6574_v59, %v3023_v44  ;;  %v2607_v56 = vadd.f32 %v2606_v52, %v6550_v43  ;;  %v2608_v61 = vpop.f32.mrb[45].mxu0 }
 0x25b   : > { %v3169_v12 = vmul.f32 %v6574_v59, %v3025_v45  ;;  %v2696_v57 = vadd.f32 %v2695_v55, %v6550_v43  ;;  %v2697_v62 = vpop.f32.mrb[45].mxu1  ;;  %v4142_v63 = vpack.c.bf16 %v3282_v47, %v3281_v40  ;;  %v3168_v1 = vmul.f32 %v6574_v59, %v3024_v50 }
 0x25c   : > { %v4143_v0 = vpack.c.bf16 %v3284_v49, %v3283_v41  ;;  %v3170_v3 = vmul.f32 %v6574_v59, %v3026_v51  ;;  %v3311_v16 = vadd.f32 %v6612_v46, %v3167_v60  ;;  %v3053_v6 = vmax.f32 %v2607_v56, 0.0 }
 0x25d   : > { %v3313_v4 = vadd.f32 %v6612_v46, %v3169_v12  ;;  %v3055_v9 = vmax.f32 %v2696_v57, 0.0  ;;  %3751 = vst [vmem:[%s6632_s18 + $0x50] sm:$0xff] %v4142_v63  ;;  %v3312_v10 = vadd.f32 %v6612_v46, %v3168_v1  ;;  %v2609_v13 = vadd.f32 %v2608_v61, %v6550_v43  ;;  %v2612_v17 = vpop.f32.mrb[46].mxu0 }
 0x25e   : > { %3752 = vst [vmem:[%s6632_s18 + $0x58] sm:$0xff] %v4143_v0  ;;  %v3314_v11 = vadd.f32 %v6612_v46, %v3170_v3  ;;  %v2698_v14 = vadd.f32 %v2697_v62, %v6550_v43  ;;  %v2701_v15 = vpop.f32.mrb[46].mxu1  ;;  %v3197_v5 = vmul.f32 %v6580_v2, %v3053_v6  ;;  %v2613_v19 = vadd.f32 %v2612_v17, %v6566_v53  ;;  %v2614_v20 = vpop.f32.mrb[47].mxu0 }
 0x25f   : > { %v3199_v8 = vmul.f32 %v6580_v2, %v3055_v9  ;;  %v2702_v18 = vadd.f32 %v2701_v15, %v6566_v53  ;;  %v2703_v21 = vpop.f32.mrb[47].mxu1  ;;  %v4157_v22 = vpack.c.bf16 %v3312_v10, %v3311_v16  ;;  %v3054_v25 = vmax.f32 %v2609_v13, 0.0 }
 0x260   : > { %v4158_v23 = vpack.c.bf16 %v3314_v11, %v3313_v4  ;;  %v3056_v26 = vmax.f32 %v2698_v14, 0.0  ;;  %v3341_v27 = vadd.f32 %v6652_v36, %v3197_v5  ;;  %v3083_v29 = vmax.f32 %v2613_v19, 0.0 }
 0x261   : > { %v3343_v28 = vadd.f32 %v6652_v36, %v3199_v8  ;;  %v3085_v30 = vmax.f32 %v2702_v18, 0.0  ;;  %3766 = vst [vmem:[%s6632_s18 + $0xc8] sm:$0xff] %v4157_v22  ;;  %v3198_v31 = vmul.f32 %v6580_v2, %v3054_v25  ;;  %v2615_v33 = vadd.f32 %v2614_v20, %v6566_v53 }
 0x262   : > { %3767 = vst [vmem:[%s6632_s18 + $0xd0] sm:$0xff] %v4158_v23  ;;  %v3200_v32 = vmul.f32 %v6580_v2, %v3056_v26  ;;  %v2704_v34 = vadd.f32 %v2703_v21, %v6566_v53  ;;  %v3227_v35 = vmul.f32 %v6585_v7, %v3083_v29 }
 0x263   : > { %v3229_v37 = vmul.f32 %v6585_v7, %v3085_v30  ;;  %v3342_v38 = vadd.f32 %v6652_v36, %v3198_v31  ;;  %v3084_v40 = vmax.f32 %v2615_v33, 0.0 }
 0x264   : > { %v3344_v39 = vadd.f32 %v6652_v36, %v3200_v32  ;;  %v3086_v41 = vmax.f32 %v2704_v34, 0.0  ;;  %v3371_v44 = vadd.f32 %v6669_v54, %v3227_v35 }
 0x265   : > { %v3373_v45 = vadd.f32 %v6669_v54, %v3229_v37  ;;  %v4172_v47 = vpack.c.bf16 %v3342_v38, %v3341_v27  ;;  %v3228_v50 = vmul.f32 %v6585_v7, %v3084_v40 }
 0x266   : > { %v4173_v49 = vpack.c.bf16 %v3344_v39, %v3343_v28  ;;  %v3230_v51 = vmul.f32 %v6585_v7, %v3086_v41 }
 0x267   : > { %3781 = vst [vmem:[%s6632_s18 + $0x140] sm:$0xff] %v4172_v47  ;;  %v3372_v52 = vadd.f32 %v6669_v54, %v3228_v50 }
 0x268   : > { %3782 = vst [vmem:[%s6632_s18 + $0x148] sm:$0xff] %v4173_v49  ;;  %v3374_v55 = vadd.f32 %v6669_v54, %v3230_v51 }
 0x269   : > { %v4187_v60 = vpack.c.bf16 %v3372_v52, %v3371_v44 }
 0x26a   : > { %v4188_v12 = vpack.c.bf16 %v3374_v55, %v3373_v45 }
 0x26b   : > { %3796 = vst [vmem:[%s6632_s18 + $0x1b8] sm:$0xff] %v4187_v60 }
 0x26c   : > { %3797 = vst [vmem:[%s6632_s18 + $0x1c0] sm:$0xff] %v4188_v12 }
 0x275   : > { %v2772_v56 = vpop.f32.mrb[48].mxu0 }
 0x276   : > { %v2861_v57 = vpop.f32.mrb[48].mxu1  ;;  %v2773_v61 = vadd.f32 %v2772_v56, %v6542_v42  ;;  %v2774_v63 = vpop.f32.mrb[49].mxu0 }
 0x277   : > { %v2862_v62 = vadd.f32 %v2861_v57, %v6542_v42  ;;  %v2863_v0 = vpop.f32.mrb[49].mxu1  ;;  %v2775_v1 = vadd.f32 %v2774_v63, %v6542_v42 }
 0x278   : > { %v2864_v3 = vadd.f32 %v2863_v0, %v6542_v42  ;;  %v2997_v16 = vmax.f32 %v2773_v61, 0.0 }
 0x279   : > { %v2999_v4 = vmax.f32 %v2862_v62, 0.0  ;;  %v2998_v6 = vmax.f32 %v2775_v1, 0.0  ;;  %v2778_v10 = vpop.f32.mrb[50].mxu0 }
 0x27a   : > { %v3000_v9 = vmax.f32 %v2864_v3, 0.0  ;;  %v2867_v11 = vpop.f32.mrb[50].mxu1  ;;  %v3141_v13 = vmul.f32 %v6572_v58, %v2997_v16  ;;  %v2779_v17 = vadd.f32 %v2778_v10, %v6560_v48  ;;  %v2780_v5 = vpop.f32.mrb[51].mxu0 }
 0x27b   : > { %v3143_v14 = vmul.f32 %v6572_v58, %v2999_v4  ;;  %v2868_v15 = vadd.f32 %v2867_v11, %v6560_v48  ;;  %v2869_v8 = vpop.f32.mrb[51].mxu1  ;;  %v3142_v19 = vmul.f32 %v6572_v58, %v2998_v6  ;;  %v2781_v20 = vadd.f32 %v2780_v5, %v6560_v48 }
 0x27c   : > { %v3144_v18 = vmul.f32 %v6572_v58, %v3000_v9  ;;  %v2870_v21 = vadd.f32 %v2869_v8, %v6560_v48  ;;  %v3285_v22 = vadd.f32 %v6592_v24, %v3141_v13  ;;  %v3027_v25 = vmax.f32 %v2779_v17, 0.0 }
 0x27d   : > { %v3287_v23 = vadd.f32 %v6592_v24, %v3143_v14  ;;  %v3029_v26 = vmax.f32 %v2868_v15, 0.0  ;;  %v3286_v27 = vadd.f32 %v6592_v24, %v3142_v19  ;;  %v3028_v29 = vmax.f32 %v2781_v20, 0.0  ;;  %v2784_v31 = vpop.f32.mrb[52].mxu0 }
 0x27e   : > { %v3288_v28 = vadd.f32 %v6592_v24, %v3144_v18  ;;  %v3030_v30 = vmax.f32 %v2870_v21, 0.0  ;;  %v2873_v32 = vpop.f32.mrb[52].mxu1  ;;  %v3171_v33 = vmul.f32 %v6574_v59, %v3027_v25  ;;  %v2785_v35 = vadd.f32 %v2784_v31, %v6550_v43  ;;  %v2786_v38 = vpop.f32.mrb[53].mxu0 }
 0x27f   : > { %v3173_v34 = vmul.f32 %v6574_v59, %v3029_v26  ;;  %v2874_v37 = vadd.f32 %v2873_v32, %v6550_v43  ;;  %v2875_v39 = vpop.f32.mrb[53].mxu1  ;;  %v4144_v40 = vpack.c.bf16 %v3286_v27, %v3285_v22  ;;  %v3172_v44 = vmul.f32 %v6574_v59, %v3028_v29 }
 0x280   : > { %v4145_v41 = vpack.c.bf16 %v3288_v28, %v3287_v23  ;;  %v3174_v45 = vmul.f32 %v6574_v59, %v3030_v30  ;;  %v3315_v47 = vadd.f32 %v6612_v46, %v3171_v33  ;;  %v3057_v50 = vmax.f32 %v2785_v35, 0.0 }
 0x281   : > { %v3317_v49 = vadd.f32 %v6612_v46, %v3173_v34  ;;  %v3059_v51 = vmax.f32 %v2874_v37, 0.0  ;;  %3753 = vst [vmem:[%s6632_s18 + $0x60] sm:$0xff] %v4144_v40  ;;  %v3316_v52 = vadd.f32 %v6612_v46, %v3172_v44  ;;  %v2787_v60 = vadd.f32 %v2786_v38, %v6550_v43  ;;  %v2790_v56 = vpop.f32.mrb[54].mxu0 }
 0x282   : > { %3754 = vst [vmem:[%s6632_s18 + $0x68] sm:$0xff] %v4145_v41  ;;  %v3318_v55 = vadd.f32 %v6612_v46, %v3174_v45  ;;  %v2876_v12 = vadd.f32 %v2875_v39, %v6550_v43  ;;  %v2879_v57 = vpop.f32.mrb[54].mxu1  ;;  %v3201_v61 = vmul.f32 %v6580_v2, %v3057_v50  ;;  %v2791_v63 = vadd.f32 %v2790_v56, %v6566_v53  ;;  %v2792_v1 = vpop.f32.mrb[55].mxu0 }
 0x283   : > { %v3203_v62 = vmul.f32 %v6580_v2, %v3059_v51  ;;  %v2880_v0 = vadd.f32 %v2879_v57, %v6566_v53  ;;  %v2881_v3 = vpop.f32.mrb[55].mxu1  ;;  %v4159_v16 = vpack.c.bf16 %v3316_v52, %v3315_v47  ;;  %v3058_v6 = vmax.f32 %v2787_v60, 0.0 }
 0x284   : > { %v4160_v4 = vpack.c.bf16 %v3318_v55, %v3317_v49  ;;  %v3060_v9 = vmax.f32 %v2876_v12, 0.0  ;;  %v3345_v10 = vadd.f32 %v6652_v36, %v3201_v61  ;;  %v3087_v13 = vmax.f32 %v2791_v63, 0.0 }
 0x285   : > { %v3347_v11 = vadd.f32 %v6652_v36, %v3203_v62  ;;  %v3089_v14 = vmax.f32 %v2880_v0, 0.0  ;;  %3768 = vst [vmem:[%s6632_s18 + $0xd8] sm:$0xff] %v4159_v16  ;;  %v3202_v17 = vmul.f32 %v6580_v2, %v3058_v6  ;;  %v2793_v5 = vadd.f32 %v2792_v1, %v6566_v53 }
 0x286   : > { %3769 = vst [vmem:[%s6632_s18 + $0xe0] sm:$0xff] %v4160_v4  ;;  %v3204_v15 = vmul.f32 %v6580_v2, %v3060_v9  ;;  %v2882_v8 = vadd.f32 %v2881_v3, %v6566_v53  ;;  %v3231_v19 = vmul.f32 %v6585_v7, %v3087_v13 }
 0x287   : > { %v3233_v18 = vmul.f32 %v6585_v7, %v3089_v14  ;;  %v3346_v20 = vadd.f32 %v6652_v36, %v3202_v17  ;;  %v3088_v22 = vmax.f32 %v2793_v5, 0.0 }
 0x288   : > { %v3348_v21 = vadd.f32 %v6652_v36, %v3204_v15  ;;  %v3090_v23 = vmax.f32 %v2882_v8, 0.0  ;;  %v3375_v25 = vadd.f32 %v6669_v54, %v3231_v19  ;;  %v3831_v19 = vld [vmem:[%s6632_s18 + $0x20] sm:$0xff] (%p5541_p5) }
 0x289   : > { %v3377_v26 = vadd.f32 %v6669_v54, %v3233_v18  ;;  %v4174_v27 = vpack.c.bf16 %v3346_v20, %v3345_v10  ;;  %v3232_v29 = vmul.f32 %v6585_v7, %v3088_v22  ;;  %v3833_v18 = vld [vmem:[%s6632_s18 + $0x28] sm:$0xff] (%p5541_p5)  ;;  %v3835_v20 = vld [vmem:[%s6632_s18 + $0x30] sm:$0xff] (%p5541_p5)  ;;  %v3839_v22 = vld [vmem:[%s6632_s18 + $0x40] sm:$0xff] (%p5541_p5)  ;;  %3832 = vst [vmem:[%s7084_s17 + $0x20] sm:$0xff] (%p5541_p5), %v3831_v19 }
 0x28a   : > { %v4175_v28 = vpack.c.bf16 %v3348_v21, %v3347_v11  ;;  %v3234_v30 = vmul.f32 %v6585_v7, %v3090_v23  ;;  %v3837_v21 = vld [vmem:[%s6632_s18 + $0x38] sm:$0xff] (%p5541_p5)  ;;  %3834 = vst [vmem:[%s7084_s17 + $0x28] sm:$0xff] (%p5541_p5), %v3833_v18  ;;  %3836 = vst [vmem:[%s7084_s17 + $0x30] sm:$0xff] (%p5541_p5), %v3835_v20  ;;  %v3841_v23 = vld [vmem:[%s6632_s18 + $0x48] sm:$0xff] (%p5541_p5) }
 0x28b   : > { %3783 = vst [vmem:[%s6632_s18 + $0x150] sm:$0xff] %v4174_v27  ;;  %v3376_v31 = vadd.f32 %v6669_v54, %v3232_v29  ;;  %3838 = vst [vmem:[%s7084_s17 + $0x38] sm:$0xff] (%p5541_p5), %v3837_v21  ;;  %v3847_v27 = vld [vmem:[%s6632_s18 + $0x60] sm:$0xff] (%p5541_p5) }
 0x28c   : > { %3784 = vst [vmem:[%s6632_s18 + $0x158] sm:$0xff] %v4175_v28  ;;  %v3378_v32 = vadd.f32 %v6669_v54, %v3234_v30  ;;  %3840 = vst [vmem:[%s7084_s17 + $0x40] sm:$0xff] (%p5541_p5), %v3839_v22  ;;  %v3849_v28 = vld [vmem:[%s6632_s18 + $0x68] sm:$0xff] (%p5541_p5)  ;;  %v3853_v30 = vld [vmem:[%s6632_s18 + $0x78] sm:$0xff] (%p5541_p5) }
 0x28d   : > { %v4189_v33 = vpack.c.bf16 %v3376_v31, %v3375_v25  ;;  %v3843_v25 = vld [vmem:[%s6632_s18 + $0x50] sm:$0xff] (%p5541_p5)  ;;  %3842 = vst [vmem:[%s7084_s17 + $0x48] sm:$0xff] (%p5541_p5), %v3841_v23  ;;  %3848 = vst [vmem:[%s7084_s17 + $0x60] sm:$0xff] (%p5541_p5), %v3847_v27  ;;  %v3855_v31 = vld [vmem:[%s6632_s18 + $0x80] sm:$0xff] (%p5541_p5) }
 0x28e   : > { %v4190_v34 = vpack.c.bf16 %v3378_v32, %v3377_v26  ;;  %v3845_v26 = vld [vmem:[%s6632_s18 + $0x58] sm:$0xff] (%p5541_p5)  ;;  %3844 = vst [vmem:[%s7084_s17 + $0x50] sm:$0xff] (%p5541_p5), %v3843_v25  ;;  %3850 = vst [vmem:[%s7084_s17 + $0x68] sm:$0xff] (%p5541_p5), %v3849_v28  ;;  %v3857_v32 = vld [vmem:[%s6632_s18 + $0x88] sm:$0xff] (%p5541_p5) }
 0x28f   : > { %3798 = vst [vmem:[%s6632_s18 + $0x1c8] sm:$0xff] %v4189_v33  ;;  %3846 = vst [vmem:[%s7084_s17 + $0x58] sm:$0xff] (%p5541_p5), %v3845_v26  ;;  %v3859_v33 = vld [vmem:[%s6632_s18 + $0x90] sm:$0xff] (%p5541_p5) }
 0x290   : > { %3799 = vst [vmem:[%s6632_s18 + $0x1d0] sm:$0xff] %v4190_v34  ;;  %3854 = vst [vmem:[%s7084_s17 + $0x168] sm:$0xff] (%p5541_p5), %v3853_v30  ;;  %v3861_v34 = vld [vmem:[%s6632_s18 + $0x98] sm:$0xff] (%p5541_p5) }
 0x291   : > { %3856 = vst [vmem:[%s7084_s17 + $0x170] sm:$0xff] (%p5541_p5), %v3855_v31  ;;  %3858 = vst [vmem:[%s7084_s17 + $0x178] sm:$0xff] (%p5541_p5), %v3857_v32 }
 0x292   : > { %3860 = vst [vmem:[%s7084_s17 + $0x180] sm:$0xff] (%p5541_p5), %v3859_v33  ;;  %3862 = vst [vmem:[%s7084_s17 + $0x188] sm:$0xff] (%p5541_p5), %v3861_v34 }
 0x299   : > { %v2950_v35 = vpop.f32.mrb[56].mxu0 }
 0x29a   : > { %v2962_v37 = vpop.f32.mrb[56].mxu1  ;;  %v2951_v38 = vadd.f32 %v2950_v35, %v6542_v42  ;;  %v2952_v40 = vpop.f32.mrb[57].mxu0  ;;  %v3863_v35 = vld [vmem:[%s6632_s18 + $0xa0] sm:$0xff] (%p5541_p5) }
 0x29b   : > { %v2963_v39 = vadd.f32 %v2962_v37, %v6550_v43  ;;  %v2964_v41 = vpop.f32.mrb[57].mxu1  ;;  %v2953_v44 = vadd.f32 %v2952_v40, %v6542_v42  ;;  %3864 = vst [vmem:[%s7084_s17 + $0x190] sm:$0xff] (%p5541_p5), %v3863_v35  ;;  %v3865_v37 = vld [vmem:[%s6632_s18 + $0xa8] sm:$0xff] (%p5541_p5)  ;;  %v3871_v40 = vld [vmem:[%s6632_s18 + $0xc0] sm:$0xff] (%p5541_p5) }
 0x29c   : > { %v2965_v45 = vadd.f32 %v2964_v41, %v6550_v43  ;;  %v3001_v47 = vmax.f32 %v2951_v38, 0.0  ;;  %v3867_v38 = vld [vmem:[%s6632_s18 + $0xb0] sm:$0xff] (%p5541_p5)  ;;  %3866 = vst [vmem:[%s7084_s17 + $0x198] sm:$0xff] (%p5541_p5), %v3865_v37  ;;  %v3873_v41 = vld [vmem:[%s6632_s18 + $0xc8] sm:$0xff] (%p5541_p5)  ;;  %3872 = vst [vmem:[%s7084_s17 + $0x1b0] sm:$0xff] (%p5541_p5), %v3871_v40 }
 0x29d   : > { %v3061_v49 = vmax.f32 %v2963_v39, 0.0  ;;  %v3002_v50 = vmax.f32 %v2953_v44, 0.0  ;;  %v2956_v52 = vpop.f32.mrb[58].mxu0  ;;  %v3869_v39 = vld [vmem:[%s6632_s18 + $0xb8] sm:$0xff] (%p5541_p5)  ;;  %3868 = vst [vmem:[%s7084_s17 + $0x1a0] sm:$0xff] (%p5541_p5), %v3867_v38  ;;  %v3875_v44 = vld [vmem:[%s6632_s18 + $0xd0] sm:$0xff] (%p5541_p5) }
 0x29e   : > { %v3062_v51 = vmax.f32 %v2965_v45, 0.0  ;;  %v2968_v55 = vpop.f32.mrb[58].mxu1  ;;  %v3145_v60 = vmul.f32 %v6572_v58, %v3001_v47  ;;  %v2957_v56 = vadd.f32 %v2956_v52, %v6560_v48  ;;  %v2958_v61 = vpop.f32.mrb[59].mxu0  ;;  %3870 = vst [vmem:[%s7084_s17 + $0x1a8] sm:$0xff] (%p5541_p5), %v3869_v39  ;;  %3874 = vst [vmem:[%s7084_s17 + $0x1b8] sm:$0xff] (%p5541_p5), %v3873_v41  ;;  %v3877_v45 = vld [vmem:[%s6632_s18 + $0xd8] sm:$0xff] (%p5541_p5) }
 0x29f   : > { %v3205_v12 = vmul.f32 %v6580_v2, %v3061_v49  ;;  %v2969_v57 = vadd.f32 %v2968_v55, %v6566_v53  ;;  %v2970_v62 = vpop.f32.mrb[59].mxu1  ;;  %v3146_v42 = vmul.f32 %v6572_v58, %v3002_v50  ;;  %v2959_v63 = vadd.f32 %v2958_v61, %v6560_v48  ;;  %3876 = vst [vmem:[%s7084_s17 + $0x1c0] sm:$0xff] (%p5541_p5), %v3875_v44  ;;  %v3879_v47 = vld [vmem:[%s6632_s18 + $0xe0] sm:$0xff] (%p5541_p5)  ;;  %v3883_v50 = vld [vmem:[%s6632_s18 + $0xf0] sm:$0xff] (%p5541_p5)  ;;  %v3889_v55 = vld [vmem:[%s6632_s18 + $0x108] sm:$0xff] (%p5541_p5) }
 0x2a0   : > { %v3206_v43 = vmul.f32 %v6580_v2, %v3062_v51  ;;  %v2971_v0 = vadd.f32 %v2970_v62, %v6566_v53  ;;  %v3289_v1 = vadd.f32 %v6592_v24, %v3145_v60  ;;  %v3031_v16 = vmax.f32 %v2957_v56, 0.0  ;;  %3878 = vst [vmem:[%s7084_s17 + $0x1c8] sm:$0xff] (%p5541_p5), %v3877_v45  ;;  %3880 = vst [vmem:[%s7084_s17 + $0x1d0] sm:$0xff] (%p5541_p5), %v3879_v47  ;;  %v3885_v51 = vld [vmem:[%s6632_s18 + $0xf8] sm:$0xff] (%p5541_p5)  ;;  %v3887_v52 = vld [vmem:[%s6632_s18 + $0x100] sm:$0xff] (%p5541_p5) }
 0x2a1   : > { %v3349_v3 = vadd.f32 %v6652_v36, %v3205_v12  ;;  %v3091_v4 = vmax.f32 %v2969_v57, 0.0  ;;  %v3290_v6 = vadd.f32 %v6592_v24, %v3146_v42  ;;  %v3032_v10 = vmax.f32 %v2959_v63, 0.0  ;;  %3884 = vst [vmem:[%s7084_s17 + $0x2d0] sm:$0xff] (%p5541_p5), %v3883_v50  ;;  %3886 = vst [vmem:[%s7084_s17 + $0x2d8] sm:$0xff] (%p5541_p5), %v3885_v51  ;;  %v3891_v60 = vld [vmem:[%s6632_s18 + $0x110] sm:$0xff] (%p5541_p5)  ;;  %v3893_v12 = vld [vmem:[%s6632_s18 + $0x118] sm:$0xff] (%p5541_p5) }
 0x2a2   : > { %v3350_v9 = vadd.f32 %v6652_v36, %v3206_v43  ;;  %v3092_v58 = vmax.f32 %v2971_v0, 0.0  ;;  %v3175_v48 = vmul.f32 %v6574_v59, %v3031_v16  ;;  %3888 = vst [vmem:[%s7084_s17 + $0x2e0] sm:$0xff] (%p5541_p5), %v3887_v52  ;;  %3890 = vst [vmem:[%s7084_s17 + $0x2e8] sm:$0xff] (%p5541_p5), %v3889_v55  ;;  %v3895_v56 = vld [vmem:[%s6632_s18 + $0x120] sm:$0xff] (%p5541_p5)  ;;  %v3897_v57 = vld [vmem:[%s6632_s18 + $0x128] sm:$0xff] (%p5541_p5) }
 0x2a3   : > { %v3235_v53 = vmul.f32 %v6585_v7, %v3091_v4  ;;  %v4146_v2 = vpack.c.bf16 %v3290_v6, %v3289_v1  ;;  %v3176_v13 = vmul.f32 %v6574_v59, %v3032_v10  ;;  %v3823_v59 = vld [vmem:[%s6632_s18] sm:$0xff] (%p5541_p5)  ;;  %3892 = vst [vmem:[%s7084_s17 + $0x2f0] sm:$0xff] (%p5541_p5), %v3891_v60  ;;  %3894 = vst [vmem:[%s7084_s17 + $0x2f8] sm:$0xff] (%p5541_p5), %v3893_v12  ;;  %v3899_v61 = vld [vmem:[%s6632_s18 + $0x130] sm:$0xff] (%p5541_p5) }
 0x2a4   : > { %v4176_v11 = vpack.c.bf16 %v3350_v9, %v3349_v3  ;;  %v3236_v14 = vmul.f32 %v6585_v7, %v3092_v58  ;;  %v3319_v17 = vadd.f32 %v6612_v46, %v3175_v48  ;;  %3807 = sbr.rel (!%p5541_p5) target bundleno = 693 (0x2b5), region = 67  ;;  %v3825_v7 = vld [vmem:[%s6632_s18 + $0x8] sm:$0xff] (%p5541_p5)  ;;  %3824 = vst [vmem:[%s7084_s17] sm:$0xff] (%p5541_p5), %v3823_v59  ;;  %3896 = vst [vmem:[%s7084_s17 + $0x300] sm:$0xff] (%p5541_p5), %v3895_v56  ;;  %v3901_v62 = vld [vmem:[%s6632_s18 + $0x138] sm:$0xff] (%p5541_p5) }
 0x2a5   : > { %v3379_v24 = vadd.f32 %v6669_v54, %v3235_v53  ;;  %3755 = vst [vmem:[%s6632_s18 + $0x70] sm:$0xff] %v4146_v2  ;;  %v3320_v36 = vadd.f32 %v6612_v46, %v3176_v13  ;;  %v3827_v46 = vld [vmem:[%s6632_s18 + $0x10] sm:$0xff] (%p5541_p5)  ;;  %3826 = vst [vmem:[%s7084_s17 + $0x8] sm:$0xff] (%p5541_p5), %v3825_v7  ;;  %v3903_v42 = vld [vmem:[%s6632_s18 + $0x140] sm:$0xff] (%p5541_p5) }
 0x2a6   : > { %3785 = vst [vmem:[%s6632_s18 + $0x160] sm:$0xff] %v4176_v11  ;;  %v3380_v15 = vadd.f32 %v6669_v54, %v3236_v14  ;;  %v3829_v54 = vld [vmem:[%s6632_s18 + $0x18] sm:$0xff] (%p5541_p5)  ;;  %3828 = vst [vmem:[%s7084_s17 + $0x10] sm:$0xff] (%p5541_p5), %v3827_v46  ;;  %v3905_v43 = vld [vmem:[%s6632_s18 + $0x148] sm:$0xff] (%p5541_p5) }
 0x2a7   : > { %v4161_v5 = vpack.c.bf16 %v3320_v36, %v3319_v17  ;;  %3830 = vst [vmem:[%s7084_s17 + $0x18] sm:$0xff] (%p5541_p5), %v3829_v54  ;;  %3898 = vst [vmem:[%s7084_s17 + $0x308] sm:$0xff] (%p5541_p5), %v3897_v57  ;;  %v3907_v63 = vld [vmem:[%s6632_s18 + $0x150] sm:$0xff] (%p5541_p5)  ;;  %v3909_v0 = vld [vmem:[%s6632_s18 + $0x158] sm:$0xff] (%p5541_p5) }
 0x2a8   : > { %v4191_v8 = vpack.c.bf16 %v3380_v15, %v3379_v24  ;;  %3900 = vst [vmem:[%s7084_s17 + $0x310] sm:$0xff] (%p5541_p5), %v3899_v61  ;;  %3902 = vst [vmem:[%s7084_s17 + $0x318] sm:$0xff] (%p5541_p5), %v3901_v62  ;;  %v3913_v3 = vld [vmem:[%s6632_s18 + $0x168] sm:$0xff] (%p5541_p5)  ;;  %v3915_v16 = vld [vmem:[%s6632_s18 + $0x170] sm:$0xff] (%p5541_p5) }
 0x2a9   : > { %3770 = vst [vmem:[%s6632_s18 + $0xe8] sm:$0xff] %v4161_v5  ;;  %3904 = vst [vmem:[%s7084_s17 + $0x320] sm:$0xff] (%p5541_p5), %v3903_v42  ;;  %v3917_v4 = vld [vmem:[%s6632_s18 + $0x178] sm:$0xff] (%p5541_p5)  ;;  %v3919_v6 = vld [vmem:[%s6632_s18 + $0x180] sm:$0xff] (%p5541_p5) }
 0x2aa   : > { %3800 = vst [vmem:[%s6632_s18 + $0x1d8] sm:$0xff] %v4191_v8  ;;  %3906 = vst [vmem:[%s7084_s17 + $0x328] sm:$0xff] (%p5541_p5), %v3905_v43  ;;  %v3921_v9 = vld [vmem:[%s6632_s18 + $0x188] sm:$0xff] (%p5541_p5)  ;;  %v3923_v10 = vld [vmem:[%s6632_s18 + $0x190] sm:$0xff] (%p5541_p5) }
 0x2ab   : > { %3908 = vst [vmem:[%s7084_s17 + $0x330] sm:$0xff] %v3907_v63  ;;  %3910 = vst [vmem:[%s7084_s17 + $0x338] sm:$0xff] %v3909_v0  ;;  %v3925_v58 = vld [vmem:[%s6632_s18 + $0x198] sm:$0xff]  ;;  %v3927_v48 = vld [vmem:[%s6632_s18 + $0x1a0] sm:$0xff] }
 0x2ac   : > { %v3851_v29 = vld [vmem:[%s6632_s18 + $0x70] sm:$0xff]  ;;  %3914 = vst [vmem:[%s7084_s17 + $0x438] sm:$0xff] %v3913_v3  ;;  %3916 = vst [vmem:[%s7084_s17 + $0x440] sm:$0xff] %v3915_v16  ;;  %v3929_v53 = vld [vmem:[%s6632_s18 + $0x1a8] sm:$0xff] }
 0x2ad   : > { %3852 = vst [vmem:[%s7084_s17 + $0x70] sm:$0xff] %v3851_v29  ;;  %v3911_v1 = vld [vmem:[%s6632_s18 + $0x160] sm:$0xff]  ;;  %3918 = vst [vmem:[%s7084_s17 + $0x448] sm:$0xff] %v3917_v4  ;;  %v3931_v2 = vld [vmem:[%s6632_s18 + $0x1b0] sm:$0xff] }
 0x2ae   : > { %3912 = vst [vmem:[%s7084_s17 + $0x340] sm:$0xff] %v3911_v1  ;;  %3920 = vst [vmem:[%s7084_s17 + $0x450] sm:$0xff] %v3919_v6  ;;  %v3933_v11 = vld [vmem:[%s6632_s18 + $0x1b8] sm:$0xff]  ;;  %v3935_v13 = vld [vmem:[%s6632_s18 + $0x1c0] sm:$0xff] }
 0x2af   : > { %3922 = vst [vmem:[%s7084_s17 + $0x458] sm:$0xff] %v3921_v9  ;;  %3924 = vst [vmem:[%s7084_s17 + $0x460] sm:$0xff] %v3923_v10  ;;  %v3937_v14 = vld [vmem:[%s6632_s18 + $0x1c8] sm:$0xff]  ;;  %v3939_v17 = vld [vmem:[%s6632_s18 + $0x1d0] sm:$0xff] }
 0x2b0   : > { %v3881_v49 = vld [vmem:[%s6632_s18 + $0xe8] sm:$0xff]  ;;  %3926 = vst [vmem:[%s7084_s17 + $0x468] sm:$0xff] %v3925_v58  ;;  %3928 = vst [vmem:[%s7084_s17 + $0x470] sm:$0xff] %v3927_v48 }
 0x2b1   : > { %3882 = vst [vmem:[%s7084_s17 + $0x1d8] sm:$0xff] %v3881_v49  ;;  %3930 = vst [vmem:[%s7084_s17 + $0x478] sm:$0xff] %v3929_v53  ;;  %v3941_v24 = vld [vmem:[%s6632_s18 + $0x1d8] sm:$0xff] }
 0x2b2   : > { %3932 = vst [vmem:[%s7084_s17 + $0x480] sm:$0xff] %v3931_v2  ;;  %3934 = vst [vmem:[%s7084_s17 + $0x488] sm:$0xff] %v3933_v11 }
 0x2b3   : > { %3936 = vst [vmem:[%s7084_s17 + $0x490] sm:$0xff] %v3935_v13  ;;  %3938 = vst [vmem:[%s7084_s17 + $0x498] sm:$0xff] %v3937_v14 }
 0x2b4   : > { %3940 = vst [vmem:[%s7084_s17 + $0x4a0] sm:$0xff] %v3939_v17  ;;  %3942 = vst [vmem:[%s7084_s17 + $0x4a8] sm:$0xff] %v3941_v24 }
 0x2b5 PF: > { %p12_p10 = scmp.ge.s32.totalorder %s5528_s22, 5   ;;  %s7217_s18 = smov %s5474_s19 }
 0x2b6   : > { %s7218_s19 = smov %s5539_s25  ;;  %s7219_s20 = smov %s5528_s22 }
 0x2b7   :  { %14 = sbr.rel (!%p12_p10) target bundleno = 2 (0x2), region = 121 }

// kernel: net_forward.9
= control target key start
LH: loop header
LB: loop body
LE: loop exit
PB: predicated region body
PF: predicated region fallthrough
CT: control target
= control target key end

     0   :  { %v1143_v0 = vmov 0   ;;  %vm996_vm0 = vcmask 723968   ;;  %s2662_s4 = inlined_call_operand.vmem [shape: f32[64,1], index: 4, kind: input, shape index: {}]   ;;  %s2663_s5 = inlined_call_operand.vmem [shape: f32[64,1], index: 5, kind: input, shape index: {}]   ;;  %s2664_s0 = inlined_call_operand.vmem [shape: bf16[64,1369], index: 0, kind: input, shape index: {}]   ;;  %s2665_s1 = inlined_call_operand.vmem [shape: bf16[64,1369], index: 1, kind: input, shape index: {}]   ;;  %s2666_s2 = inlined_call_operand.vmem [shape: bf16[64,1369], index: 2, kind: input, shape index: {}]   ;;  %s2667_s3 = inlined_call_operand.vmem [shape: bf16[64,1369], index: 3, kind: input, shape index: {}]   ;;  %s2668_s6 = inlined_call_operand.vmem [shape: bf16[64,1369], index: 6, kind: output, shape index: {}]  }
   0x1   :  { %1142 = vset.pattern.permute.xlu1 %v1143_v0  ;;  %1141 = vset.pattern.permute.xlu0 %v1143_v0  ;;  %v449_v1 = vld [vmem:[%s2662_s4 + $0x10] sm:$0xff]  ;;  %v447_v2 = vld [vmem:[%s2662_s4] sm:$0xff]  ;;  %v450_v3 = vld [vmem:[%s2662_s4 + $0x18] sm:$0xff] }
   0x2   :  { %467 = vperm.xlu1 %1142, %v449_v1   ;;  %457 = vperm.xlu0 %1141, %v447_v2   ;;  %v448_v4 = vld [vmem:[%s2662_s4 + $0x8] sm:$0xff]  ;;  %v451_v6 = vld [vmem:[%s2662_s4 + $0x20] sm:$0xff]  ;;  %v454_v7 = vld [vmem:[%s2662_s4 + $0x38] sm:$0xff] }
   0x3   :  { %v452_v5 = vld [vmem:[%s2662_s4 + $0x28] sm:$0xff]  ;;  %v453_v8 = vld [vmem:[%s2662_s4 + $0x30] sm:$0xff]  ;;  %v583_v10 = vld [vmem:[%s2663_s5] sm:$0xff] }
   0x4   :  { %v584_v9 = vld [vmem:[%s2663_s5 + $0x8] sm:$0xff]  ;;  %v586_v11 = vld [vmem:[%s2663_s5 + $0x18] sm:$0xff]  ;;  %v585_v12 = vld [vmem:[%s2663_s5 + $0x10] sm:$0xff] }
   0x5   :  { %v588_v13 = vld [vmem:[%s2663_s5 + $0x28] sm:$0xff]  ;;  %v587_v14 = vld [vmem:[%s2663_s5 + $0x20] sm:$0xff]  ;;  %v590_v15 = vld [vmem:[%s2663_s5 + $0x38] sm:$0xff] }
   0x6   :  { %472 = vperm.xlu1 %1142, %v450_v3   ;;  %462 = vperm.xlu0 %1141, %v448_v4   ;;  %v589_v16 = vld [vmem:[%s2663_s5 + $0x30] sm:$0xff]  ;;  %v35_v17 = vld [vmem:[%s2664_s0 + $0x58] sm:$0xff]  ;;  %v36_v18 = vld [vmem:[%s2664_s0 + $0x60] sm:$0xff] }
   0x7   :  { %v83_v19 = vld [vmem:[%s2665_s1 + $0x58] sm:$0xff]  ;;  %v84_v20 = vld [vmem:[%s2665_s1 + $0x60] sm:$0xff]  ;;  %v37_v22 = vld [vmem:[%s2664_s0 + $0x68] sm:$0xff] }
   0x8   :  { %v179_v21 = vld [vmem:[%s2666_s2 + $0x58] sm:$0xff]  ;;  %v38_v23 = vld [vmem:[%s2664_s0 + $0x70] sm:$0xff]  ;;  %v85_v24 = vld [vmem:[%s2665_s1 + $0x68] sm:$0xff]  ;;  %v131_v39 = vmax.bf16 %v83_v19, %v35_v17  ;;  %v132_v44 = vmax.bf16 %v84_v20, %v36_v18 }
   0x9   :  { %v86_v25 = vld [vmem:[%s2665_s1 + $0x70] sm:$0xff]  ;;  %v180_v26 = vld [vmem:[%s2666_s2 + $0x60] sm:$0xff]  ;;  %v181_v27 = vld [vmem:[%s2666_s2 + $0x68] sm:$0xff]  ;;  %v133_v49 = vmax.bf16 %v85_v24, %v37_v22 }
   0xa   :  { %482 = vperm.xlu1 %1142, %v452_v5   ;;  %477 = vperm.xlu0 %1141, %v451_v6   ;;  %v227_v28 = vld [vmem:[%s2667_s3 + $0x58] sm:$0xff]  ;;  %v40_v30 = vld [vmem:[%s2664_s0 + $0x80] sm:$0xf]  ;;  %v182_v33 = vld [vmem:[%s2666_s2 + $0x70] sm:$0xff]  ;;  %v134_v50 = vmax.bf16 %v86_v25, %v38_v23 }
   0xb   :  { %v39_v29 = vld [vmem:[%s2664_s0 + $0x78] sm:$0xff]  ;;  %v88_v32 = vld [vmem:[%s2665_s1 + $0x80] sm:$0xf]  ;;  %v229_v37 = vld [vmem:[%s2667_s3 + $0x68] sm:$0xff]  ;;  %v275_v42 = vmax.bf16 %v227_v28, %v179_v21 }
   0xc   :  { %v87_v31 = vld [vmem:[%s2665_s1 + $0x78] sm:$0xff]  ;;  %v228_v35 = vld [vmem:[%s2667_s3 + $0x60] sm:$0xff]  ;;  %v230_v38 = vld [vmem:[%s2667_s3 + $0x70] sm:$0xff]  ;;  %v277_v51 = vmax.bf16 %v229_v37, %v181_v27  ;;  %v136_v58 = vmax.bf16 %v88_v32, %v40_v30 }
   0xd   :  { %v183_v34 = vld [vmem:[%s2666_s2 + $0x78] sm:$0xff]  ;;  %v184_v36 = vld [vmem:[%s2666_s2 + $0x80] sm:$0xf]  ;;  %v276_v45 = vmax.bf16 %v228_v35, %v180_v26  ;;  %v24_v46 = vld [vmem:[%s2664_s0 + $0x8] sm:$0xff]  ;;  %v278_v52 = vmax.bf16 %v230_v38, %v182_v33  ;;  %v135_v57 = vmax.bf16 %v87_v31, %v39_v29  ;;  %v1350_v4 = vmax.bf16 %v275_v42, %v131_v39 }
   0xe   :  { %492 = vperm.xlu1 %1142, %v454_v7   ;;  %487 = vperm.xlu0 %1141, %v453_v8   ;;  %v231_v40 = vld [vmem:[%s2667_s3 + $0x78] sm:$0xff]  ;;  %v232_v41 = vld [vmem:[%s2667_s3 + $0x80] sm:$0xf]  ;;  %v72_v48 = vld [vmem:[%s2665_s1 + $0x8] sm:$0xff] }
   0xf   :  { %v23_v43 = vld [vmem:[%s2664_s0] sm:$0xff]  ;;  %v25_v53 = vld [vmem:[%s2664_s0 + $0x10] sm:$0xff]  ;;  %v279_v59 = vmax.bf16 %v231_v40, %v183_v34  ;;  %v280_v60 = vmax.bf16 %v232_v41, %v184_v36  ;;  %v1326_v61 = vld [vmem:[%s2664_s0 + $0x18] sm:$0xff]  ;;  %v1361_v8 = vmax.bf16 %v276_v45, %v132_v44 }
  0x10   :  { %v71_v47 = vld [vmem:[%s2665_s1] sm:$0xff]  ;;  %v73_v54 = vld [vmem:[%s2665_s1 + $0x10] sm:$0xff]  ;;  %v1336_v63 = vld [vmem:[%s2664_s0 + $0x28] sm:$0xf] }
  0x11   :  { %v167_v55 = vld [vmem:[%s2666_s2] sm:$0xff]  ;;  %v74_v0 = vld [vmem:[%s2665_s1 + $0x18] sm:$0xff]  ;;  %v168_v2 = vld [vmem:[%s2666_s2 + $0x8] sm:$0xff]  ;;  %v1385_v21 = vmax.bf16 %v279_v59, %v135_v57  ;;  %v1387_v22 = vmax.bf16 %v280_v60, %v136_v58  ;;  %v121_v23 = vmax.bf16 %v73_v54, %v25_v53 }
  0x12   :  { %598 = vperm.xlu1 %1142, %v584_v9   ;;  %593 = vperm.xlu0 %1141, %v583_v10   ;;  %v215_v56 = vld [vmem:[%s2667_s3] sm:$0xff]  ;;  %v216_v3 = vld [vmem:[%s2667_s3 + $0x8] sm:$0xff]  ;;  %v169_v6 = vld [vmem:[%s2666_s2 + $0x10] sm:$0xff]  ;;  %v119_v9 = vmax.bf16 %v71_v47, %v23_v43  ;;  %v122_v26 = vmax.bf16 %v74_v0, %v1326_v61 }
  0x13   :  { %v1331_v62 = vld [vmem:[%s2664_s0 + $0x20] sm:$0xff]  ;;  %v76_v5 = vld [vmem:[%s2665_s1 + $0x28] sm:$0xf]  ;;  %v217_v7 = vld [vmem:[%s2667_s3 + $0x10] sm:$0xff]  ;;  %v264_v20 = vmax.bf16 %v216_v3, %v168_v2 }
  0x14   :  { %v75_v1 = vld [vmem:[%s2665_s1 + $0x20] sm:$0xff]  ;;  %v170_v10 = vld [vmem:[%s2666_s2 + $0x18] sm:$0xff]  ;;  %v220_v19 = vld [vmem:[%s2667_s3 + $0x28] sm:$0xf]  ;;  %v265_v24 = vmax.bf16 %v217_v7, %v169_v6  ;;  %v124_v28 = vmax.bf16 %v76_v5, %v1336_v63 }
  0x15   :  { %v218_v17 = vld [vmem:[%s2667_s3 + $0x18] sm:$0xff]  ;;  %v219_v18 = vld [vmem:[%s2667_s3 + $0x20] sm:$0xff]  ;;  %v123_v27 = vmax.bf16 %v75_v1, %v1331_v62  ;;  %v1408_v38 = vld [vmem:[%s2664_s0 + $0x8c] sm:$0xff] }
  0x16   :  { %608 = vperm.xlu1 %1142, %v586_v11   ;;  %603 = vperm.xlu0 %1141, %v585_v12   ;;  %v171_v11 = vld [vmem:[%s2666_s2 + $0x20] sm:$0xff]  ;;  %v172_v12 = vld [vmem:[%s2666_s2 + $0x28] sm:$0xf]  ;;  %v266_v29 = vmax.bf16 %v218_v17, %v170_v10  ;;  %v1418_v40 = vld [vmem:[%s2665_s1 + $0x8c] sm:$0xff]  ;;  %v1423_v44 = vmax.bf16 %v265_v24, %v121_v23 }
  0x17   :  { %v267_v30 = vmax.bf16 %v219_v18, %v171_v11  ;;  %v268_v31 = vmax.bf16 %v220_v19, %v172_v12  ;;  %v1398_v33 = vld [vmem:[%s2664_s0 + $0x84] sm:$0xff]  ;;  %v1428_v45 = vld [vmem:[%s2664_s0 + $0x94] sm:$0xff]  ;;  %v186_v57 = vld [vmem:[%s2666_s2 + $0x8c] sm:$0xff]  ;;  %v138_v17 = vmax.bf16 %v1418_v40, %v1408_v38 }
  0x18   :  { %v1413_v39 = vld [vmem:[%s2665_s1 + $0x84] sm:$0xff]  ;;  %v1438_v47 = vld [vmem:[%s2665_s1 + $0x94] sm:$0xff]  ;;  %v234_v59 = vld [vmem:[%s2667_s3 + $0x8c] sm:$0xff]  ;;  %v1474_v60 = vmax.bf16 %v266_v29, %v122_v26 }
  0x19   :  { %v187_v58 = vld [vmem:[%s2666_s2 + $0x94] sm:$0xff]  ;;  %v1476_v61 = vmax.bf16 %v267_v30, %v123_v27  ;;  %v1478_v62 = vmax.bf16 %v268_v31, %v124_v28  ;;  %v1484_v0 = vld [vmem:[%s2664_s0 + $0xac] sm:$0xf]  ;;  %v188_v1 = vld [vmem:[%s2666_s2 + $0x9c] sm:$0xff]  ;;  %v139_v24 = vmax.bf16 %v1438_v47, %v1428_v45 }
  0x1a   :  { %618 = vperm.xlu1 %1142, %v588_v13   ;;  %613 = vperm.xlu0 %1141, %v587_v14   ;;  %v263_v13 = vmax.bf16 %v215_v56, %v167_v55  ;;  %v1372_v14 = vmax.bf16 %v277_v51, %v133_v49  ;;  %v185_v49 = vld [vmem:[%s2666_s2 + $0x84] sm:$0xff]  ;;  %v235_v2 = vld [vmem:[%s2667_s3 + $0x94] sm:$0xff]  ;;  %v236_v3 = vld [vmem:[%s2667_s3 + $0x9c] sm:$0xff] }
  0x1b   :  { %v1458_v55 = vld [vmem:[%s2664_s0 + $0xa4] sm:$0xff]  ;;  %v94_v7 = vld [vmem:[%s2665_s1 + $0xac] sm:$0xf]  ;;  %v283_v27 = vmax.bf16 %v235_v2, %v187_v58  ;;  %v284_v28 = vmax.bf16 %v236_v3, %v188_v1  ;;  %v30_v29 = vld [vmem:[%s2664_s0 + $0x34] sm:$0xff] }
  0x1c   :  { %v1393_v32 = vmax.bf16 %v263_v13, %v119_v9  ;;  %v1463_v56 = vld [vmem:[%s2665_s1 + $0xa4] sm:$0xff]  ;;  %v137_v9 = vmax.bf16 %v1413_v39, %v1398_v33  ;;  %v190_v11 = vld [vmem:[%s2666_s2 + $0xac] sm:$0xf]  ;;  %v31_v30 = vld [vmem:[%s2664_s0 + $0x3c] sm:$0xff] }
  0x1d   :  { %v189_v10 = vld [vmem:[%s2666_s2 + $0xa4] sm:$0xff]  ;;  %v238_v19 = vld [vmem:[%s2667_s3 + $0xac] sm:$0xf]  ;;  %v78_v33 = vld [vmem:[%s2665_s1 + $0x34] sm:$0xff] }
  0x1e   :  { %628 = vperm.xlu1 %1142, %v590_v15   ;;  %623 = vperm.xlu0 %1141, %v589_v16   ;;  %v1374_v15 = vmax.bf16 %v278_v52, %v134_v50  ;;  %v120_v16 = vmax.bf16 %v72_v48, %v24_v46  ;;  %v1433_v46 = vld [vmem:[%s2664_s0 + $0x9c] sm:$0xff]  ;;  %v233_v50 = vld [vmem:[%s2667_s3 + $0x84] sm:$0xff]  ;;  %v29_v23 = vld [vmem:[%s2664_s0 + $0x2c] sm:$0xff]  ;;  %v286_v58 = vmax.bf16 %v238_v19, %v190_v11 }
  0x1f   :  { %v1443_v48 = vld [vmem:[%s2665_s1 + $0x9c] sm:$0xff]  ;;  %v281_v12 = vmax.bf16 %v233_v50, %v185_v49  ;;  %v237_v18 = vld [vmem:[%s2667_s3 + $0xa4] sm:$0xff]  ;;  %v77_v31 = vld [vmem:[%s2665_s1 + $0x2c] sm:$0xff]  ;;  %v142_v50 = vmax.bf16 %v94_v7, %v1484_v0  ;;  %v1593_v7 = vmax.bf16 %v283_v27, %v139_v24 }
  0x20   :  { %v1403_v37 = vmax.bf16 %v264_v20, %v120_v16  ;;  %v282_v20 = vmax.bf16 %v234_v59, %v186_v57  ;;  %v140_v26 = vmax.bf16 %v1443_v48, %v1433_v46  ;;  %v79_v38 = vld [vmem:[%s2665_s1 + $0x3c] sm:$0xff]  ;;  %v141_v46 = vmax.bf16 %v1463_v56, %v1458_v55  ;;  %v173_v47 = vld [vmem:[%s2666_s2 + $0x2c] sm:$0xff]  ;;  %v174_v48 = vld [vmem:[%s2666_s2 + $0x34] sm:$0xff] }
  0x21   :  { %v221_v49 = vld [vmem:[%s2667_s3 + $0x2c] sm:$0xff]  ;;  %v285_v57 = vmax.bf16 %v237_v18, %v189_v10  ;;  %v1555_v59 = vmax.bf16 %v281_v12, %v137_v9  ;;  %v1560_v55 = vld [vmem:[%s2664_s0 + $0x44] sm:$0xff]  ;;  %v175_v1 = vld [vmem:[%s2666_s2 + $0x3c] sm:$0xff]  ;;  %2732 = vst [vmem:[#allocation2_spill] sm:$0xff] %v1593_v7  ;;  %v127_v27 = vmax.bf16 %v79_v38, %v31_v30  ;;  %v1617_v13 = vmax.bf16 %v286_v58, %v142_v50 }
  0x22   :  { %v1565_v56 = vld [vmem:[%s2664_s0 + $0x4c] sm:$0xff]  ;;  %v222_v0 = vld [vmem:[%s2667_s3 + $0x34] sm:$0xff]  ;;  %v223_v2 = vld [vmem:[%s2667_s3 + $0x3c] sm:$0xff]  ;;  %v1579_v10 = vmax.bf16 %v282_v20, %v138_v17  ;;  %v1595_v17 = vmax.bf16 %v284_v28, %v140_v26  ;;  %v125_v20 = vmax.bf16 %v77_v31, %v29_v23  ;;  %v269_v40 = vmax.bf16 %v221_v49, %v173_v47 }
  0x23   :  { %v34_v11 = vld [vmem:[%s2664_s0 + $0x54] sm:$0xf]  ;;  %v80_v12 = vld [vmem:[%s2665_s1 + $0x44] sm:$0xff]  ;;  %v81_v18 = vld [vmem:[%s2665_s1 + $0x4c] sm:$0xff]  ;;  %v126_v26 = vmax.bf16 %v78_v33, %v30_v29  ;;  %v270_v31 = vmax.bf16 %v222_v0, %v174_v48  ;;  %v271_v39 = vmax.bf16 %v223_v2, %v175_v1  ;;  %v1615_v16 = vmax.bf16 %v285_v57, %v141_v46  ;;  %2735 = vst [vmem:[#allocation5_spill] sm:$0xff] %v1617_v13 }
  0x24   :  { %v176_v19 = vld [vmem:[%s2666_s2 + $0x44] sm:$0xff]  ;;  %2733 = vst [vmem:[#allocation3_spill] sm:$0xff] %v1595_v17  ;;  %v177_v9 = vld [vmem:[%s2666_s2 + $0x4c] sm:$0xff]  ;;  %v82_v24 = vld [vmem:[%s2665_s1 + $0x54] sm:$0xf]  ;;  %v128_v29 = vmax.bf16 %v80_v12, %v1560_v55  ;;  %v129_v30 = vmax.bf16 %v81_v18, %v1565_v56  ;;  %v1624_v48 = vmax.bf16 %v269_v40, %v125_v20 }
  0x25   :  { %v224_v3 = vld [vmem:[%s2667_s3 + $0x44] sm:$0xff]  ;;  %v225_v45 = vld [vmem:[%s2667_s3 + $0x4c] sm:$0xff]  ;;  %v178_v23 = vld [vmem:[%s2666_s2 + $0x54] sm:$0xf]  ;;  %2734 = vst [vmem:[#allocation4_spill] sm:$0xff] %v1615_v16  ;;  %v130_v5 = vmax.bf16 %v82_v24, %v34_v11  ;;  %v1638_v58 = vmax.bf16 %v270_v31, %v126_v26  ;;  %v1640_v55 = vmax.bf16 %v271_v39, %v127_v27 }
  0x26   :  { %v226_v28 = vld [vmem:[%s2667_s3 + $0x54] sm:$0xf]  ;;  %v272_v33 = vmax.bf16 %v224_v3, %v176_v19  ;;  %v273_v38 = vmax.bf16 %v225_v45, %v177_v9  ;;  %2736 = vst [vmem:[#allocation6_spill] sm:$0xff] %v1624_v48  ;;  %v1629_v46 = vld [vmem:[%s2664_s0 + $0xdc] sm:$0xff]  ;;  %v1645_v40 = vld [vmem:[%s2664_s0 + $0xe4] sm:$0xff] }
  0x27   :  { %v274_v63 = vmax.bf16 %v226_v28, %v178_v23  ;;  %v1634_v50 = vld [vmem:[%s2665_s1 + $0xdc] sm:$0xff]  ;;  %2737 = vst [vmem:[#allocation7_spill] sm:$0xff] %v1638_v58  ;;  %2738 = vst [vmem:[#allocation8_spill] sm:$0xff] %v1640_v55  ;;  %v1650_v56 = vld [vmem:[%s2664_s0 + $0xec] sm:$0xff] }
  0x28   :  { %v1655_v1 = vld [vmem:[%s2665_s1 + $0xe4] sm:$0xff]  ;;  %v1660_v39 = vld [vmem:[%s2665_s1 + $0xec] sm:$0xff]  ;;  %v197_v0 = vld [vmem:[%s2666_s2 + $0xdc] sm:$0xff]  ;;  %v1702_v31 = vmax.bf16 %v272_v33, %v128_v29  ;;  %v1704_v12 = vmax.bf16 %v273_v38, %v129_v30  ;;  %v149_v28 = vmax.bf16 %v1634_v50, %v1629_v46 }
  0x29   :  { %v245_v2 = vld [vmem:[%s2667_s3 + $0xdc] sm:$0xff]  ;;  %v1675_v18 = vld [vmem:[%s2664_s0 + $0xf4] sm:$0xff]  ;;  %v198_v26 = vld [vmem:[%s2666_s2 + $0xe4] sm:$0xff]  ;;  %v1727_v33 = vmax.bf16 %v274_v63, %v130_v5  ;;  %v150_v5 = vmax.bf16 %v1655_v1, %v1645_v40  ;;  %v151_v46 = vmax.bf16 %v1660_v39, %v1650_v56 }
  0x2a   :  { %v1680_v19 = vld [vmem:[%s2664_s0 + $0xfc] sm:$0xff]  ;;  %v1685_v20 = vld [vmem:[%s2665_s1 + $0xf4] sm:$0xff]  ;;  %v1698_v27 = vld [vmem:[%s2666_s2 + $0xec] sm:$0xff]  ;;  %2739 = vst [vmem:[#allocation9_spill] sm:$0xff] %v1702_v31  ;;  %v293_v6 = vmax.bf16 %v245_v2, %v197_v0 }
  0x2b   :  { %v1690_v24 = vld [vmem:[%s2665_s1 + $0xfc] sm:$0xff]  ;;  %2740 = vst [vmem:[#allocation10_spill] sm:$0xff] %v1704_v12  ;;  %v1709_v11 = vld [vmem:[%s2664_s0 + $0x104] sm:$0xf]  ;;  %v200_v23 = vld [vmem:[%s2666_s2 + $0xf4] sm:$0xff]  ;;  %v152_v2 = vmax.bf16 %v1685_v20, %v1675_v18 }
  0x2c   :  { %v1714_v9 = vld [vmem:[%s2665_s1 + $0x104] sm:$0xf]  ;;  %v1722_v29 = vld [vmem:[%s2666_s2 + $0xfc] sm:$0xff]  ;;  %2741 = vst [vmem:[#allocation11_spill] sm:$0xff] %v1727_v33  ;;  %v247_v45 = vld [vmem:[%s2667_s3 + $0xec] sm:$0xff]  ;;  %v153_v40 = vmax.bf16 %v1690_v24, %v1680_v19  ;;  %v1792_v24 = vmax.bf16 %v293_v6, %v149_v28 }
  0x2d   :  { %v246_v30 = vld [vmem:[%s2667_s3 + $0xe4] sm:$0xff]  ;;  %v248_v57 = vld [vmem:[%s2667_s3 + $0xf4] sm:$0xff]  ;;  %v249_v50 = vld [vmem:[%s2667_s3 + $0xfc] sm:$0xff]  ;;  %v295_v56 = vmax.bf16 %v247_v45, %v1698_v27 }
  0x2e   :  { %v202_v3 = vld [vmem:[%s2666_s2 + $0x104] sm:$0xf]  ;;  %v47_v0 = vld [vmem:[%s2664_s0 + $0xb0] sm:$0xff]  ;;  %v294_v38 = vmax.bf16 %v246_v30, %v198_v26  ;;  %v48_v63 = vld [vmem:[%s2664_s0 + $0xb8] sm:$0xff]  ;;  %v296_v1 = vmax.bf16 %v248_v57, %v200_v23  ;;  %v154_v57 = vmax.bf16 %v1714_v9, %v1709_v11  ;;  %v297_v45 = vmax.bf16 %v249_v50, %v1722_v29  ;;  %2742 = vst [vmem:[#allocation12_spill] sm:$0xff] %v1792_v24 }
  0x2f   :  { %v250_v49 = vld [vmem:[%s2667_s3 + $0x104] sm:$0xf]  ;;  %v95_v47 = vld [vmem:[%s2665_s1 + $0xb0] sm:$0xff]  ;;  %v96_v54 = vld [vmem:[%s2665_s1 + $0xb8] sm:$0xff]  ;;  %v1844_v36 = vmax.bf16 %v295_v56, %v151_v46 }
  0x30   :  { %v1776_v39 = vld [vmem:[%s2664_s0 + $0xc0] sm:$0xff]  ;;  %v191_v18 = vld [vmem:[%s2666_s2 + $0xb0] sm:$0xff]  ;;  %v298_v20 = vmax.bf16 %v250_v49, %v202_v3  ;;  %v50_v27 = vld [vmem:[%s2664_s0 + $0xc8] sm:$0xff]  ;;  %v1833_v3 = vmax.bf16 %v294_v38, %v150_v5  ;;  %v143_v29 = vmax.bf16 %v95_v47, %v47_v0  ;;  %v1846_v35 = vmax.bf16 %v296_v1, %v152_v2 }
  0x31   :  { %v1781_v26 = vld [vmem:[%s2665_s1 + $0xc0] sm:$0xff]  ;;  %v239_v19 = vld [vmem:[%s2667_s3 + $0xb0] sm:$0xff]  ;;  %v98_v30 = vld [vmem:[%s2665_s1 + $0xc8] sm:$0xff]  ;;  %2744 = vst [vmem:[#allocation14_spill] sm:$0xff] %v1844_v36  ;;  %v144_v38 = vmax.bf16 %v96_v54, %v48_v63  ;;  %v1857_v34 = vmax.bf16 %v297_v45, %v153_v40 }
  0x32   :  { %v1800_v23 = vld [vmem:[%s2664_s0 + $0xd0] sm:$0xff]  ;;  %v192_v6 = vld [vmem:[%s2666_s2 + $0xb8] sm:$0xff]  ;;  %v193_v52 = vld [vmem:[%s2666_s2 + $0xc0] sm:$0xff]  ;;  %2743 = vst [vmem:[#allocation13_spill] sm:$0xff] %v1833_v3  ;;  %v287_v41 = vmax.bf16 %v239_v19, %v191_v18  ;;  %v1859_v46 = vmax.bf16 %v298_v20, %v154_v57  ;;  %v145_v54 = vmax.bf16 %v1781_v26, %v1776_v39  ;;  %v146_v63 = vmax.bf16 %v98_v30, %v50_v27 }
  0x33   :  { %v1808_v9 = vld [vmem:[%s2665_s1 + $0xd0] sm:$0xff]  ;;  %v240_v49 = vld [vmem:[%s2667_s3 + $0xb8] sm:$0xff]  ;;  %v194_v11 = vld [vmem:[%s2666_s2 + $0xc8] sm:$0xff]  ;;  %2745 = vst [vmem:[#allocation15_spill] sm:$0xff] %v1846_v35 }
  0x34   :  { %v52_v50 = vld [vmem:[%s2664_s0 + $0xd8] sm:$0xf]  ;;  %v195_v51 = vld [vmem:[%s2666_s2 + $0xd0] sm:$0xff]  ;;  %v241_v43 = vld [vmem:[%s2667_s3 + $0xc0] sm:$0xff]  ;;  %v288_v28 = vmax.bf16 %v240_v49, %v192_v6  ;;  %2746 = vst [vmem:[#allocation16_spill] sm:$0xff] %v1857_v34  ;;  %v147_v56 = vmax.bf16 %v1808_v9, %v1800_v23  ;;  %v1866_v12 = vmax.bf16 %v287_v41, %v143_v29 }
  0x35   :  { %v100_v53 = vld [vmem:[%s2665_s1 + $0xd8] sm:$0xf]  ;;  %v242_v42 = vld [vmem:[%s2667_s3 + $0xc8] sm:$0xff]  ;;  %v243_v5 = vld [vmem:[%s2667_s3 + $0xd0] sm:$0xff]  ;;  %2747 = vst [vmem:[#allocation17_spill] sm:$0xff] %v1859_v46  ;;  %v289_v1 = vmax.bf16 %v241_v43, %v193_v52 }
  0x36   :  { %v196_v47 = vld [vmem:[%s2666_s2 + $0xd8] sm:$0xf]  ;;  %v290_v18 = vmax.bf16 %v242_v42, %v194_v11  ;;  %v148_v19 = vmax.bf16 %v100_v53, %v52_v50  ;;  %v291_v25 = vmax.bf16 %v243_v5, %v195_v51  ;;  %2748 = vst [vmem:[#allocation18_spill] sm:$0xff] %v1866_v12  ;;  %v1876_v39 = vld [vmem:[%s2664_s0 + $0x13c] sm:$0xff]  ;;  %v1881_v51 = vmax.bf16 %v288_v28, %v144_v38  ;;  %v1886_v41 = vld [vmem:[%s2664_s0 + $0x144] sm:$0xff] }
  0x37   :  { %v244_v0 = vld [vmem:[%s2667_s3 + $0xd8] sm:$0xf]  ;;  %v1896_v53 = vld [vmem:[%s2665_s1 + $0x13c] sm:$0xff]  ;;  %v1901_v57 = vld [vmem:[%s2665_s1 + $0x144] sm:$0xff]  ;;  %v1924_v28 = vmax.bf16 %v289_v1, %v145_v54 }
  0x38   :  { %v292_v33 = vmax.bf16 %v244_v0, %v196_v47  ;;  %v1871_v40 = vld [vmem:[%s2664_s0 + $0x134] sm:$0xff]  ;;  %2749 = vst [vmem:[#allocation19_spill] sm:$0xff] %v1881_v51  ;;  %v1915_v9 = vld [vmem:[%s2666_s2 + $0x13c] sm:$0xff]  ;;  %v1920_v6 = vld [vmem:[%s2666_s2 + $0x144] sm:$0xff]  ;;  %v1926_v29 = vmax.bf16 %v290_v18, %v146_v63  ;;  %v1948_v63 = vmax.bf16 %v291_v25, %v147_v56  ;;  %v162_v27 = vmax.bf16 %v1896_v53, %v1876_v39 }
  0x39   :  { %v1891_v52 = vld [vmem:[%s2665_s1 + $0x134] sm:$0xff]  ;;  %2750 = vst [vmem:[#allocation20_spill] sm:$0xff] %v1924_v28  ;;  %v1931_v50 = vld [vmem:[%s2664_s0 + $0x14c] sm:$0xff]  ;;  %v258_v5 = vld [vmem:[%s2667_s3 + $0x13c] sm:$0xff]  ;;  %v163_v39 = vmax.bf16 %v1901_v57, %v1886_v41 }
  0x3a   :  { %v1910_v30 = vld [vmem:[%s2666_s2 + $0x134] sm:$0xff]  ;;  %2751 = vst [vmem:[#allocation21_spill] sm:$0xff] %v1926_v29  ;;  %v1936_v38 = vld [vmem:[%s2665_s1 + $0x14c] sm:$0xff]  ;;  %v259_v0 = vld [vmem:[%s2667_s3 + $0x144] sm:$0xff]  ;;  %v1950_v1 = vmax.bf16 %v292_v33, %v148_v19  ;;  %v161_v23 = vmax.bf16 %v1891_v52, %v1871_v40  ;;  %v306_v53 = vmax.bf16 %v258_v5, %v1915_v9 }
  0x3b   :  { %v257_v47 = vld [vmem:[%s2667_s3 + $0x134] sm:$0xff]  ;;  %2752 = vst [vmem:[#allocation22_spill] sm:$0xff] %v1948_v63  ;;  %v1961_v49 = vld [vmem:[%s2664_s0 + $0x15c] sm:$0xf]  ;;  %v1976_v33 = vld [vmem:[%s2666_s2 + $0x14c] sm:$0xff]  ;;  %v307_v18 = vmax.bf16 %v259_v0, %v1920_v6  ;;  %v164_v12 = vmax.bf16 %v1936_v38, %v1931_v50 }
  0x3c   :  { %v1956_v11 = vld [vmem:[%s2664_s0 + $0x154] sm:$0xff]  ;;  %v1971_v25 = vld [vmem:[%s2665_s1 + $0x15c] sm:$0xf]  ;;  %v260_v45 = vld [vmem:[%s2667_s3 + $0x14c] sm:$0xff]  ;;  %v305_v52 = vmax.bf16 %v257_v47, %v1910_v30 }
  0x3d   :  { %v1966_v54 = vld [vmem:[%s2665_s1 + $0x154] sm:$0xff]  ;;  %v1992_v20 = vld [vmem:[%s2666_s2 + $0x15c] sm:$0xf]  ;;  %v59_v42 = vld [vmem:[%s2664_s0 + $0x108] sm:$0xff]  ;;  %v166_v63 = vmax.bf16 %v1971_v25, %v1961_v49  ;;  %v308_v29 = vmax.bf16 %v260_v45, %v1976_v33  ;;  %v2089_v49 = vmax.bf16 %v306_v53, %v162_v27  ;;  %v2091_v45 = vmax.bf16 %v307_v18, %v163_v39 }
  0x3e   :  { %v1981_v56 = vld [vmem:[%s2666_s2 + $0x154] sm:$0xff]  ;;  %v262_v40 = vld [vmem:[%s2667_s3 + $0x15c] sm:$0xf]  ;;  %v107_v26 = vld [vmem:[%s2665_s1 + $0x108] sm:$0xff]  ;;  %v165_v2 = vmax.bf16 %v1966_v54, %v1956_v11  ;;  %v2087_v54 = vmax.bf16 %v305_v52, %v161_v23 }
  0x3f   :  { %v261_v19 = vld [vmem:[%s2667_s3 + $0x154] sm:$0xff]  ;;  %v62_v5 = vld [vmem:[%s2664_s0 + $0x120] sm:$0xff]  ;;  %v203_v6 = vld [vmem:[%s2666_s2 + $0x108] sm:$0xff]  ;;  %v310_v11 = vmax.bf16 %v262_v40, %v1992_v20  ;;  %2754 = vst [vmem:[#allocation24_spill] sm:$0xff] %v2089_v49  ;;  %v2103_v16 = vmax.bf16 %v308_v29, %v164_v12 }
  0x40   :  { %v60_v43 = vld [vmem:[%s2664_s0 + $0x110] sm:$0xff]  ;;  %v61_v47 = vld [vmem:[%s2664_s0 + $0x118] sm:$0xff]  ;;  %v110_v30 = vld [vmem:[%s2665_s1 + $0x120] sm:$0xff]  ;;  %v309_v36 = vmax.bf16 %v261_v19, %v1981_v56  ;;  %2753 = vst [vmem:[#allocation23_spill] sm:$0xff] %v2087_v54  ;;  %v155_v19 = vmax.bf16 %v107_v26, %v59_v42 }
  0x41   :  { %v108_v41 = vld [vmem:[%s2665_s1 + $0x110] sm:$0xff]  ;;  %v109_v0 = vld [vmem:[%s2665_s1 + $0x118] sm:$0xff]  ;;  %v63_v46 = vld [vmem:[%s2664_s0 + $0x128] sm:$0xff]  ;;  %2755 = vst [vmem:[#allocation25_spill] sm:$0xff] %v2091_v45  ;;  %v158_v52 = vmax.bf16 %v110_v30, %v62_v5  ;;  %v2107_v7 = vmax.bf16 %v310_v11, %v166_v63  ;;  %v2774_v11 = vunpack.c.h.bf16 %v1385_v21 }
  0x42   :  { %v204_v9 = vld [vmem:[%s2666_s2 + $0x110] sm:$0xff]  ;;  %v205_v57 = vld [vmem:[%s2666_s2 + $0x118] sm:$0xff]  ;;  %v111_v35 = vld [vmem:[%s2665_s1 + $0x128] sm:$0xff]  ;;  %v156_v20 = vmax.bf16 %v108_v41, %v60_v43  ;;  %v157_v27 = vmax.bf16 %v109_v0, %v61_v47  ;;  %2756 = vst [vmem:[#allocation26_spill] sm:$0xff] %v2103_v16  ;;  %v2105_v17 = vmax.bf16 %v309_v36, %v165_v2 }
  0x43   :  { %v64_v34 = vld [vmem:[%s2664_s0 + $0x130] sm:$0xf]  ;;  %v206_v50 = vld [vmem:[%s2666_s2 + $0x120] sm:$0xff]  ;;  %v251_v38 = vld [vmem:[%s2667_s3 + $0x108] sm:$0xff]  ;;  %v159_v53 = vmax.bf16 %v111_v35, %v63_v46  ;;  %2758 = vst [vmem:[#allocation28_spill] sm:$0xff] %v2107_v7 }
  0x44   :  { %v112_v28 = vld [vmem:[%s2665_s1 + $0x130] sm:$0xf]  ;;  %v207_v3 = vld [vmem:[%s2666_s2 + $0x128] sm:$0xff]  ;;  %v253_v24 = vld [vmem:[%s2667_s3 + $0x118] sm:$0xff]  ;;  %v299_v23 = vmax.bf16 %v251_v38, %v203_v6  ;;  %2757 = vst [vmem:[#allocation27_spill] sm:$0xff] %v2105_v17  ;;  %v2778_v38 = vunpack.c.l.bf16 %v1393_v32 }
  0x45   :  { %v252_v51 = vld [vmem:[%s2667_s3 + $0x110] sm:$0xff]  ;;  %v254_v31 = vld [vmem:[%s2667_s3 + $0x120] sm:$0xff]  ;;  %v255_v33 = vld [vmem:[%s2667_s3 + $0x128] sm:$0xff]  ;;  %v301_v18 = vmax.bf16 %v253_v24, %v205_v57  ;;  %v160_v55 = vmax.bf16 %v112_v28, %v64_v34 }
  0x46   :  { %v208_v25 = vld [vmem:[%s2666_s2 + $0x130] sm:$0xf]  ;;  %v300_v40 = vmax.bf16 %v252_v51, %v204_v9  ;;  %v302_v39 = vmax.bf16 %v254_v31, %v206_v50  ;;  %v303_v58 = vmax.bf16 %v255_v33, %v207_v3  ;;  %v2111_v42 = vmax.bf16 %v299_v23, %v155_v19  ;;  %v2793_v30 = vld [vmem:[#allocation2_spill] sm:$0xff]  ;;  %v2796_v57 = vld [vmem:[#allocation3_spill] sm:$0xff] }
  0x47   :  { %v256_v56 = vld [vmem:[%s2667_s3 + $0x130] sm:$0xf]  ;;  %v2117_v31 = vmax.bf16 %v301_v18, %v157_v27  ;;  %v2780_v50 = vunpack.c.l.bf16 %v1403_v37  ;;  %v2791_v9 = vunpack.c.l.bf16 %v1579_v10  ;;  %v2798_v41 = vunpack.c.h.bf16 %v2796_v57  ;;  %v2807_v34 = vld [vmem:[#allocation7_spill] sm:$0xff] }
  0x48   :  { %v304_v48 = vmax.bf16 %v256_v56, %v208_v25  ;;  %2759 = vst [vmem:[#allocation29_spill] sm:$0xff] %v2111_v42  ;;  %v2113_v24 = vmax.bf16 %v300_v40, %v156_v20  ;;  %v2119_v12 = vmax.bf16 %v302_v39, %v158_v52  ;;  %v2123_v46 = vmax.bf16 %v303_v58, %v159_v53  ;;  %v2799_v63 = vld [vmem:[#allocation4_spill] sm:$0xff] }
  0x49   :  { %2761 = vst [vmem:[#allocation31_spill] sm:$0xff] %v2117_v31  ;;  %v2765_v25 = vunpack.c.l.bf16 %v1350_v4  ;;  %v2766_v56 = vunpack.c.h.bf16 %v1350_v4  ;;  %v2767_v20 = vunpack.c.l.bf16 %v1361_v8  ;;  %v2768_v40 = vunpack.c.h.bf16 %v1361_v8  ;;  %v2821_v17 = vld [vmem:[#allocation12_spill] sm:$0xff] }
  0x4a   :  { %2760 = vst [vmem:[#allocation30_spill] sm:$0xff] %v2113_v24  ;;  %2762 = vst [vmem:[#allocation32_spill] sm:$0xff] %v2119_v12  ;;  %v2125_v2 = vmax.bf16 %v304_v48, %v160_v55  ;;  %v2769_v52 = vunpack.c.l.bf16 %v1372_v14  ;;  %v2770_v39 = vunpack.c.h.bf16 %v1372_v14  ;;  %v2771_v4 = vunpack.c.l.bf16 %v1374_v15 }
  0x4b   :  { %2763 = vst [vmem:[#allocation33_spill] sm:$0xff] %v2123_v46  ;;  %v2773_v8 = vunpack.c.l.bf16 %v1385_v21  ;;  %v2776_v14 = vunpack.c.l.bf16 %v1387_v22  ;;  %v2781_v21 = vunpack.c.h.bf16 %v1403_v37  ;;  %v2782_v22 = vunpack.c.l.bf16 %v1423_v44 }
  0x4c   :  { %2764 = vst [vmem:[#allocation34_spill] sm:$0xff] %v2125_v2  ;;  %v2786_v37 = vunpack.c.l.bf16 %v1476_v61  ;;  %v2789_v58 = vunpack.c.l.bf16 %v1555_v59  ;;  %v2801_v29 = vunpack.c.h.bf16 %v2799_v63  ;;  %v2808_v43 = vunpack.c.l.bf16 %v2807_v34 }
  0x4d   :  { %v2809_v26 = vunpack.c.h.bf16 %v2807_v34  ;;  %v2819_v34 = vld [vmem:[#allocation11_spill] sm:$0xff] }
  0x81   :  { %v468_v47 = vpop.permute.xlu1 %467  ;;  %v458_v5 = vpop.permute.xlu0 %457 }
  0x82   :  { %v2145_v33 = vmul.f32 %v468_v47, %v2765_v25  ;;  %v2149_v19 = vmul.f32 %v468_v47, %v2766_v56  ;;  %v2153_v23 = vmul.f32 %v468_v47, %v2767_v20  ;;  %v2157_v27 = vmul.f32 %v468_v47, %v2768_v40 }
  0x83   :  { %v2161_v18 = vmul.f32 %v468_v47, %v2769_v52  ;;  %v2165_v53 = vmul.f32 %v468_v47, %v2770_v39  ;;  %v2169_v25 = vmul.f32 %v468_v47, %v2771_v4  ;;  %v2772_v56 = vunpack.c.h.bf16 %v1374_v15 }
  0x84   :  { %v2177_v40 = vmul.f32 %v468_v47, %v2773_v8  ;;  %v2181_v52 = vmul.f32 %v468_v47, %v2774_v11  ;;  %v2185_v39 = vmul.f32 %v468_v47, %v2776_v14  ;;  %v2189_v4 = vmul.f32 %v458_v5, %v2778_v38 }
  0x85   :  { %v2173_v20 = vmul.f32 %v468_v47, %v2772_v56  ;;  %v2779_v15 = vunpack.c.h.bf16 %v1393_v32  ;;  %v2197_v8 = vmul.f32 %v458_v5, %v2780_v50  ;;  %v2201_v11 = vmul.f32 %v458_v5, %v2781_v21  ;;  %v473_v14 = vpop.permute.xlu1 %472  ;;  %v463_v0 = vpop.permute.xlu0 %462 }
  0x86   :  { %2775 = vst [vmem:[#allocation35_spill] sm:$0xff] %v2181_v52  ;;  %2777 = vst [vmem:[#allocation36_spill] sm:$0xff] %v2185_v39  ;;  %v2205_v47 = vmul.f32 %v458_v5, %v2782_v22  ;;  %v2783_v38 = vunpack.c.h.bf16 %v1423_v44  ;;  %v2784_v32 = vunpack.c.l.bf16 %v1474_v60  ;;  %v2785_v50 = vunpack.c.h.bf16 %v1474_v60 }
  0x87   :  { %v2193_v56 = vmul.f32 %v458_v5, %v2779_v15  ;;  %v2221_v21 = vmul.f32 %v458_v5, %v2786_v37  ;;  %v2787_v22 = vunpack.c.h.bf16 %v1476_v61  ;;  %v2788_v44 = vunpack.c.l.bf16 %v1478_v62 }
  0x88   :  { %v2209_v6 = vmul.f32 %v458_v5, %v2783_v38  ;;  %v2213_v15 = vmul.f32 %v458_v5, %v2784_v32  ;;  %v2217_v55 = vmul.f32 %v458_v5, %v2785_v50  ;;  %v2233_v32 = vmul.f32 %v473_v14, %v2789_v58 }
  0x89   :  { %v2225_v48 = vmul.f32 %v458_v5, %v2787_v22  ;;  %v2229_v38 = vmul.f32 %v458_v5, %v2788_v44  ;;  %v2790_v60 = vunpack.c.h.bf16 %v1555_v59  ;;  %v2241_v37 = vmul.f32 %v473_v14, %v2791_v9  ;;  %v483_v28 = vpop.permute.xlu1 %482 }
  0x8a   :  { %v2792_v61 = vunpack.c.h.bf16 %v1579_v10  ;;  %v2794_v62 = vunpack.c.l.bf16 %v2793_v30  ;;  %v2795_v44 = vunpack.c.h.bf16 %v2793_v30  ;;  %v2797_v59 = vunpack.c.l.bf16 %v2796_v57  ;;  %v478_v30 = vpop.permute.xlu0 %477 }
  0x8b   :  { %v2237_v50 = vmul.f32 %v473_v14, %v2790_v60  ;;  %v2261_v9 = vmul.f32 %v473_v14, %v2798_v41  ;;  %v2800_v10 = vunpack.c.l.bf16 %v2799_v63  ;;  %v509_v63 = vmul.f32 %v463_v0, %v2809_v26 }
  0x8c   :  { %v2245_v22 = vmul.f32 %v473_v14, %v2792_v61  ;;  %v2249_v5 = vmul.f32 %v473_v14, %v2794_v62  ;;  %v2253_v58 = vmul.f32 %v473_v14, %v2795_v44  ;;  %v2257_v60 = vmul.f32 %v473_v14, %v2797_v59  ;;  %v2804_v59 = vld [vmem:[#allocation6_spill] sm:$0xff] }
  0x8d   :  { %v2265_v61 = vmul.f32 %v473_v14, %v2800_v10  ;;  %v2269_v62 = vmul.f32 %v473_v14, %v2801_v29  ;;  %v2802_v44 = vmov %v1617_v13  ;;  %v2805_v36 = vunpack.c.l.bf16 %v2804_v59  ;;  %v2810_v29 = vld [vmem:[#allocation8_spill] sm:$0xff] }
  0x8e   :  { %v2803_v51 = vunpack.c.l.bf16 %v2802_v44  ;;  %v2806_v41 = vunpack.c.h.bf16 %v2804_v59  ;;  %v508_v10 = vmul.f32 %v463_v0, %v2808_v43  ;;  %v2811_v13 = vunpack.c.l.bf16 %v2810_v29  ;;  %v2816_v59 = vld [vmem:[#allocation10_spill] sm:$0xff] }
  0x8f   :  { %v506_v35 = vmul.f32 %v463_v0, %v2805_v36  ;;  %v2812_v46 = vunpack.c.h.bf16 %v2810_v29  ;;  %v2818_v43 = vunpack.c.h.bf16 %v2816_v59  ;;  %v2820_v26 = vunpack.c.l.bf16 %v2819_v34 }
  0x90   :  { %v2273_v3 = vmul.f32 %v473_v14, %v2803_v51  ;;  %v507_v57 = vmul.f32 %v463_v0, %v2806_v41  ;;  %v510_v2 = vmul.f32 %v463_v0, %v2811_v13  ;;  %v2813_v51 = vld [vmem:[#allocation9_spill] sm:$0xff]  ;;  %v2817_v41 = vunpack.c.l.bf16 %v2816_v59  ;;  %v2313_v59 = vpop.permute.xlu1 %492 }
  0x91   :  { %v511_v44 = vmul.f32 %v463_v0, %v2812_v46  ;;  %v2814_v14 = vunpack.c.l.bf16 %v2813_v51  ;;  %v2815_v36 = vunpack.c.h.bf16 %v2813_v51  ;;  %v515_v42 = vmul.f32 %v463_v0, %v2818_v43  ;;  %2831 = vst [vmem:[#allocation6_spill] sm:$0xff] %v2313_v59  ;;  %v2315_v43 = vpop.permute.xlu0 %487  ;;  %v2843_v59 = vld [vmem:[#allocation16_spill] sm:$0xff] }
  0x92   :  { %v514_v24 = vmul.f32 %v463_v0, %v2817_v41  ;;  %v516_v7 = vmul.f32 %v463_v0, %v2820_v26  ;;  %v2822_v13 = vunpack.c.l.bf16 %v2821_v17  ;;  %v2824_v46 = vunpack.c.h.bf16 %v2821_v17  ;;  %2832 = vst [vmem:[#allocation7_spill] sm:$0xff] %v2315_v43 }
  0x93   :  { %v512_v12 = vmul.f32 %v463_v0, %v2814_v14  ;;  %v513_v31 = vmul.f32 %v463_v0, %v2815_v36  ;;  %v2826_v14 = vld [vmem:[#allocation13_spill] sm:$0xff]  ;;  %v2833_v0 = vld [vmem:[#allocation14_spill] sm:$0xff]  ;;  %v2844_v54 = vunpack.c.l.bf16 %v2843_v59 }
  0x94   :  { %v2299_v16 = vmul.f32 %v483_v28, %v2822_v13  ;;  %v2303_v29 = vmul.f32 %v483_v28, %v2824_v46  ;;  %v2827_v51 = vunpack.c.l.bf16 %v2826_v14  ;;  %v2829_v41 = vunpack.c.h.bf16 %v2826_v14  ;;  %v2838_v46 = vld [vmem:[#allocation15_spill] sm:$0xff] }
  0x95   :  { %v2834_v34 = vunpack.c.l.bf16 %v2833_v0  ;;  %v2836_v17 = vunpack.c.h.bf16 %v2833_v0  ;;  %v2839_v49 = vunpack.c.l.bf16 %v2838_v46  ;;  %v2841_v14 = vunpack.c.h.bf16 %v2838_v46  ;;  %v2848_v0 = vld [vmem:[#allocation17_spill] sm:$0xff] }
  0x96   :  { %2823 = vst [vmem:[#allocation2_spill] sm:$0xff] %v2299_v16  ;;  %2825 = vst [vmem:[#allocation3_spill] sm:$0xff] %v2303_v29  ;;  %v2307_v36 = vmul.f32 %v483_v28, %v2827_v51  ;;  %v2311_v45 = vmul.f32 %v483_v28, %v2829_v41  ;;  %v2335_v43 = vmul.f32 %v483_v28, %v2844_v54 }
  0x97   :  { %v2319_v26 = vmul.f32 %v483_v28, %v2834_v34  ;;  %v2323_v13 = vmul.f32 %v483_v28, %v2836_v17  ;;  %v2327_v51 = vmul.f32 %v483_v28, %v2839_v49  ;;  %v2331_v41 = vmul.f32 %v483_v28, %v2841_v14 }
  0x98   :  { %2828 = vst [vmem:[#allocation4_spill] sm:$0xff] %v2307_v36  ;;  %2830 = vst [vmem:[#allocation5_spill] sm:$0xff] %v2311_v45  ;;  %v2846_v34 = vunpack.c.h.bf16 %v2843_v59  ;;  %v2849_v17 = vunpack.c.l.bf16 %v2848_v0  ;;  %v2851_v45 = vld [vmem:[#allocation18_spill] sm:$0xff] }
  0x99   :  { %2835 = vst [vmem:[#allocation8_spill] sm:$0xff] %v2319_v26  ;;  %2837 = vst [vmem:[#allocation9_spill] sm:$0xff] %v2323_v13  ;;  %v2852_v49 = vunpack.c.l.bf16 %v2851_v45  ;;  %v2854_v46 = vunpack.c.h.bf16 %v2851_v45 }
  0x9a   :  { %2840 = vst [vmem:[#allocation10_spill] sm:$0xff] %v2327_v51  ;;  %2842 = vst [vmem:[#allocation11_spill] sm:$0xff] %v2331_v41  ;;  %v2339_v26 = vmul.f32 %v483_v28, %v2846_v34  ;;  %v2343_v13 = vmul.f32 %v483_v28, %v2849_v17  ;;  %v2856_v41 = vld [vmem:[#allocation19_spill] sm:$0xff] }
  0x9b   :  { %2845 = vst [vmem:[#allocation12_spill] sm:$0xff] %v2335_v43  ;;  %v2347_v51 = vmul.f32 %v478_v30, %v2852_v49  ;;  %v2351_v14 = vmul.f32 %v478_v30, %v2854_v46  ;;  %v2857_v36 = vunpack.c.l.bf16 %v2856_v41  ;;  %v2859_v59 = vunpack.c.h.bf16 %v2856_v41 }
  0x9c   :  { %2847 = vst [vmem:[#allocation13_spill] sm:$0xff] %v2339_v26  ;;  %2850 = vst [vmem:[#allocation14_spill] sm:$0xff] %v2343_v13  ;;  %v2861_v26 = vld [vmem:[#allocation20_spill] sm:$0xff] }
  0x9d   :  { %2853 = vst [vmem:[#allocation15_spill] sm:$0xff] %v2347_v51  ;;  %2855 = vst [vmem:[#allocation16_spill] sm:$0xff] %v2351_v14  ;;  %v2355_v54 = vmul.f32 %v478_v30, %v2857_v36  ;;  %v2359_v34 = vmul.f32 %v478_v30, %v2859_v59  ;;  %v2862_v0 = vunpack.c.l.bf16 %v2861_v26  ;;  %v2864_v17 = vunpack.c.h.bf16 %v2861_v26  ;;  %v2866_v51 = vld [vmem:[#allocation21_spill] sm:$0xff] }
  0x9e   :  { %v2867_v45 = vunpack.c.l.bf16 %v2866_v51  ;;  %v2869_v14 = vunpack.c.h.bf16 %v2866_v51  ;;  %v2876_v26 = vunpack.c.l.bf16 %v1950_v1 }
  0x9f   :  { %2858 = vst [vmem:[#allocation17_spill] sm:$0xff] %v2355_v54  ;;  %2860 = vst [vmem:[#allocation18_spill] sm:$0xff] %v2359_v34  ;;  %v2363_v28 = vmul.f32 %v478_v30, %v2862_v0  ;;  %v2367_v49 = vmul.f32 %v478_v30, %v2864_v17  ;;  %v2871_v54 = vld [vmem:[#allocation22_spill] sm:$0xff]  ;;  %v599_v34 = vpop.permute.xlu1 %598 }
  0xa0   :  { %v2371_v46 = vmul.f32 %v478_v30, %v2867_v45  ;;  %v2375_v36 = vmul.f32 %v478_v30, %v2869_v14  ;;  %v2872_v41 = vunpack.c.l.bf16 %v2871_v54  ;;  %v2874_v0 = vunpack.c.h.bf16 %v2871_v54 }
  0xa1   :  { %2863 = vst [vmem:[#allocation19_spill] sm:$0xff] %v2363_v28  ;;  %2865 = vst [vmem:[#allocation20_spill] sm:$0xff] %v2367_v49  ;;  %v2387_v17 = vmul.f32 %v478_v30, %v2876_v26  ;;  %v642_v49 = vadd.f32 %v599_v34, %v506_v35  ;;  %v643_v45 = vadd.f32 %v599_v34, %v507_v57  ;;  %v2879_v26 = vld [vmem:[#allocation2_spill] sm:$0xff] }
  0xa2   :  { %2868 = vst [vmem:[#allocation21_spill] sm:$0xff] %v2371_v46  ;;  %2870 = vst [vmem:[#allocation37_spill] sm:$0xff] %v2375_v36  ;;  %v2379_v59 = vmul.f32 %v478_v30, %v2872_v41  ;;  %v2383_v28 = vmul.f32 %v478_v30, %v2874_v0  ;;  %v644_v46 = vadd.f32 %v599_v34, %v508_v10  ;;  %v594_v36 = vpop.permute.xlu0 %593 }
  0xa3   :  { %v645_v13 = vadd.f32 %v599_v34, %v509_v63  ;;  %v646_v51 = vadd.f32 %v599_v34, %v510_v2  ;;  %v647_v14 = vadd.f32 %v599_v34, %v511_v44  ;;  %v648_v43 = vadd.f32 %v599_v34, %v512_v12 }
  0xa4   :  { %2873 = vst [vmem:[#allocation22_spill] sm:$0xff] %v2379_v59  ;;  %2875 = vst [vmem:[#allocation38_spill] sm:$0xff] %v2383_v28  ;;  %v649_v29 = vadd.f32 %v599_v34, %v513_v31  ;;  %v650_v41 = vadd.f32 %v599_v34, %v514_v24  ;;  %v651_v59 = vadd.f32 %v599_v34, %v515_v42  ;;  %v609_v31 = vpop.permute.xlu1 %608 }
  0xa5   :  { %v652_v16 = vadd.f32 %v599_v34, %v516_v7  ;;  %v1098_v39 = vpack.c.bf16 %v643_v45, %v642_v49  ;;  %v1099_v54 = vpack.c.bf16 %v645_v13, %v644_v46  ;;  %v1100_v0 = vpack.c.bf16 %v647_v14, %v646_v51 }
  0xa6   :  { %v1101_v28 = vpack.c.bf16 %v649_v29, %v648_v43  ;;  %v1102_v52 = vpack.c.bf16 %v651_v59, %v650_v41  ;;  %v631_v1 = vadd.f32 %v594_v36, %v2189_v4  ;;  %v632_v35 = vadd.f32 %v594_v36, %v2193_v56 }
  0xa7   :  { %v1103_v30 = vpack.c.bf16 %v652_v16, %v652_v16  ;;  %998 = vst [vmem:[%s2668_s6 + $0x2c] sm:$0xff] %v1098_v39  ;;  %999 = vst [vmem:[%s2668_s6 + $0x34] sm:$0xff] %v1099_v54  ;;  %v633_v7 = vadd.f32 %v594_v36, %v2197_v8  ;;  %v634_v42 = vadd.f32 %v594_v36, %v2201_v11  ;;  %v2880_v54 = vld [vmem:[#allocation3_spill] sm:$0xff] }
  0xa8   :  { %1000 = vst [vmem:[%s2668_s6 + $0x3c] sm:$0xff] %v1100_v0  ;;  %v635_v24 = vadd.f32 %v594_v36, %v2205_v47  ;;  %1001 = vst [vmem:[%s2668_s6 + $0x44] sm:$0xff] %v1101_v28  ;;  %v636_v16 = vadd.f32 %v594_v36, %v2209_v6  ;;  %v637_v12 = vadd.f32 %v594_v36, %v2213_v15  ;;  %v619_v28 = vpop.permute.xlu1 %618 }
  0xa9   :  { %1002 = vst [vmem:[%s2668_s6 + $0x4c] sm:$0xff] %v1102_v52  ;;  %v638_v2 = vadd.f32 %v594_v36, %v2217_v55  ;;  %v639_v39 = vadd.f32 %v594_v36, %v2221_v21  ;;  %1003 = vst.msk [vmem:[%s2668_s6 + $0x54] sm:$0xf] %vm996_vm0, %v1103_v30  ;;  %v640_v4 = vadd.f32 %v594_v36, %v2225_v48  ;;  %v2883_v30 = vld [vmem:[#allocation8_spill] sm:$0xff] }
  0xaa   :  { %v641_v56 = vadd.f32 %v594_v36, %v2229_v38  ;;  %v1092_v8 = vpack.c.bf16 %v632_v35, %v631_v1  ;;  %v1093_v11 = vpack.c.bf16 %v634_v42, %v633_v7  ;;  %v1094_v52 = vpack.c.bf16 %v636_v16, %v635_v24  ;;  %v604_v38 = vpop.permute.xlu0 %603  ;;  %v2882_v1 = vld [vmem:[#allocation5_spill] sm:$0xff]  ;;  %v2885_v16 = vld [vmem:[#allocation10_spill] sm:$0xff] }
  0xab   :  { %v1095_v47 = vpack.c.bf16 %v638_v2, %v637_v12  ;;  %v664_v6 = vadd.f32 %v609_v31, %v2233_v32  ;;  %v665_v15 = vadd.f32 %v609_v31, %v2237_v50  ;;  %v1096_v55 = vpack.c.bf16 %v640_v4, %v639_v39  ;;  %v2884_v42 = vld [vmem:[#allocation9_spill] sm:$0xff]  ;;  %v2886_v2 = vld [vmem:[#allocation11_spill] sm:$0xff]  ;;  %v2887_v4 = vld [vmem:[#allocation12_spill] sm:$0xff] }
  0xac   :  { %v1097_v57 = vpack.c.bf16 %v641_v56, %v641_v56  ;;  %991 = vst [vmem:[%s2668_s6] sm:$0xff] %v1092_v8  ;;  %992 = vst [vmem:[%s2668_s6 + $0x8] sm:$0xff] %v1093_v11  ;;  %v666_v48 = vadd.f32 %v609_v31, %v2241_v37  ;;  %v667_v21 = vadd.f32 %v609_v31, %v2245_v22  ;;  %v2888_v8 = vld [vmem:[#allocation13_spill] sm:$0xff] }
  0xad   :  { %993 = vst [vmem:[%s2668_s6 + $0x10] sm:$0xff] %v1094_v52  ;;  %994 = vst [vmem:[%s2668_s6 + $0x18] sm:$0xff] %v1095_v47  ;;  %v668_v32 = vadd.f32 %v609_v31, %v2249_v5  ;;  %v669_v50 = vadd.f32 %v609_v31, %v2253_v58  ;;  %v670_v10 = vadd.f32 %v609_v31, %v2257_v60  ;;  %v2889_v52 = vld [vmem:[#allocation14_spill] sm:$0xff] }
  0xae   :  { %v671_v63 = vadd.f32 %v609_v31, %v2261_v9  ;;  %995 = vst [vmem:[%s2668_s6 + $0x20] sm:$0xff] %v1096_v55  ;;  %997 = vst.msk [vmem:[%s2668_s6 + $0x28] sm:$0xf] %vm996_vm0, %v1097_v57  ;;  %v672_v37 = vadd.f32 %v609_v31, %v2265_v61  ;;  %v673_v22 = vadd.f32 %v609_v31, %v2269_v62 }
  0xaf   :  { %v674_v5 = vadd.f32 %v609_v31, %v2273_v3  ;;  %v1110_v58 = vpack.c.bf16 %v665_v15, %v664_v6  ;;  %v1111_v44 = vpack.c.bf16 %v667_v21, %v666_v48  ;;  %v1112_v60 = vpack.c.bf16 %v669_v50, %v668_v32  ;;  %v614_v31 = vpop.permute.xlu0 %613  ;;  %v2890_v21 = vld [vmem:[#allocation15_spill] sm:$0xff]  ;;  %v2891_v32 = vld [vmem:[#allocation16_spill] sm:$0xff] }
  0xb0   :  { %v1113_v29 = vpack.c.bf16 %v671_v63, %v670_v10  ;;  %v653_v9 = vadd.f32 %v604_v38, %v2145_v33  ;;  %v1114_v43 = vpack.c.bf16 %v673_v22, %v672_v37  ;;  %v654_v34 = vadd.f32 %v604_v38, %v2149_v19  ;;  %v2892_v63 = vld [vmem:[#allocation17_spill] sm:$0xff]  ;;  %v2893_v22 = vld [vmem:[#allocation18_spill] sm:$0xff] }
  0xb1   :  { %v1115_v13 = vpack.c.bf16 %v674_v5, %v674_v5  ;;  %1010 = vst [vmem:[%s2668_s6 + $0x84] sm:$0xff] %v1110_v58  ;;  %v655_v61 = vadd.f32 %v604_v38, %v2153_v23  ;;  %1011 = vst [vmem:[%s2668_s6 + $0x8c] sm:$0xff] %v1111_v44  ;;  %v656_v3 = vadd.f32 %v604_v38, %v2157_v27  ;;  %v2877_v27 = vld [vmem:[#allocation35_spill] sm:$0xff] }
  0xb2   :  { %1012 = vst [vmem:[%s2668_s6 + $0x94] sm:$0xff] %v1112_v60  ;;  %1013 = vst [vmem:[%s2668_s6 + $0x9c] sm:$0xff] %v1113_v29  ;;  %v657_v33 = vadd.f32 %v604_v38, %v2161_v18  ;;  %v658_v19 = vadd.f32 %v604_v38, %v2165_v53  ;;  %v659_v23 = vadd.f32 %v604_v38, %v2169_v25  ;;  %v2878_v18 = vld [vmem:[#allocation36_spill] sm:$0xff]  ;;  %v2894_v58 = vld [vmem:[#allocation19_spill] sm:$0xff] }
  0xb3   :  { %1014 = vst [vmem:[%s2668_s6 + $0xa4] sm:$0xff] %v1114_v43  ;;  %1015 = vst.msk [vmem:[%s2668_s6 + $0xac] sm:$0xf] %vm996_vm0, %v1115_v13  ;;  %v660_v62 = vadd.f32 %v604_v38, %v2173_v20  ;;  %v661_v49 = vadd.f32 %v604_v38, %v2177_v40  ;;  %v662_v46 = vadd.f32 %v604_v38, %v2877_v27  ;;  %v2881_v20 = vld [vmem:[#allocation4_spill] sm:$0xff]  ;;  %v2897_v13 = vld [vmem:[#allocation37_spill] sm:$0xff] }
  0xb4   :  { %v663_v36 = vadd.f32 %v604_v38, %v2878_v18  ;;  %v1104_v53 = vpack.c.bf16 %v654_v34, %v653_v9  ;;  %v1105_v59 = vpack.c.bf16 %v656_v3, %v655_v61  ;;  %v1106_v25 = vpack.c.bf16 %v658_v19, %v657_v33  ;;  %v2895_v60 = vld [vmem:[#allocation20_spill] sm:$0xff]  ;;  %v2896_v9 = vld [vmem:[#allocation21_spill] sm:$0xff]  ;;  %v2898_v61 = vld [vmem:[#allocation22_spill] sm:$0xff] }
  0xb5   :  { %v686_v45 = vadd.f32 %v619_v28, %v2879_v26  ;;  %v1107_v51 = vpack.c.bf16 %v660_v62, %v659_v23  ;;  %v1108_v14 = vpack.c.bf16 %v662_v46, %v661_v49  ;;  %v687_v0 = vadd.f32 %v619_v28, %v2880_v54  ;;  %v2899_v3 = vld [vmem:[#allocation38_spill] sm:$0xff]  ;;  %v629_v46 = vpop.permute.xlu1 %628  ;;  %v2900_v18 = vld [vmem:[#allocation23_spill] sm:$0xff] }
  0xb6   :  { %v1109_v41 = vpack.c.bf16 %v663_v36, %v663_v36  ;;  %1004 = vst [vmem:[%s2668_s6 + $0x58] sm:$0xff] %v1104_v53  ;;  %1005 = vst [vmem:[%s2668_s6 + $0x60] sm:$0xff] %v1105_v59  ;;  %v688_v40 = vadd.f32 %v619_v28, %v2881_v20  ;;  %v689_v35 = vadd.f32 %v619_v28, %v2882_v1  ;;  %v2901_v36 = vunpack.c.l.bf16 %v2900_v18  ;;  %v2902_v53 = vld [vmem:[#allocation6_spill] sm:$0xff]  ;;  %v2907_v20 = vld [vmem:[#allocation25_spill] sm:$0xff] }
  0xb7   :  { %1006 = vst [vmem:[%s2668_s6 + $0x68] sm:$0xff] %v1106_v25  ;;  %v690_v7 = vadd.f32 %v619_v28, %v2883_v30  ;;  %v691_v24 = vadd.f32 %v619_v28, %v2884_v42  ;;  %1007 = vst [vmem:[%s2668_s6 + $0x70] sm:$0xff] %v1107_v51  ;;  %v692_v12 = vadd.f32 %v619_v28, %v2885_v16  ;;  %v2903_v25 = vunpack.c.h.bf16 %v2900_v18 }
  0xb8   :  { %1008 = vst [vmem:[%s2668_s6 + $0x78] sm:$0xff] %v1108_v14  ;;  %1009 = vst.msk [vmem:[%s2668_s6 + $0x80] sm:$0xf] %vm996_vm0, %v1109_v41  ;;  %v693_v39 = vadd.f32 %v619_v28, %v2886_v2  ;;  %v694_v56 = vadd.f32 %v619_v28, %v2887_v4  ;;  %v695_v11 = vadd.f32 %v619_v28, %v2888_v8  ;;  %v2916_v8 = vld [vmem:[#allocation28_spill] sm:$0xff] }
  0xb9   :  { %v696_v47 = vadd.f32 %v619_v28, %v2889_v52  ;;  %v1122_v6 = vpack.c.bf16 %v687_v0, %v686_v45  ;;  %v1123_v15 = vpack.c.bf16 %v689_v35, %v688_v40  ;;  %v1124_v55 = vpack.c.bf16 %v691_v24, %v690_v7  ;;  %v2910_v7 = vld [vmem:[#allocation26_spill] sm:$0xff] }
  0xba   :  { %v1125_v57 = vpack.c.bf16 %v693_v39, %v692_v12  ;;  %v1126_v48 = vpack.c.bf16 %v695_v11, %v694_v56  ;;  %v675_v38 = vadd.f32 %v614_v31, %v2890_v21  ;;  %v676_v50 = vadd.f32 %v614_v31, %v2891_v32  ;;  %v2913_v12 = vld [vmem:[#allocation27_spill] sm:$0xff] }
  0xbb   :  { %v1127_v10 = vpack.c.bf16 %v696_v47, %v696_v47  ;;  %1022 = vst [vmem:[%s2668_s6 + $0xdc] sm:$0xff] %v1122_v6  ;;  %1023 = vst [vmem:[%s2668_s6 + $0xe4] sm:$0xff] %v1123_v15  ;;  %v677_v37 = vadd.f32 %v614_v31, %v2892_v63  ;;  %v678_v5 = vadd.f32 %v614_v31, %v2893_v22  ;;  %v2908_v40 = vunpack.c.l.bf16 %v2907_v20 }
  0xbc   :  { %1024 = vst [vmem:[%s2668_s6 + $0xec] sm:$0xff] %v1124_v55  ;;  %v679_v44 = vadd.f32 %v614_v31, %v2894_v58  ;;  %1025 = vst [vmem:[%s2668_s6 + $0xf4] sm:$0xff] %v1125_v57  ;;  %v680_v29 = vadd.f32 %v614_v31, %v2895_v60  ;;  %v681_v43 = vadd.f32 %v614_v31, %v2896_v9  ;;  %v2909_v35 = vunpack.c.h.bf16 %v2907_v20  ;;  %v624_v58 = vpop.permute.xlu0 %623 }
  0xbd   :  { %1026 = vst [vmem:[%s2668_s6 + $0xfc] sm:$0xff] %v1126_v48  ;;  %v682_v34 = vadd.f32 %v614_v31, %v2897_v13  ;;  %v683_v28 = vadd.f32 %v614_v31, %v2898_v61  ;;  %1027 = vst.msk [vmem:[%s2668_s6 + $0x104] sm:$0xf] %vm996_vm0, %v1127_v10  ;;  %v684_v33 = vadd.f32 %v614_v31, %v2899_v3  ;;  %v2911_v42 = vunpack.c.l.bf16 %v2910_v7 }
  0xbe   :  { %v685_v19 = vadd.f32 %v614_v31, %v2387_v17  ;;  %v1116_v23 = vpack.c.bf16 %v676_v50, %v675_v38  ;;  %v1117_v62 = vpack.c.bf16 %v678_v5, %v677_v37  ;;  %v1118_v49 = vpack.c.bf16 %v680_v29, %v679_v44  ;;  %v2904_v17 = vld [vmem:[#allocation24_spill] sm:$0xff]  ;;  %v2918_v44 = vld [vmem:[#allocation29_spill] sm:$0xff]  ;;  %v2920_v29 = vld [vmem:[#allocation7_spill] sm:$0xff] }
  0xbf   :  { %v1119_v27 = vpack.c.bf16 %v682_v34, %v681_v43  ;;  %v572_v59 = vmul.f32 %v2902_v53, %v2901_v36  ;;  %v573_v26 = vmul.f32 %v2902_v53, %v2903_v25  ;;  %v1120_v45 = vpack.c.bf16 %v684_v33, %v683_v28  ;;  %v2922_v28 = vld [vmem:[#allocation30_spill] sm:$0xff]  ;;  %v2928_v36 = vld [vmem:[#allocation32_spill] sm:$0xff] }
  0xc0   :  { %v1121_v51 = vpack.c.bf16 %v685_v19, %v685_v19  ;;  %1016 = vst [vmem:[%s2668_s6 + $0xb0] sm:$0xff] %v1116_v23  ;;  %1017 = vst [vmem:[%s2668_s6 + $0xb8] sm:$0xff] %v1117_v62  ;;  %v2905_v14 = vunpack.c.l.bf16 %v2904_v17  ;;  %v2906_v54 = vunpack.c.h.bf16 %v2904_v17  ;;  %v576_v1 = vmul.f32 %v2902_v53, %v2908_v40  ;;  %v2925_v62 = vld [vmem:[#allocation31_spill] sm:$0xff] }
  0xc1   :  { %1018 = vst [vmem:[%s2668_s6 + $0xc0] sm:$0xff] %v1118_v49  ;;  %1019 = vst [vmem:[%s2668_s6 + $0xc8] sm:$0xff] %v1119_v27  ;;  %v577_v30 = vmul.f32 %v2902_v53, %v2909_v35  ;;  %v578_v24 = vmul.f32 %v2902_v53, %v2911_v42  ;;  %v2912_v31 = vunpack.c.h.bf16 %v2910_v7  ;;  %v2914_v2 = vunpack.c.l.bf16 %v2913_v12 }
  0xc2   :  { %v574_v41 = vmul.f32 %v2902_v53, %v2905_v14  ;;  %v575_v0 = vmul.f32 %v2902_v53, %v2906_v54  ;;  %1020 = vst [vmem:[%s2668_s6 + $0xd0] sm:$0xff] %v1120_v45  ;;  %1021 = vst.msk [vmem:[%s2668_s6 + $0xd8] sm:$0xf] %vm996_vm0, %v1121_v51  ;;  %v2915_v4 = vunpack.c.h.bf16 %v2913_v12  ;;  %v2917_v11 = vunpack.c.l.bf16 %v2916_v8  ;;  %v2931_v45 = vld [vmem:[#allocation33_spill] sm:$0xff]  ;;  %v2934_v54 = vld [vmem:[#allocation34_spill] sm:$0xff] }
  0xc3   :  { %v579_v16 = vmul.f32 %v2902_v53, %v2912_v31  ;;  %v580_v39 = vmul.f32 %v2902_v53, %v2914_v2  ;;  %v708_v47 = vadd.f32 %v629_v46, %v572_v59  ;;  %v709_v6 = vadd.f32 %v629_v46, %v573_v26 }
  0xc4   :  { %v581_v56 = vmul.f32 %v2902_v53, %v2915_v4  ;;  %v582_v52 = vmul.f32 %v2902_v53, %v2917_v11  ;;  %v710_v15 = vadd.f32 %v629_v46, %v574_v41  ;;  %v711_v55 = vadd.f32 %v629_v46, %v575_v0 }
  0xc5   :  { %v712_v57 = vadd.f32 %v629_v46, %v576_v1  ;;  %v713_v48 = vadd.f32 %v629_v46, %v577_v30  ;;  %v714_v21 = vadd.f32 %v629_v46, %v578_v24  ;;  %v715_v38 = vadd.f32 %v629_v46, %v579_v16 }
  0xc6   :  { %v716_v32 = vadd.f32 %v629_v46, %v580_v39  ;;  %v717_v50 = vadd.f32 %v629_v46, %v581_v56  ;;  %v718_v10 = vadd.f32 %v629_v46, %v582_v52  ;;  %v1134_v63 = vpack.c.bf16 %v709_v6, %v708_v47 }
  0xc7   :  { %v1135_v37 = vpack.c.bf16 %v711_v55, %v710_v15  ;;  %v1136_v22 = vpack.c.bf16 %v713_v48, %v712_v57  ;;  %v1137_v5 = vpack.c.bf16 %v715_v38, %v714_v21  ;;  %v2919_v60 = vunpack.c.l.bf16 %v2918_v44 }
  0xc8   :  { %v2921_v43 = vunpack.c.h.bf16 %v2918_v44  ;;  %v1138_v34 = vpack.c.bf16 %v717_v50, %v716_v32  ;;  %v1139_v61 = vpack.c.bf16 %v718_v10, %v718_v10  ;;  %1034 = vst [vmem:[%s2668_s6 + $0x134] sm:$0xff] %v1134_v63  ;;  %v2923_v3 = vunpack.c.l.bf16 %v2922_v28 }
  0xc9   :  { %v561_v9 = vmul.f32 %v2920_v29, %v2919_v60  ;;  %1035 = vst [vmem:[%s2668_s6 + $0x13c] sm:$0xff] %v1135_v37  ;;  %v2924_v19 = vunpack.c.h.bf16 %v2922_v28  ;;  %1036 = vst [vmem:[%s2668_s6 + $0x144] sm:$0xff] %v1136_v22  ;;  %v2926_v49 = vunpack.c.l.bf16 %v2925_v62  ;;  %v2927_v46 = vunpack.c.h.bf16 %v2925_v62 }
  0xca   :  { %v562_v13 = vmul.f32 %v2920_v29, %v2921_v43  ;;  %v563_v33 = vmul.f32 %v2920_v29, %v2923_v3  ;;  %1037 = vst [vmem:[%s2668_s6 + $0x14c] sm:$0xff] %v1137_v5  ;;  %v2929_v53 = vunpack.c.l.bf16 %v2928_v36  ;;  %v2930_v25 = vunpack.c.h.bf16 %v2928_v36  ;;  %1038 = vst [vmem:[%s2668_s6 + $0x154] sm:$0xff] %v1138_v34 }
  0xcb   :  { %v564_v23 = vmul.f32 %v2920_v29, %v2924_v19  ;;  %v565_v27 = vmul.f32 %v2920_v29, %v2926_v49  ;;  %v566_v18 = vmul.f32 %v2920_v29, %v2927_v46  ;;  %1039 = vst.msk [vmem:[%s2668_s6 + $0x15c] sm:$0xf] %vm996_vm0, %v1139_v61  ;;  %v2932_v51 = vunpack.c.l.bf16 %v2931_v45 }
  0xcc   :  { %v567_v59 = vmul.f32 %v2920_v29, %v2929_v53  ;;  %v568_v26 = vmul.f32 %v2920_v29, %v2930_v25  ;;  %v2933_v14 = vunpack.c.h.bf16 %v2931_v45  ;;  %v2935_v0 = vunpack.c.l.bf16 %v2934_v54 }
  0xcd   :  { %v569_v17 = vmul.f32 %v2920_v29, %v2932_v51  ;;  %v697_v40 = vadd.f32 %v624_v58, %v561_v9  ;;  %v698_v1 = vadd.f32 %v624_v58, %v562_v13  ;;  %v699_v35 = vadd.f32 %v624_v58, %v563_v33 }
  0xce   :  { %v570_v41 = vmul.f32 %v2920_v29, %v2933_v14  ;;  %v571_v20 = vmul.f32 %v2920_v29, %v2935_v0  ;;  %v700_v30 = vadd.f32 %v624_v58, %v564_v23  ;;  %v701_v7 = vadd.f32 %v624_v58, %v565_v27 }
  0xcf   :  { %v702_v42 = vadd.f32 %v624_v58, %v566_v18  ;;  %v703_v24 = vadd.f32 %v624_v58, %v567_v59  ;;  %v704_v31 = vadd.f32 %v624_v58, %v568_v26  ;;  %v705_v16 = vadd.f32 %v624_v58, %v569_v17 }
  0xd0   :  { %v706_v12 = vadd.f32 %v624_v58, %v570_v41  ;;  %v707_v2 = vadd.f32 %v624_v58, %v571_v20  ;;  %v1128_v39 = vpack.c.bf16 %v698_v1, %v697_v40  ;;  %v1129_v4 = vpack.c.bf16 %v700_v30, %v699_v35 }
  0xd1   :  { %v1130_v56 = vpack.c.bf16 %v702_v42, %v701_v7  ;;  %v1131_v8 = vpack.c.bf16 %v704_v31, %v703_v24 }
  0xd2   :  { %v1132_v11 = vpack.c.bf16 %v706_v12, %v705_v16  ;;  %v1133_v52 = vpack.c.bf16 %v707_v2, %v707_v2  ;;  %1028 = vst [vmem:[%s2668_s6 + $0x108] sm:$0xff] %v1128_v39  ;;  %1029 = vst [vmem:[%s2668_s6 + $0x110] sm:$0xff] %v1129_v4 }
  0xd3   :  { %1030 = vst [vmem:[%s2668_s6 + $0x118] sm:$0xff] %v1130_v56  ;;  %1031 = vst [vmem:[%s2668_s6 + $0x120] sm:$0xff] %v1131_v8 }
  0xd4   :  { %1032 = vst [vmem:[%s2668_s6 + $0x128] sm:$0xff] %v1132_v11  ;;  %1033 = vst.msk [vmem:[%s2668_s6 + $0x130] sm:$0xf] %vm996_vm0, %v1133_v52 }

// kernel: net_forward.10
= control target key start
LH: loop header
LB: loop body
LE: loop exit
PB: predicated region body
PF: predicated region fallthrough
CT: control target
= control target key end

     0   :  { %v2011_v1 = vmov 0.0   ;;  %vm426_vm0 = vcmask 261120   ;;  %v2012_v30 = vmov 0   ;;  %s2809_s1 = inlined_call_operand.vmem [shape: bf16[288,768], index: 1, kind: input, shape index: {}]   ;;  %s2810_s0 = inlined_call_operand.vmem [shape: bf16[64,288], index: 0, kind: input, shape index: {}]   ;;  %s2811_s2 = inlined_call_operand.vmem [shape: f32[64,1], index: 2, kind: input, shape index: {}]   ;;  %s2812_s3 = inlined_call_operand.vmem [shape: bf16[64,768], index: 3, kind: output, shape index: {}]  }
   0x1   :  { %v1849_v0 = vld [vmem:[%s2809_s1 + $0x4] ss:$24 sps:$4 sm:$0xff]   ;;  %628 = vmatprep.mubr.f32.mxu0 %v2011_v1  ;;  %v1853_v3 = vld [vmem:[%s2809_s1] ss:$24 sps:$4 sm:$0xff]   ;;  %v1855_v5 = vld [vmem:[%s2809_s1 + $0x34] ss:$24 sps:$4 sm:$0xff]   ;;  %1847 = vset.pattern.permute.xlu0 %v2012_v30 }
   0x2   :  { %v1851_v2 = vld [vmem:[%s2809_s1 + $0x304] ss:$24 sps:$4 sm:$0xff]   ;;  %1422 = vmatprep.subr.bf16.mxu1 %v1849_v0  ;;  %v1854_v4 = vld [vmem:[%s2809_s1 + $0x300] ss:$24 sps:$4 sm:$0xff]   ;;  %v1857_v6 = vld [vmem:[%s2809_s1 + $0x334] ss:$24 sps:$4 sm:$0xff]   ;;  %1848 = vset.pattern.permute.xlu1 %v2012_v30 }
   0x3   :  { %1486 = vmatprep.subr.bf16.mxu0 %v1851_v2  ;;  %1424 = vmatpush1.bf16.msra.mxu1 %v1853_v3  ;;  %v1859_v7 = vld [vmem:[%s2809_s1 + $0x30] ss:$24 sps:$4 sm:$0xff]   ;;  %v1861_v9 = vld [vmem:[%s2809_s1 + $0x64] ss:$24 sps:$4 sm:$0xff]   ;;  %v1863_v11 = vld [vmem:[%s2809_s1 + $0x60] ss:$24 sps:$4 sm:$0xff]  }
   0x4   :  { %1488 = vmatpush1.bf16.msra.mxu0 %v1854_v4  ;;  %1426 = vmatprep.subr.bf16.mxu1 %v1855_v5  ;;  %v1860_v8 = vld [vmem:[%s2809_s1 + $0x330] ss:$24 sps:$4 sm:$0xff]   ;;  %v1864_v13 = vld [vmem:[%s2809_s1 + $0x30c] ss:$24 sps:$4 sm:$0xff]   ;;  %v1879_v21 = vld [vmem:[%s2809_s1 + $0x33c] ss:$24 sps:$4 sm:$0xff]  }
   0x5   :  { %1490 = vmatprep.subr.bf16.mxu0 %v1857_v6  ;;  %v15_v10 = vld [vmem:[%s2810_s0 + $0x8] ss:$12 sps:$4 sm:$0xff]   ;;  %v19_v18 = vld [vmem:[%s2810_s0 + $0x20] ss:$12 sps:$4 sm:$0xff]   ;;  %v1870_v19 = vld [vmem:[%s2809_s1 + $0xc4] ss:$24 sps:$4 sm:$0xff]  }
   0x6   :  { %v2067_v12 = vunpack.c.l.bf16 %v15_v10  ;;  %v1866_v14 = vld [vmem:[%s2809_s1 + $0x308] ss:$24 sps:$4 sm:$0xff]   ;;  %v1867_v15 = vld [vmem:[%s2809_s1 + $0x94] ss:$24 sps:$4 sm:$0xff]   ;;  %v2080_v16 = vunpack.c.h.bf16 %v15_v10  ;;  %v2094_v20 = vunpack.c.l.bf16 %v19_v18  ;;  %v1881_v22 = vld [vmem:[%s2809_s1 + $0x338] ss:$24 sps:$4 sm:$0xff]   ;;  %v2111_v25 = vunpack.c.h.bf16 %v19_v18 }
   0x7   :  { %1428 = vmatpush1.bf16.msra.mxu1 %v1859_v7  ;;  %v1869_v17 = vld [vmem:[%s2809_s1 + $0x90] ss:$24 sps:$4 sm:$0xff]   ;;  %v1872_v23 = vld [vmem:[%s2809_s1 + $0xc0] ss:$24 sps:$4 sm:$0xff]   ;;  %v1873_v24 = vld [vmem:[%s2809_s1 + $0xf4] ss:$24 sps:$4 sm:$0xff]  }
   0x8   :  { %1492 = vmatpush1.bf16.msra.mxu0 %v1860_v8  ;;  %1430 = vmatprep.subr.bf16.mxu1 %v1861_v9  ;;  %v1875_v26 = vld [vmem:[%s2809_s1 + $0xf0] ss:$24 sps:$4 sm:$0xff]   ;;  %v23_v27 = vld [vmem:[%s2810_s0 + $0x38] ss:$12 sps:$4 sm:$0xff]   ;;  %v1891_v28 = vld [vmem:[%s2809_s1 + $0x14] ss:$24 sps:$4 sm:$0xff]  }
   0x9   :  { %1558 = vmatprep.subr.bf16.mxu0 %v1864_v13  ;;  %v1876_v29 = vld [vmem:[%s2809_s1 + $0x124] ss:$24 sps:$4 sm:$0xff]   ;;  %v2128_v31 = vunpack.c.l.bf16 %v23_v27  ;;  %v1878_v32 = vld [vmem:[%s2809_s1 + $0x120] ss:$24 sps:$4 sm:$0xff]   ;;  %v1882_v33 = vld [vmem:[%s2809_s1 + $0x154] ss:$24 sps:$4 sm:$0xff]   ;;  %v2139_v34 = vunpack.c.h.bf16 %v23_v27 }
   0xa   :  { %v1884_v35 = vld [vmem:[%s2809_s1 + $0x150] ss:$24 sps:$4 sm:$0xff]   ;;  %v1885_v37 = vld [vmem:[%s2809_s1 + $0x184] ss:$24 sps:$4 sm:$0xff]   ;;  %v1887_v39 = vld [vmem:[%s2809_s1 + $0x180] ss:$24 sps:$4 sm:$0xff]  }
   0xb   :  { %1349 = vmatmul.mubr.msk.f32.vlgmr.msra.gmra.mrb[0].mxu0 %vm426_vm0, %v2067_v12  ;;  %1432 = vmatpush1.bf16.msra.mxu1 %v1863_v11  ;;  %v27_v36 = vld [vmem:[%s2810_s0 + $0x50] ss:$12 sps:$4 sm:$0xff]   ;;  %v1888_v40 = vld [vmem:[%s2809_s1 + $0x1b4] ss:$24 sps:$4 sm:$0xff]   ;;  %v2173_v43 = vld [vmem:[%s2810_s0] sm:$0xff] }
   0xc   :  { %1560 = vmatpush1.bf16.msra.mxu0 %v1866_v14  ;;  %634 = vmatprep.mubr.f32.mxu0 %v2011_v1  ;;  %v2153_v38 = vunpack.c.l.bf16 %v27_v36  ;;  %v2164_v41 = vunpack.c.h.bf16 %v27_v36  ;;  %v1890_v42 = vld [vmem:[%s2809_s1 + $0x1b0] ss:$24 sps:$4 sm:$0xff]   ;;  %v1894_v44 = vld [vmem:[%s2809_s1 + $0x1e4] ss:$24 sps:$4 sm:$0xff]   ;;  %v2179_v45 = vunpack.c.h.bf16 %v2173_v43  ;;  %v1896_v47 = vld [vmem:[%s2809_s1 + $0x1e0] ss:$24 sps:$4 sm:$0xff]   ;;  %v2279_v9 = vunpack.c.l.bf16 %v2173_v43 }
   0xd   :  { %1434 = vmatprep.subr.bf16.mxu1 %v1867_v15  ;;  %1562 = vmatprep.subr.bf16.mxu0 %v1879_v21  ;;  %v1893_v46 = vld [vmem:[%s2809_s1 + $0x10] ss:$24 sps:$4 sm:$0xff]   ;;  %v1897_v48 = vld [vmem:[%s2809_s1 + $0x44] ss:$24 sps:$4 sm:$0xff]   ;;  %v1900_v49 = vld [vmem:[%s2809_s1 + $0x214] ss:$24 sps:$4 sm:$0xff]  }
   0xe   :  { %515 = vmatprep.mubr.f32.mxu1 %v2179_v45  ;;  %v1899_v50 = vld [vmem:[%s2809_s1 + $0x40] ss:$24 sps:$4 sm:$0xff]   ;;  %v1902_v51 = vld [vmem:[%s2809_s1 + $0x210] ss:$24 sps:$4 sm:$0xff]   ;;  %v1903_v52 = vld [vmem:[%s2809_s1 + $0x74] ss:$24 sps:$4 sm:$0xff]  }
   0xf   :  { %1350 = vmatmul.mubr.msk.f32.gmra.mrb[2].mxu0 %vm426_vm0, %v2080_v16  ;;  %1436 = vmatpush1.bf16.msra.mxu1 %v1869_v17  ;;  %v1906_v53 = vld [vmem:[%s2809_s1 + $0x244] ss:$24 sps:$4 sm:$0xff]   ;;  %v1905_v54 = vld [vmem:[%s2809_s1 + $0x70] ss:$24 sps:$4 sm:$0xff]   ;;  %v1908_v55 = vld [vmem:[%s2809_s1 + $0x240] ss:$24 sps:$4 sm:$0xff]  }
  0x10   :  { %640 = vmatprep.mubr.f32.mxu0 %v2011_v1  ;;  %1438 = vmatprep.subr.bf16.mxu1 %v1870_v19  ;;  %v1909_v56 = vld [vmem:[%s2809_s1 + $0xa4] ss:$24 sps:$4 sm:$0xff]   ;;  %v1912_v57 = vld [vmem:[%s2809_s1 + $0x274] ss:$24 sps:$4 sm:$0xff]   ;;  %v1911_v58 = vld [vmem:[%s2809_s1 + $0xa0] ss:$24 sps:$4 sm:$0xff]  }
  0x11   :  { %1564 = vmatpush1.bf16.msra.mxu0 %v1881_v22  ;;  %v1914_v59 = vld [vmem:[%s2809_s1 + $0x270] ss:$24 sps:$4 sm:$0xff]   ;;  %v1915_v60 = vld [vmem:[%s2809_s1 + $0xd4] ss:$24 sps:$4 sm:$0xff]   ;;  %v1918_v61 = vld [vmem:[%s2809_s1 + $0x2a4] ss:$24 sps:$4 sm:$0xff]  }
  0x12   :  { %1566 = vmatprep.subr.bf16.mxu0 %v1891_v28  ;;  %v1917_v62 = vld [vmem:[%s2809_s1 + $0xd0] ss:$24 sps:$4 sm:$0xff]   ;;  %v1920_v63 = vld [vmem:[%s2809_s1 + $0x2a0] ss:$24 sps:$4 sm:$0xff]   ;;  %v1921_v0 = vld [vmem:[%s2809_s1 + $0x104] ss:$24 sps:$4 sm:$0xff]  }
  0x13   :  { %1351 = vmatmul.mubr.msk.f32.gmra.mrb[4].mxu0 %vm426_vm0, %v2094_v20  ;;  %1440 = vmatpush1.bf16.msra.mxu1 %v1872_v23  ;;  %v1924_v2 = vld [vmem:[%s2809_s1 + $0x2d4] ss:$24 sps:$4 sm:$0xff]   ;;  %v1923_v3 = vld [vmem:[%s2809_s1 + $0x100] ss:$24 sps:$4 sm:$0xff]   ;;  %v1926_v4 = vld [vmem:[%s2809_s1 + $0x2d0] ss:$24 sps:$4 sm:$0xff]  }
  0x14   :  { %646 = vmatprep.mubr.f32.mxu0 %v2011_v1  ;;  %1442 = vmatprep.subr.bf16.mxu1 %v1873_v24  ;;  %v1927_v5 = vld [vmem:[%s2809_s1 + $0x134] ss:$24 sps:$4 sm:$0xff]   ;;  %v1929_v8 = vld [vmem:[%s2809_s1 + $0x130] ss:$24 sps:$4 sm:$0xff]   ;;  %v1933_v13 = vld [vmem:[%s2809_s1 + $0x164] ss:$24 sps:$4 sm:$0xff]  }
  0x15   :  { %v1930_v6 = vld [vmem:[%s2809_s1 + $0xc] ss:$24 sps:$4 sm:$0xff]   ;;  %v1932_v10 = vld [vmem:[%s2809_s1 + $0x8] ss:$24 sps:$4 sm:$0xff]   ;;  %v1936_v14 = vld [vmem:[%s2809_s1 + $0x3c] ss:$24 sps:$4 sm:$0xff]  }
  0x16   :  { %v16_v7 = vld [vmem:[%s2810_s0 + $0xc] sm:$0xff]  ;;  %v18_v15 = vld [vmem:[%s2810_s0 + $0x18] sm:$0xff]  ;;  %v20_v24 = vld [vmem:[%s2810_s0 + $0x24] sm:$0xff] }
  0x17   :  { %1352 = vmatmul.mubr.msk.f32.gmra.mrb[6].mxu0 %vm426_vm0, %v2111_v25  ;;  %1444 = vmatpush1.bf16.msra.mxu1 %v1875_v26  ;;  %v2286_v11 = vunpack.c.h.bf16 %v16_v7  ;;  %v1935_v17 = vld [vmem:[%s2809_s1 + $0x160] ss:$24 sps:$4 sm:$0xff]   ;;  %v2302_v18 = vunpack.c.l.bf16 %v16_v7  ;;  %v2310_v21 = vunpack.c.h.bf16 %v18_v15  ;;  %v1939_v22 = vld [vmem:[%s2809_s1 + $0x194] ss:$24 sps:$4 sm:$0xff]   ;;  %v1941_v26 = vld [vmem:[%s2809_s1 + $0x190] ss:$24 sps:$4 sm:$0xff]   ;;  %v2326_v27 = vunpack.c.l.bf16 %v18_v15 }
  0x18   :  { %652 = vmatprep.mubr.f32.mxu0 %v2011_v1  ;;  %1446 = vmatprep.subr.bf16.mxu1 %v1876_v29  ;;  %v1938_v19 = vld [vmem:[%s2809_s1 + $0x38] ss:$24 sps:$4 sm:$0xff]   ;;  %v1942_v23 = vld [vmem:[%s2809_s1 + $0x6c] ss:$24 sps:$4 sm:$0xff]   ;;  %v1944_v28 = vld [vmem:[%s2809_s1 + $0x68] ss:$24 sps:$4 sm:$0xff]   ;;  %v2334_v29 = vunpack.c.h.bf16 %v20_v24  ;;  %v2350_v36 = vunpack.c.l.bf16 %v20_v24 }
  0x19   :  { %v1945_v30 = vld [vmem:[%s2809_s1 + $0x1c4] ss:$24 sps:$4 sm:$0xff]   ;;  %v1951_v43 = vld [vmem:[%s2809_s1 + $0x1f4] ss:$24 sps:$4 sm:$0xff]   ;;  %v1974_v15 = vld [vmem:[%s2809_s1 + $0x158] ss:$24 sps:$4 sm:$0xff]  }
  0x1a   :  { %v1981_v24 = vld [vmem:[%s2809_s1 + $0x2e4] ss:$24 sps:$4 sm:$0xff]  }
  0x1b   :  { %1353 = vmatmul.mubr.msk.f32.gmra.mrb[8].mxu0 %vm426_vm0, %v2128_v31  ;;  %1448 = vmatpush1.bf16.msra.mxu1 %v1878_v32  ;;  %v1948_v32 = vld [vmem:[%s2809_s1 + $0x9c] ss:$24 sps:$4 sm:$0xff]  }
  0x1c   :  { %658 = vmatprep.mubr.f32.mxu0 %v2011_v1  ;;  %1450 = vmatprep.subr.bf16.mxu1 %v1882_v33  ;;  %v22_v33 = vld [vmem:[%s2810_s0 + $0x30] sm:$0xff] }
  0x1f   :  { %1354 = vmatmul.mubr.msk.f32.gmra.mrb[10].mxu0 %vm426_vm0, %v2139_v34  ;;  %1452 = vmatpush1.bf16.msra.mxu1 %v1884_v35  ;;  %v1947_v35 = vld [vmem:[%s2809_s1 + $0x1c0] ss:$24 sps:$4 sm:$0xff]  }
  0x20   :  { %664 = vmatprep.mubr.f32.mxu0 %v2011_v1  ;;  %1454 = vmatprep.subr.bf16.mxu1 %v1885_v37  ;;  %v1950_v37 = vld [vmem:[%s2809_s1 + $0x98] ss:$24 sps:$4 sm:$0xff]  }
  0x23   :  { %1355 = vmatmul.mubr.msk.f32.gmra.mrb[12].mxu0 %vm426_vm0, %v2153_v38  ;;  %1456 = vmatpush1.bf16.msra.mxu1 %v1887_v39  ;;  %v378_v39 = vld [vmem:[%s2811_s2] sm:$0xff] }
  0x24   :  { %670 = vmatprep.mubr.f32.mxu0 %v2011_v1  ;;  %1458 = vmatprep.subr.bf16.mxu1 %v1888_v40  ;;  %v380_v40 = vld [vmem:[%s2811_s2 + $0x10] sm:$0xff] }
  0x25   :  { %388 = vperm.xlu0 %1847, %v378_v39   ;;  %398 = vperm.xlu1 %1848, %v380_v40   ;;  %v2005_v39 = vld [vmem:[%s2809_s1 + $0x344] ss:$24 sps:$4 sm:$0xff]   ;;  %v1995_v40 = vld [vmem:[%s2809_s1 + $0x218] ss:$24 sps:$4 sm:$0xff]  }
  0x27   :  { %1356 = vmatmul.mubr.msk.f32.gmra.mrb[14].mxu0 %vm426_vm0, %v2164_v41  ;;  %1460 = vmatpush1.bf16.msra.mxu1 %v1890_v42  ;;  %v2362_v42 = vunpack.c.h.bf16 %v22_v33 }
  0x28   :  { %854 = vmatprep.mubr.f32.mxu0 %v2011_v1  ;;  %1462 = vmatprep.subr.bf16.mxu1 %v1894_v44  ;;  %v1954_v44 = vld [vmem:[%s2809_s1 + $0xcc] ss:$24 sps:$4 sm:$0xff]  }
  0x2b   :  { %1357 = vmatmul.mubr.msk.f32.vlgmr.msra.gmra.mrb[16].mxu0 %vm426_vm0, %v2067_v12  ;;  %1464 = vmatpush1.bf16.msra.mxu1 %v1896_v47  ;;  %v2374_v47 = vunpack.c.l.bf16 %v22_v33  ;;  %v1989_v33 = vld [vmem:[%s2809_s1 + $0x1e8] ss:$24 sps:$4 sm:$0xff]  }
  0x2c   :  { %1568 = vmatpush1.bf16.msra.mxu0 %v1893_v46  ;;  %1466 = vmatprep.subr.bf16.mxu1 %v1900_v49  ;;  %v24_v46 = vld [vmem:[%s2810_s0 + $0x3c] sm:$0xff]  ;;  %v1953_v49 = vld [vmem:[%s2809_s1 + $0x1f0] ss:$24 sps:$4 sm:$0xff]  }
  0x2d   :  { %1570 = vmatprep.subr.bf16.mxu0 %v1897_v48  ;;  %860 = vmatprep.mubr.f32.mxu0 %v2011_v1  ;;  %v379_v48 = vld [vmem:[%s2811_s2 + $0x8] sm:$0xff] }
  0x2e   :  { %393 = vperm.xlu0 %1847, %v379_v48   ;;  %v1999_v48 = vld [vmem:[%s2809_s1 + $0x27c] ss:$24 sps:$4 sm:$0xff]  }
  0x2f   :  { %1358 = vmatmul.mubr.msk.f32.gmra.mrb[18].mxu0 %vm426_vm0, %v2080_v16  ;;  %1468 = vmatpush1.bf16.msra.mxu1 %v1902_v51  ;;  %v381_v51 = vld [vmem:[%s2811_s2 + $0x18] sm:$0xff] }
  0x30   :  { %1572 = vmatpush1.bf16.msra.mxu0 %v1899_v50  ;;  %1470 = vmatprep.subr.bf16.mxu1 %v1906_v53  ;;  %v1956_v50 = vld [vmem:[%s2809_s1 + $0xc8] ss:$24 sps:$4 sm:$0xff]   ;;  %v1957_v53 = vld [vmem:[%s2809_s1 + $0x224] ss:$24 sps:$4 sm:$0xff]  }
  0x31   :  { %1574 = vmatprep.subr.bf16.mxu0 %v1903_v52  ;;  %866 = vmatprep.mubr.f32.mxu0 %v2011_v1  ;;  %v2389_v52 = vunpack.c.h.bf16 %v24_v46 }
  0x32   :  { %403 = vperm.xlu1 %1848, %v381_v51   ;;  %v2004_v51 = vld [vmem:[%s2809_s1 + $0x2a8] ss:$24 sps:$4 sm:$0xff]  }
  0x33   :  { %1359 = vmatmul.mubr.msk.f32.gmra.mrb[20].mxu0 %vm426_vm0, %v2094_v20  ;;  %1472 = vmatpush1.bf16.msra.mxu1 %v1908_v55  ;;  %v26_v55 = vld [vmem:[%s2810_s0 + $0x48] sm:$0xff] }
  0x34   :  { %1576 = vmatpush1.bf16.msra.mxu0 %v1905_v54  ;;  %1474 = vmatprep.subr.bf16.mxu1 %v1912_v57  ;;  %v1960_v54 = vld [vmem:[%s2809_s1 + $0xfc] ss:$24 sps:$4 sm:$0xff]   ;;  %v382_v57 = vld [vmem:[%s2811_s2 + $0x20] sm:$0xff] }
  0x35   :  { %1578 = vmatprep.subr.bf16.mxu0 %v1909_v56  ;;  %872 = vmatprep.mubr.f32.mxu0 %v2011_v1  ;;  %v2401_v56 = vunpack.c.l.bf16 %v24_v46  ;;  %v1998_v46 = vld [vmem:[%s2809_s1 + $0x248] ss:$24 sps:$4 sm:$0xff]  }
  0x36   :  { %408 = vperm.xlu0 %1847, %v382_v57  }
  0x37   :  { %1360 = vmatmul.mubr.msk.f32.gmra.mrb[22].mxu0 %vm426_vm0, %v2111_v25  ;;  %1476 = vmatpush1.bf16.msra.mxu1 %v1914_v59  ;;  %v1962_v59 = vld [vmem:[%s2809_s1 + $0xf8] ss:$24 sps:$4 sm:$0xff]  }
  0x38   :  { %1580 = vmatpush1.bf16.msra.mxu0 %v1911_v58  ;;  %1478 = vmatprep.subr.bf16.mxu1 %v1918_v61  ;;  %v1959_v58 = vld [vmem:[%s2809_s1 + $0x220] ss:$24 sps:$4 sm:$0xff]   ;;  %v2416_v61 = vunpack.c.h.bf16 %v26_v55 }
  0x39   :  { %1582 = vmatprep.subr.bf16.mxu0 %v1915_v60  ;;  %878 = vmatprep.mubr.f32.mxu0 %v2011_v1  ;;  %v383_v60 = vld [vmem:[%s2811_s2 + $0x28] sm:$0xff] }
  0x3a   :  { %413 = vperm.xlu1 %1848, %v383_v60  }
  0x3b   :  { %1361 = vmatmul.mubr.msk.f32.gmra.mrb[24].mxu0 %vm426_vm0, %v2128_v31  ;;  %1480 = vmatpush1.bf16.msra.mxu1 %v1920_v63  ;;  %v1966_v63 = vld [vmem:[%s2809_s1 + $0x12c] ss:$24 sps:$4 sm:$0xff]  }
  0x3c   :  { %1584 = vmatpush1.bf16.msra.mxu0 %v1917_v62  ;;  %1482 = vmatprep.subr.bf16.mxu1 %v1924_v2  ;;  %v1963_v62 = vld [vmem:[%s2809_s1 + $0x254] ss:$24 sps:$4 sm:$0xff]   ;;  %v2428_v2 = vunpack.c.l.bf16 %v26_v55 }
  0x3d   :  { %1586 = vmatprep.subr.bf16.mxu0 %v1921_v0  ;;  %884 = vmatprep.mubr.f32.mxu0 %v2011_v1  ;;  %v28_v0 = vld [vmem:[%s2810_s0 + $0x54] sm:$0xff] }
  0x3e   :  { %v2443_v7 = vunpack.c.h.bf16 %v28_v0 }
  0x3f   :  { %1362 = vmatmul.mubr.msk.f32.gmra.mrb[26].mxu0 %vm426_vm0, %v2139_v34  ;;  %1484 = vmatpush1.bf16.msra.mxu1 %v1926_v4  ;;  %v1965_v4 = vld [vmem:[%s2809_s1 + $0x250] ss:$24 sps:$4 sm:$0xff]  }
  0x40   :  { %1588 = vmatpush1.bf16.msra.mxu0 %v1923_v3  ;;  %1494 = vmatprep.subr.bf16.mxu1 %v1930_v6  ;;  %v384_v3 = vld [vmem:[%s2811_s2 + $0x30] sm:$0xff]  ;;  %v385_v6 = vld [vmem:[%s2811_s2 + $0x38] sm:$0xff] }
  0x41   :  { %1590 = vmatprep.subr.bf16.mxu0 %v1927_v5  ;;  %890 = vmatprep.mubr.f32.mxu0 %v2011_v1  ;;  %v1968_v5 = vld [vmem:[%s2809_s1 + $0x128] ss:$24 sps:$4 sm:$0xff]  }
  0x42   :  { %516 = vmatmul.mubr.f32.vlgmr.msra.gmra.mrb[0].mxu1 %v2279_v9  ;;  %418 = vperm.xlu0 %1847, %v384_v3  }
  0x43   :  { %1363 = vmatmul.mubr.msk.f32.gmra.mrb[28].mxu0 %vm426_vm0, %v2153_v38  ;;  %1496 = vmatpush1.bf16.msra.mxu1 %v1932_v10  ;;  %v1972_v10 = vld [vmem:[%s2809_s1 + $0x15c] ss:$24 sps:$4 sm:$0xff]  }
  0x44   :  { %1592 = vmatpush1.bf16.msra.mxu0 %v1929_v8  ;;  %521 = vmatprep.mubr.f32.mxu1 %v2286_v11  ;;  %v1969_v8 = vld [vmem:[%s2809_s1 + $0x284] ss:$24 sps:$4 sm:$0xff]  }
  0x45   :  { %1594 = vmatprep.subr.bf16.mxu0 %v1933_v13  ;;  %1498 = vmatprep.subr.bf16.mxu1 %v1936_v14  ;;  %v2452_v13 = vunpack.c.l.bf16 %v28_v0  ;;  %v1971_v14 = vld [vmem:[%s2809_s1 + $0x280] ss:$24 sps:$4 sm:$0xff]  }
  0x46   :  { %896 = vmatprep.mubr.f32.mxu0 %v2011_v1  ;;  %522 = vmatmul.mubr.f32.gmra.mrb[2].mxu1 %v2302_v18 }
  0x47   :  { %1364 = vmatmul.mubr.msk.f32.gmra.mrb[30].mxu0 %vm426_vm0, %v2164_v41  ;;  %1500 = vmatpush1.bf16.msra.mxu1 %v1938_v19  ;;  %v1978_v19 = vld [vmem:[%s2809_s1 + $0x18c] ss:$24 sps:$4 sm:$0xff]  }
  0x48   :  { %1596 = vmatpush1.bf16.msra.mxu0 %v1935_v17  ;;  %527 = vmatprep.mubr.f32.mxu1 %v2310_v21  ;;  %v1975_v17 = vld [vmem:[%s2809_s1 + $0x2b4] ss:$24 sps:$4 sm:$0xff]  }
  0x49   :  { %1598 = vmatprep.subr.bf16.mxu0 %v1939_v22  ;;  %1502 = vmatprep.subr.bf16.mxu1 %v1942_v23  ;;  %v1977_v22 = vld [vmem:[%s2809_s1 + $0x2b0] ss:$24 sps:$4 sm:$0xff]  }
  0x4a   :  { %967 = vmatprep.mubr.f32.mxu0 %v2179_v45  ;;  %528 = vmatmul.mubr.f32.gmra.mrb[4].mxu1 %v2326_v27  ;;  %v1980_v23 = vld [vmem:[%s2809_s1 + $0x188] ss:$24 sps:$4 sm:$0xff]  }
  0x4b   :  { %1504 = vmatpush1.bf16.msra.mxu1 %v1944_v28  ;;  %533 = vmatprep.mubr.f32.mxu1 %v2334_v29  ;;  %v1983_v28 = vld [vmem:[%s2809_s1 + $0x2e0] ss:$24 sps:$4 sm:$0xff]  }
  0x4c   :  { %1600 = vmatpush1.bf16.msra.mxu0 %v1941_v26  ;;  %1506 = vmatprep.subr.bf16.mxu1 %v1948_v32  ;;  %v1984_v26 = vld [vmem:[%s2809_s1 + $0x1bc] ss:$24 sps:$4 sm:$0xff]   ;;  %v1987_v32 = vld [vmem:[%s2809_s1 + $0x1ec] ss:$24 sps:$4 sm:$0xff]  }
  0x4d   :  { %1602 = vmatprep.subr.bf16.mxu0 %v1945_v30  ;;  %423 = vperm.xlu1 %1848, %v385_v6   ;;  %v1986_v30 = vld [vmem:[%s2809_s1 + $0x1b8] ss:$24 sps:$4 sm:$0xff]  }
  0x4e   :  { %534 = vmatmul.mubr.f32.gmra.mrb[6].mxu1 %v2350_v36 }
  0x4f   :  { %1508 = vmatpush1.bf16.msra.mxu1 %v1950_v37  ;;  %539 = vmatprep.mubr.f32.mxu1 %v2362_v42  ;;  %v1993_v37 = vld [vmem:[%s2809_s1 + $0x21c] ss:$24 sps:$4 sm:$0xff]  }
  0x50   :  { %1604 = vmatpush1.bf16.msra.mxu0 %v1947_v35  ;;  %1510 = vmatprep.subr.bf16.mxu1 %v1954_v44  ;;  %v1992_v35 = vld [vmem:[%s2809_s1 + $0x310] ss:$24 sps:$4 sm:$0xff]   ;;  %v2007_v44 = vld [vmem:[%s2809_s1 + $0x340] ss:$24 sps:$4 sm:$0xff]  }
  0x51   :  { %1606 = vmatprep.subr.bf16.mxu0 %v1951_v43  ;;  %v1996_v43 = vld [vmem:[%s2809_s1 + $0x24c] ss:$24 sps:$4 sm:$0xff]  }
  0x52   :  { %540 = vmatmul.mubr.f32.gmra.mrb[8].mxu1 %v2374_v47 }
  0x53   :  { %1512 = vmatpush1.bf16.msra.mxu1 %v1956_v50  ;;  %545 = vmatprep.mubr.f32.mxu1 %v2389_v52  ;;  %v2002_v50 = vld [vmem:[%s2809_s1 + $0x2ac] ss:$24 sps:$4 sm:$0xff]  }
  0x54   :  { %1608 = vmatpush1.bf16.msra.mxu0 %v1953_v49  ;;  %1514 = vmatprep.subr.bf16.mxu1 %v1960_v54  ;;  %v2001_v49 = vld [vmem:[%s2809_s1 + $0x278] ss:$24 sps:$4 sm:$0xff]  }
  0x55   :  { %1610 = vmatprep.subr.bf16.mxu0 %v1957_v53  ;;  %v2008_v53 = vld [vmem:[%s2809_s1 + $0x2dc] ss:$24 sps:$4 sm:$0xff]   ;;  %v2010_v54 = vld [vmem:[%s2809_s1 + $0x2d8] ss:$24 sps:$4 sm:$0xff]  }
  0x56   :  { %546 = vmatmul.mubr.f32.gmra.mrb[10].mxu1 %v2401_v56 }
  0x57   :  { %1516 = vmatpush1.bf16.msra.mxu1 %v1962_v59  ;;  %551 = vmatprep.mubr.f32.mxu1 %v2416_v61 }
  0x58   :  { %1612 = vmatpush1.bf16.msra.mxu0 %v1959_v58  ;;  %1518 = vmatprep.subr.bf16.mxu1 %v1966_v63 }
  0x59   :  { %1614 = vmatprep.subr.bf16.mxu0 %v1963_v62 }
  0x5a   :  { %552 = vmatmul.mubr.f32.gmra.mrb[12].mxu1 %v2428_v2 }
  0x5b   :  { %1520 = vmatpush1.bf16.msra.mxu1 %v1968_v5  ;;  %557 = vmatprep.mubr.f32.mxu1 %v2443_v7 }
  0x5c   :  { %1616 = vmatpush1.bf16.msra.mxu0 %v1965_v4  ;;  %1522 = vmatprep.subr.bf16.mxu1 %v1972_v10 }
  0x5d   :  { %1618 = vmatprep.subr.bf16.mxu0 %v1969_v8 }
  0x5e   :  { %558 = vmatmul.mubr.f32.gmra.mrb[14].mxu1 %v2452_v13 }
  0x5f   :  { %1524 = vmatpush1.bf16.msra.mxu1 %v1974_v15  ;;  %741 = vmatprep.mubr.f32.mxu1 %v2179_v45  ;;  %v1990_v45 = vld [vmem:[%s2809_s1 + $0x314] ss:$24 sps:$4 sm:$0xff]  }
  0x60   :  { %1620 = vmatpush1.bf16.msra.mxu0 %v1971_v14  ;;  %1526 = vmatprep.subr.bf16.mxu1 %v1978_v19 }
  0x61   :  { %1622 = vmatprep.subr.bf16.mxu0 %v1975_v17 }
  0x63   :  { %1528 = vmatpush1.bf16.msra.mxu1 %v1980_v23 }
  0x64   :  { %1624 = vmatpush1.bf16.msra.mxu0 %v1977_v22  ;;  %1530 = vmatprep.subr.bf16.mxu1 %v1984_v26 }
  0x65   :  { %1626 = vmatprep.subr.bf16.mxu0 %v1981_v24 }
  0x67   :  { %1532 = vmatpush1.bf16.msra.mxu1 %v1986_v30 }
  0x68   :  { %1628 = vmatpush1.bf16.msra.mxu0 %v1983_v28  ;;  %1534 = vmatprep.subr.bf16.mxu1 %v1987_v32 }
  0x69   :  { %1630 = vmatprep.subr.bf16.mxu0 %v1990_v45 }
  0x6b   :  { %968 = vmatmul.mubr.f32.vlgmr.msra.gmra.mrb[32].mxu0 %v2279_v9  ;;  %1536 = vmatpush1.bf16.msra.mxu1 %v1989_v33 }
  0x6c   :  { %1632 = vmatpush1.bf16.msra.mxu0 %v1992_v35  ;;  %973 = vmatprep.mubr.f32.mxu0 %v2286_v11 }
  0x6d   :  { %1538 = vmatprep.subr.bf16.mxu1 %v1993_v37  ;;  %1634 = vmatprep.subr.bf16.mxu0 %v2005_v39 }
  0x6f   :  { %974 = vmatmul.mubr.f32.gmra.mrb[34].mxu0 %v2302_v18  ;;  %1540 = vmatpush1.bf16.msra.mxu1 %v1995_v40 }
  0x70   :  { %979 = vmatprep.mubr.f32.mxu0 %v2310_v21  ;;  %1542 = vmatprep.subr.bf16.mxu1 %v1996_v43 }
  0x71   :  { %1636 = vmatpush1.bf16.msra.mxu0 %v2007_v44 }
  0x73   :  { %980 = vmatmul.mubr.f32.gmra.mrb[36].mxu0 %v2326_v27  ;;  %1544 = vmatpush1.bf16.msra.mxu1 %v1998_v46 }
  0x74   :  { %985 = vmatprep.mubr.f32.mxu0 %v2334_v29  ;;  %1546 = vmatprep.subr.bf16.mxu1 %v1999_v48 }
  0x77   :  { %986 = vmatmul.mubr.f32.gmra.mrb[38].mxu0 %v2350_v36  ;;  %1548 = vmatpush1.bf16.msra.mxu1 %v2001_v49 }
  0x78   :  { %991 = vmatprep.mubr.f32.mxu0 %v2362_v42  ;;  %1550 = vmatprep.subr.bf16.mxu1 %v2002_v50 }
  0x7b   :  { %992 = vmatmul.mubr.f32.gmra.mrb[40].mxu0 %v2374_v47  ;;  %1552 = vmatpush1.bf16.msra.mxu1 %v2004_v51 }
  0x7c   :  { %997 = vmatprep.mubr.f32.mxu0 %v2389_v52  ;;  %1554 = vmatprep.subr.bf16.mxu1 %v2008_v53 }
  0x7f   :  { %998 = vmatmul.mubr.f32.gmra.mrb[42].mxu0 %v2401_v56  ;;  %1556 = vmatpush1.bf16.msra.mxu1 %v2010_v54 }
  0x80   :  { %1003 = vmatprep.mubr.f32.mxu0 %v2416_v61  ;;  %1637 = vmatprep.subr.bf16.mxu1 %v1990_v45 }
  0x82   :  { %742 = vmatmul.mubr.f32.vlgmr.msra.gmra.mrb[16].mxu1 %v2279_v9 }
  0x83   :  { %1004 = vmatmul.mubr.f32.gmra.mrb[44].mxu0 %v2428_v2  ;;  %1639 = vmatpush1.bf16.msra.mxu1 %v1992_v35 }
  0x84   :  { %1009 = vmatprep.mubr.f32.mxu0 %v2443_v7  ;;  %747 = vmatprep.mubr.f32.mxu1 %v2286_v11 }
  0x85   :  { %1638 = vmatprep.subr.bf16.mxu1 %v2005_v39 }
  0x86   :  { %748 = vmatmul.mubr.f32.gmra.mrb[18].mxu1 %v2302_v18 }
  0x87   :  { %1010 = vmatmul.mubr.f32.gmra.mrb[46].mxu0 %v2452_v13  ;;  %753 = vmatprep.mubr.f32.mxu1 %v2310_v21 }
  0x88   :  { %1080 = vmatprep.mubr.f32.mxu0 %v2011_v1  ;;  %1640 = vmatpush1.bf16.msra.mxu1 %v2007_v44 }
  0x8a   :  { %754 = vmatmul.mubr.f32.gmra.mrb[20].mxu1 %v2326_v27 }
  0x8b   :  { %1365 = vmatmul.mubr.msk.f32.vlgmr.msra.gmra.mrb[32].mxu0 %vm426_vm0, %v2067_v12  ;;  %759 = vmatprep.mubr.f32.mxu1 %v2334_v29 }
  0x8c   :  { %1086 = vmatprep.mubr.f32.mxu0 %v2011_v1 }
  0x8e   :  { %760 = vmatmul.mubr.f32.gmra.mrb[22].mxu1 %v2350_v36 }
  0x8f   :  { %1366 = vmatmul.mubr.msk.f32.gmra.mrb[34].mxu0 %vm426_vm0, %v2080_v16  ;;  %765 = vmatprep.mubr.f32.mxu1 %v2362_v42 }
  0x90   :  { %1092 = vmatprep.mubr.f32.mxu0 %v2011_v1 }
  0x92   :  { %766 = vmatmul.mubr.f32.gmra.mrb[24].mxu1 %v2374_v47 }
  0x93   :  { %1367 = vmatmul.mubr.msk.f32.gmra.mrb[36].mxu0 %vm426_vm0, %v2094_v20  ;;  %771 = vmatprep.mubr.f32.mxu1 %v2389_v52 }
  0x94   :  { %1098 = vmatprep.mubr.f32.mxu0 %v2011_v1 }
  0x96   :  { %772 = vmatmul.mubr.f32.gmra.mrb[26].mxu1 %v2401_v56 }
  0x97   :  { %1368 = vmatmul.mubr.msk.f32.gmra.mrb[38].mxu0 %vm426_vm0, %v2111_v25  ;;  %777 = vmatprep.mubr.f32.mxu1 %v2416_v61 }
  0x98   :  { %1104 = vmatprep.mubr.f32.mxu0 %v2011_v1 }
  0x9a   :  { %778 = vmatmul.mubr.f32.gmra.mrb[28].mxu1 %v2428_v2 }
  0x9b   :  { %1369 = vmatmul.mubr.msk.f32.gmra.mrb[40].mxu0 %vm426_vm0, %v2128_v31  ;;  %783 = vmatprep.mubr.f32.mxu1 %v2443_v7 }
  0x9c   :  { %1110 = vmatprep.mubr.f32.mxu0 %v2011_v1 }
  0x9e   :  { %784 = vmatmul.mubr.f32.gmra.mrb[30].mxu1 %v2452_v13 }
  0x9f   :  { %1370 = vmatmul.mubr.msk.f32.gmra.mrb[42].mxu0 %vm426_vm0, %v2139_v34  ;;  %1122 = vmatprep.mubr.f32.mxu1 %v2011_v1 }
  0xa0   :  { %1116 = vmatprep.mubr.f32.mxu0 %v2011_v1 }
  0xa2   :  { %1372 = vmatmul.mubr.msk.f32.vlgmr.msra.gmra.mrb[32].mxu1 %vm426_vm0, %v2164_v41 }
  0xa3   :  { %1371 = vmatmul.mubr.msk.f32.gmra.mrb[44].mxu0 %vm426_vm0, %v2153_v38 }
  0xa4   :  { %v2629_v62 = vpop.permute.xlu0 %388  ;;  %v2643_v13 = vpop.permute.xlu1 %398 }
  0xad   :  { %v2641_v8 = vpop.permute.xlu0 %393 }
  0xb1   :  { %v2656_v44 = vpop.permute.xlu1 %403 }
  0xde   :  { %v630_v12 = vpop.f32.mrb[0].mxu0 }
  0xdf   :  { %v632_v16 = vpop.f32.mrb[1].mxu0 }
  0xe2   :  { %v636_v20 = vpop.f32.mrb[2].mxu0 }
  0xe3   :  { %v638_v25 = vpop.f32.mrb[3].mxu0 }
  0xe6   :  { %v642_v31 = vpop.f32.mrb[4].mxu0 }
  0xe7   :  { %v644_v9 = vpop.f32.mrb[5].mxu0 }
  0xea   :  { %v2589_v11 = vpop.f32.mrb[6].mxu0 }
  0xeb   :  { %v2591_v34 = vpop.f32.mrb[7].mxu0 }
  0xee   :  { %v2593_v18 = vpop.f32.mrb[8].mxu0 }
  0xef   :  { %v2595_v21 = vpop.f32.mrb[9].mxu0 }
  0xf2   :  { %v2597_v1 = vpop.f32.mrb[10].mxu0 }
  0xf3   :  { %v2599_v38 = vpop.f32.mrb[11].mxu0 }
  0xf6   :  { %v2601_v27 = vpop.f32.mrb[12].mxu0 }
  0xf7   :  { %v2603_v41 = vpop.f32.mrb[13].mxu0 }
  0xfa   :  { %v2605_v29 = vpop.f32.mrb[14].mxu0 }
  0xfb   :  { %v2607_v36 = vpop.f32.mrb[15].mxu0 }
  0xfe   :  { %v2609_v42 = vpop.f32.mrb[16].mxu0 }
  0xff   :  { %v2611_v47 = vpop.f32.mrb[17].mxu0 }
 0x102   :  { %v2613_v52 = vpop.f32.mrb[18].mxu0 }
 0x103   :  { %v2615_v55 = vpop.f32.mrb[19].mxu0 }
 0x106   :  { %v2617_v56 = vpop.f32.mrb[20].mxu0 }
 0x107   :  { %v2619_v57 = vpop.f32.mrb[21].mxu0 }
 0x10a   :  { %v2621_v58 = vpop.f32.mrb[22].mxu0 }
 0x10b   :  { %v2623_v59 = vpop.f32.mrb[23].mxu0 }
 0x10e   :  { %v2625_v60 = vpop.f32.mrb[24].mxu0 }
 0x10f   :  { %v2627_v61 = vpop.f32.mrb[25].mxu0 }
 0x112   :  { %v2631_v63 = vpop.f32.mrb[26].mxu0 }
 0x113   :  { %v2633_v0 = vpop.f32.mrb[27].mxu0 }
 0x115   :  { %v517_v2 = vpop.f32.mrb[0].mxu1 }
 0x116   :  { %v2635_v3 = vpop.f32.mrb[28].mxu0  ;;  %v518_v4 = vadd.f32 %v517_v2, %v2629_v62  ;;  %v519_v5 = vpop.f32.mrb[1].mxu1 }
 0x117   :  { %v2638_v6 = vpop.f32.mrb[29].mxu0  ;;  %v520_v7 = vadd.f32 %v519_v5, %v2629_v62 }
 0x118   :  { %v631_v10 = vadd.f32 %v630_v12, %v518_v4 }
 0x119   :  { %v633_v14 = vadd.f32 %v632_v16, %v520_v7  ;;  %v523_v15 = vpop.f32.mrb[2].mxu1 }
 0x11a   :  { %v2645_v17 = vpop.f32.mrb[30].mxu0  ;;  %v1129_v19 = vmax.f32 %v631_v10, 0.0  ;;  %v524_v22 = vadd.f32 %v523_v15, %v2641_v8  ;;  %v525_v23 = vpop.f32.mrb[3].mxu1 }
 0x11b   :  { %v2648_v24 = vpop.f32.mrb[31].mxu0  ;;  %v1130_v26 = vmax.f32 %v633_v14, 0.0  ;;  %v526_v28 = vadd.f32 %v525_v23, %v2641_v8  ;;  %v2672_v15 = vpop.permute.xlu1 %413 }
 0x11c   :  { %v637_v30 = vadd.f32 %v636_v20, %v524_v22  ;;  %v2663_v20 = vpop.permute.xlu0 %408 }
 0x11d   :  { %v1397_v32 = vpack.c.bf16 %v1130_v26, %v1129_v19  ;;  %v639_v45 = vadd.f32 %v638_v25, %v526_v28  ;;  %v529_v33 = vpop.f32.mrb[4].mxu1 }
 0x11e   :  { %v1135_v35 = vmax.f32 %v637_v30, 0.0  ;;  %v530_v37 = vadd.f32 %v529_v33, %v2643_v13  ;;  %v531_v39 = vpop.f32.mrb[5].mxu1 }
 0x11f   :  { %1321 = vst [vmem:[%s2812_s3] sm:$0xff] %v1397_v32  ;;  %v1136_v40 = vmax.f32 %v639_v45, 0.0  ;;  %v532_v43 = vadd.f32 %v531_v39, %v2643_v13 }
 0x120   :  { %v643_v46 = vadd.f32 %v642_v31, %v530_v37  ;;  %v2681_v45 = vpop.permute.xlu0 %418 }
 0x121   :  { %v1400_v48 = vpack.c.bf16 %v1136_v40, %v1135_v35  ;;  %v645_v49 = vadd.f32 %v644_v9, %v532_v43  ;;  %v535_v50 = vpop.f32.mrb[6].mxu1 }
 0x122   :  { %v1141_v51 = vmax.f32 %v643_v46, 0.0  ;;  %v536_v53 = vadd.f32 %v535_v50, %v2656_v44  ;;  %v537_v54 = vpop.f32.mrb[7].mxu1 }
 0x123   :  { %1324 = vst [vmem:[%s2812_s3 + $0x18] sm:$0xff] %v1400_v48  ;;  %v1142_v12 = vmax.f32 %v645_v49, 0.0  ;;  %v538_v16 = vadd.f32 %v537_v54, %v2656_v44  ;;  %v2690_v48 = vpop.permute.xlu1 %423 }
 0x124   :  { %v649_v25 = vadd.f32 %v2589_v11, %v536_v53 }
 0x125   :  { %v1403_v2 = vpack.c.bf16 %v1142_v12, %v1141_v51  ;;  %v651_v31 = vadd.f32 %v2591_v34, %v538_v16  ;;  %v541_v9 = vpop.f32.mrb[8].mxu1 }
 0x126   :  { %v1147_v4 = vmax.f32 %v649_v25, 0.0  ;;  %v542_v5 = vadd.f32 %v541_v9, %v2663_v20  ;;  %v543_v7 = vpop.f32.mrb[9].mxu1 }
 0x127   :  { %1327 = vst [vmem:[%s2812_s3 + $0x30] sm:$0xff] %v1403_v2  ;;  %v1148_v10 = vmax.f32 %v651_v31, 0.0  ;;  %v544_v14 = vadd.f32 %v543_v7, %v2663_v20 }
 0x128   :  { %v655_v19 = vadd.f32 %v2593_v18, %v542_v5 }
 0x129   :  { %v1406_v11 = vpack.c.bf16 %v1148_v10, %v1147_v4  ;;  %v657_v22 = vadd.f32 %v2595_v21, %v544_v14  ;;  %v547_v34 = vpop.f32.mrb[10].mxu1 }
 0x12a   :  { %v1153_v23 = vmax.f32 %v655_v19, 0.0  ;;  %v548_v26 = vadd.f32 %v547_v34, %v2672_v15  ;;  %v549_v28 = vpop.f32.mrb[11].mxu1 }
 0x12b   :  { %1330 = vst [vmem:[%s2812_s3 + $0x48] sm:$0xff] %v1406_v11  ;;  %v1154_v30 = vmax.f32 %v657_v22, 0.0  ;;  %v550_v32 = vadd.f32 %v549_v28, %v2672_v15 }
 0x12c   :  { %v661_v33 = vadd.f32 %v2597_v1, %v548_v26 }
 0x12d   :  { %v1409_v18 = vpack.c.bf16 %v1154_v30, %v1153_v23  ;;  %v663_v35 = vadd.f32 %v2599_v38, %v550_v32  ;;  %v553_v21 = vpop.f32.mrb[12].mxu1 }
 0x12e   :  { %v1159_v37 = vmax.f32 %v661_v33, 0.0  ;;  %v554_v39 = vadd.f32 %v553_v21, %v2681_v45  ;;  %v555_v40 = vpop.f32.mrb[13].mxu1 }
 0x12f   :  { %1333 = vst [vmem:[%s2812_s3 + $0x60] sm:$0xff] %v1409_v18  ;;  %v1160_v43 = vmax.f32 %v663_v35, 0.0  ;;  %v556_v46 = vadd.f32 %v555_v40, %v2681_v45 }
 0x130   :  { %v667_v49 = vadd.f32 %v2601_v27, %v554_v39 }
 0x131   :  { %v1412_v1 = vpack.c.bf16 %v1160_v43, %v1159_v37  ;;  %v669_v50 = vadd.f32 %v2603_v41, %v556_v46  ;;  %v559_v38 = vpop.f32.mrb[14].mxu1 }
 0x132   :  { %v1165_v51 = vmax.f32 %v667_v49, 0.0  ;;  %v560_v53 = vadd.f32 %v559_v38, %v2690_v48  ;;  %v561_v54 = vpop.f32.mrb[15].mxu1 }
 0x133   :  { %1336 = vst [vmem:[%s2812_s3 + $0x78] sm:$0xff] %v1412_v1  ;;  %v1166_v12 = vmax.f32 %v669_v50, 0.0  ;;  %v562_v16 = vadd.f32 %v561_v54, %v2690_v48 }
 0x134   :  { %v673_v25 = vadd.f32 %v2605_v29, %v560_v53 }
 0x135   :  { %v1415_v2 = vpack.c.bf16 %v1166_v12, %v1165_v51  ;;  %v675_v27 = vadd.f32 %v2607_v36, %v562_v16 }
 0x136   :  { %v1171_v31 = vmax.f32 %v673_v25, 0.0 }
 0x137   :  { %1339 = vst [vmem:[%s2812_s3 + $0x90] sm:$0xff] %v1415_v2  ;;  %v1172_v41 = vmax.f32 %v675_v27, 0.0 }
 0x139   :  { %v1418_v9 = vpack.c.bf16 %v1172_v41, %v1171_v31 }
 0x13b   :  { %1342 = vst [vmem:[%s2812_s3 + $0xa8] sm:$0xff] %v1418_v9 }
 0x155   :  { %v743_v4 = vpop.f32.mrb[16].mxu1 }
 0x156   :  { %v744_v5 = vadd.f32 %v743_v4, %v2629_v62  ;;  %v745_v7 = vpop.f32.mrb[17].mxu1 }
 0x157   :  { %v746_v29 = vadd.f32 %v745_v7, %v2629_v62 }
 0x158   :  { %v857_v10 = vadd.f32 %v2609_v42, %v744_v5 }
 0x159   :  { %v859_v36 = vadd.f32 %v2611_v47, %v746_v29  ;;  %v749_v14 = vpop.f32.mrb[18].mxu1 }
 0x15a   :  { %v2711_v19 = vpop.f32.mrb[46].mxu0  ;;  %v1131_v11 = vmax.f32 %v857_v10, 0.0  ;;  %v750_v22 = vadd.f32 %v749_v14, %v2641_v8  ;;  %v751_v34 = vpop.f32.mrb[19].mxu1 }
 0x15b   :  { %v2714_v23 = vpop.f32.mrb[47].mxu0  ;;  %v1132_v26 = vmax.f32 %v859_v36, 0.0  ;;  %v752_v28 = vadd.f32 %v751_v34, %v2641_v8 }
 0x15c   :  { %v863_v30 = vadd.f32 %v2613_v52, %v750_v22 }
 0x15d   :  { %v1398_v32 = vpack.c.bf16 %v1132_v26, %v1131_v11  ;;  %v865_v33 = vadd.f32 %v2615_v55, %v752_v28  ;;  %v755_v18 = vpop.f32.mrb[20].mxu1 }
 0x15e   :  { %v1082_v42 = vpop.f32.mrb[32].mxu0  ;;  %v1137_v47 = vmax.f32 %v863_v30, 0.0  ;;  %v756_v21 = vadd.f32 %v755_v18, %v2643_v13  ;;  %v757_v39 = vpop.f32.mrb[21].mxu1 }
 0x15f   :  { %v1705_v35 = vadd.f32 %v1082_v42, %v2629_v62  ;;  %v1084_v37 = vpop.f32.mrb[33].mxu0  ;;  %1322 = vst [vmem:[%s2812_s3 + $0x8] sm:$0xff] %v1398_v32  ;;  %v1138_v40 = vmax.f32 %v865_v33, 0.0  ;;  %v758_v52 = vadd.f32 %v757_v39, %v2643_v13 }
 0x160   :  { %v1706_v43 = vadd.f32 %v1084_v37, %v2629_v62  ;;  %v869_v55 = vadd.f32 %v2617_v56, %v756_v21 }
 0x161   :  { %v1133_v46 = vmax.f32 %v1705_v35, 0.0  ;;  %v1401_v49 = vpack.c.bf16 %v1138_v40, %v1137_v47  ;;  %v871_v50 = vadd.f32 %v2619_v57, %v758_v52  ;;  %v761_v51 = vpop.f32.mrb[22].mxu1 }
 0x162   :  { %v1134_v1 = vmax.f32 %v1706_v43, 0.0  ;;  %v1088_v38 = vpop.f32.mrb[34].mxu0  ;;  %v1143_v53 = vmax.f32 %v869_v55, 0.0  ;;  %v762_v12 = vadd.f32 %v761_v51, %v2656_v44  ;;  %v763_v25 = vpop.f32.mrb[23].mxu1 }
 0x163   :  { %v1707_v54 = vadd.f32 %v1088_v38, %v2641_v8  ;;  %v1090_v16 = vpop.f32.mrb[35].mxu0  ;;  %1325 = vst [vmem:[%s2812_s3 + $0x20] sm:$0xff] %v1401_v49  ;;  %v1144_v2 = vmax.f32 %v871_v50, 0.0  ;;  %v764_v27 = vadd.f32 %v763_v25, %v2656_v44 }
 0x164   :  { %v1399_v62 = vpack.c.bf16 %v1134_v1, %v1133_v46  ;;  %v1708_v56 = vadd.f32 %v1090_v16, %v2641_v8  ;;  %v875_v31 = vadd.f32 %v2621_v58, %v762_v12 }
 0x165   :  { %v1139_v57 = vmax.f32 %v1707_v54, 0.0  ;;  %v1404_v41 = vpack.c.bf16 %v1144_v2, %v1143_v53  ;;  %v877_v4 = vadd.f32 %v2623_v59, %v764_v27  ;;  %v767_v7 = vpop.f32.mrb[24].mxu1 }
 0x166   :  { %1323 = vst [vmem:[%s2812_s3 + $0x10] sm:$0xff] %v1399_v62  ;;  %v1140_v9 = vmax.f32 %v1708_v56, 0.0  ;;  %v1094_v5 = vpop.f32.mrb[36].mxu0  ;;  %v1149_v29 = vmax.f32 %v875_v31, 0.0  ;;  %v768_v8 = vadd.f32 %v767_v7, %v2663_v20  ;;  %v769_v14 = vpop.f32.mrb[25].mxu1 }
 0x167   :  { %v1709_v10 = vadd.f32 %v1094_v5, %v2643_v13  ;;  %v1096_v36 = vpop.f32.mrb[37].mxu0  ;;  %1328 = vst [vmem:[%s2812_s3 + $0x38] sm:$0xff] %v1404_v41  ;;  %v1150_v11 = vmax.f32 %v877_v4, 0.0  ;;  %v770_v34 = vadd.f32 %v769_v14, %v2663_v20 }
 0x168   :  { %v1402_v58 = vpack.c.bf16 %v1140_v9, %v1139_v57  ;;  %v1710_v22 = vadd.f32 %v1096_v36, %v2643_v13  ;;  %v881_v26 = vadd.f32 %v2625_v60, %v768_v8  ;;  %v1014_v36 = vadd.f32 %v2714_v23, %v2690_v48 }
 0x169   :  { %v1145_v59 = vmax.f32 %v1709_v10, 0.0  ;;  %v1407_v28 = vpack.c.bf16 %v1150_v11, %v1149_v29  ;;  %v883_v32 = vadd.f32 %v2627_v61, %v770_v34  ;;  %v773_v42 = vpop.f32.mrb[26].mxu1 }
 0x16a   :  { %1326 = vst [vmem:[%s2812_s3 + $0x28] sm:$0xff] %v1402_v58  ;;  %v1146_v30 = vmax.f32 %v1710_v22, 0.0  ;;  %v1100_v33 = vpop.f32.mrb[38].mxu0  ;;  %v1155_v18 = vmax.f32 %v881_v26, 0.0  ;;  %v774_v13 = vadd.f32 %v773_v42, %v2672_v15  ;;  %v775_v21 = vpop.f32.mrb[27].mxu1 }
 0x16b   :  { %v1711_v47 = vadd.f32 %v1100_v33, %v2656_v44  ;;  %v1102_v35 = vpop.f32.mrb[39].mxu0  ;;  %1331 = vst [vmem:[%s2812_s3 + $0x50] sm:$0xff] %v1407_v28  ;;  %v1156_v37 = vmax.f32 %v883_v32, 0.0  ;;  %v776_v40 = vadd.f32 %v775_v21, %v2672_v15 }
 0x16c   :  { %v1405_v60 = vpack.c.bf16 %v1146_v30, %v1145_v59  ;;  %v1712_v39 = vadd.f32 %v1102_v35, %v2656_v44  ;;  %v887_v43 = vadd.f32 %v2631_v63, %v774_v13 }
 0x16d   :  { %v1151_v61 = vmax.f32 %v1711_v47, 0.0  ;;  %v1410_v52 = vpack.c.bf16 %v1156_v37, %v1155_v18  ;;  %v889_v55 = vadd.f32 %v2633_v0, %v776_v40  ;;  %v779_v1 = vpop.f32.mrb[28].mxu1 }
 0x16e   :  { %1329 = vst [vmem:[%s2812_s3 + $0x40] sm:$0xff] %v1405_v60  ;;  %v1152_v46 = vmax.f32 %v1712_v39, 0.0  ;;  %v1106_v49 = vpop.f32.mrb[40].mxu0  ;;  %v1161_v50 = vmax.f32 %v887_v43, 0.0  ;;  %v780_v44 = vadd.f32 %v779_v1, %v2681_v45  ;;  %v781_v53 = vpop.f32.mrb[29].mxu1 }
 0x16f   :  { %v1713_v38 = vadd.f32 %v1106_v49, %v2663_v20  ;;  %v1108_v51 = vpop.f32.mrb[41].mxu0  ;;  %1334 = vst [vmem:[%s2812_s3 + $0x68] sm:$0xff] %v1410_v52  ;;  %v1162_v54 = vmax.f32 %v889_v55, 0.0  ;;  %v782_v16 = vadd.f32 %v781_v53, %v2681_v45 }
 0x170   :  { %v1408_v63 = vpack.c.bf16 %v1152_v46, %v1151_v61  ;;  %v1714_v12 = vadd.f32 %v1108_v51, %v2663_v20  ;;  %v893_v25 = vadd.f32 %v2635_v3, %v780_v44 }
 0x171   :  { %v1157_v0 = vmax.f32 %v1713_v38, 0.0  ;;  %v1413_v62 = vpack.c.bf16 %v1162_v54, %v1161_v50  ;;  %v895_v56 = vadd.f32 %v2638_v6, %v782_v16  ;;  %v785_v57 = vpop.f32.mrb[30].mxu1  ;;  %v1012_v6 = vadd.f32 %v2711_v19, %v2690_v48 }
 0x172   :  { %1332 = vst [vmem:[%s2812_s3 + $0x58] sm:$0xff] %v1408_v63  ;;  %v1158_v2 = vmax.f32 %v1714_v12, 0.0  ;;  %v1112_v27 = vpop.f32.mrb[42].mxu0  ;;  %v1167_v31 = vmax.f32 %v893_v25, 0.0  ;;  %v786_v20 = vadd.f32 %v785_v57, %v2690_v48  ;;  %v787_v4 = vpop.f32.mrb[31].mxu1 }
 0x173   :  { %v1715_v41 = vadd.f32 %v1112_v27, %v2672_v15  ;;  %v1114_v9 = vpop.f32.mrb[43].mxu0  ;;  %1337 = vst [vmem:[%s2812_s3 + $0x80] sm:$0xff] %v1413_v62  ;;  %v1168_v5 = vmax.f32 %v895_v56, 0.0  ;;  %v788_v29 = vadd.f32 %v787_v4, %v2690_v48 }
 0x174   :  { %v1411_v3 = vpack.c.bf16 %v1158_v2, %v1157_v0  ;;  %v1716_v7 = vadd.f32 %v1114_v9, %v2672_v15  ;;  %v899_v8 = vadd.f32 %v2645_v17, %v786_v20 }
 0x175   :  { %v1163_v10 = vmax.f32 %v1715_v41, 0.0  ;;  %v1416_v14 = vpack.c.bf16 %v1168_v5, %v1167_v31  ;;  %v901_v11 = vadd.f32 %v2648_v24, %v788_v29  ;;  %v1124_v22 = vpop.f32.mrb[32].mxu1 }
 0x176   :  { %1335 = vst [vmem:[%s2812_s3 + $0x70] sm:$0xff] %v1411_v3  ;;  %v1164_v58 = vmax.f32 %v1716_v7, 0.0  ;;  %v1118_v15 = vpop.f32.mrb[44].mxu0  ;;  %v1173_v34 = vmax.f32 %v899_v8, 0.0  ;;  %v1125_v26 = vadd.f32 %v1124_v22, %v1012_v6  ;;  %v1126_v28 = vpop.f32.mrb[33].mxu1 }
 0x177   :  { %v1717_v59 = vadd.f32 %v1118_v15, %v2681_v45  ;;  %v1120_v19 = vpop.f32.mrb[45].mxu0  ;;  %1340 = vst [vmem:[%s2812_s3 + $0x98] sm:$0xff] %v1416_v14  ;;  %v1174_v48 = vmax.f32 %v901_v11, 0.0  ;;  %v1127_v30 = vadd.f32 %v1126_v28, %v1014_v36 }
 0x178   :  { %v1414_v17 = vpack.c.bf16 %v1164_v58, %v1163_v10  ;;  %v1718_v23 = vadd.f32 %v1120_v19, %v2681_v45  ;;  %v1175_v33 = vmax.f32 %v1125_v26, 0.0 }
 0x179   :  { %v1169_v32 = vmax.f32 %v1717_v59, 0.0  ;;  %v1419_v24 = vpack.c.bf16 %v1174_v48, %v1173_v34  ;;  %v1176_v18 = vmax.f32 %v1127_v30, 0.0 }
 0x17a   :  { %1338 = vst [vmem:[%s2812_s3 + $0x88] sm:$0xff] %v1414_v17  ;;  %v1170_v42 = vmax.f32 %v1718_v23, 0.0 }
 0x17b   :  { %1343 = vst [vmem:[%s2812_s3 + $0xb0] sm:$0xff] %v1419_v24  ;;  %v1420_v13 = vpack.c.bf16 %v1176_v18, %v1175_v33 }
 0x17c   :  { %v1417_v47 = vpack.c.bf16 %v1170_v42, %v1169_v32 }
 0x17d   :  { %1344 = vst [vmem:[%s2812_s3 + $0xb8] sm:$0xff] %v1420_v13 }
 0x17e   :  { %1341 = vst [vmem:[%s2812_s3 + $0xa0] sm:$0xff] %v1417_v47 }

// kernel: net_forward.11
= control target key start
LH: loop header
LB: loop body
LE: loop exit
PB: predicated region body
PF: predicated region fallthrough
CT: control target
= control target key end

     0   :  { %v495_v0 = vmov 0   ;;  %vm439_vm0 = vcmask 658432   ;;  %s937_s4 = inlined_call_operand.vmem [shape: f32[128,1], index: 4, kind: input, shape index: {}]   ;;  %s938_s5 = inlined_call_operand.vmem [shape: f32[128,1], index: 5, kind: input, shape index: {}]   ;;  %s939_s0 = inlined_call_operand.vmem [shape: bf16[128,81], index: 0, kind: input, shape index: {}]   ;;  %s940_s1 = inlined_call_operand.vmem [shape: bf16[128,81], index: 1, kind: input, shape index: {}]   ;;  %s941_s2 = inlined_call_operand.vmem [shape: bf16[128,81], index: 2, kind: input, shape index: {}]   ;;  %s942_s3 = inlined_call_operand.vmem [shape: bf16[128,81], index: 3, kind: input, shape index: {}]   ;;  %s943_s6 = inlined_call_operand.vmem [shape: bf16[128,81], index: 6, kind: output, shape index: {}]  }
   0x1   :  { %494 = vset.pattern.permute.xlu1 %v495_v0  ;;  %493 = vset.pattern.permute.xlu0 %v495_v0  ;;  %v153_v1 = vld [vmem:[%s937_s4 + $0x10] sm:$0xff]  ;;  %v151_v2 = vld [vmem:[%s937_s4] sm:$0xff]  ;;  %v154_v3 = vld [vmem:[%s937_s4 + $0x18] sm:$0xff] }
   0x2   :  { %179 = vperm.xlu1 %494, %v153_v1   ;;  %169 = vperm.xlu0 %493, %v151_v2   ;;  %v152_v4 = vld [vmem:[%s937_s4 + $0x8] sm:$0xff]  ;;  %v155_v6 = vld [vmem:[%s937_s4 + $0x20] sm:$0xff]  ;;  %v158_v7 = vld [vmem:[%s937_s4 + $0x38] sm:$0xff] }
   0x3   :  { %v156_v5 = vld [vmem:[%s937_s4 + $0x28] sm:$0xff]  ;;  %v157_v8 = vld [vmem:[%s937_s4 + $0x30] sm:$0xff]  ;;  %v159_v10 = vld [vmem:[%s937_s4 + $0x40] sm:$0xff] }
   0x4   :  { %v160_v9 = vld [vmem:[%s937_s4 + $0x48] sm:$0xff]  ;;  %v162_v11 = vld [vmem:[%s937_s4 + $0x58] sm:$0xff]  ;;  %v161_v12 = vld [vmem:[%s937_s4 + $0x50] sm:$0xff] }
   0x5   :  { %v164_v13 = vld [vmem:[%s937_s4 + $0x68] sm:$0xff]  ;;  %v163_v14 = vld [vmem:[%s937_s4 + $0x60] sm:$0xff]  ;;  %v166_v15 = vld [vmem:[%s937_s4 + $0x78] sm:$0xff] }
   0x6   :  { %184 = vperm.xlu1 %494, %v154_v3   ;;  %174 = vperm.xlu0 %493, %v152_v4   ;;  %v165_v16 = vld [vmem:[%s937_s4 + $0x70] sm:$0xff]  ;;  %v264_v17 = vld [vmem:[%s938_s5 + $0x8] sm:$0xff]  ;;  %v263_v18 = vld [vmem:[%s938_s5] sm:$0xff] }
   0x7   :  { %v266_v19 = vld [vmem:[%s938_s5 + $0x18] sm:$0xff]  ;;  %v265_v20 = vld [vmem:[%s938_s5 + $0x10] sm:$0xff]  ;;  %v268_v21 = vld [vmem:[%s938_s5 + $0x28] sm:$0xff] }
   0x8   :  { %v267_v22 = vld [vmem:[%s938_s5 + $0x20] sm:$0xff]  ;;  %v270_v23 = vld [vmem:[%s938_s5 + $0x38] sm:$0xff]  ;;  %v269_v24 = vld [vmem:[%s938_s5 + $0x30] sm:$0xff] }
   0x9   :  { %v272_v25 = vld [vmem:[%s938_s5 + $0x48] sm:$0xff]  ;;  %v271_v26 = vld [vmem:[%s938_s5 + $0x40] sm:$0xff]  ;;  %v274_v27 = vld [vmem:[%s938_s5 + $0x58] sm:$0xff] }
   0xa   :  { %194 = vperm.xlu1 %494, %v156_v5   ;;  %189 = vperm.xlu0 %493, %v155_v6   ;;  %v273_v28 = vld [vmem:[%s938_s5 + $0x50] sm:$0xff]  ;;  %v276_v29 = vld [vmem:[%s938_s5 + $0x68] sm:$0xff]  ;;  %v275_v30 = vld [vmem:[%s938_s5 + $0x60] sm:$0xff] }
   0xb   :  { %v278_v31 = vld [vmem:[%s938_s5 + $0x78] sm:$0xff]  ;;  %v277_v32 = vld [vmem:[%s938_s5 + $0x70] sm:$0xff]  ;;  %v23_v41 = vld [vmem:[%s939_s0] sm:$0xf] }
   0xc   :  { %v39_v42 = vld [vmem:[%s940_s1] sm:$0xf]  ;;  %v24_v45 = vld [vmem:[%s939_s0 + $0x4] sm:$0xf]  ;;  %v25_v51 = vld [vmem:[%s939_s0 + $0x8] sm:$0xf] }
   0xd   :  { %v71_v43 = vld [vmem:[%s941_s2] sm:$0xf]  ;;  %v40_v46 = vld [vmem:[%s940_s1 + $0x4] sm:$0xf]  ;;  %v41_v52 = vld [vmem:[%s940_s1 + $0x8] sm:$0xf]  ;;  %v55_v55 = vmax.bf16 %v39_v42, %v23_v41 }
   0xe   :  { %204 = vperm.xlu1 %494, %v158_v7   ;;  %199 = vperm.xlu0 %493, %v157_v8   ;;  %v87_v44 = vld [vmem:[%s942_s3] sm:$0xf]  ;;  %v72_v47 = vld [vmem:[%s941_s2 + $0x4] sm:$0xf]  ;;  %v73_v53 = vld [vmem:[%s941_s2 + $0x8] sm:$0xf]  ;;  %v56_v60 = vmax.bf16 %v40_v46, %v24_v45  ;;  %v57_v6 = vmax.bf16 %v41_v52, %v25_v51 }
   0xf   :  { %v88_v48 = vld [vmem:[%s942_s3 + $0x4] sm:$0xf]  ;;  %v89_v54 = vld [vmem:[%s942_s3 + $0x8] sm:$0xf]  ;;  %v103_v56 = vmax.bf16 %v87_v44, %v71_v43  ;;  %v26_v57 = vld [vmem:[%s939_s0 + $0xc] sm:$0xf] }
  0x10   :  { %v42_v58 = vld [vmem:[%s940_s1 + $0xc] sm:$0xf]  ;;  %v104_v61 = vmax.bf16 %v88_v48, %v72_v47  ;;  %v28_v63 = vld [vmem:[%s939_s0 + $0x14] sm:$0xf]  ;;  %v27_v5 = vld [vmem:[%s939_s0 + $0x10] sm:$0xf]  ;;  %v105_v7 = vmax.bf16 %v89_v54, %v73_v53 }
  0x11   :  { %v74_v59 = vld [vmem:[%s941_s2 + $0xc] sm:$0xf]  ;;  %v44_v0 = vld [vmem:[%s940_s1 + $0x14] sm:$0xf]  ;;  %v43_v8 = vld [vmem:[%s940_s1 + $0x10] sm:$0xf] }
  0x12   :  { %214 = vperm.xlu1 %494, %v160_v9   ;;  %209 = vperm.xlu0 %493, %v159_v10   ;;  %v90_v62 = vld [vmem:[%s942_s3 + $0xc] sm:$0xf]  ;;  %v76_v3 = vld [vmem:[%s941_s2 + $0x14] sm:$0xf]  ;;  %v75_v9 = vld [vmem:[%s941_s2 + $0x10] sm:$0xf] }
  0x13   :  { %v92_v4 = vld [vmem:[%s942_s3 + $0x14] sm:$0xf]  ;;  %v91_v10 = vld [vmem:[%s942_s3 + $0x10] sm:$0xf]  ;;  %v32_v47 = vld [vmem:[%s939_s0 + $0x24] sm:$0xf] }
  0x14   :  { %v48_v48 = vld [vmem:[%s940_s1 + $0x24] sm:$0xf] }
  0x15   :  { %v80_v53 = vld [vmem:[%s941_s2 + $0x24] sm:$0xf] }
  0x16   :  { %224 = vperm.xlu1 %494, %v162_v11   ;;  %219 = vperm.xlu0 %493, %v161_v12   ;;  %v119_v11 = vmax.bf16 %v103_v56, %v55_v55  ;;  %v58_v12 = vmax.bf16 %v42_v58, %v26_v57  ;;  %v96_v54 = vld [vmem:[%s942_s3 + $0x24] sm:$0xf]  ;;  %v31_v55 = vld [vmem:[%s939_s0 + $0x20] sm:$0xf] }
  0x1a   :  { %234 = vperm.xlu1 %494, %v164_v13   ;;  %229 = vperm.xlu0 %493, %v163_v14   ;;  %v106_v13 = vmax.bf16 %v90_v62, %v74_v59  ;;  %v120_v14 = vmax.bf16 %v104_v61, %v56_v60  ;;  %v47_v60 = vld [vmem:[%s940_s1 + $0x20] sm:$0xf] }
  0x1b   :  { %v79_v61 = vld [vmem:[%s941_s2 + $0x20] sm:$0xf] }
  0x1c   :  { %v95_v62 = vld [vmem:[%s942_s3 + $0x20] sm:$0xf] }
  0x1e   :  { %244 = vperm.xlu1 %494, %v166_v15   ;;  %239 = vperm.xlu0 %493, %v165_v16   ;;  %v60_v15 = vmax.bf16 %v44_v0, %v28_v63  ;;  %v108_v16 = vmax.bf16 %v92_v4, %v76_v3  ;;  %v50_v3 = vld [vmem:[%s940_s1 + $0x2c] sm:$0xf] }
  0x1f   :  { %v82_v4 = vld [vmem:[%s941_s2 + $0x2c] sm:$0xf] }
  0x20   :  { %v751_v41 = vmax.bf16 %v108_v16, %v60_v15  ;;  %v63_v15 = vmax.bf16 %v47_v60, %v31_v55  ;;  %v111_v16 = vmax.bf16 %v95_v62, %v79_v61  ;;  %v83_v55 = vld [vmem:[%s941_s2 + $0x30] sm:$0xf] }
  0x22   :  { %286 = vperm.xlu1 %494, %v264_v17   ;;  %281 = vperm.xlu0 %493, %v263_v18   ;;  %v30_v17 = vld [vmem:[%s939_s0 + $0x1c] sm:$0xf]  ;;  %v140_v63 = vunpack.c.l.bf16 %v751_v41 }
  0x26   :  { %296 = vperm.xlu1 %494, %v266_v19   ;;  %291 = vperm.xlu0 %493, %v265_v20   ;;  %v59_v20 = vmax.bf16 %v43_v8, %v27_v5  ;;  %v112_v8 = vmax.bf16 %v96_v54, %v80_v53  ;;  %v51_v54 = vld [vmem:[%s940_s1 + $0x30] sm:$0xf] }
  0x2a   :  { %306 = vperm.xlu1 %494, %v268_v21   ;;  %301 = vperm.xlu0 %493, %v267_v22   ;;  %v107_v21 = vmax.bf16 %v91_v10, %v75_v9  ;;  %v46_v22 = vld [vmem:[%s940_s1 + $0x1c] sm:$0xf]  ;;  %v98_v9 = vld [vmem:[%s942_s3 + $0x2c] sm:$0xf]  ;;  %v33_v10 = vld [vmem:[%s939_s0 + $0x28] sm:$0xf] }
  0x2b   :  { %v62_v42 = vmax.bf16 %v46_v22, %v30_v17  ;;  %v81_v17 = vld [vmem:[%s941_s2 + $0x28] sm:$0xf] }
  0x2c   :  { %v123_v46 = vmax.bf16 %v107_v21, %v59_v20  ;;  %v97_v20 = vld [vmem:[%s942_s3 + $0x28] sm:$0xf] }
  0x2e   :  { %316 = vperm.xlu1 %494, %v270_v23   ;;  %311 = vperm.xlu0 %493, %v269_v24   ;;  %v78_v23 = vld [vmem:[%s941_s2 + $0x1c] sm:$0xf] }
  0x2f   :  { %v94_v24 = vld [vmem:[%s942_s3 + $0x1c] sm:$0xf] }
  0x30   :  { %v110_v43 = vmax.bf16 %v94_v24, %v78_v23 }
  0x32   :  { %326 = vperm.xlu1 %494, %v272_v25   ;;  %321 = vperm.xlu0 %493, %v271_v26   ;;  %v29_v25 = vld [vmem:[%s939_s0 + $0x18] sm:$0xf]  ;;  %v121_v26 = vmax.bf16 %v105_v7, %v57_v6  ;;  %v784_v0 = vmax.bf16 %v110_v43, %v62_v42  ;;  %v139_v7 = vunpack.c.l.bf16 %v123_v46 }
  0x34   :  { %v137_v56 = vunpack.c.l.bf16 %v121_v26  ;;  %v114_v26 = vmax.bf16 %v98_v9, %v82_v4  ;;  %v142_v43 = vunpack.c.l.bf16 %v784_v0  ;;  %v54_v0 = vld [vmem:[%s940_s1 + $0x3c] sm:$0xf]  ;;  %v37_v9 = vld [vmem:[%s939_s0 + $0x38] sm:$0xf] }
  0x36   :  { %336 = vperm.xlu1 %494, %v274_v27   ;;  %331 = vperm.xlu0 %493, %v273_v28   ;;  %v135_v27 = vunpack.c.l.bf16 %v119_v11  ;;  %v122_v28 = vmax.bf16 %v106_v13, %v58_v12  ;;  %v49_v11 = vld [vmem:[%s940_s1 + $0x28] sm:$0xf] }
  0x38   :  { %v138_v58 = vunpack.c.l.bf16 %v122_v28 }
  0x3a   :  { %346 = vperm.xlu1 %494, %v276_v29   ;;  %341 = vperm.xlu0 %493, %v275_v30   ;;  %v136_v29 = vunpack.c.l.bf16 %v120_v14  ;;  %v45_v30 = vld [vmem:[%s940_s1 + $0x18] sm:$0xf] }
  0x3b   :  { %v61_v51 = vmax.bf16 %v45_v30, %v29_v25  ;;  %v65_v30 = vmax.bf16 %v49_v11, %v33_v10 }
  0x3e   :  { %356 = vperm.xlu1 %494, %v278_v31   ;;  %351 = vperm.xlu0 %493, %v277_v32   ;;  %v77_v31 = vld [vmem:[%s941_s2 + $0x18] sm:$0xf] }
  0x3f   :  { %v93_v32 = vld [vmem:[%s942_s3 + $0x18] sm:$0xf] }
  0x40   :  { %v109_v52 = vmax.bf16 %v93_v32, %v77_v31  ;;  %v113_v31 = vmax.bf16 %v97_v20, %v81_v17  ;;  %v52_v32 = vld [vmem:[%s940_s1 + $0x34] sm:$0xf] }
  0x42   :  { %v125_v14 = vmax.bf16 %v109_v52, %v61_v51  ;;  %v35_v51 = vld [vmem:[%s939_s0 + $0x30] sm:$0xf] }
  0x44   :  { %v141_v46 = vunpack.c.l.bf16 %v125_v14  ;;  %v101_v14 = vld [vmem:[%s942_s3 + $0x38] sm:$0xf] }
  0x81   :  { %v627_v33 = vpop.permute.xlu1 %179  ;;  %v629_v34 = vpop.permute.xlu0 %169 }
  0x82   :  { %v247_v57 = vmul.f32 %v629_v34, %v135_v27  ;;  %v64_v34 = vmax.bf16 %v48_v48, %v32_v47  ;;  %v249_v21 = vmul.f32 %v627_v33, %v137_v56  ;;  %v36_v27 = vld [vmem:[%s939_s0 + $0x34] sm:$0xf]  ;;  %v127_v48 = vmax.bf16 %v111_v16, %v63_v15  ;;  %v99_v56 = vld [vmem:[%s942_s3 + $0x30] sm:$0xf] }
  0x83   :  { %v84_v33 = vld [vmem:[%s941_s2 + $0x34] sm:$0xf]  ;;  %v68_v60 = vmax.bf16 %v52_v32, %v36_v27 }
  0x84   :  { %v128_v47 = vmax.bf16 %v112_v8, %v64_v34  ;;  %v143_v4 = vunpack.c.l.bf16 %v127_v48  ;;  %v102_v8 = vld [vmem:[%s942_s3 + $0x3c] sm:$0xf] }
  0x85   :  { %v631_v35 = vpop.permute.xlu1 %184  ;;  %v633_v36 = vpop.permute.xlu0 %174 }
  0x86   :  { %v248_v59 = vmul.f32 %v633_v36, %v136_v29  ;;  %v34_v36 = vld [vmem:[%s939_s0 + $0x2c] sm:$0xf]  ;;  %v250_v22 = vmul.f32 %v631_v35, %v138_v58  ;;  %v100_v35 = vld [vmem:[%s942_s3 + $0x34] sm:$0xf] }
  0x87   :  { %v66_v25 = vmax.bf16 %v50_v3, %v34_v36  ;;  %v116_v61 = vmax.bf16 %v100_v35, %v84_v33  ;;  %v144_v3 = vunpack.c.l.bf16 %v128_v47 }
  0x89   :  { %v635_v37 = vpop.permute.xlu1 %194  ;;  %v637_v38 = vpop.permute.xlu0 %189  ;;  %v132_v20 = vmax.bf16 %v116_v61, %v68_v60 }
  0x8a   :  { %v252_v52 = vmul.f32 %v635_v37, %v140_v63  ;;  %v251_v53 = vmul.f32 %v637_v38, %v139_v7  ;;  %v129_v38 = vmax.bf16 %v113_v31, %v65_v30  ;;  %v38_v63 = vld [vmem:[%s939_s0 + $0x3c] sm:$0xf] }
  0x8b   :  { %v86_v7 = vld [vmem:[%s941_s2 + $0x3c] sm:$0xf] }
  0x8d   :  { %v639_v39 = vpop.permute.xlu1 %204  ;;  %v641_v40 = vpop.permute.xlu0 %199 }
  0x8e   :  { %v254_v10 = vmul.f32 %v639_v39, %v142_v43  ;;  %v253_v11 = vmul.f32 %v641_v40, %v141_v46  ;;  %v70_v40 = vmax.bf16 %v54_v0, %v38_v63  ;;  %v148_v43 = vunpack.c.l.bf16 %v132_v20 }
  0x91   :  { %v667_v49 = vpop.permute.xlu1 %214  ;;  %v669_v50 = vpop.permute.xlu0 %209 }
  0x92   :  { %v255_v30 = vmul.f32 %v669_v50, %v143_v4 }
  0x95   :  { %v701_v1 = vpop.permute.xlu1 %224  ;;  %v703_v2 = vpop.permute.xlu0 %219 }
  0x99   :  { %v726_v18 = vpop.permute.xlu1 %234  ;;  %v728_v19 = vpop.permute.xlu0 %229 }
  0x9d   :  { %v753_v44 = vpop.permute.xlu1 %244  ;;  %v755_v45 = vpop.permute.xlu0 %239 }
  0xa1   :  { %v287_v5 = vpop.permute.xlu1 %286  ;;  %v282_v6 = vpop.permute.xlu0 %281 }
  0xa2   :  { %v360_v12 = vadd.f32 %v287_v5, %v248_v59  ;;  %v359_v13 = vadd.f32 %v282_v6, %v247_v57  ;;  %v130_v59 = vmax.bf16 %v114_v26, %v66_v25  ;;  %v67_v5 = vmax.bf16 %v51_v54, %v35_v51 }
  0xa3   :  { %v115_v6 = vmax.bf16 %v99_v56, %v83_v55  ;;  %v118_v26 = vmax.bf16 %v102_v8, %v86_v7 }
  0xa4   :  { %v477_v23 = vpack.c.bf16 %v360_v12, %v360_v12  ;;  %v476_v24 = vpack.c.bf16 %v359_v13, %v359_v13  ;;  %v53_v12 = vld [vmem:[%s940_s1 + $0x38] sm:$0xf]  ;;  %v146_v17 = vunpack.c.l.bf16 %v130_v59 }
  0xa5   :  { %v297_v28 = vpop.permute.xlu1 %296  ;;  %v292_v29 = vpop.permute.xlu0 %291  ;;  %v85_v13 = vld [vmem:[%s941_s2 + $0x38] sm:$0xf]  ;;  %v131_v25 = vmax.bf16 %v115_v6, %v67_v5  ;;  %v69_v27 = vmax.bf16 %v53_v12, %v37_v9  ;;  %v134_v46 = vmax.bf16 %v118_v26, %v70_v40 }
  0xa6   :  { %441 = vst.msk [vmem:[%s943_s6 + $0x4] sm:$0xf] %vm439_vm0, %v477_v23  ;;  %440 = vst.msk [vmem:[%s943_s6] sm:$0xf] %vm439_vm0, %v476_v24  ;;  %v362_v41 = vadd.f32 %v297_v28, %v250_v22  ;;  %v361_v42 = vadd.f32 %v292_v29, %v249_v21  ;;  %v145_v22 = vunpack.c.l.bf16 %v129_v38  ;;  %v117_v28 = vmax.bf16 %v101_v14, %v85_v13 }
  0xa7   :  { %v256_v29 = vmul.f32 %v667_v49, %v144_v3  ;;  %v147_v49 = vunpack.c.l.bf16 %v131_v25  ;;  %v258_v47 = vmul.f32 %v701_v1, %v146_v17 }
  0xa8   :  { %v479_v57 = vpack.c.bf16 %v362_v41, %v362_v41  ;;  %v478_v58 = vpack.c.bf16 %v361_v42, %v361_v42  ;;  %v133_v50 = vmax.bf16 %v117_v28, %v69_v27  ;;  %v257_v48 = vmul.f32 %v703_v2, %v145_v22 }
  0xa9   :  { %v307_v37 = vpop.permute.xlu1 %306  ;;  %v302_v62 = vpop.permute.xlu0 %301  ;;  %v260_v2 = vmul.f32 %v726_v18, %v148_v43 }
  0xaa   :  { %443 = vst.msk [vmem:[%s943_s6 + $0xc] sm:$0xf] %vm439_vm0, %v479_v57  ;;  %442 = vst.msk [vmem:[%s943_s6 + $0x8] sm:$0xf] %vm439_vm0, %v478_v58  ;;  %v364_v34 = vadd.f32 %v307_v37, %v252_v52  ;;  %v363_v36 = vadd.f32 %v302_v62, %v251_v53  ;;  %v150_v57 = vunpack.c.l.bf16 %v134_v46  ;;  %v149_v1 = vunpack.c.l.bf16 %v133_v50 }
  0xab   :  { %v259_v58 = vmul.f32 %v728_v19, %v147_v49 }
  0xac   :  { %v481_v15 = vpack.c.bf16 %v364_v34, %v364_v34  ;;  %v480_v16 = vpack.c.bf16 %v363_v36, %v363_v36  ;;  %v262_v18 = vmul.f32 %v753_v44, %v150_v57  ;;  %v261_v19 = vmul.f32 %v755_v45, %v149_v1 }
  0xad   :  { %v317_v21 = vpop.permute.xlu1 %316  ;;  %v312_v39 = vpop.permute.xlu0 %311 }
  0xae   :  { %445 = vst.msk [vmem:[%s943_s6 + $0x14] sm:$0xf] %vm439_vm0, %v481_v15  ;;  %444 = vst.msk [vmem:[%s943_s6 + $0x10] sm:$0xf] %vm439_vm0, %v480_v16  ;;  %v366_v23 = vadd.f32 %v317_v21, %v254_v10  ;;  %v365_v24 = vadd.f32 %v312_v39, %v253_v11 }
  0xb0   :  { %v483_v31 = vpack.c.bf16 %v366_v23, %v366_v23  ;;  %v482_v32 = vpack.c.bf16 %v365_v24, %v365_v24 }
  0xb1   :  { %v327_v33 = vpop.permute.xlu1 %326  ;;  %v322_v35 = vpop.permute.xlu0 %321 }
  0xb2   :  { %447 = vst.msk [vmem:[%s943_s6 + $0x1c] sm:$0xf] %vm439_vm0, %v483_v31  ;;  %446 = vst.msk [vmem:[%s943_s6 + $0x18] sm:$0xf] %vm439_vm0, %v482_v32  ;;  %v368_v41 = vadd.f32 %v327_v33, %v256_v29  ;;  %v367_v42 = vadd.f32 %v322_v35, %v255_v30 }
  0xb4   :  { %v485_v51 = vpack.c.bf16 %v368_v41, %v368_v41  ;;  %v484_v52 = vpack.c.bf16 %v367_v42, %v367_v42 }
  0xb5   :  { %v337_v53 = vpop.permute.xlu1 %336  ;;  %v332_v54 = vpop.permute.xlu0 %331 }
  0xb6   :  { %449 = vst.msk [vmem:[%s943_s6 + $0x24] sm:$0xf] %vm439_vm0, %v485_v51  ;;  %448 = vst.msk [vmem:[%s943_s6 + $0x20] sm:$0xf] %vm439_vm0, %v484_v52  ;;  %v370_v55 = vadd.f32 %v337_v53, %v258_v47  ;;  %v369_v56 = vadd.f32 %v332_v54, %v257_v48 }
  0xb8   :  { %v487_v59 = vpack.c.bf16 %v370_v55, %v370_v55  ;;  %v486_v60 = vpack.c.bf16 %v369_v56, %v369_v56 }
  0xb9   :  { %v347_v61 = vpop.permute.xlu1 %346  ;;  %v342_v37 = vpop.permute.xlu0 %341 }
  0xba   :  { %451 = vst.msk [vmem:[%s943_s6 + $0x2c] sm:$0xf] %vm439_vm0, %v487_v59  ;;  %450 = vst.msk [vmem:[%s943_s6 + $0x28] sm:$0xf] %vm439_vm0, %v486_v60  ;;  %v372_v62 = vadd.f32 %v347_v61, %v260_v2  ;;  %v371_v38 = vadd.f32 %v342_v37, %v259_v58 }
  0xbc   :  { %v489_v63 = vpack.c.bf16 %v372_v62, %v372_v62  ;;  %v488_v0 = vpack.c.bf16 %v371_v38, %v371_v38 }
  0xbd   :  { %v357_v34 = vpop.permute.xlu1 %356  ;;  %v352_v36 = vpop.permute.xlu0 %351 }
  0xbe   :  { %453 = vst.msk [vmem:[%s943_s6 + $0x34] sm:$0xf] %vm439_vm0, %v489_v63  ;;  %452 = vst.msk [vmem:[%s943_s6 + $0x30] sm:$0xf] %vm439_vm0, %v488_v0  ;;  %v374_v3 = vadd.f32 %v357_v34, %v262_v18  ;;  %v373_v4 = vadd.f32 %v352_v36, %v261_v19 }
  0xc0   :  { %v491_v5 = vpack.c.bf16 %v374_v3, %v374_v3  ;;  %v490_v44 = vpack.c.bf16 %v373_v4, %v373_v4 }
  0xc2   :  { %455 = vst.msk [vmem:[%s943_s6 + $0x3c] sm:$0xf] %vm439_vm0, %v491_v5  ;;  %454 = vst.msk [vmem:[%s943_s6 + $0x38] sm:$0xf] %vm439_vm0, %v490_v44 }

// kernel: net_forward.12
= control target key start
LH: loop header
LB: loop body
LE: loop exit
PB: predicated region body
PF: predicated region fallthrough
CT: control target
= control target key end

     0   :  { %v1127_v3 = vmov 0   ;;  %vm270_vm0 = vcmask 523264   ;;  %s1368_s1 = inlined_call_operand.vmem [shape: bf16[576,128], index: 1, kind: input, shape index: {}]   ;;  %s1369_s0 = inlined_call_operand.vmem [shape: bf16[64,576], index: 0, kind: input, shape index: {}]   ;;  %s1370_s2 = inlined_call_operand.vmem [shape: f32[64,1], index: 2, kind: input, shape index: {}]   ;;  %s1371_s3 = inlined_call_operand.vmem [shape: bf16[64,128], index: 3, kind: output, shape index: {}]  }
   0x1   :  { %v849_v0 = vld [vmem:[%s1368_s1 + $0x40] sm:$0xff]   ;;  %1125 = vset.pattern.permute.xlu0 %v1127_v3  ;;  %1126 = vset.pattern.permute.xlu1 %v1127_v3  ;;  %v850_v5 = vld [vmem:[%s1368_s1 + $0x48] sm:$0xff]   ;;  %v851_v9 = vld [vmem:[%s1368_s1 + $0x50] sm:$0xff]  }
   0x2   :  { %v865_v1 = vld [vmem:[%s1368_s1 + $0xc0] sm:$0xff]   ;;  %1037 = vmatprep.subr.bf16.mxu0 %v849_v0  ;;  %v866_v6 = vld [vmem:[%s1368_s1 + $0xc8] sm:$0xff]   ;;  %v867_v10 = vld [vmem:[%s1368_s1 + $0xd0] sm:$0xff]  }
   0x3   :  { %v679_v2 = vld [vmem:[%s1368_s1] sm:$0xff]   ;;  %1069 = vmatprep.subr.bf16.mxu1 %v865_v1  ;;  %v842_v7 = vld [vmem:[%s1368_s1 + $0x8] sm:$0xff]   ;;  %v843_v11 = vld [vmem:[%s1368_s1 + $0x10] sm:$0xff]  }
   0x4   :  { %v857_v4 = vld [vmem:[%s1368_s1 + $0x80] sm:$0xff]   ;;  %1039 = vmatpush3.bf16.msra.mxu0 %v679_v2  ;;  %v858_v8 = vld [vmem:[%s1368_s1 + $0x88] sm:$0xff]   ;;  %v859_v12 = vld [vmem:[%s1368_s1 + $0x90] sm:$0xff]  }
   0x5   :  { %1071 = vmatpush3.bf16.msra.mxu1 %v857_v4  ;;  %1041 = vmatprep.subr.bf16.mxu0 %v850_v5  ;;  %v852_v13 = vld [vmem:[%s1368_s1 + $0x58] sm:$0xff]   ;;  %v1193_v15 = vld [vmem:[%s1369_s0] sm:$0xff]  ;;  %v1205_v19 = vld [vmem:[%s1369_s0 + $0x8] sm:$0xff] }
   0x6   :  { %1073 = vmatprep.subr.bf16.mxu1 %v866_v6  ;;  %v868_v14 = vld [vmem:[%s1368_s1 + $0xd8] sm:$0xff]   ;;  %v39_v18 = vunpack.c.h.bf16 %v1193_v15  ;;  %v853_v20 = vld [vmem:[%s1368_s1 + $0x60] sm:$0xff]   ;;  %v41_v22 = vunpack.c.h.bf16 %v1205_v19  ;;  %v854_v25 = vld [vmem:[%s1368_s1 + $0x68] sm:$0xff]   ;;  %v38_v46 = vunpack.c.l.bf16 %v1193_v15  ;;  %v40_v47 = vunpack.c.l.bf16 %v1205_v19 }
   0x7   :  { %v844_v16 = vld [vmem:[%s1368_s1 + $0x18] sm:$0xff]   ;;  %v869_v21 = vld [vmem:[%s1368_s1 + $0xe0] sm:$0xff]   ;;  %v870_v26 = vld [vmem:[%s1368_s1 + $0xe8] sm:$0xff]  }
   0x8   :  { %1043 = vmatpush3.bf16.msra.mxu0 %v842_v7  ;;  %v860_v17 = vld [vmem:[%s1368_s1 + $0x98] sm:$0xff]   ;;  %359 = vmatprep.mubr.f32.mxu0 %v39_v18  ;;  %v845_v23 = vld [vmem:[%s1368_s1 + $0x20] sm:$0xff]   ;;  %v846_v28 = vld [vmem:[%s1368_s1 + $0x28] sm:$0xff]  }
   0x9   :  { %1075 = vmatpush3.bf16.msra.mxu1 %v858_v8  ;;  %1045 = vmatprep.subr.bf16.mxu0 %v851_v9  ;;  %v861_v24 = vld [vmem:[%s1368_s1 + $0xa0] sm:$0xff]   ;;  %v862_v29 = vld [vmem:[%s1368_s1 + $0xa8] sm:$0xff]   ;;  %v224_v30 = vld [vmem:[%s1370_s2 + $0x10] sm:$0xff] }
   0xa   :  { %1077 = vmatprep.subr.bf16.mxu1 %v867_v10  ;;  %464 = vmatprep.mubr.f32.mxu1 %v41_v22  ;;  %v222_v27 = vld [vmem:[%s1370_s2] sm:$0xff]  ;;  %v855_v31 = vld [vmem:[%s1368_s1 + $0x70] sm:$0xff]   ;;  %v223_v33 = vld [vmem:[%s1370_s2 + $0x8] sm:$0xff] }
   0xb   :  { %v871_v32 = vld [vmem:[%s1368_s1 + $0xf0] sm:$0xff]   ;;  %232 = vperm.xlu0 %1125, %v222_v27   ;;  %242 = vperm.xlu1 %1126, %v224_v30   ;;  %v225_v34 = vld [vmem:[%s1370_s2 + $0x18] sm:$0xff]  ;;  %v227_v39 = vld [vmem:[%s1370_s2 + $0x28] sm:$0xff] }
   0xc   :  { %1047 = vmatpush3.bf16.msra.mxu0 %v843_v11  ;;  %v847_v35 = vld [vmem:[%s1368_s1 + $0x30] sm:$0xff]   ;;  %v856_v37 = vld [vmem:[%s1368_s1 + $0x78] sm:$0xff]   ;;  %v226_v40 = vld [vmem:[%s1370_s2 + $0x20] sm:$0xff] }
   0xd   :  { %1079 = vmatpush3.bf16.msra.mxu1 %v859_v12  ;;  %1049 = vmatprep.subr.bf16.mxu0 %v852_v13  ;;  %v863_v36 = vld [vmem:[%s1368_s1 + $0xb0] sm:$0xff]   ;;  %v872_v38 = vld [vmem:[%s1368_s1 + $0xf8] sm:$0xff]   ;;  %v873_v43 = vld [vmem:[%s1368_s1 + $0x100] sm:$0xff]  }
   0xe   :  { %1081 = vmatprep.subr.bf16.mxu1 %v868_v14  ;;  %v848_v41 = vld [vmem:[%s1368_s1 + $0x38] sm:$0xff]   ;;  %v228_v49 = vld [vmem:[%s1370_s2 + $0x30] sm:$0xff]  ;;  %v20_v52 = vld [vmem:[%s1369_s0 + $0x28] sm:$0xff] }
   0xf   :  { %237 = vperm.xlu0 %1125, %v223_v33   ;;  %247 = vperm.xlu1 %1126, %v225_v34   ;;  %v864_v42 = vld [vmem:[%s1368_s1 + $0xb8] sm:$0xff]   ;;  %v21_v53 = vld [vmem:[%s1369_s0 + $0x30] sm:$0xff]  ;;  %v874_v56 = vld [vmem:[%s1368_s1 + $0x108] sm:$0xff]   ;;  %v49_v57 = vunpack.c.h.bf16 %v20_v52  ;;  %v48_v61 = vunpack.c.l.bf16 %v20_v52 }
  0x10   :  { %1051 = vmatpush3.bf16.msra.mxu0 %v844_v16  ;;  %v17_v44 = vld [vmem:[%s1369_s0 + $0x14] sm:$0xff]  ;;  %v18_v45 = vld [vmem:[%s1369_s0 + $0x1c] sm:$0xff]  ;;  %v51_v58 = vunpack.c.h.bf16 %v21_v53  ;;  %v24_v60 = vld [vmem:[%s1369_s0 + $0x44] sm:$0xff]  ;;  %v50_v62 = vunpack.c.l.bf16 %v21_v53 }
  0x11   :  { %1083 = vmatpush3.bf16.msra.mxu1 %v860_v17  ;;  %1053 = vmatprep.subr.bf16.mxu0 %v853_v20  ;;  %v229_v48 = vld [vmem:[%s1370_s2 + $0x38] sm:$0xff]  ;;  %v44_v50 = vunpack.c.h.bf16 %v17_v44  ;;  %v46_v51 = vunpack.c.h.bf16 %v18_v45  ;;  %v43_v54 = vunpack.c.l.bf16 %v17_v44  ;;  %v45_v55 = vunpack.c.l.bf16 %v18_v45  ;;  %v875_v63 = vld [vmem:[%s1368_s1 + $0x110] sm:$0xff]   ;;  %v29_v9 = vld [vmem:[%s1369_s0 + $0x64] sm:$0xff] }
  0x12   :  { %1085 = vmatprep.subr.bf16.mxu1 %v869_v21  ;;  %v23_v59 = vld [vmem:[%s1369_s0 + $0x3c] sm:$0xff]  ;;  %v56_v1 = vunpack.c.h.bf16 %v24_v60  ;;  %v26_v2 = vld [vmem:[%s1369_s0 + $0x50] sm:$0xff]  ;;  %v55_v5 = vunpack.c.l.bf16 %v24_v60  ;;  %v64_v13 = vunpack.c.h.bf16 %v29_v9  ;;  %v63_v17 = vunpack.c.l.bf16 %v29_v9  ;;  %v22_v33 = vld [vmem:[%s1369_s0 + $0x38] ss:$80 sps:$4 sm:$0xff]  }
  0x13   :  { %257 = vperm.xlu1 %1126, %v227_v39   ;;  %252 = vperm.xlu0 %1125, %v226_v40   ;;  %v54_v0 = vunpack.c.h.bf16 %v23_v59  ;;  %v27_v3 = vld [vmem:[%s1369_s0 + $0x58] sm:$0xff]  ;;  %v53_v4 = vunpack.c.l.bf16 %v23_v59  ;;  %v59_v7 = vunpack.c.h.bf16 %v26_v2  ;;  %v30_v10 = vld [vmem:[%s1369_s0 + $0x6c] sm:$0xff]  ;;  %v58_v11 = vunpack.c.l.bf16 %v26_v2  ;;  %v33_v16 = vld [vmem:[%s1369_s0 + $0x80] sm:$0xff] }
  0x14   :  { %1055 = vmatpush3.bf16.msra.mxu0 %v845_v23  ;;  %v876_v6 = vld [vmem:[%s1368_s1 + $0x118] sm:$0xff]   ;;  %v61_v8 = vunpack.c.h.bf16 %v27_v3  ;;  %v60_v12 = vunpack.c.l.bf16 %v27_v3  ;;  %v66_v14 = vunpack.c.h.bf16 %v30_v10  ;;  %v65_v18 = vunpack.c.l.bf16 %v30_v10  ;;  %v35_v21 = vld [vmem:[%s1369_s0 + $0x8c] sm:$0xff] }
  0x15   :  { %1087 = vmatpush3.bf16.msra.mxu1 %v861_v24  ;;  %1057 = vmatprep.subr.bf16.mxu0 %v854_v25  ;;  %v32_v15 = vld [vmem:[%s1369_s0 + $0x78] sm:$0xff]  ;;  %v71_v20 = vunpack.c.h.bf16 %v33_v16  ;;  %v70_v24 = vunpack.c.l.bf16 %v33_v16  ;;  %v74_v25 = vunpack.c.h.bf16 %v35_v21  ;;  %v16_v27 = vld [vmem:[%s1369_s0 + $0x10] ss:$80 sps:$4 sm:$0xff]  }
  0x16   :  { %1089 = vmatprep.subr.bf16.mxu1 %v870_v26  ;;  %v69_v19 = vunpack.c.h.bf16 %v32_v15  ;;  %v36_v22 = vld [vmem:[%s1369_s0 + $0x94] sm:$0xff]  ;;  %v68_v23 = vunpack.c.l.bf16 %v32_v15  ;;  %v42_v30 = vunpack.c.l.bf16 %v16_v27 }
  0x17   :  { %267 = vperm.xlu1 %1126, %v229_v48   ;;  %262 = vperm.xlu0 %1125, %v228_v49   ;;  %v76_v26 = vunpack.c.h.bf16 %v36_v22 }
  0x18   :  { %1059 = vmatpush3.bf16.msra.mxu0 %v846_v28  ;;  %v73_v28 = vunpack.c.l.bf16 %v35_v21 }
  0x19   :  { %1091 = vmatpush3.bf16.msra.mxu1 %v862_v29  ;;  %1061 = vmatprep.subr.bf16.mxu0 %v855_v31  ;;  %v75_v29 = vunpack.c.l.bf16 %v36_v22  ;;  %v62_v31 = vunpack.c.h.bf16 %v16_v27 }
  0x1a   :  { %1093 = vmatprep.subr.bf16.mxu1 %v871_v32  ;;  %v19_v32 = vld [vmem:[%s1369_s0 + $0x24] ss:$80 sps:$4 sm:$0xff]  }
  0x1b   :  { %v47_v34 = vunpack.c.l.bf16 %v19_v32 }
  0x1c   :  { %1063 = vmatpush3.bf16.msra.mxu0 %v847_v35  ;;  %v67_v35 = vunpack.c.h.bf16 %v19_v32 }
  0x1d   :  { %1095 = vmatpush3.bf16.msra.mxu1 %v863_v36  ;;  %1065 = vmatprep.subr.bf16.mxu0 %v856_v37  ;;  %v52_v36 = vunpack.c.l.bf16 %v22_v33  ;;  %v72_v37 = vunpack.c.h.bf16 %v22_v33 }
  0x1e   :  { %1097 = vmatprep.subr.bf16.mxu1 %v872_v38  ;;  %v25_v38 = vld [vmem:[%s1369_s0 + $0x4c] ss:$80 sps:$4 sm:$0xff]  }
  0x1f   :  { %v57_v39 = vunpack.c.l.bf16 %v25_v38  ;;  %v77_v40 = vunpack.c.h.bf16 %v25_v38 }
  0x20   :  { %1067 = vmatpush3.bf16.msra.mxu0 %v848_v41 }
  0x21   :  { %1099 = vmatpush3.bf16.msra.mxu1 %v864_v42  ;;  %1101 = vmatprep.subr.bf16.mxu0 %v873_v43 }
  0x22   :  { %1116 = vmatprep.subr.bf16.mxu1 %v873_v43 }
  0x23   :  { %360 = vmatmul.mubr.f32.vlgmr.msra.gmra.mrb[0].mxu0 %v38_v46 }
  0x24   :  { %465 = vmatmul.mubr.f32.vlgmr.msra.gmra.mrb[0].mxu1 %v40_v47  ;;  %1103 = vmatpush3.bf16.msra.mxu0 %v873_v43 }
  0x25   :  { %1120 = vmatpush3.bf16.msra.mxu1 %v873_v43  ;;  %364 = vmatprep.mubr.f32.mxu0 %v44_v50 }
  0x26   :  { %469 = vmatprep.mubr.f32.mxu1 %v46_v51  ;;  %1105 = vmatprep.subr.bf16.mxu0 %v874_v56 }
  0x27   :  { %1117 = vmatprep.subr.bf16.mxu1 %v874_v56  ;;  %365 = vmatmul.mubr.f32.gmra.mrb[2].mxu0 %v43_v54 }
  0x28   :  { %470 = vmatmul.mubr.f32.gmra.mrb[2].mxu1 %v45_v55  ;;  %369 = vmatprep.mubr.f32.mxu0 %v49_v57 }
  0x29   :  { %474 = vmatprep.mubr.f32.mxu1 %v51_v58  ;;  %1107 = vmatpush3.bf16.msra.mxu0 %v874_v56 }
  0x2a   :  { %1121 = vmatpush3.bf16.msra.mxu1 %v874_v56  ;;  %1109 = vmatprep.subr.bf16.mxu0 %v875_v63 }
  0x2b   :  { %1118 = vmatprep.subr.bf16.mxu1 %v875_v63  ;;  %370 = vmatmul.mubr.f32.gmra.mrb[4].mxu0 %v48_v61 }
  0x2c   :  { %475 = vmatmul.mubr.f32.gmra.mrb[4].mxu1 %v50_v62  ;;  %374 = vmatprep.mubr.f32.mxu0 %v54_v0 }
  0x2d   :  { %479 = vmatprep.mubr.f32.mxu1 %v56_v1  ;;  %1111 = vmatpush3.bf16.msra.mxu0 %v875_v63 }
  0x2e   :  { %1122 = vmatpush3.bf16.msra.mxu1 %v875_v63  ;;  %1113 = vmatprep.subr.bf16.mxu0 %v876_v6 }
  0x2f   :  { %1119 = vmatprep.subr.bf16.mxu1 %v876_v6  ;;  %375 = vmatmul.mubr.f32.gmra.mrb[6].mxu0 %v53_v4 }
  0x30   :  { %480 = vmatmul.mubr.f32.gmra.mrb[6].mxu1 %v55_v5  ;;  %379 = vmatprep.mubr.f32.mxu0 %v59_v7 }
  0x31   :  { %484 = vmatprep.mubr.f32.mxu1 %v61_v8  ;;  %1115 = vmatpush3.bf16.msra.mxu0 %v876_v6 }
  0x32   :  { %1123 = vmatpush3.bf16.msra.mxu1 %v876_v6 }
  0x33   :  { %380 = vmatmul.mubr.f32.gmra.mrb[8].mxu0 %v58_v11 }
  0x34   :  { %485 = vmatmul.mubr.f32.gmra.mrb[8].mxu1 %v60_v12  ;;  %384 = vmatprep.mubr.f32.mxu0 %v64_v13 }
  0x35   :  { %489 = vmatprep.mubr.f32.mxu1 %v66_v14 }
  0x37   :  { %385 = vmatmul.mubr.f32.gmra.mrb[10].mxu0 %v63_v17 }
  0x38   :  { %490 = vmatmul.mubr.f32.gmra.mrb[10].mxu1 %v65_v18  ;;  %389 = vmatprep.mubr.f32.mxu0 %v69_v19 }
  0x39   :  { %494 = vmatprep.mubr.f32.mxu1 %v71_v20 }
  0x3b   :  { %390 = vmatmul.mubr.f32.gmra.mrb[12].mxu0 %v68_v23 }
  0x3c   :  { %495 = vmatmul.mubr.f32.gmra.mrb[12].mxu1 %v70_v24  ;;  %394 = vmatprep.mubr.f32.mxu0 %v74_v25 }
  0x3d   :  { %499 = vmatprep.mubr.f32.mxu1 %v76_v26 }
  0x3f   :  { %395 = vmatmul.mubr.f32.gmra.mrb[14].mxu0 %v73_v28 }
  0x40   :  { %500 = vmatmul.mubr.f32.gmra.mrb[14].mxu1 %v75_v29  ;;  %1024 = vmatprep.mubr.msk.f32.mxu0 %vm270_vm0, %v42_v30 }
  0x41   :  { %1030 = vmatprep.mubr.msk.f32.mxu1 %vm270_vm0, %v62_v31 }
  0x43   :  { %1025 = vmatmul.mubr.msk.f32.vlgmr.msra.gmra.mrb[16].mxu0 %vm270_vm0, %v47_v34 }
  0x44   :  { %1031 = vmatmul.mubr.msk.f32.vlgmr.msra.gmra.mrb[16].mxu1 %vm270_vm0, %v67_v35  ;;  %1027 = vmatprep.mubr.msk.f32.mxu0 %vm270_vm0, %v52_v36 }
  0x45   :  { %1033 = vmatprep.mubr.msk.f32.mxu1 %vm270_vm0, %v72_v37 }
  0x47   :  { %1028 = vmatmul.mubr.msk.f32.gmra.mrb[18].mxu0 %vm270_vm0, %v57_v39 }
  0x48   :  { %1034 = vmatmul.mubr.msk.f32.gmra.mrb[18].mxu1 %vm270_vm0, %v77_v40 }
  0x8a   :  { %v233_v41 = vpop.permute.xlu0 %232  ;;  %v243_v57 = vpop.permute.xlu1 %242 }
  0x8e   :  { %v238_v48 = vpop.permute.xlu0 %237  ;;  %v248_v10 = vpop.permute.xlu1 %247 }
  0x92   :  { %v253_v19 = vpop.permute.xlu0 %252  ;;  %v258_v28 = vpop.permute.xlu1 %257 }
  0x96   :  { %v263_v37 = vpop.permute.xlu0 %262 }
  0xf6   :  { %v912_v42 = vpop.f32.mrb[0].mxu0 }
  0xf7   :  { %v968_v43 = vpop.f32.mrb[0].mxu1  ;;  %v913_v44 = vpop.f32.mrb[1].mxu0 }
  0xf8   :  { %v969_v45 = vpop.f32.mrb[1].mxu1  ;;  %v914_v46 = vadd.f32 %v913_v44, %v912_v42 }
  0xf9   :  { %v970_v47 = vadd.f32 %v969_v45, %v968_v43 }
  0xfa   :  { %v362_v49 = vadd.f32 %v914_v46, %v233_v41  ;;  %v915_v50 = vpop.f32.mrb[2].mxu0  ;;  %v268_v46 = vpop.permute.xlu1 %267 }
  0xfb   :  { %v971_v51 = vpop.f32.mrb[2].mxu1  ;;  %v916_v52 = vpop.f32.mrb[3].mxu0 }
  0xfc   :  { %v972_v53 = vpop.f32.mrb[3].mxu1  ;;  %v917_v54 = vadd.f32 %v916_v52, %v915_v50  ;;  %v467_v56 = vadd.f32 %v970_v47, %v362_v49 }
  0xfd   :  { %v973_v55 = vadd.f32 %v972_v53, %v971_v51 }
  0xfe   :  { %v367_v58 = vadd.f32 %v917_v54, %v238_v48  ;;  %v918_v59 = vpop.f32.mrb[4].mxu0 }
  0xff   :  { %v974_v60 = vpop.f32.mrb[4].mxu1  ;;  %v919_v61 = vpop.f32.mrb[5].mxu0 }
 0x100   :  { %v975_v62 = vpop.f32.mrb[5].mxu1  ;;  %v920_v63 = vadd.f32 %v919_v61, %v918_v59  ;;  %v472_v1 = vadd.f32 %v973_v55, %v367_v58 }
 0x101   :  { %v976_v0 = vadd.f32 %v975_v62, %v974_v60 }
 0x102   :  { %v372_v2 = vadd.f32 %v920_v63, %v243_v57  ;;  %v921_v3 = vpop.f32.mrb[6].mxu0 }
 0x103   :  { %v977_v4 = vpop.f32.mrb[6].mxu1  ;;  %v922_v5 = vpop.f32.mrb[7].mxu0 }
 0x104   :  { %v978_v6 = vpop.f32.mrb[7].mxu1  ;;  %v923_v7 = vadd.f32 %v922_v5, %v921_v3  ;;  %v477_v9 = vadd.f32 %v976_v0, %v372_v2 }
 0x105   :  { %v979_v8 = vadd.f32 %v978_v6, %v977_v4 }
 0x106   :  { %v377_v11 = vadd.f32 %v923_v7, %v248_v10  ;;  %v924_v12 = vpop.f32.mrb[8].mxu0 }
 0x107   :  { %v980_v13 = vpop.f32.mrb[8].mxu1  ;;  %v925_v14 = vpop.f32.mrb[9].mxu0 }
 0x108   :  { %v981_v15 = vpop.f32.mrb[9].mxu1  ;;  %v926_v16 = vadd.f32 %v925_v14, %v924_v12  ;;  %v482_v18 = vadd.f32 %v979_v8, %v377_v11 }
 0x109   :  { %v982_v17 = vadd.f32 %v981_v15, %v980_v13 }
 0x10a   :  { %v382_v20 = vadd.f32 %v926_v16, %v253_v19  ;;  %v927_v21 = vpop.f32.mrb[10].mxu0 }
 0x10b   :  { %v983_v22 = vpop.f32.mrb[10].mxu1  ;;  %v928_v23 = vpop.f32.mrb[11].mxu0 }
 0x10c   :  { %v984_v24 = vpop.f32.mrb[11].mxu1  ;;  %v929_v25 = vadd.f32 %v928_v23, %v927_v21  ;;  %v487_v27 = vadd.f32 %v982_v17, %v382_v20 }
 0x10d   :  { %v985_v26 = vadd.f32 %v984_v24, %v983_v22 }
 0x10e   :  { %v387_v29 = vadd.f32 %v929_v25, %v258_v28  ;;  %v930_v30 = vpop.f32.mrb[12].mxu0 }
 0x10f   :  { %v986_v31 = vpop.f32.mrb[12].mxu1  ;;  %v931_v32 = vpop.f32.mrb[13].mxu0 }
 0x110   :  { %v987_v33 = vpop.f32.mrb[13].mxu1  ;;  %v932_v34 = vadd.f32 %v931_v32, %v930_v30  ;;  %v492_v36 = vadd.f32 %v985_v26, %v387_v29 }
 0x111   :  { %v988_v35 = vadd.f32 %v987_v33, %v986_v31 }
 0x112   :  { %v392_v38 = vadd.f32 %v932_v34, %v263_v37  ;;  %v933_v39 = vpop.f32.mrb[14].mxu0 }
 0x113   :  { %v989_v40 = vpop.f32.mrb[14].mxu1  ;;  %v934_v41 = vpop.f32.mrb[15].mxu0 }
 0x114   :  { %v990_v42 = vpop.f32.mrb[15].mxu1  ;;  %v935_v43 = vadd.f32 %v934_v41, %v933_v39  ;;  %v497_v45 = vadd.f32 %v988_v35, %v392_v38 }
 0x115   :  { %v991_v44 = vadd.f32 %v990_v42, %v989_v40 }
 0x116   :  { %v397_v47 = vadd.f32 %v935_v43, %v268_v46  ;;  %v1026_v48 = vpop.f32.mrb[16].mxu0 }
 0x117   :  { %v1032_v49 = vpop.f32.mrb[16].mxu1  ;;  %v577_v50 = vadd.f32 %v1026_v48, %v472_v1  ;;  %v571_v52 = vpop.f32.mrb[17].mxu0 }
 0x118   :  { %v597_v51 = vadd.f32 %v1032_v49, %v492_v36  ;;  %v591_v53 = vpop.f32.mrb[17].mxu1  ;;  %v572_v54 = vadd.f32 %v571_v52, %v467_v56  ;;  %v502_v57 = vadd.f32 %v991_v44, %v397_v47 }
 0x119   :  { %v592_v55 = vadd.f32 %v591_v53, %v487_v27 }
 0x11a   :  { %v825_v58 = vpack.c.bf16 %v577_v50, %v572_v54  ;;  %v1029_v60 = vpop.f32.mrb[18].mxu0 }
 0x11b   :  { %v835_v59 = vpack.c.bf16 %v597_v51, %v592_v55  ;;  %v1035_v61 = vpop.f32.mrb[18].mxu1  ;;  %v587_v62 = vadd.f32 %v1029_v60, %v482_v18  ;;  %v581_v0 = vpop.f32.mrb[19].mxu0 }
 0x11c   :  { %v607_v63 = vadd.f32 %v1035_v61, %v502_v57  ;;  %v601_v2 = vpop.f32.mrb[19].mxu1  ;;  %826 = vst [vmem:[%s1371_s3] sm:$0xff] %v825_v58   ;;  %v582_v1 = vadd.f32 %v581_v0, %v477_v9 }
 0x11d   :  { %878 = vst [vmem:[%s1371_s3 + $0x10] sm:$0xff] %v835_v59   ;;  %v602_v56 = vadd.f32 %v601_v2, %v497_v45 }
 0x11e   :  { %v830_v3 = vpack.c.bf16 %v587_v62, %v582_v1 }
 0x11f   :  { %v840_v4 = vpack.c.bf16 %v607_v63, %v602_v56 }
 0x120   :  { %877 = vst [vmem:[%s1371_s3 + $0x8] sm:$0xff] %v830_v3  }
 0x121   :  { %879 = vst [vmem:[%s1371_s3 + $0x18] sm:$0xff] %v840_v4  }

// kernel: net_forward.13
= control target key start
LH: loop header
LB: loop body
LE: loop exit
PB: predicated region body
PF: predicated region fallthrough
CT: control target
= control target key end

     0   :  { %vm1268_vm0 = vcmask 523264   ;;  %s6662_s1 = inlined_call_operand.vmem [shape: bf16[1600,512], index: 1, kind: input, shape index: {}]   ;;  %s6663_s0 = inlined_call_operand.vmem [shape: bf16[8,1600], index: 0, kind: input, shape index: {}]   ;;  %s6664_s3 = inlined_call_operand.vmem [shape: bf16[512,256], index: 3, kind: input, shape index: {}]   ;;  %s6665_s2 = inlined_call_operand.vmem [shape: f32[1,512], index: 2, kind: input, shape index: {}]   ;;  %s6666_s5 = inlined_call_operand.vmem [shape: bf16[256,128], index: 5, kind: input, shape index: {}]   ;;  %s6667_s4 = inlined_call_operand.vmem [shape: f32[1,256], index: 4, kind: input, shape index: {}]   ;;  %s6668_s6 = inlined_call_operand.vmem [shape: f32[1,128], index: 6, kind: input, shape index: {}]   ;;  %s6669_s7 = inlined_call_operand.vmem [shape: f32[8,128], index: 7, kind: output, shape index: {}]  }
   0x1   :  { %v4346_v0 = vld [vmem:[%s6662_s1 + $0x4] ss:$16 sps:$4 sm:$0xff]   ;;  %v4350_v2 = vld [vmem:[%s6662_s1] ss:$16 sps:$4 sm:$0xff]   ;;  %v5234_v48 = vld [vmem:[%s6663_s0 + $0x8] sm:$0xff] }
   0x2   :  { %v4348_v1 = vld [vmem:[%s6662_s1 + $0x204] ss:$16 sps:$4 sm:$0xff]   ;;  %2890 = vmatprep.subr.bf16.mxu1 %v4346_v0  ;;  %v4351_v3 = vld [vmem:[%s6662_s1 + $0x200] ss:$16 sps:$4 sm:$0xff]   ;;  %v36_v51 = vunpack.c.h.bf16 %v5234_v48 }
   0x3   :  { %2954 = vmatprep.subr.bf16.mxu0 %v4348_v1  ;;  %v4352_v4 = vld [vmem:[%s6662_s1 + $0x24] ss:$16 sps:$4 sm:$0xff]   ;;  %2892 = vmatpush1.bf16.msra.mxu1 %v4350_v2  ;;  %v4356_v6 = vld [vmem:[%s6662_s1 + $0x20] ss:$16 sps:$4 sm:$0xff]  }
   0x4   :  { %2956 = vmatpush1.bf16.msra.mxu0 %v4351_v3  ;;  %v4354_v5 = vld [vmem:[%s6662_s1 + $0x224] ss:$16 sps:$4 sm:$0xff]   ;;  %2894 = vmatprep.subr.bf16.mxu1 %v4352_v4  ;;  %v4357_v7 = vld [vmem:[%s6662_s1 + $0x220] ss:$16 sps:$4 sm:$0xff]  }
   0x5   :  { %2958 = vmatprep.subr.bf16.mxu0 %v4354_v5  ;;  %v4358_v8 = vld [vmem:[%s6662_s1 + $0x44] ss:$16 sps:$4 sm:$0xff]   ;;  %v4362_v10 = vld [vmem:[%s6662_s1 + $0x40] ss:$16 sps:$4 sm:$0xff]   ;;  %1407 = vmatprep.mubr.f32.mxu0 %v36_v51  ;;  %v4445_v5 = vld [vmem:[%s6662_s1 + $0xc] ss:$16 sps:$4 sm:$0xff]  }
   0x6   :  { %v4360_v9 = vld [vmem:[%s6662_s1 + $0x244] ss:$16 sps:$4 sm:$0xff]   ;;  %v4363_v11 = vld [vmem:[%s6662_s1 + $0x240] ss:$16 sps:$4 sm:$0xff]  }
   0x7   :  { %2896 = vmatpush1.bf16.msra.mxu1 %v4356_v6  ;;  %v4364_v12 = vld [vmem:[%s6662_s1 + $0x64] ss:$16 sps:$4 sm:$0xff]   ;;  %v4368_v14 = vld [vmem:[%s6662_s1 + $0x60] ss:$16 sps:$4 sm:$0xff]  }
   0x8   :  { %2960 = vmatpush1.bf16.msra.mxu0 %v4357_v7  ;;  %2898 = vmatprep.subr.bf16.mxu1 %v4358_v8  ;;  %v4366_v13 = vld [vmem:[%s6662_s1 + $0x264] ss:$16 sps:$4 sm:$0xff]   ;;  %v4369_v15 = vld [vmem:[%s6662_s1 + $0x260] ss:$16 sps:$4 sm:$0xff]   ;;  %v35_v7 = vunpack.c.l.bf16 %v5234_v48  ;;  %v4649_v48 = vld [vmem:[%s6662_s1 + $0x44c] ss:$16 sps:$4 sm:$0xff]  }
   0x9   :  { %2962 = vmatprep.subr.bf16.mxu0 %v4360_v9  ;;  %v4370_v16 = vld [vmem:[%s6662_s1 + $0x84] ss:$16 sps:$4 sm:$0xff]   ;;  %v4374_v18 = vld [vmem:[%s6662_s1 + $0x80] ss:$16 sps:$4 sm:$0xff]   ;;  %v4447_v9 = vld [vmem:[%s6662_s1 + $0x8] ss:$16 sps:$4 sm:$0xff]  }
   0xa   :  { %v4372_v17 = vld [vmem:[%s6662_s1 + $0x284] ss:$16 sps:$4 sm:$0xff]   ;;  %v4375_v19 = vld [vmem:[%s6662_s1 + $0x280] ss:$16 sps:$4 sm:$0xff]  }
   0xb   :  { %2900 = vmatpush1.bf16.msra.mxu1 %v4362_v10  ;;  %v4376_v20 = vld [vmem:[%s6662_s1 + $0xa4] ss:$16 sps:$4 sm:$0xff]   ;;  %v4380_v22 = vld [vmem:[%s6662_s1 + $0xa0] ss:$16 sps:$4 sm:$0xff]  }
   0xc   :  { %2964 = vmatpush1.bf16.msra.mxu0 %v4363_v11  ;;  %2902 = vmatprep.subr.bf16.mxu1 %v4364_v12  ;;  %v4378_v21 = vld [vmem:[%s6662_s1 + $0x2a4] ss:$16 sps:$4 sm:$0xff]   ;;  %v4381_v23 = vld [vmem:[%s6662_s1 + $0x2a0] ss:$16 sps:$4 sm:$0xff]   ;;  %v4451_v11 = vld [vmem:[%s6662_s1 + $0x2c] ss:$16 sps:$4 sm:$0xff]  }
   0xd   :  { %2966 = vmatprep.subr.bf16.mxu0 %v4366_v13  ;;  %v4382_v24 = vld [vmem:[%s6662_s1 + $0xc4] ss:$16 sps:$4 sm:$0xff]   ;;  %v4386_v26 = vld [vmem:[%s6662_s1 + $0xc0] ss:$16 sps:$4 sm:$0xff]   ;;  %v4453_v13 = vld [vmem:[%s6662_s1 + $0x28] ss:$16 sps:$4 sm:$0xff]  }
   0xe   :  { %v4384_v25 = vld [vmem:[%s6662_s1 + $0x2c4] ss:$16 sps:$4 sm:$0xff]   ;;  %v4387_v27 = vld [vmem:[%s6662_s1 + $0x2c0] ss:$16 sps:$4 sm:$0xff]  }
   0xf   :  { %2904 = vmatpush1.bf16.msra.mxu1 %v4368_v14  ;;  %v4388_v28 = vld [vmem:[%s6662_s1 + $0xe4] ss:$16 sps:$4 sm:$0xff]   ;;  %v4392_v30 = vld [vmem:[%s6662_s1 + $0xe0] ss:$16 sps:$4 sm:$0xff]  }
  0x10   :  { %2968 = vmatpush1.bf16.msra.mxu0 %v4369_v15  ;;  %2906 = vmatprep.subr.bf16.mxu1 %v4370_v16  ;;  %v4390_v29 = vld [vmem:[%s6662_s1 + $0x2e4] ss:$16 sps:$4 sm:$0xff]   ;;  %v4393_v31 = vld [vmem:[%s6662_s1 + $0x2e0] ss:$16 sps:$4 sm:$0xff]   ;;  %v4457_v15 = vld [vmem:[%s6662_s1 + $0x4c] ss:$16 sps:$4 sm:$0xff]  }
  0x11   :  { %2970 = vmatprep.subr.bf16.mxu0 %v4372_v17  ;;  %v4394_v32 = vld [vmem:[%s6662_s1 + $0x104] ss:$16 sps:$4 sm:$0xff]   ;;  %v4398_v34 = vld [vmem:[%s6662_s1 + $0x100] ss:$16 sps:$4 sm:$0xff]   ;;  %v4459_v17 = vld [vmem:[%s6662_s1 + $0x48] ss:$16 sps:$4 sm:$0xff]  }
  0x12   :  { %v4396_v33 = vld [vmem:[%s6662_s1 + $0x304] ss:$16 sps:$4 sm:$0xff]   ;;  %v4399_v35 = vld [vmem:[%s6662_s1 + $0x300] ss:$16 sps:$4 sm:$0xff]  }
  0x13   :  { %2908 = vmatpush1.bf16.msra.mxu1 %v4374_v18  ;;  %v4400_v36 = vld [vmem:[%s6662_s1 + $0x124] ss:$16 sps:$4 sm:$0xff]   ;;  %v4404_v38 = vld [vmem:[%s6662_s1 + $0x120] ss:$16 sps:$4 sm:$0xff]  }
  0x14   :  { %2972 = vmatpush1.bf16.msra.mxu0 %v4375_v19  ;;  %2910 = vmatprep.subr.bf16.mxu1 %v4376_v20  ;;  %v4402_v37 = vld [vmem:[%s6662_s1 + $0x324] ss:$16 sps:$4 sm:$0xff]   ;;  %v4405_v39 = vld [vmem:[%s6662_s1 + $0x320] ss:$16 sps:$4 sm:$0xff]   ;;  %v4463_v19 = vld [vmem:[%s6662_s1 + $0x6c] ss:$16 sps:$4 sm:$0xff]  }
  0x15   :  { %2974 = vmatprep.subr.bf16.mxu0 %v4378_v21  ;;  %v4406_v40 = vld [vmem:[%s6662_s1 + $0x144] ss:$16 sps:$4 sm:$0xff]   ;;  %v4410_v42 = vld [vmem:[%s6662_s1 + $0x140] ss:$16 sps:$4 sm:$0xff]   ;;  %v4465_v21 = vld [vmem:[%s6662_s1 + $0x68] ss:$16 sps:$4 sm:$0xff]  }
  0x16   :  { %v4408_v41 = vld [vmem:[%s6662_s1 + $0x344] ss:$16 sps:$4 sm:$0xff]   ;;  %v4411_v43 = vld [vmem:[%s6662_s1 + $0x340] ss:$16 sps:$4 sm:$0xff]  }
  0x17   :  { %2912 = vmatpush1.bf16.msra.mxu1 %v4380_v22  ;;  %v4412_v44 = vld [vmem:[%s6662_s1 + $0x164] ss:$16 sps:$4 sm:$0xff]   ;;  %v4416_v49 = vld [vmem:[%s6662_s1 + $0x160] ss:$16 sps:$4 sm:$0xff]  }
  0x18   :  { %2976 = vmatpush1.bf16.msra.mxu0 %v4381_v23  ;;  %2914 = vmatprep.subr.bf16.mxu1 %v4382_v24  ;;  %v4414_v45 = vld [vmem:[%s6662_s1 + $0x364] ss:$16 sps:$4 sm:$0xff]   ;;  %v4417_v50 = vld [vmem:[%s6662_s1 + $0x360] ss:$16 sps:$4 sm:$0xff]   ;;  %v4469_v23 = vld [vmem:[%s6662_s1 + $0x8c] ss:$16 sps:$4 sm:$0xff]  }
  0x19   :  { %2978 = vmatprep.subr.bf16.mxu0 %v4384_v25  ;;  %v5228_v46 = vld [vmem:[%s6663_s0] sm:$0xff]  ;;  %v4471_v25 = vld [vmem:[%s6662_s1 + $0x88] ss:$16 sps:$4 sm:$0xff]  }
  0x1a   :  { %v34_v47 = vunpack.c.h.bf16 %v5228_v46  ;;  %v4418_v52 = vld [vmem:[%s6662_s1 + $0x184] ss:$16 sps:$4 sm:$0xff]   ;;  %v4422_v54 = vld [vmem:[%s6662_s1 + $0x180] ss:$16 sps:$4 sm:$0xff]   ;;  %v33_v6 = vunpack.c.l.bf16 %v5228_v46  ;;  %v4553_v46 = vld [vmem:[%s6662_s1 + $0x24c] ss:$16 sps:$4 sm:$0xff]  }
  0x1b   :  { %2916 = vmatpush1.bf16.msra.mxu1 %v4386_v26  ;;  %v4420_v53 = vld [vmem:[%s6662_s1 + $0x384] ss:$16 sps:$4 sm:$0xff]   ;;  %v4423_v55 = vld [vmem:[%s6662_s1 + $0x380] ss:$16 sps:$4 sm:$0xff]  }
  0x1c   :  { %2980 = vmatpush1.bf16.msra.mxu0 %v4387_v27  ;;  %2918 = vmatprep.subr.bf16.mxu1 %v4388_v28  ;;  %v4424_v56 = vld [vmem:[%s6662_s1 + $0x1a4] ss:$16 sps:$4 sm:$0xff]   ;;  %v4428_v58 = vld [vmem:[%s6662_s1 + $0x1a0] ss:$16 sps:$4 sm:$0xff]   ;;  %v4475_v27 = vld [vmem:[%s6662_s1 + $0xac] ss:$16 sps:$4 sm:$0xff]  }
  0x1d   :  { %2982 = vmatprep.subr.bf16.mxu0 %v4390_v29  ;;  %1336 = vmatprep.mubr.f32.mxu1 %v34_v47  ;;  %v4426_v57 = vld [vmem:[%s6662_s1 + $0x3a4] ss:$16 sps:$4 sm:$0xff]   ;;  %v4429_v59 = vld [vmem:[%s6662_s1 + $0x3a0] ss:$16 sps:$4 sm:$0xff]   ;;  %v4477_v29 = vld [vmem:[%s6662_s1 + $0xa8] ss:$16 sps:$4 sm:$0xff]  }
  0x1e   :  { %v4430_v60 = vld [vmem:[%s6662_s1 + $0x1c4] ss:$16 sps:$4 sm:$0xff]   ;;  %v4434_v62 = vld [vmem:[%s6662_s1 + $0x1c0] ss:$16 sps:$4 sm:$0xff]  }
  0x1f   :  { %2920 = vmatpush1.bf16.msra.mxu1 %v4392_v30  ;;  %v4432_v61 = vld [vmem:[%s6662_s1 + $0x3c4] ss:$16 sps:$4 sm:$0xff]   ;;  %v4435_v63 = vld [vmem:[%s6662_s1 + $0x3c0] ss:$16 sps:$4 sm:$0xff]  }
  0x20   :  { %2984 = vmatpush1.bf16.msra.mxu0 %v4393_v31  ;;  %2922 = vmatprep.subr.bf16.mxu1 %v4394_v32  ;;  %v4436_v0 = vld [vmem:[%s6662_s1 + $0x1e4] ss:$16 sps:$4 sm:$0xff]   ;;  %v4440_v2 = vld [vmem:[%s6662_s1 + $0x1e0] ss:$16 sps:$4 sm:$0xff]   ;;  %v4481_v31 = vld [vmem:[%s6662_s1 + $0xcc] ss:$16 sps:$4 sm:$0xff]  }
  0x21   :  { %2986 = vmatprep.subr.bf16.mxu0 %v4396_v33  ;;  %v4438_v1 = vld [vmem:[%s6662_s1 + $0x3e4] ss:$16 sps:$4 sm:$0xff]   ;;  %v4441_v3 = vld [vmem:[%s6662_s1 + $0x3e0] ss:$16 sps:$4 sm:$0xff]  }
  0x22   :  { %v4442_v4 = vld [vmem:[%s6662_s1 + $0x404] ss:$16 sps:$4 sm:$0xff]   ;;  %v4444_v8 = vld [vmem:[%s6662_s1 + $0x400] ss:$16 sps:$4 sm:$0xff]  }
  0x23   :  { %2924 = vmatpush1.bf16.msra.mxu1 %v4398_v34  ;;  %v4448_v10 = vld [vmem:[%s6662_s1 + $0x424] ss:$16 sps:$4 sm:$0xff]   ;;  %v4450_v12 = vld [vmem:[%s6662_s1 + $0x420] ss:$16 sps:$4 sm:$0xff]  }
  0x24   :  { %2988 = vmatpush1.bf16.msra.mxu0 %v4399_v35  ;;  %2926 = vmatprep.subr.bf16.mxu1 %v4400_v36  ;;  %v4454_v14 = vld [vmem:[%s6662_s1 + $0x444] ss:$16 sps:$4 sm:$0xff]   ;;  %v4456_v16 = vld [vmem:[%s6662_s1 + $0x440] ss:$16 sps:$4 sm:$0xff]   ;;  %v4483_v35 = vld [vmem:[%s6662_s1 + $0xc8] ss:$16 sps:$4 sm:$0xff]  }
  0x25   :  { %2990 = vmatprep.subr.bf16.mxu0 %v4402_v37  ;;  %v4460_v18 = vld [vmem:[%s6662_s1 + $0x464] ss:$16 sps:$4 sm:$0xff]   ;;  %v4462_v20 = vld [vmem:[%s6662_s1 + $0x460] ss:$16 sps:$4 sm:$0xff]   ;;  %v4487_v37 = vld [vmem:[%s6662_s1 + $0xec] ss:$16 sps:$4 sm:$0xff]  }
  0x26   :  { %v4466_v22 = vld [vmem:[%s6662_s1 + $0x484] ss:$16 sps:$4 sm:$0xff]   ;;  %v4468_v24 = vld [vmem:[%s6662_s1 + $0x480] ss:$16 sps:$4 sm:$0xff]  }
  0x27   :  { %2928 = vmatpush1.bf16.msra.mxu1 %v4404_v38  ;;  %v4472_v26 = vld [vmem:[%s6662_s1 + $0x4a4] ss:$16 sps:$4 sm:$0xff]   ;;  %v4474_v28 = vld [vmem:[%s6662_s1 + $0x4a0] ss:$16 sps:$4 sm:$0xff]  }
  0x28   :  { %2992 = vmatpush1.bf16.msra.mxu0 %v4405_v39  ;;  %2930 = vmatprep.subr.bf16.mxu1 %v4406_v40  ;;  %v4478_v30 = vld [vmem:[%s6662_s1 + $0x4c4] ss:$16 sps:$4 sm:$0xff]   ;;  %v4480_v33 = vld [vmem:[%s6662_s1 + $0x4c0] ss:$16 sps:$4 sm:$0xff]   ;;  %v4489_v39 = vld [vmem:[%s6662_s1 + $0xe8] ss:$16 sps:$4 sm:$0xff]  }
  0x29   :  { %2994 = vmatprep.subr.bf16.mxu0 %v4408_v41  ;;  %v5384_v32 = vld [vmem:[%s6663_s0 + $0x10] sm:$0xff]  ;;  %v4493_v41 = vld [vmem:[%s6662_s1 + $0x10c] ss:$16 sps:$4 sm:$0xff]  }
  0x2a   :  { %v38_v34 = vunpack.c.h.bf16 %v5384_v32  ;;  %v4484_v36 = vld [vmem:[%s6662_s1 + $0x4e4] ss:$16 sps:$4 sm:$0xff]   ;;  %v4486_v38 = vld [vmem:[%s6662_s1 + $0x4e0] ss:$16 sps:$4 sm:$0xff]  }
  0x2b   :  { %2932 = vmatpush1.bf16.msra.mxu1 %v4410_v42  ;;  %v4490_v40 = vld [vmem:[%s6662_s1 + $0x504] ss:$16 sps:$4 sm:$0xff]   ;;  %v4492_v42 = vld [vmem:[%s6662_s1 + $0x500] ss:$16 sps:$4 sm:$0xff]  }
  0x2c   :  { %2996 = vmatpush1.bf16.msra.mxu0 %v4411_v43  ;;  %2934 = vmatprep.subr.bf16.mxu1 %v4412_v44  ;;  %v4495_v43 = vld [vmem:[%s6662_s1 + $0x108] ss:$16 sps:$4 sm:$0xff]   ;;  %v4496_v44 = vld [vmem:[%s6662_s1 + $0x524] ss:$16 sps:$4 sm:$0xff]  }
  0x2d   :  { %2998 = vmatprep.subr.bf16.mxu0 %v4414_v45  ;;  %v4499_v45 = vld [vmem:[%s6662_s1 + $0x12c] ss:$16 sps:$4 sm:$0xff]  }
  0x2f   :  { %2936 = vmatpush1.bf16.msra.mxu1 %v4416_v49  ;;  %v4501_v49 = vld [vmem:[%s6662_s1 + $0x128] ss:$16 sps:$4 sm:$0xff]  }
  0x30   :  { %3000 = vmatpush1.bf16.msra.mxu0 %v4417_v50  ;;  %2938 = vmatprep.subr.bf16.mxu1 %v4418_v52  ;;  %v4502_v50 = vld [vmem:[%s6662_s1 + $0x544] ss:$16 sps:$4 sm:$0xff]   ;;  %v4505_v52 = vld [vmem:[%s6662_s1 + $0x14c] ss:$16 sps:$4 sm:$0xff]  }
  0x31   :  { %3002 = vmatprep.subr.bf16.mxu0 %v4420_v53  ;;  %v4504_v53 = vld [vmem:[%s6662_s1 + $0x540] ss:$16 sps:$4 sm:$0xff]  }
  0x33   :  { %2940 = vmatpush1.bf16.msra.mxu1 %v4422_v54  ;;  %v4507_v54 = vld [vmem:[%s6662_s1 + $0x148] ss:$16 sps:$4 sm:$0xff]  }
  0x34   :  { %3004 = vmatpush1.bf16.msra.mxu0 %v4423_v55  ;;  %2942 = vmatprep.subr.bf16.mxu1 %v4424_v56  ;;  %v4508_v55 = vld [vmem:[%s6662_s1 + $0x564] ss:$16 sps:$4 sm:$0xff]   ;;  %v4511_v56 = vld [vmem:[%s6662_s1 + $0x16c] ss:$16 sps:$4 sm:$0xff]  }
  0x35   :  { %3006 = vmatprep.subr.bf16.mxu0 %v4426_v57  ;;  %v4510_v57 = vld [vmem:[%s6662_s1 + $0x560] ss:$16 sps:$4 sm:$0xff]  }
  0x37   :  { %2944 = vmatpush1.bf16.msra.mxu1 %v4428_v58  ;;  %v4513_v58 = vld [vmem:[%s6662_s1 + $0x168] ss:$16 sps:$4 sm:$0xff]  }
  0x38   :  { %3008 = vmatpush1.bf16.msra.mxu0 %v4429_v59  ;;  %2946 = vmatprep.subr.bf16.mxu1 %v4430_v60  ;;  %v4514_v59 = vld [vmem:[%s6662_s1 + $0x584] ss:$16 sps:$4 sm:$0xff]   ;;  %v4517_v60 = vld [vmem:[%s6662_s1 + $0x18c] ss:$16 sps:$4 sm:$0xff]  }
  0x39   :  { %3010 = vmatprep.subr.bf16.mxu0 %v4432_v61  ;;  %v4516_v61 = vld [vmem:[%s6662_s1 + $0x580] ss:$16 sps:$4 sm:$0xff]  }
  0x3b   :  { %2948 = vmatpush1.bf16.msra.mxu1 %v4434_v62  ;;  %v4519_v62 = vld [vmem:[%s6662_s1 + $0x188] ss:$16 sps:$4 sm:$0xff]  }
  0x3c   :  { %3012 = vmatpush1.bf16.msra.mxu0 %v4435_v63  ;;  %2950 = vmatprep.subr.bf16.mxu1 %v4436_v0  ;;  %v4520_v63 = vld [vmem:[%s6662_s1 + $0x5a4] ss:$16 sps:$4 sm:$0xff]   ;;  %v4523_v0 = vld [vmem:[%s6662_s1 + $0x1ac] ss:$16 sps:$4 sm:$0xff]  }
  0x3d   :  { %3014 = vmatprep.subr.bf16.mxu0 %v4438_v1  ;;  %v4522_v1 = vld [vmem:[%s6662_s1 + $0x5a0] ss:$16 sps:$4 sm:$0xff]  }
  0x3f   :  { %2952 = vmatpush1.bf16.msra.mxu1 %v4440_v2  ;;  %v4525_v2 = vld [vmem:[%s6662_s1 + $0x1a8] ss:$16 sps:$4 sm:$0xff]  }
  0x40   :  { %3016 = vmatpush1.bf16.msra.mxu0 %v4441_v3  ;;  %3290 = vmatprep.subr.bf16.mxu1 %v4445_v5  ;;  %v4526_v3 = vld [vmem:[%s6662_s1 + $0x5c4] ss:$16 sps:$4 sm:$0xff]   ;;  %v4528_v5 = vld [vmem:[%s6662_s1 + $0x5c0] ss:$16 sps:$4 sm:$0xff]  }
  0x41   :  { %3018 = vmatprep.subr.bf16.mxu0 %v4442_v4  ;;  %v4529_v4 = vld [vmem:[%s6662_s1 + $0x1cc] ss:$16 sps:$4 sm:$0xff]  }
  0x42   :  { %1337 = vmatmul.mubr.f32.vlgmr.msra.gmra.mrb[0].mxu1 %v33_v6 }
  0x43   :  { %1408 = vmatmul.mubr.f32.vlgmr.msra.gmra.mrb[0].mxu0 %v35_v7  ;;  %3292 = vmatpush1.bf16.msra.mxu1 %v4447_v9  ;;  %v4532_v9 = vld [vmem:[%s6662_s1 + $0x5e4] ss:$16 sps:$4 sm:$0xff]  }
  0x44   :  { %3020 = vmatpush1.bf16.msra.mxu0 %v4444_v8  ;;  %3294 = vmatprep.subr.bf16.mxu1 %v4451_v11  ;;  %v4531_v8 = vld [vmem:[%s6662_s1 + $0x1c8] ss:$16 sps:$4 sm:$0xff]   ;;  %v4534_v11 = vld [vmem:[%s6662_s1 + $0x5e0] ss:$16 sps:$4 sm:$0xff]  }
  0x45   :  { %3022 = vmatprep.subr.bf16.mxu0 %v4448_v10  ;;  %1833 = vmatprep.mubr.f32.mxu1 %v34_v47  ;;  %v4498_v47 = vld [vmem:[%s6662_s1 + $0x520] ss:$16 sps:$4 sm:$0xff]   ;;  %v4535_v10 = vld [vmem:[%s6662_s1 + $0x1ec] ss:$16 sps:$4 sm:$0xff]  }
  0x46   :  { %1478 = vmatprep.mubr.f32.mxu0 %v38_v34 }
  0x47   :  { %3296 = vmatpush1.bf16.msra.mxu1 %v4453_v13  ;;  %v4538_v13 = vld [vmem:[%s6662_s1 + $0x604] ss:$16 sps:$4 sm:$0xff]  }
  0x48   :  { %3024 = vmatpush1.bf16.msra.mxu0 %v4450_v12  ;;  %3298 = vmatprep.subr.bf16.mxu1 %v4457_v15  ;;  %v4537_v12 = vld [vmem:[%s6662_s1 + $0x1e8] ss:$16 sps:$4 sm:$0xff]   ;;  %v37_v15 = vunpack.c.l.bf16 %v5384_v32  ;;  %v4745_v32 = vld [vmem:[%s6662_s1 + $0x64c] ss:$16 sps:$4 sm:$0xff]  }
  0x49   :  { %3026 = vmatprep.subr.bf16.mxu0 %v4454_v14  ;;  %v4541_v14 = vld [vmem:[%s6662_s1 + $0x20c] ss:$16 sps:$4 sm:$0xff]  }
  0x4b   :  { %3300 = vmatpush1.bf16.msra.mxu1 %v4459_v17  ;;  %v4543_v17 = vld [vmem:[%s6662_s1 + $0x208] ss:$16 sps:$4 sm:$0xff]  }
  0x4c   :  { %3028 = vmatpush1.bf16.msra.mxu0 %v4456_v16  ;;  %3302 = vmatprep.subr.bf16.mxu1 %v4463_v19  ;;  %v4540_v16 = vld [vmem:[%s6662_s1 + $0x600] ss:$16 sps:$4 sm:$0xff]   ;;  %v4547_v19 = vld [vmem:[%s6662_s1 + $0x22c] ss:$16 sps:$4 sm:$0xff]  }
  0x4d   :  { %3030 = vmatprep.subr.bf16.mxu0 %v4460_v18  ;;  %v4544_v18 = vld [vmem:[%s6662_s1 + $0x624] ss:$16 sps:$4 sm:$0xff]  }
  0x4f   :  { %3304 = vmatpush1.bf16.msra.mxu1 %v4465_v21 }
  0x50   :  { %3032 = vmatpush1.bf16.msra.mxu0 %v4462_v20  ;;  %3306 = vmatprep.subr.bf16.mxu1 %v4469_v23  ;;  %v5525_v20 = vld [vmem:[%s6663_s0 + $0x18] sm:$0xff] }
  0x51   :  { %3034 = vmatprep.subr.bf16.mxu0 %v4466_v22  ;;  %v40_v21 = vunpack.c.h.bf16 %v5525_v20  ;;  %v4546_v22 = vld [vmem:[%s6662_s1 + $0x620] ss:$16 sps:$4 sm:$0xff]   ;;  %v4549_v23 = vld [vmem:[%s6662_s1 + $0x228] ss:$16 sps:$4 sm:$0xff]  }
  0x53   :  { %3308 = vmatpush1.bf16.msra.mxu1 %v4471_v25  ;;  %v4555_v25 = vld [vmem:[%s6662_s1 + $0x248] ss:$16 sps:$4 sm:$0xff]  }
  0x54   :  { %3036 = vmatpush1.bf16.msra.mxu0 %v4468_v24  ;;  %3310 = vmatprep.subr.bf16.mxu1 %v4475_v27  ;;  %v4550_v24 = vld [vmem:[%s6662_s1 + $0x644] ss:$16 sps:$4 sm:$0xff]   ;;  %v4558_v27 = vld [vmem:[%s6662_s1 + $0x660] ss:$16 sps:$4 sm:$0xff]  }
  0x55   :  { %3038 = vmatprep.subr.bf16.mxu0 %v4472_v26  ;;  %v4556_v26 = vld [vmem:[%s6662_s1 + $0x664] ss:$16 sps:$4 sm:$0xff]  }
  0x57   :  { %3312 = vmatpush1.bf16.msra.mxu1 %v4477_v29  ;;  %v4562_v29 = vld [vmem:[%s6662_s1 + $0x684] ss:$16 sps:$4 sm:$0xff]  }
  0x58   :  { %3040 = vmatpush1.bf16.msra.mxu0 %v4474_v28  ;;  %3314 = vmatprep.subr.bf16.mxu1 %v4481_v31  ;;  %v4561_v28 = vld [vmem:[%s6662_s1 + $0x268] ss:$16 sps:$4 sm:$0xff]   ;;  %v4564_v31 = vld [vmem:[%s6662_s1 + $0x680] ss:$16 sps:$4 sm:$0xff]  }
  0x59   :  { %3042 = vmatprep.subr.bf16.mxu0 %v4478_v30  ;;  %v4565_v30 = vld [vmem:[%s6662_s1 + $0x28c] ss:$16 sps:$4 sm:$0xff]  }
  0x5b   :  { %3316 = vmatpush1.bf16.msra.mxu1 %v4483_v35  ;;  %v4568_v35 = vld [vmem:[%s6662_s1 + $0x6a4] ss:$16 sps:$4 sm:$0xff]  }
  0x5c   :  { %3044 = vmatpush1.bf16.msra.mxu0 %v4480_v33  ;;  %3318 = vmatprep.subr.bf16.mxu1 %v4487_v37  ;;  %v4567_v33 = vld [vmem:[%s6662_s1 + $0x288] ss:$16 sps:$4 sm:$0xff]   ;;  %v4570_v37 = vld [vmem:[%s6662_s1 + $0x6a0] ss:$16 sps:$4 sm:$0xff]  }
  0x5d   :  { %3046 = vmatprep.subr.bf16.mxu0 %v4484_v36  ;;  %v4571_v36 = vld [vmem:[%s6662_s1 + $0x2ac] ss:$16 sps:$4 sm:$0xff]  }
  0x5f   :  { %3320 = vmatpush1.bf16.msra.mxu1 %v4489_v39  ;;  %v4574_v39 = vld [vmem:[%s6662_s1 + $0x6c4] ss:$16 sps:$4 sm:$0xff]  }
  0x60   :  { %3048 = vmatpush1.bf16.msra.mxu0 %v4486_v38  ;;  %3322 = vmatprep.subr.bf16.mxu1 %v4493_v41  ;;  %v4573_v38 = vld [vmem:[%s6662_s1 + $0x2a8] ss:$16 sps:$4 sm:$0xff]   ;;  %v4576_v41 = vld [vmem:[%s6662_s1 + $0x6c0] ss:$16 sps:$4 sm:$0xff]  }
  0x61   :  { %3050 = vmatprep.subr.bf16.mxu0 %v4490_v40  ;;  %v4577_v40 = vld [vmem:[%s6662_s1 + $0x2cc] ss:$16 sps:$4 sm:$0xff]  }
  0x63   :  { %3324 = vmatpush1.bf16.msra.mxu1 %v4495_v43  ;;  %v4580_v43 = vld [vmem:[%s6662_s1 + $0x6e4] ss:$16 sps:$4 sm:$0xff]  }
  0x64   :  { %3052 = vmatpush1.bf16.msra.mxu0 %v4492_v42  ;;  %3326 = vmatprep.subr.bf16.mxu1 %v4499_v45  ;;  %v4579_v42 = vld [vmem:[%s6662_s1 + $0x2c8] ss:$16 sps:$4 sm:$0xff]   ;;  %v4582_v45 = vld [vmem:[%s6662_s1 + $0x6e0] ss:$16 sps:$4 sm:$0xff]  }
  0x65   :  { %3054 = vmatprep.subr.bf16.mxu0 %v4496_v44  ;;  %v4583_v44 = vld [vmem:[%s6662_s1 + $0x2ec] ss:$16 sps:$4 sm:$0xff]  }
  0x67   :  { %3328 = vmatpush1.bf16.msra.mxu1 %v4501_v49  ;;  %v4586_v49 = vld [vmem:[%s6662_s1 + $0x704] ss:$16 sps:$4 sm:$0xff]  }
  0x68   :  { %3056 = vmatpush1.bf16.msra.mxu0 %v4498_v47  ;;  %3330 = vmatprep.subr.bf16.mxu1 %v4505_v52  ;;  %v4585_v47 = vld [vmem:[%s6662_s1 + $0x2e8] ss:$16 sps:$4 sm:$0xff]   ;;  %v4588_v52 = vld [vmem:[%s6662_s1 + $0x700] ss:$16 sps:$4 sm:$0xff]  }
  0x69   :  { %3058 = vmatprep.subr.bf16.mxu0 %v4502_v50  ;;  %v4589_v50 = vld [vmem:[%s6662_s1 + $0x30c] ss:$16 sps:$4 sm:$0xff]  }
  0x6b   :  { %3332 = vmatpush1.bf16.msra.mxu1 %v4507_v54  ;;  %v4592_v54 = vld [vmem:[%s6662_s1 + $0x724] ss:$16 sps:$4 sm:$0xff]  }
  0x6c   :  { %3060 = vmatpush1.bf16.msra.mxu0 %v4504_v53  ;;  %3334 = vmatprep.subr.bf16.mxu1 %v4511_v56  ;;  %v4591_v53 = vld [vmem:[%s6662_s1 + $0x308] ss:$16 sps:$4 sm:$0xff]   ;;  %v4594_v56 = vld [vmem:[%s6662_s1 + $0x720] ss:$16 sps:$4 sm:$0xff]  }
  0x6d   :  { %3062 = vmatprep.subr.bf16.mxu0 %v4508_v55  ;;  %v4595_v55 = vld [vmem:[%s6662_s1 + $0x32c] ss:$16 sps:$4 sm:$0xff]  }
  0x6f   :  { %3336 = vmatpush1.bf16.msra.mxu1 %v4513_v58  ;;  %v4598_v58 = vld [vmem:[%s6662_s1 + $0x744] ss:$16 sps:$4 sm:$0xff]  }
  0x70   :  { %3064 = vmatpush1.bf16.msra.mxu0 %v4510_v57  ;;  %3338 = vmatprep.subr.bf16.mxu1 %v4517_v60  ;;  %v4597_v57 = vld [vmem:[%s6662_s1 + $0x328] ss:$16 sps:$4 sm:$0xff]   ;;  %v4600_v60 = vld [vmem:[%s6662_s1 + $0x740] ss:$16 sps:$4 sm:$0xff]  }
  0x71   :  { %3066 = vmatprep.subr.bf16.mxu0 %v4514_v59  ;;  %v4601_v59 = vld [vmem:[%s6662_s1 + $0x34c] ss:$16 sps:$4 sm:$0xff]  }
  0x73   :  { %3340 = vmatpush1.bf16.msra.mxu1 %v4519_v62  ;;  %v4604_v62 = vld [vmem:[%s6662_s1 + $0x764] ss:$16 sps:$4 sm:$0xff]  }
  0x74   :  { %3068 = vmatpush1.bf16.msra.mxu0 %v4516_v61  ;;  %3342 = vmatprep.subr.bf16.mxu1 %v4523_v0  ;;  %v4603_v61 = vld [vmem:[%s6662_s1 + $0x348] ss:$16 sps:$4 sm:$0xff]   ;;  %v4606_v0 = vld [vmem:[%s6662_s1 + $0x760] ss:$16 sps:$4 sm:$0xff]  }
  0x75   :  { %3070 = vmatprep.subr.bf16.mxu0 %v4520_v63  ;;  %v4607_v63 = vld [vmem:[%s6662_s1 + $0x36c] ss:$16 sps:$4 sm:$0xff]  }
  0x77   :  { %3344 = vmatpush1.bf16.msra.mxu1 %v4525_v2  ;;  %v4610_v2 = vld [vmem:[%s6662_s1 + $0x784] ss:$16 sps:$4 sm:$0xff]  }
  0x78   :  { %3072 = vmatpush1.bf16.msra.mxu0 %v4522_v1  ;;  %3346 = vmatprep.subr.bf16.mxu1 %v4529_v4  ;;  %v4609_v1 = vld [vmem:[%s6662_s1 + $0x368] ss:$16 sps:$4 sm:$0xff]   ;;  %v4612_v4 = vld [vmem:[%s6662_s1 + $0x780] ss:$16 sps:$4 sm:$0xff]  }
  0x79   :  { %3074 = vmatprep.subr.bf16.mxu0 %v4526_v3  ;;  %v4613_v3 = vld [vmem:[%s6662_s1 + $0x38c] ss:$16 sps:$4 sm:$0xff]  }
  0x7b   :  { %3348 = vmatpush1.bf16.msra.mxu1 %v4531_v8  ;;  %v4616_v8 = vld [vmem:[%s6662_s1 + $0x7a4] ss:$16 sps:$4 sm:$0xff]  }
  0x7c   :  { %3076 = vmatpush1.bf16.msra.mxu0 %v4528_v5  ;;  %3350 = vmatprep.subr.bf16.mxu1 %v4535_v10  ;;  %v4615_v5 = vld [vmem:[%s6662_s1 + $0x388] ss:$16 sps:$4 sm:$0xff]   ;;  %v4618_v10 = vld [vmem:[%s6662_s1 + $0x7a0] ss:$16 sps:$4 sm:$0xff]  }
  0x7d   :  { %3078 = vmatprep.subr.bf16.mxu0 %v4532_v9  ;;  %v4619_v9 = vld [vmem:[%s6662_s1 + $0x3ac] ss:$16 sps:$4 sm:$0xff]  }
  0x7f   :  { %3352 = vmatpush1.bf16.msra.mxu1 %v4537_v12  ;;  %v4622_v12 = vld [vmem:[%s6662_s1 + $0x7c4] ss:$16 sps:$4 sm:$0xff]  }
  0x80   :  { %3080 = vmatpush1.bf16.msra.mxu0 %v4534_v11  ;;  %3354 = vmatprep.subr.bf16.mxu1 %v4541_v14  ;;  %v4621_v11 = vld [vmem:[%s6662_s1 + $0x3a8] ss:$16 sps:$4 sm:$0xff]   ;;  %v4624_v14 = vld [vmem:[%s6662_s1 + $0x7c0] ss:$16 sps:$4 sm:$0xff]  }
  0x81   :  { %3082 = vmatprep.subr.bf16.mxu0 %v4538_v13  ;;  %v4625_v13 = vld [vmem:[%s6662_s1 + $0x3cc] ss:$16 sps:$4 sm:$0xff]  }
  0x82   :  { %1834 = vmatmul.mubr.f32.vlgmr.msra.gmra.mrb[2].mxu1 %v33_v6  ;;  %v4552_v6 = vld [vmem:[%s6662_s1 + $0x640] ss:$16 sps:$4 sm:$0xff]  }
  0x83   :  { %1479 = vmatmul.mubr.f32.vlgmr.msra.gmra.mrb[0].mxu0 %v37_v15  ;;  %3356 = vmatpush1.bf16.msra.mxu1 %v4543_v17  ;;  %v4628_v17 = vld [vmem:[%s6662_s1 + $0x7e4] ss:$16 sps:$4 sm:$0xff]  }
  0x84   :  { %3084 = vmatpush1.bf16.msra.mxu0 %v4540_v16  ;;  %3358 = vmatprep.subr.bf16.mxu1 %v4547_v19  ;;  %v4627_v16 = vld [vmem:[%s6662_s1 + $0x3c8] ss:$16 sps:$4 sm:$0xff]   ;;  %v4630_v19 = vld [vmem:[%s6662_s1 + $0x7e0] ss:$16 sps:$4 sm:$0xff]  }
  0x85   :  { %3086 = vmatprep.subr.bf16.mxu0 %v4544_v18  ;;  %1549 = vmatprep.mubr.f32.mxu0 %v40_v21  ;;  %v4631_v18 = vld [vmem:[%s6662_s1 + $0x3ec] ss:$16 sps:$4 sm:$0xff]  }
  0x86   :  { %1904 = vmatprep.mubr.f32.mxu1 %v36_v51  ;;  %v4559_v51 = vld [vmem:[%s6662_s1 + $0x26c] ss:$16 sps:$4 sm:$0xff]  }
  0x87   :  { %3360 = vmatpush1.bf16.msra.mxu1 %v4549_v23  ;;  %v4634_v23 = vld [vmem:[%s6662_s1 + $0x804] ss:$16 sps:$4 sm:$0xff]  }
  0x88   :  { %3088 = vmatpush1.bf16.msra.mxu0 %v4546_v22  ;;  %3362 = vmatprep.subr.bf16.mxu1 %v4553_v46  ;;  %v4633_v22 = vld [vmem:[%s6662_s1 + $0x3e8] ss:$16 sps:$4 sm:$0xff]   ;;  %v39_v46 = vunpack.c.l.bf16 %v5525_v20  ;;  %v4841_v20 = vld [vmem:[%s6662_s1 + $0x84c] ss:$16 sps:$4 sm:$0xff]  }
  0x89   :  { %3090 = vmatprep.subr.bf16.mxu0 %v4550_v24  ;;  %v4637_v24 = vld [vmem:[%s6662_s1 + $0x40c] ss:$16 sps:$4 sm:$0xff]  }
  0x8b   :  { %3364 = vmatpush1.bf16.msra.mxu1 %v4555_v25  ;;  %v4636_v25 = vld [vmem:[%s6662_s1 + $0x800] ss:$16 sps:$4 sm:$0xff]  }
  0x8c   :  { %3092 = vmatpush1.bf16.msra.mxu0 %v4552_v6  ;;  %3366 = vmatprep.subr.bf16.mxu1 %v4559_v51  ;;  %v5720_v6 = vld [vmem:[%s6663_s0 + $0x20] sm:$0xff] }
  0x8d   :  { %3094 = vmatprep.subr.bf16.mxu0 %v4556_v26  ;;  %v4639_v26 = vld [vmem:[%s6662_s1 + $0x408] ss:$16 sps:$4 sm:$0xff]   ;;  %v4640_v51 = vld [vmem:[%s6662_s1 + $0x824] ss:$16 sps:$4 sm:$0xff]  }
  0x8f   :  { %3368 = vmatpush1.bf16.msra.mxu1 %v4561_v28  ;;  %v42_v28 = vunpack.c.h.bf16 %v5720_v6 }
  0x90   :  { %3096 = vmatpush1.bf16.msra.mxu0 %v4558_v27  ;;  %3370 = vmatprep.subr.bf16.mxu1 %v4565_v30  ;;  %v4643_v27 = vld [vmem:[%s6662_s1 + $0x42c] ss:$16 sps:$4 sm:$0xff]   ;;  %v4645_v30 = vld [vmem:[%s6662_s1 + $0x428] ss:$16 sps:$4 sm:$0xff]  }
  0x91   :  { %3098 = vmatprep.subr.bf16.mxu0 %v4562_v29  ;;  %v4642_v29 = vld [vmem:[%s6662_s1 + $0x820] ss:$16 sps:$4 sm:$0xff]  }
  0x93   :  { %3372 = vmatpush1.bf16.msra.mxu1 %v4567_v33  ;;  %v4651_v33 = vld [vmem:[%s6662_s1 + $0x448] ss:$16 sps:$4 sm:$0xff]  }
  0x94   :  { %3100 = vmatpush1.bf16.msra.mxu0 %v4564_v31  ;;  %3374 = vmatprep.subr.bf16.mxu1 %v4571_v36  ;;  %v4646_v31 = vld [vmem:[%s6662_s1 + $0x844] ss:$16 sps:$4 sm:$0xff]   ;;  %v4654_v36 = vld [vmem:[%s6662_s1 + $0x860] ss:$16 sps:$4 sm:$0xff]  }
  0x95   :  { %3102 = vmatprep.subr.bf16.mxu0 %v4568_v35  ;;  %v4652_v35 = vld [vmem:[%s6662_s1 + $0x864] ss:$16 sps:$4 sm:$0xff]  }
  0x97   :  { %3376 = vmatpush1.bf16.msra.mxu1 %v4573_v38  ;;  %v4658_v38 = vld [vmem:[%s6662_s1 + $0x884] ss:$16 sps:$4 sm:$0xff]  }
  0x98   :  { %3104 = vmatpush1.bf16.msra.mxu0 %v4570_v37  ;;  %3378 = vmatprep.subr.bf16.mxu1 %v4577_v40  ;;  %v4657_v37 = vld [vmem:[%s6662_s1 + $0x468] ss:$16 sps:$4 sm:$0xff]   ;;  %v4660_v40 = vld [vmem:[%s6662_s1 + $0x880] ss:$16 sps:$4 sm:$0xff]  }
  0x99   :  { %3106 = vmatprep.subr.bf16.mxu0 %v4574_v39  ;;  %v4661_v39 = vld [vmem:[%s6662_s1 + $0x48c] ss:$16 sps:$4 sm:$0xff]  }
  0x9b   :  { %3380 = vmatpush1.bf16.msra.mxu1 %v4579_v42  ;;  %v4664_v42 = vld [vmem:[%s6662_s1 + $0x8a4] ss:$16 sps:$4 sm:$0xff]  }
  0x9c   :  { %3108 = vmatpush1.bf16.msra.mxu0 %v4576_v41  ;;  %3382 = vmatprep.subr.bf16.mxu1 %v4583_v44  ;;  %v4663_v41 = vld [vmem:[%s6662_s1 + $0x488] ss:$16 sps:$4 sm:$0xff]   ;;  %v4666_v44 = vld [vmem:[%s6662_s1 + $0x8a0] ss:$16 sps:$4 sm:$0xff]  }
  0x9d   :  { %3110 = vmatprep.subr.bf16.mxu0 %v4580_v43  ;;  %v4667_v43 = vld [vmem:[%s6662_s1 + $0x4ac] ss:$16 sps:$4 sm:$0xff]  }
  0x9f   :  { %3384 = vmatpush1.bf16.msra.mxu1 %v4585_v47  ;;  %v4670_v47 = vld [vmem:[%s6662_s1 + $0x8c4] ss:$16 sps:$4 sm:$0xff]  }
  0xa0   :  { %3112 = vmatpush1.bf16.msra.mxu0 %v4582_v45  ;;  %3386 = vmatprep.subr.bf16.mxu1 %v4589_v50  ;;  %v4669_v45 = vld [vmem:[%s6662_s1 + $0x4a8] ss:$16 sps:$4 sm:$0xff]   ;;  %v4672_v50 = vld [vmem:[%s6662_s1 + $0x8c0] ss:$16 sps:$4 sm:$0xff]  }
  0xa1   :  { %3114 = vmatprep.subr.bf16.mxu0 %v4586_v49  ;;  %v4673_v49 = vld [vmem:[%s6662_s1 + $0x4cc] ss:$16 sps:$4 sm:$0xff]  }
  0xa3   :  { %3388 = vmatpush1.bf16.msra.mxu1 %v4591_v53  ;;  %v4676_v53 = vld [vmem:[%s6662_s1 + $0x8e4] ss:$16 sps:$4 sm:$0xff]  }
  0xa4   :  { %3116 = vmatpush1.bf16.msra.mxu0 %v4588_v52  ;;  %3390 = vmatprep.subr.bf16.mxu1 %v4595_v55  ;;  %v4675_v52 = vld [vmem:[%s6662_s1 + $0x4c8] ss:$16 sps:$4 sm:$0xff]   ;;  %v4678_v55 = vld [vmem:[%s6662_s1 + $0x8e0] ss:$16 sps:$4 sm:$0xff]  }
  0xa5   :  { %3118 = vmatprep.subr.bf16.mxu0 %v4592_v54  ;;  %v4679_v54 = vld [vmem:[%s6662_s1 + $0x4ec] ss:$16 sps:$4 sm:$0xff]  }
  0xa7   :  { %3392 = vmatpush1.bf16.msra.mxu1 %v4597_v57  ;;  %v4682_v57 = vld [vmem:[%s6662_s1 + $0x904] ss:$16 sps:$4 sm:$0xff]  }
  0xa8   :  { %3120 = vmatpush1.bf16.msra.mxu0 %v4594_v56  ;;  %3394 = vmatprep.subr.bf16.mxu1 %v4601_v59  ;;  %v4681_v56 = vld [vmem:[%s6662_s1 + $0x4e8] ss:$16 sps:$4 sm:$0xff]   ;;  %v4684_v59 = vld [vmem:[%s6662_s1 + $0x900] ss:$16 sps:$4 sm:$0xff]  }
  0xa9   :  { %3122 = vmatprep.subr.bf16.mxu0 %v4598_v58  ;;  %v4685_v58 = vld [vmem:[%s6662_s1 + $0x50c] ss:$16 sps:$4 sm:$0xff]  }
  0xab   :  { %3396 = vmatpush1.bf16.msra.mxu1 %v4603_v61  ;;  %v4688_v61 = vld [vmem:[%s6662_s1 + $0x924] ss:$16 sps:$4 sm:$0xff]  }
  0xac   :  { %3124 = vmatpush1.bf16.msra.mxu0 %v4600_v60  ;;  %3398 = vmatprep.subr.bf16.mxu1 %v4607_v63  ;;  %v4687_v60 = vld [vmem:[%s6662_s1 + $0x508] ss:$16 sps:$4 sm:$0xff]   ;;  %v4690_v63 = vld [vmem:[%s6662_s1 + $0x920] ss:$16 sps:$4 sm:$0xff]  }
  0xad   :  { %3126 = vmatprep.subr.bf16.mxu0 %v4604_v62  ;;  %v4691_v62 = vld [vmem:[%s6662_s1 + $0x52c] ss:$16 sps:$4 sm:$0xff]  }
  0xaf   :  { %3400 = vmatpush1.bf16.msra.mxu1 %v4609_v1  ;;  %v4694_v1 = vld [vmem:[%s6662_s1 + $0x944] ss:$16 sps:$4 sm:$0xff]  }
  0xb0   :  { %3128 = vmatpush1.bf16.msra.mxu0 %v4606_v0  ;;  %3402 = vmatprep.subr.bf16.mxu1 %v4613_v3  ;;  %v4693_v0 = vld [vmem:[%s6662_s1 + $0x528] ss:$16 sps:$4 sm:$0xff]   ;;  %v4696_v3 = vld [vmem:[%s6662_s1 + $0x940] ss:$16 sps:$4 sm:$0xff]  }
  0xb1   :  { %3130 = vmatprep.subr.bf16.mxu0 %v4610_v2  ;;  %v4697_v2 = vld [vmem:[%s6662_s1 + $0x54c] ss:$16 sps:$4 sm:$0xff]  }
  0xb3   :  { %3404 = vmatpush1.bf16.msra.mxu1 %v4615_v5  ;;  %v4700_v5 = vld [vmem:[%s6662_s1 + $0x964] ss:$16 sps:$4 sm:$0xff]  }
  0xb4   :  { %3132 = vmatpush1.bf16.msra.mxu0 %v4612_v4  ;;  %3406 = vmatprep.subr.bf16.mxu1 %v4619_v9  ;;  %v4699_v4 = vld [vmem:[%s6662_s1 + $0x548] ss:$16 sps:$4 sm:$0xff]   ;;  %v4702_v9 = vld [vmem:[%s6662_s1 + $0x960] ss:$16 sps:$4 sm:$0xff]  }
  0xb5   :  { %3134 = vmatprep.subr.bf16.mxu0 %v4616_v8  ;;  %v4703_v8 = vld [vmem:[%s6662_s1 + $0x56c] ss:$16 sps:$4 sm:$0xff]  }
  0xb7   :  { %3408 = vmatpush1.bf16.msra.mxu1 %v4621_v11  ;;  %v4706_v11 = vld [vmem:[%s6662_s1 + $0x984] ss:$16 sps:$4 sm:$0xff]  }
  0xb8   :  { %3136 = vmatpush1.bf16.msra.mxu0 %v4618_v10  ;;  %3410 = vmatprep.subr.bf16.mxu1 %v4625_v13  ;;  %v4705_v10 = vld [vmem:[%s6662_s1 + $0x568] ss:$16 sps:$4 sm:$0xff]   ;;  %v4708_v13 = vld [vmem:[%s6662_s1 + $0x980] ss:$16 sps:$4 sm:$0xff]  }
  0xb9   :  { %3138 = vmatprep.subr.bf16.mxu0 %v4622_v12  ;;  %v4709_v12 = vld [vmem:[%s6662_s1 + $0x58c] ss:$16 sps:$4 sm:$0xff]  }
  0xbb   :  { %3412 = vmatpush1.bf16.msra.mxu1 %v4627_v16  ;;  %v4712_v16 = vld [vmem:[%s6662_s1 + $0x9a4] ss:$16 sps:$4 sm:$0xff]  }
  0xbc   :  { %3140 = vmatpush1.bf16.msra.mxu0 %v4624_v14  ;;  %3414 = vmatprep.subr.bf16.mxu1 %v4631_v18  ;;  %v4711_v14 = vld [vmem:[%s6662_s1 + $0x588] ss:$16 sps:$4 sm:$0xff]   ;;  %v4714_v18 = vld [vmem:[%s6662_s1 + $0x9a0] ss:$16 sps:$4 sm:$0xff]  }
  0xbd   :  { %3142 = vmatprep.subr.bf16.mxu0 %v4628_v17  ;;  %v4715_v17 = vld [vmem:[%s6662_s1 + $0x5ac] ss:$16 sps:$4 sm:$0xff]  }
  0xbf   :  { %3416 = vmatpush1.bf16.msra.mxu1 %v4633_v22  ;;  %v4718_v22 = vld [vmem:[%s6662_s1 + $0x9c4] ss:$16 sps:$4 sm:$0xff]  }
  0xc0   :  { %3144 = vmatpush1.bf16.msra.mxu0 %v4630_v19  ;;  %3418 = vmatprep.subr.bf16.mxu1 %v4637_v24  ;;  %v4717_v19 = vld [vmem:[%s6662_s1 + $0x5a8] ss:$16 sps:$4 sm:$0xff]   ;;  %v4720_v24 = vld [vmem:[%s6662_s1 + $0x9c0] ss:$16 sps:$4 sm:$0xff]  }
  0xc1   :  { %3146 = vmatprep.subr.bf16.mxu0 %v4634_v23  ;;  %v4721_v23 = vld [vmem:[%s6662_s1 + $0x5cc] ss:$16 sps:$4 sm:$0xff]  }
  0xc2   :  { %1905 = vmatmul.mubr.f32.vlgmr.msra.gmra.mrb[2].mxu1 %v35_v7  ;;  %v4648_v7 = vld [vmem:[%s6662_s1 + $0x840] ss:$16 sps:$4 sm:$0xff]  }
  0xc3   :  { %1550 = vmatmul.mubr.f32.vlgmr.msra.gmra.mrb[0].mxu0 %v39_v46  ;;  %3420 = vmatpush1.bf16.msra.mxu1 %v4639_v26  ;;  %v4724_v26 = vld [vmem:[%s6662_s1 + $0x9e4] ss:$16 sps:$4 sm:$0xff]  }
  0xc4   :  { %3148 = vmatpush1.bf16.msra.mxu0 %v4636_v25  ;;  %3422 = vmatprep.subr.bf16.mxu1 %v4643_v27  ;;  %v4723_v25 = vld [vmem:[%s6662_s1 + $0x5c8] ss:$16 sps:$4 sm:$0xff]   ;;  %v4726_v27 = vld [vmem:[%s6662_s1 + $0x9e0] ss:$16 sps:$4 sm:$0xff]  }
  0xc5   :  { %3150 = vmatprep.subr.bf16.mxu0 %v4640_v51  ;;  %1620 = vmatprep.mubr.f32.mxu0 %v42_v28  ;;  %v4727_v51 = vld [vmem:[%s6662_s1 + $0x5ec] ss:$16 sps:$4 sm:$0xff]  }
  0xc6   :  { %1975 = vmatprep.mubr.f32.mxu1 %v38_v34  ;;  %v4655_v34 = vld [vmem:[%s6662_s1 + $0x46c] ss:$16 sps:$4 sm:$0xff]  }
  0xc7   :  { %3424 = vmatpush1.bf16.msra.mxu1 %v4645_v30  ;;  %v4730_v30 = vld [vmem:[%s6662_s1 + $0xa04] ss:$16 sps:$4 sm:$0xff]  }
  0xc8   :  { %3152 = vmatpush1.bf16.msra.mxu0 %v4642_v29  ;;  %3426 = vmatprep.subr.bf16.mxu1 %v4649_v48  ;;  %v4729_v29 = vld [vmem:[%s6662_s1 + $0x5e8] ss:$16 sps:$4 sm:$0xff]  }
  0xc9   :  { %3154 = vmatprep.subr.bf16.mxu0 %v4646_v31  ;;  %v4733_v31 = vld [vmem:[%s6662_s1 + $0x60c] ss:$16 sps:$4 sm:$0xff]  }
  0xca   :  { %v5926_v48 = vld [vmem:[%s6663_s0 + $0x28] sm:$0xff] }
  0xcb   :  { %3428 = vmatpush1.bf16.msra.mxu1 %v4651_v33  ;;  %v4732_v33 = vld [vmem:[%s6662_s1 + $0xa00] ss:$16 sps:$4 sm:$0xff]  }
  0xcc   :  { %3156 = vmatpush1.bf16.msra.mxu0 %v4648_v7  ;;  %3430 = vmatprep.subr.bf16.mxu1 %v4655_v34  ;;  %v41_v7 = vunpack.c.l.bf16 %v5720_v6  ;;  %v4736_v34 = vld [vmem:[%s6662_s1 + $0xa24] ss:$16 sps:$4 sm:$0xff]  }
  0xcd   :  { %3158 = vmatprep.subr.bf16.mxu0 %v4652_v35  ;;  %v4735_v35 = vld [vmem:[%s6662_s1 + $0x608] ss:$16 sps:$4 sm:$0xff]   ;;  %v4976_v6 = vld [vmem:[%s6664_s3 + $0xa4] ss:$8 sps:$4 sm:$0xff]  }
  0xcf   :  { %3432 = vmatpush1.bf16.msra.mxu1 %v4657_v37  ;;  %v44_v37 = vunpack.c.h.bf16 %v5926_v48 }
  0xd0   :  { %3160 = vmatpush1.bf16.msra.mxu0 %v4654_v36  ;;  %3434 = vmatprep.subr.bf16.mxu1 %v4661_v39  ;;  %v4739_v36 = vld [vmem:[%s6662_s1 + $0x62c] ss:$16 sps:$4 sm:$0xff]   ;;  %v4741_v39 = vld [vmem:[%s6662_s1 + $0x628] ss:$16 sps:$4 sm:$0xff]  }
  0xd1   :  { %3162 = vmatprep.subr.bf16.mxu0 %v4658_v38  ;;  %v4738_v38 = vld [vmem:[%s6662_s1 + $0xa20] ss:$16 sps:$4 sm:$0xff]  }
  0xd3   :  { %3436 = vmatpush1.bf16.msra.mxu1 %v4663_v41  ;;  %v4747_v41 = vld [vmem:[%s6662_s1 + $0x648] ss:$16 sps:$4 sm:$0xff]  }
  0xd4   :  { %3164 = vmatpush1.bf16.msra.mxu0 %v4660_v40  ;;  %3438 = vmatprep.subr.bf16.mxu1 %v4667_v43  ;;  %v4742_v40 = vld [vmem:[%s6662_s1 + $0xa44] ss:$16 sps:$4 sm:$0xff]   ;;  %v4750_v43 = vld [vmem:[%s6662_s1 + $0xa60] ss:$16 sps:$4 sm:$0xff]  }
  0xd5   :  { %3166 = vmatprep.subr.bf16.mxu0 %v4664_v42  ;;  %v4748_v42 = vld [vmem:[%s6662_s1 + $0xa64] ss:$16 sps:$4 sm:$0xff]  }
  0xd7   :  { %3440 = vmatpush1.bf16.msra.mxu1 %v4669_v45  ;;  %v4754_v45 = vld [vmem:[%s6662_s1 + $0xa84] ss:$16 sps:$4 sm:$0xff]  }
  0xd8   :  { %3168 = vmatpush1.bf16.msra.mxu0 %v4666_v44  ;;  %3442 = vmatprep.subr.bf16.mxu1 %v4673_v49  ;;  %v4753_v44 = vld [vmem:[%s6662_s1 + $0x668] ss:$16 sps:$4 sm:$0xff]   ;;  %v4756_v49 = vld [vmem:[%s6662_s1 + $0xa80] ss:$16 sps:$4 sm:$0xff]  }
  0xd9   :  { %3170 = vmatprep.subr.bf16.mxu0 %v4670_v47  ;;  %v4757_v47 = vld [vmem:[%s6662_s1 + $0x68c] ss:$16 sps:$4 sm:$0xff]  }
  0xdb   :  { %3444 = vmatpush1.bf16.msra.mxu1 %v4675_v52  ;;  %v4760_v52 = vld [vmem:[%s6662_s1 + $0xaa4] ss:$16 sps:$4 sm:$0xff]  }
  0xdc   :  { %3172 = vmatpush1.bf16.msra.mxu0 %v4672_v50  ;;  %3446 = vmatprep.subr.bf16.mxu1 %v4679_v54  ;;  %v4759_v50 = vld [vmem:[%s6662_s1 + $0x688] ss:$16 sps:$4 sm:$0xff]   ;;  %v4762_v54 = vld [vmem:[%s6662_s1 + $0xaa0] ss:$16 sps:$4 sm:$0xff]  }
  0xdd   :  { %3174 = vmatprep.subr.bf16.mxu0 %v4676_v53  ;;  %v4763_v53 = vld [vmem:[%s6662_s1 + $0x6ac] ss:$16 sps:$4 sm:$0xff]  }
  0xdf   :  { %3448 = vmatpush1.bf16.msra.mxu1 %v4681_v56  ;;  %v4766_v56 = vld [vmem:[%s6662_s1 + $0xac4] ss:$16 sps:$4 sm:$0xff]  }
  0xe0   :  { %3176 = vmatpush1.bf16.msra.mxu0 %v4678_v55  ;;  %3450 = vmatprep.subr.bf16.mxu1 %v4685_v58  ;;  %v4765_v55 = vld [vmem:[%s6662_s1 + $0x6a8] ss:$16 sps:$4 sm:$0xff]  }
  0xe1   :  { %3178 = vmatprep.subr.bf16.mxu0 %v4682_v57  ;;  %v4769_v57 = vld [vmem:[%s6662_s1 + $0x6cc] ss:$16 sps:$4 sm:$0xff]  }
  0xe3   :  { %3452 = vmatpush1.bf16.msra.mxu1 %v4687_v60  ;;  %v4768_v60 = vld [vmem:[%s6662_s1 + $0xac0] ss:$16 sps:$4 sm:$0xff]  }
  0xe4   :  { %3180 = vmatpush1.bf16.msra.mxu0 %v4684_v59  ;;  %3454 = vmatprep.subr.bf16.mxu1 %v4691_v62  ;;  %v4772_v62 = vld [vmem:[%s6662_s1 + $0xae4] ss:$16 sps:$4 sm:$0xff]  }
  0xe5   :  { %3182 = vmatprep.subr.bf16.mxu0 %v4688_v61  ;;  %v4771_v61 = vld [vmem:[%s6662_s1 + $0x6c8] ss:$16 sps:$4 sm:$0xff]  }
  0xe7   :  { %3456 = vmatpush1.bf16.msra.mxu1 %v4693_v0  ;;  %v4774_v0 = vld [vmem:[%s6662_s1 + $0xae0] ss:$16 sps:$4 sm:$0xff]  }
  0xe8   :  { %3184 = vmatpush1.bf16.msra.mxu0 %v4690_v63  ;;  %3458 = vmatprep.subr.bf16.mxu1 %v4697_v2  ;;  %v4775_v63 = vld [vmem:[%s6662_s1 + $0x6ec] ss:$16 sps:$4 sm:$0xff]   ;;  %v4778_v2 = vld [vmem:[%s6662_s1 + $0xb04] ss:$16 sps:$4 sm:$0xff]  }
  0xe9   :  { %3186 = vmatprep.subr.bf16.mxu0 %v4694_v1  ;;  %v4777_v1 = vld [vmem:[%s6662_s1 + $0x6e8] ss:$16 sps:$4 sm:$0xff]  }
  0xeb   :  { %3460 = vmatpush1.bf16.msra.mxu1 %v4699_v4  ;;  %v4780_v4 = vld [vmem:[%s6662_s1 + $0xb00] ss:$16 sps:$4 sm:$0xff]  }
  0xec   :  { %3188 = vmatpush1.bf16.msra.mxu0 %v4696_v3  ;;  %3462 = vmatprep.subr.bf16.mxu1 %v4703_v8  ;;  %v4781_v3 = vld [vmem:[%s6662_s1 + $0x70c] ss:$16 sps:$4 sm:$0xff]   ;;  %v4784_v8 = vld [vmem:[%s6662_s1 + $0xb24] ss:$16 sps:$4 sm:$0xff]  }
  0xed   :  { %3190 = vmatprep.subr.bf16.mxu0 %v4700_v5  ;;  %v4783_v5 = vld [vmem:[%s6662_s1 + $0x708] ss:$16 sps:$4 sm:$0xff]  }
  0xef   :  { %3464 = vmatpush1.bf16.msra.mxu1 %v4705_v10  ;;  %v4786_v10 = vld [vmem:[%s6662_s1 + $0xb20] ss:$16 sps:$4 sm:$0xff]  }
  0xf0   :  { %3192 = vmatpush1.bf16.msra.mxu0 %v4702_v9  ;;  %3466 = vmatprep.subr.bf16.mxu1 %v4709_v12  ;;  %v4787_v9 = vld [vmem:[%s6662_s1 + $0x72c] ss:$16 sps:$4 sm:$0xff]   ;;  %v4790_v12 = vld [vmem:[%s6662_s1 + $0xb44] ss:$16 sps:$4 sm:$0xff]  }
  0xf1   :  { %3194 = vmatprep.subr.bf16.mxu0 %v4706_v11  ;;  %v4789_v11 = vld [vmem:[%s6662_s1 + $0x728] ss:$16 sps:$4 sm:$0xff]  }
  0xf3   :  { %3468 = vmatpush1.bf16.msra.mxu1 %v4711_v14  ;;  %v4792_v14 = vld [vmem:[%s6662_s1 + $0xb40] ss:$16 sps:$4 sm:$0xff]  }
  0xf4   :  { %3196 = vmatpush1.bf16.msra.mxu0 %v4708_v13  ;;  %3470 = vmatprep.subr.bf16.mxu1 %v4715_v17  ;;  %v4793_v13 = vld [vmem:[%s6662_s1 + $0x74c] ss:$16 sps:$4 sm:$0xff]   ;;  %v4796_v17 = vld [vmem:[%s6662_s1 + $0xb64] ss:$16 sps:$4 sm:$0xff]  }
  0xf5   :  { %3198 = vmatprep.subr.bf16.mxu0 %v4712_v16  ;;  %v4795_v16 = vld [vmem:[%s6662_s1 + $0x748] ss:$16 sps:$4 sm:$0xff]  }
  0xf7   :  { %3472 = vmatpush1.bf16.msra.mxu1 %v4717_v19  ;;  %v4798_v19 = vld [vmem:[%s6662_s1 + $0xb60] ss:$16 sps:$4 sm:$0xff]  }
  0xf8   :  { %3200 = vmatpush1.bf16.msra.mxu0 %v4714_v18  ;;  %3474 = vmatprep.subr.bf16.mxu1 %v4721_v23  ;;  %v4799_v18 = vld [vmem:[%s6662_s1 + $0x76c] ss:$16 sps:$4 sm:$0xff]   ;;  %v4802_v23 = vld [vmem:[%s6662_s1 + $0xb84] ss:$16 sps:$4 sm:$0xff]  }
  0xf9   :  { %3202 = vmatprep.subr.bf16.mxu0 %v4718_v22  ;;  %v4801_v22 = vld [vmem:[%s6662_s1 + $0x768] ss:$16 sps:$4 sm:$0xff]  }
  0xfb   :  { %3476 = vmatpush1.bf16.msra.mxu1 %v4723_v25  ;;  %v4804_v25 = vld [vmem:[%s6662_s1 + $0xb80] ss:$16 sps:$4 sm:$0xff]  }
  0xfc   :  { %3204 = vmatpush1.bf16.msra.mxu0 %v4720_v24  ;;  %3478 = vmatprep.subr.bf16.mxu1 %v4727_v51  ;;  %v4805_v24 = vld [vmem:[%s6662_s1 + $0x78c] ss:$16 sps:$4 sm:$0xff]   ;;  %v4808_v51 = vld [vmem:[%s6662_s1 + $0xba4] ss:$16 sps:$4 sm:$0xff]  }
  0xfd   :  { %3206 = vmatprep.subr.bf16.mxu0 %v4724_v26  ;;  %v4807_v26 = vld [vmem:[%s6662_s1 + $0x788] ss:$16 sps:$4 sm:$0xff]  }
  0xff   :  { %3480 = vmatpush1.bf16.msra.mxu1 %v4729_v29  ;;  %v4810_v29 = vld [vmem:[%s6662_s1 + $0xba0] ss:$16 sps:$4 sm:$0xff]  }
 0x100   :  { %3208 = vmatpush1.bf16.msra.mxu0 %v4726_v27  ;;  %3482 = vmatprep.subr.bf16.mxu1 %v4733_v31  ;;  %v4811_v27 = vld [vmem:[%s6662_s1 + $0x7ac] ss:$16 sps:$4 sm:$0xff]   ;;  %v4814_v31 = vld [vmem:[%s6662_s1 + $0xbc4] ss:$16 sps:$4 sm:$0xff]  }
 0x101   :  { %3210 = vmatprep.subr.bf16.mxu0 %v4730_v30  ;;  %v4813_v30 = vld [vmem:[%s6662_s1 + $0x7a8] ss:$16 sps:$4 sm:$0xff]  }
 0x102   :  { %1976 = vmatmul.mubr.f32.vlgmr.msra.gmra.mrb[2].mxu1 %v37_v15  ;;  %v4744_v15 = vld [vmem:[%s6662_s1 + $0xa40] ss:$16 sps:$4 sm:$0xff]  }
 0x103   :  { %1621 = vmatmul.mubr.f32.vlgmr.msra.gmra.mrb[0].mxu0 %v41_v7  ;;  %3484 = vmatpush1.bf16.msra.mxu1 %v4735_v35  ;;  %v4816_v35 = vld [vmem:[%s6662_s1 + $0xbc0] ss:$16 sps:$4 sm:$0xff]  }
 0x104   :  { %3212 = vmatpush1.bf16.msra.mxu0 %v4732_v33  ;;  %3486 = vmatprep.subr.bf16.mxu1 %v4739_v36  ;;  %v4817_v33 = vld [vmem:[%s6662_s1 + $0x7cc] ss:$16 sps:$4 sm:$0xff]   ;;  %v4820_v36 = vld [vmem:[%s6662_s1 + $0xbe4] ss:$16 sps:$4 sm:$0xff]  }
 0x105   :  { %3214 = vmatprep.subr.bf16.mxu0 %v4736_v34  ;;  %1691 = vmatprep.mubr.f32.mxu0 %v44_v37  ;;  %v4819_v34 = vld [vmem:[%s6662_s1 + $0x7c8] ss:$16 sps:$4 sm:$0xff]  }
 0x106   :  { %2046 = vmatprep.mubr.f32.mxu1 %v40_v21  ;;  %v4751_v21 = vld [vmem:[%s6662_s1 + $0x66c] ss:$16 sps:$4 sm:$0xff]  }
 0x107   :  { %3488 = vmatpush1.bf16.msra.mxu1 %v4741_v39  ;;  %v4822_v39 = vld [vmem:[%s6662_s1 + $0xbe0] ss:$16 sps:$4 sm:$0xff]  }
 0x108   :  { %3216 = vmatpush1.bf16.msra.mxu0 %v4738_v38  ;;  %3490 = vmatprep.subr.bf16.mxu1 %v4745_v32  ;;  %v4823_v38 = vld [vmem:[%s6662_s1 + $0x7ec] ss:$16 sps:$4 sm:$0xff]   ;;  %v4826_v32 = vld [vmem:[%s6662_s1 + $0xc04] ss:$16 sps:$4 sm:$0xff]  }
 0x109   :  { %3218 = vmatprep.subr.bf16.mxu0 %v4742_v40  ;;  %v4825_v40 = vld [vmem:[%s6662_s1 + $0x7e8] ss:$16 sps:$4 sm:$0xff]  }
 0x10b   :  { %3492 = vmatpush1.bf16.msra.mxu1 %v4747_v41  ;;  %v43_v41 = vunpack.c.l.bf16 %v5926_v48  ;;  %v2776_v48 = vld [vmem:[%s6666_s5] sm:$0xff]  }
 0x10c   :  { %3220 = vmatpush1.bf16.msra.mxu0 %v4744_v15  ;;  %3494 = vmatprep.subr.bf16.mxu1 %v4751_v21  ;;  %v4829_v15 = vld [vmem:[%s6662_s1 + $0x80c] ss:$16 sps:$4 sm:$0xff]   ;;  %v4831_v21 = vld [vmem:[%s6662_s1 + $0x808] ss:$16 sps:$4 sm:$0xff]  }
 0x10d   :  { %3222 = vmatprep.subr.bf16.mxu0 %v4748_v42  ;;  %v4828_v42 = vld [vmem:[%s6662_s1 + $0xc00] ss:$16 sps:$4 sm:$0xff]  }
 0x10f   :  { %3496 = vmatpush1.bf16.msra.mxu1 %v4753_v44  ;;  %v4835_v44 = vld [vmem:[%s6662_s1 + $0x82c] ss:$16 sps:$4 sm:$0xff]  }
 0x110   :  { %3224 = vmatpush1.bf16.msra.mxu0 %v4750_v43  ;;  %3498 = vmatprep.subr.bf16.mxu1 %v4757_v47  ;;  %v4832_v43 = vld [vmem:[%s6662_s1 + $0xc24] ss:$16 sps:$4 sm:$0xff]   ;;  %v4837_v47 = vld [vmem:[%s6662_s1 + $0x828] ss:$16 sps:$4 sm:$0xff]  }
 0x111   :  { %3226 = vmatprep.subr.bf16.mxu0 %v4754_v45  ;;  %v4834_v45 = vld [vmem:[%s6662_s1 + $0xc20] ss:$16 sps:$4 sm:$0xff]  }
 0x113   :  { %3500 = vmatpush1.bf16.msra.mxu1 %v4759_v50  ;;  %v4840_v50 = vld [vmem:[%s6662_s1 + $0xc40] ss:$16 sps:$4 sm:$0xff]  }
 0x114   :  { %3228 = vmatpush1.bf16.msra.mxu0 %v4756_v49  ;;  %3502 = vmatprep.subr.bf16.mxu1 %v4763_v53  ;;  %v4838_v49 = vld [vmem:[%s6662_s1 + $0xc44] ss:$16 sps:$4 sm:$0xff]  }
 0x115   :  { %3230 = vmatprep.subr.bf16.mxu0 %v4760_v52  ;;  %v6010_v58 = vpop.f32.mrb[0].mxu1  ;;  %v4843_v52 = vld [vmem:[%s6662_s1 + $0x848] ss:$16 sps:$4 sm:$0xff]   ;;  %v4844_v53 = vld [vmem:[%s6662_s1 + $0xc64] ss:$16 sps:$4 sm:$0xff]  }
 0x116   :  { %v6012_v59 = vpop.f32.mrb[1].mxu1 }
 0x117   :  { %3504 = vmatpush1.bf16.msra.mxu1 %v4765_v55  ;;  %v4849_v55 = vld [vmem:[%s6662_s1 + $0x868] ss:$16 sps:$4 sm:$0xff]  }
 0x118   :  { %3232 = vmatpush1.bf16.msra.mxu0 %v4762_v54  ;;  %3506 = vmatprep.subr.bf16.mxu1 %v4769_v57  ;;  %v4846_v54 = vld [vmem:[%s6662_s1 + $0xc60] ss:$16 sps:$4 sm:$0xff]   ;;  %v4850_v57 = vld [vmem:[%s6662_s1 + $0x88c] ss:$16 sps:$4 sm:$0xff]  }
 0x119   :  { %3234 = vmatprep.subr.bf16.mxu0 %v4766_v56  ;;  %v32_v56 = vld [vmem:[%s6663_s0 + $0x30] sm:$0xf] }
 0x11b   :  { %3508 = vmatpush1.bf16.msra.mxu1 %v4771_v61  ;;  %v45_v61 = vunpack.c.l.bf16 %v32_v56  ;;  %v4892_v56 = vld [vmem:[%s6662_s1 + $0xa4c] ss:$16 sps:$4 sm:$0xff]  }
 0x11c   :  { %3236 = vmatpush1.bf16.msra.mxu0 %v4768_v60  ;;  %3510 = vmatprep.subr.bf16.mxu1 %v4775_v63  ;;  %v4925_v60 = vld [vmem:[%s6662_s1 + $0xc0c] ss:$16 sps:$4 sm:$0xff]  }
 0x11d   :  { %3238 = vmatprep.subr.bf16.mxu0 %v4772_v62  ;;  %v4852_v62 = vld [vmem:[%s6662_s1 + $0x888] ss:$16 sps:$4 sm:$0xff]   ;;  %v4853_v63 = vld [vmem:[%s6662_s1 + $0x8ac] ss:$16 sps:$4 sm:$0xff]  }
 0x11f   :  { %3512 = vmatpush1.bf16.msra.mxu1 %v4777_v1  ;;  %v4931_v1 = vld [vmem:[%s6662_s1 + $0xc2c] ss:$16 sps:$4 sm:$0xff]  }
 0x120   :  { %3240 = vmatpush1.bf16.msra.mxu0 %v4774_v0  ;;  %3514 = vmatprep.subr.bf16.mxu1 %v4781_v3  ;;  %v4927_v0 = vld [vmem:[%s6662_s1 + $0xc08] ss:$16 sps:$4 sm:$0xff]   ;;  %v4856_v3 = vld [vmem:[%s6662_s1 + $0x8cc] ss:$16 sps:$4 sm:$0xff]  }
 0x121   :  { %3242 = vmatprep.subr.bf16.mxu0 %v4778_v2  ;;  %v4855_v2 = vld [vmem:[%s6662_s1 + $0x8a8] ss:$16 sps:$4 sm:$0xff]  }
 0x123   :  { %3516 = vmatpush1.bf16.msra.mxu1 %v4783_v5  ;;  %v4937_v5 = vld [vmem:[%s6662_s1 + $0xc4c] ss:$16 sps:$4 sm:$0xff]  }
 0x124   :  { %3244 = vmatpush1.bf16.msra.mxu0 %v4780_v4  ;;  %3518 = vmatprep.subr.bf16.mxu1 %v4787_v9  ;;  %v4933_v4 = vld [vmem:[%s6662_s1 + $0xc28] ss:$16 sps:$4 sm:$0xff]   ;;  %v4859_v9 = vld [vmem:[%s6662_s1 + $0x8ec] ss:$16 sps:$4 sm:$0xff]  }
 0x125   :  { %3246 = vmatprep.subr.bf16.mxu0 %v4784_v8  ;;  %v4858_v8 = vld [vmem:[%s6662_s1 + $0x8c8] ss:$16 sps:$4 sm:$0xff]  }
 0x127   :  { %3520 = vmatpush1.bf16.msra.mxu1 %v4789_v11  ;;  %v4943_v11 = vld [vmem:[%s6662_s1 + $0xc6c] ss:$16 sps:$4 sm:$0xff]  }
 0x128   :  { %3248 = vmatpush1.bf16.msra.mxu0 %v4786_v10  ;;  %3522 = vmatprep.subr.bf16.mxu1 %v4793_v13  ;;  %v4939_v10 = vld [vmem:[%s6662_s1 + $0xc48] ss:$16 sps:$4 sm:$0xff]  }
 0x129   :  { %3250 = vmatprep.subr.bf16.mxu0 %v4790_v12  ;;  %v4861_v12 = vld [vmem:[%s6662_s1 + $0x8e8] ss:$16 sps:$4 sm:$0xff]  }
 0x12a   :  { %v4945_v13 = vld [vmem:[%s6662_s1 + $0xc68] ss:$16 sps:$4 sm:$0xff]  }
 0x12b   :  { %3524 = vmatpush1.bf16.msra.mxu1 %v4795_v16  ;;  %v4946_v16 = vld [vmem:[%s6664_s3 + $0x4] ss:$8 sps:$4 sm:$0xff]  }
 0x12c   :  { %3252 = vmatpush1.bf16.msra.mxu0 %v4792_v14  ;;  %3526 = vmatprep.subr.bf16.mxu1 %v4799_v18  ;;  %v4862_v14 = vld [vmem:[%s6662_s1 + $0x90c] ss:$16 sps:$4 sm:$0xff]   ;;  %v4948_v18 = vld [vmem:[%s6664_s3] ss:$8 sps:$4 sm:$0xff]  }
 0x12d   :  { %3254 = vmatprep.subr.bf16.mxu0 %v4796_v17  ;;  %v4864_v17 = vld [vmem:[%s6662_s1 + $0x908] ss:$16 sps:$4 sm:$0xff]  }
 0x12f   :  { %3528 = vmatpush1.bf16.msra.mxu1 %v4801_v22  ;;  %v4949_v22 = vld [vmem:[%s6664_s3 + $0x14] ss:$8 sps:$4 sm:$0xff]  }
 0x130   :  { %3256 = vmatpush1.bf16.msra.mxu0 %v4798_v19  ;;  %3530 = vmatprep.subr.bf16.mxu1 %v4805_v24  ;;  %v4865_v19 = vld [vmem:[%s6662_s1 + $0x92c] ss:$16 sps:$4 sm:$0xff]   ;;  %v4951_v24 = vld [vmem:[%s6664_s3 + $0x10] ss:$8 sps:$4 sm:$0xff]  }
 0x131   :  { %3258 = vmatprep.subr.bf16.mxu0 %v4802_v23  ;;  %v4867_v23 = vld [vmem:[%s6662_s1 + $0x928] ss:$16 sps:$4 sm:$0xff]  }
 0x133   :  { %3532 = vmatpush1.bf16.msra.mxu1 %v4807_v26  ;;  %v4952_v26 = vld [vmem:[%s6664_s3 + $0x24] ss:$8 sps:$4 sm:$0xff]  }
 0x134   :  { %3260 = vmatpush1.bf16.msra.mxu0 %v4804_v25  ;;  %3534 = vmatprep.subr.bf16.mxu1 %v4811_v27  ;;  %v4868_v25 = vld [vmem:[%s6662_s1 + $0x94c] ss:$16 sps:$4 sm:$0xff]   ;;  %v4954_v27 = vld [vmem:[%s6664_s3 + $0x20] ss:$8 sps:$4 sm:$0xff]  }
 0x135   :  { %3262 = vmatprep.subr.bf16.mxu0 %v4808_v51  ;;  %v4870_v51 = vld [vmem:[%s6662_s1 + $0x948] ss:$16 sps:$4 sm:$0xff]  }
 0x137   :  { %3536 = vmatpush1.bf16.msra.mxu1 %v4813_v30  ;;  %v4955_v30 = vld [vmem:[%s6664_s3 + $0x34] ss:$8 sps:$4 sm:$0xff]  }
 0x138   :  { %3264 = vmatpush1.bf16.msra.mxu0 %v4810_v29  ;;  %3538 = vmatprep.subr.bf16.mxu1 %v4817_v33  ;;  %v4871_v29 = vld [vmem:[%s6662_s1 + $0x96c] ss:$16 sps:$4 sm:$0xff]   ;;  %v4957_v33 = vld [vmem:[%s6664_s3 + $0x30] ss:$8 sps:$4 sm:$0xff]  }
 0x139   :  { %3266 = vmatprep.subr.bf16.mxu0 %v4814_v31  ;;  %v4873_v31 = vld [vmem:[%s6662_s1 + $0x968] ss:$16 sps:$4 sm:$0xff]  }
 0x13b   :  { %3540 = vmatpush1.bf16.msra.mxu1 %v4819_v34  ;;  %v4958_v34 = vld [vmem:[%s6664_s3 + $0x44] ss:$8 sps:$4 sm:$0xff]  }
 0x13c   :  { %3268 = vmatpush1.bf16.msra.mxu0 %v4816_v35  ;;  %3542 = vmatprep.subr.bf16.mxu1 %v4823_v38  ;;  %v4874_v35 = vld [vmem:[%s6662_s1 + $0x98c] ss:$16 sps:$4 sm:$0xff]   ;;  %v4960_v38 = vld [vmem:[%s6664_s3 + $0x40] ss:$8 sps:$4 sm:$0xff]  }
 0x13d   :  { %3270 = vmatprep.subr.bf16.mxu0 %v4820_v36  ;;  %v4876_v36 = vld [vmem:[%s6662_s1 + $0x988] ss:$16 sps:$4 sm:$0xff]  }
 0x13f   :  { %3544 = vmatpush1.bf16.msra.mxu1 %v4825_v40  ;;  %v4961_v40 = vld [vmem:[%s6664_s3 + $0x54] ss:$8 sps:$4 sm:$0xff]  }
 0x140   :  { %3272 = vmatpush1.bf16.msra.mxu0 %v4822_v39  ;;  %3546 = vmatprep.subr.bf16.mxu1 %v4829_v15  ;;  %v4877_v39 = vld [vmem:[%s6662_s1 + $0x9ac] ss:$16 sps:$4 sm:$0xff]   ;;  %v4963_v15 = vld [vmem:[%s6664_s3 + $0x50] ss:$8 sps:$4 sm:$0xff]  }
 0x141   :  { %3274 = vmatprep.subr.bf16.mxu0 %v4826_v32  ;;  %v4879_v32 = vld [vmem:[%s6662_s1 + $0x9a8] ss:$16 sps:$4 sm:$0xff]  }
 0x142   :  { %2047 = vmatmul.mubr.f32.vlgmr.msra.gmra.mrb[2].mxu1 %v39_v46  ;;  %v5046_v46 = vmov 0.0  }
 0x143   :  { %1692 = vmatmul.mubr.f32.vlgmr.msra.gmra.mrb[0].mxu0 %v43_v41  ;;  %3548 = vmatpush1.bf16.msra.mxu1 %v4831_v21  ;;  %v4964_v21 = vld [vmem:[%s6664_s3 + $0x64] ss:$8 sps:$4 sm:$0xff]  }
 0x144   :  { %3276 = vmatpush1.bf16.msra.mxu0 %v4828_v42  ;;  %3550 = vmatprep.subr.bf16.mxu1 %v4835_v44  ;;  %v4880_v42 = vld [vmem:[%s6662_s1 + $0x9cc] ss:$16 sps:$4 sm:$0xff]   ;;  %v4966_v44 = vld [vmem:[%s6664_s3 + $0x60] ss:$8 sps:$4 sm:$0xff]  }
 0x145   :  { %3278 = vmatprep.subr.bf16.mxu0 %v4832_v43  ;;  %1762 = vmatprep.mubr.f32.mxu0 %v5046_v46  ;;  %v4882_v43 = vld [vmem:[%s6662_s1 + $0x9c8] ss:$16 sps:$4 sm:$0xff]  }
 0x146   :  { %2117 = vmatprep.mubr.f32.mxu1 %v42_v28  ;;  %v4847_v28 = vld [vmem:[%s6662_s1 + $0x86c] ss:$16 sps:$4 sm:$0xff]  }
 0x147   :  { %3552 = vmatpush1.bf16.msra.mxu1 %v4837_v47  ;;  %v4967_v47 = vld [vmem:[%s6664_s3 + $0x74] ss:$8 sps:$4 sm:$0xff]  }
 0x148   :  { %3280 = vmatpush1.bf16.msra.mxu0 %v4834_v45  ;;  %3554 = vmatprep.subr.bf16.mxu1 %v4841_v20  ;;  %v4883_v45 = vld [vmem:[%s6662_s1 + $0x9ec] ss:$16 sps:$4 sm:$0xff]   ;;  %v4969_v20 = vld [vmem:[%s6664_s3 + $0x70] ss:$8 sps:$4 sm:$0xff]  }
 0x149   :  { %3282 = vmatprep.subr.bf16.mxu0 %v4838_v49  ;;  %v4885_v49 = vld [vmem:[%s6662_s1 + $0x9e8] ss:$16 sps:$4 sm:$0xff]  }
 0x14b   :  { %3556 = vmatpush1.bf16.msra.mxu1 %v4843_v52  ;;  %v4888_v52 = vld [vmem:[%s6662_s1 + $0xa08] ss:$16 sps:$4 sm:$0xff]  }
 0x14c   :  { %3284 = vmatpush1.bf16.msra.mxu0 %v4840_v50  ;;  %3558 = vmatprep.subr.bf16.mxu1 %v4847_v28  ;;  %v4970_v50 = vld [vmem:[%s6664_s3 + $0x84] ss:$8 sps:$4 sm:$0xff]   ;;  %v4972_v28 = vld [vmem:[%s6664_s3 + $0x80] ss:$8 sps:$4 sm:$0xff]  }
 0x14d   :  { %3286 = vmatprep.subr.bf16.mxu0 %v4844_v53  ;;  %v4889_v53 = vld [vmem:[%s6662_s1 + $0xa2c] ss:$16 sps:$4 sm:$0xff]  }
 0x14f   :  { %3560 = vmatpush1.bf16.msra.mxu1 %v4849_v55  ;;  %v4891_v55 = vld [vmem:[%s6662_s1 + $0xa28] ss:$16 sps:$4 sm:$0xff]  }
 0x150   :  { %3288 = vmatpush1.bf16.msra.mxu0 %v4846_v54  ;;  %3562 = vmatprep.subr.bf16.mxu1 %v4850_v57  ;;  %v4973_v54 = vld [vmem:[%s6664_s3 + $0x94] ss:$8 sps:$4 sm:$0xff]   ;;  %v4975_v57 = vld [vmem:[%s6664_s3 + $0x90] ss:$8 sps:$4 sm:$0xff]  }
 0x151   :  { %3674 = vmatprep.subr.bf16.mxu0 %v4925_v60  ;;  %v4978_v60 = vld [vmem:[%s6664_s3 + $0xa0] ss:$8 sps:$4 sm:$0xff]  }
 0x153   :  { %2772 = vmatmul.mubr.msk.f32.vlgmr.msra.gmra.mrb[0].mxu0 %vm1268_vm0, %v45_v61  ;;  %3564 = vmatpush1.bf16.msra.mxu1 %v4852_v62  ;;  %v4897_v62 = vld [vmem:[%s6662_s1 + $0xa68] ss:$16 sps:$4 sm:$0xff]  }
 0x154   :  { %3676 = vmatpush1.bf16.msra.mxu0 %v4927_v0  ;;  %3566 = vmatprep.subr.bf16.mxu1 %v4853_v63  ;;  %v4898_v63 = vld [vmem:[%s6662_s1 + $0xa8c] ss:$16 sps:$4 sm:$0xff]   ;;  %v4981_v0 = vld [vmem:[%s6664_s3 + $0xb0] ss:$8 sps:$4 sm:$0xff]  }
 0x155   :  { %3678 = vmatprep.subr.bf16.mxu0 %v4931_v1  ;;  %2259 = vmatprep.mubr.f32.mxu0 %v5046_v46  ;;  %v4886_v46 = vld [vmem:[%s6662_s1 + $0xa0c] ss:$16 sps:$4 sm:$0xff]  }
 0x156   :  { %v4982_v1 = vld [vmem:[%s6664_s3 + $0xc4] ss:$8 sps:$4 sm:$0xff]  }
 0x157   :  { %3568 = vmatpush1.bf16.msra.mxu1 %v4855_v2  ;;  %v4900_v2 = vld [vmem:[%s6662_s1 + $0xa88] ss:$16 sps:$4 sm:$0xff]  }
 0x158   :  { %3680 = vmatpush1.bf16.msra.mxu0 %v4933_v4  ;;  %3570 = vmatprep.subr.bf16.mxu1 %v4856_v3  ;;  %v4901_v3 = vld [vmem:[%s6662_s1 + $0xaac] ss:$16 sps:$4 sm:$0xff]   ;;  %v4984_v4 = vld [vmem:[%s6664_s3 + $0xc0] ss:$8 sps:$4 sm:$0xff]  }
 0x159   :  { %3682 = vmatprep.subr.bf16.mxu0 %v4937_v5  ;;  %v4985_v5 = vld [vmem:[%s6664_s3 + $0xd4] ss:$8 sps:$4 sm:$0xff]  }
 0x15b   :  { %3572 = vmatpush1.bf16.msra.mxu1 %v4858_v8  ;;  %v4903_v8 = vld [vmem:[%s6662_s1 + $0xaa8] ss:$16 sps:$4 sm:$0xff]  }
 0x15c   :  { %3684 = vmatpush1.bf16.msra.mxu0 %v4939_v10  ;;  %3574 = vmatprep.subr.bf16.mxu1 %v4859_v9  ;;  %v4904_v9 = vld [vmem:[%s6662_s1 + $0xacc] ss:$16 sps:$4 sm:$0xff]   ;;  %v4987_v10 = vld [vmem:[%s6664_s3 + $0xd0] ss:$8 sps:$4 sm:$0xff]  }
 0x15d   :  { %3686 = vmatprep.subr.bf16.mxu0 %v4943_v11  ;;  %v4988_v11 = vld [vmem:[%s6664_s3 + $0xe4] ss:$8 sps:$4 sm:$0xff]  }
 0x15f   :  { %3576 = vmatpush1.bf16.msra.mxu1 %v4861_v12  ;;  %v4906_v12 = vld [vmem:[%s6662_s1 + $0xac8] ss:$16 sps:$4 sm:$0xff]  }
 0x160   :  { %3688 = vmatpush1.bf16.msra.mxu0 %v4945_v13  ;;  %3578 = vmatprep.subr.bf16.mxu1 %v4862_v14  ;;  %v4907_v13 = vld [vmem:[%s6662_s1 + $0xaec] ss:$16 sps:$4 sm:$0xff]   ;;  %v4990_v14 = vld [vmem:[%s6664_s3 + $0xe0] ss:$8 sps:$4 sm:$0xff]  }
 0x161   :  { %3690 = vmatprep.subr.bf16.mxu0 %v4946_v16  ;;  %v4909_v16 = vld [vmem:[%s6662_s1 + $0xae8] ss:$16 sps:$4 sm:$0xff]  }
 0x163   :  { %2773 = vmatmul.mubr.msk.f32.vlgmr.msra.gmra.mrb[2].mxu0 %vm1268_vm0, %v45_v61  ;;  %3580 = vmatpush1.bf16.msra.mxu1 %v4864_v17  ;;  %v4979_v61 = vld [vmem:[%s6664_s3 + $0xb4] ss:$8 sps:$4 sm:$0xff]  }
 0x164   :  { %3692 = vmatpush1.bf16.msra.mxu0 %v4948_v18  ;;  %3582 = vmatprep.subr.bf16.mxu1 %v4865_v19  ;;  %v4910_v17 = vld [vmem:[%s6662_s1 + $0xb0c] ss:$16 sps:$4 sm:$0xff]   ;;  %v4912_v18 = vld [vmem:[%s6662_s1 + $0xb08] ss:$16 sps:$4 sm:$0xff]  }
 0x165   :  { %3694 = vmatprep.subr.bf16.mxu0 %v4949_v22  ;;  %v4913_v19 = vld [vmem:[%s6662_s1 + $0xb2c] ss:$16 sps:$4 sm:$0xff]   ;;  %v4915_v22 = vld [vmem:[%s6662_s1 + $0xb28] ss:$16 sps:$4 sm:$0xff]  }
 0x167   :  { %3584 = vmatpush1.bf16.msra.mxu1 %v4867_v23  ;;  %v4916_v23 = vld [vmem:[%s6662_s1 + $0xb4c] ss:$16 sps:$4 sm:$0xff]  }
 0x168   :  { %3696 = vmatpush1.bf16.msra.mxu0 %v4951_v24  ;;  %3586 = vmatprep.subr.bf16.mxu1 %v4868_v25  ;;  %v4991_v24 = vld [vmem:[%s6664_s3 + $0xf4] ss:$8 sps:$4 sm:$0xff]   ;;  %v4993_v25 = vld [vmem:[%s6664_s3 + $0xf0] ss:$8 sps:$4 sm:$0xff]  }
 0x169   :  { %3698 = vmatprep.subr.bf16.mxu0 %v4952_v26  ;;  %v4918_v26 = vld [vmem:[%s6662_s1 + $0xb48] ss:$16 sps:$4 sm:$0xff]  }
 0x16b   :  { %3588 = vmatpush1.bf16.msra.mxu1 %v4870_v51  ;;  %v4919_v51 = vld [vmem:[%s6662_s1 + $0xb6c] ss:$16 sps:$4 sm:$0xff]  }
 0x16c   :  { %3700 = vmatpush1.bf16.msra.mxu0 %v4954_v27  ;;  %3590 = vmatprep.subr.bf16.mxu1 %v4871_v29  ;;  %v4994_v27 = vld [vmem:[%s6664_s3 + $0x104] ss:$8 sps:$4 sm:$0xff]   ;;  %v4921_v29 = vld [vmem:[%s6662_s1 + $0xb68] ss:$16 sps:$4 sm:$0xff]  }
 0x16d   :  { %3702 = vmatprep.subr.bf16.mxu0 %v4955_v30  ;;  %v4922_v30 = vld [vmem:[%s6662_s1 + $0xb8c] ss:$16 sps:$4 sm:$0xff]  }
 0x16f   :  { %3592 = vmatpush1.bf16.msra.mxu1 %v4873_v31  ;;  %v4924_v31 = vld [vmem:[%s6662_s1 + $0xb88] ss:$16 sps:$4 sm:$0xff]  }
 0x170   :  { %3704 = vmatpush1.bf16.msra.mxu0 %v4957_v33  ;;  %3594 = vmatprep.subr.bf16.mxu1 %v4874_v35  ;;  %v4928_v33 = vld [vmem:[%s6662_s1 + $0xbac] ss:$16 sps:$4 sm:$0xff]   ;;  %v4930_v35 = vld [vmem:[%s6662_s1 + $0xba8] ss:$16 sps:$4 sm:$0xff]  }
 0x171   :  { %3706 = vmatprep.subr.bf16.mxu0 %v4958_v34  ;;  %v4934_v34 = vld [vmem:[%s6662_s1 + $0xbcc] ss:$16 sps:$4 sm:$0xff]  }
 0x173   :  { %3596 = vmatpush1.bf16.msra.mxu1 %v4876_v36  ;;  %v4936_v36 = vld [vmem:[%s6662_s1 + $0xbc8] ss:$16 sps:$4 sm:$0xff]  }
 0x174   :  { %3708 = vmatpush1.bf16.msra.mxu0 %v4960_v38  ;;  %3598 = vmatprep.subr.bf16.mxu1 %v4877_v39  ;;  %v4940_v38 = vld [vmem:[%s6662_s1 + $0xbec] ss:$16 sps:$4 sm:$0xff]   ;;  %v4942_v39 = vld [vmem:[%s6662_s1 + $0xbe8] ss:$16 sps:$4 sm:$0xff]  }
 0x175   :  { %3710 = vmatprep.subr.bf16.mxu0 %v4961_v40  ;;  %v1248_v40 = vlaneseq }
 0x177   :  { %3600 = vmatpush1.bf16.msra.mxu1 %v4879_v32  ;;  %v6486_v32 = vshrl.u32 %v1248_v40, 7 }
 0x178   :  { %3712 = vmatpush1.bf16.msra.mxu0 %v4963_v15  ;;  %3602 = vmatprep.subr.bf16.mxu1 %v4880_v42  ;;  %v6491_v15 = vld [vmem:[%s6665_s2] sm:$0xf] }
 0x179   :  { %3714 = vmatprep.subr.bf16.mxu0 %v4964_v21  ;;  %v1250_v42 = vsub.s32 0, %v6486_v32  ;;  %v1254_v21 = vsub.s32 1, %v6486_v32 }
 0x17b   :  { %3604 = vmatpush1.bf16.msra.mxu1 %v4882_v43  ;;  %v2846_v43 = vld [vmem:[%s6666_s5 + $0x40] sm:$0xff]  }
 0x17c   :  { %3716 = vmatpush1.bf16.msra.mxu0 %v4966_v44  ;;  %3606 = vmatprep.subr.bf16.mxu1 %v4883_v45  ;;  %v1251_v44 = vrot.slane %v6491_v15, %v1250_v42  ;;  %v2839_v45 = vld [vmem:[%s6666_s5 + $0x8] sm:$0xff]  }
 0x17d   :  { %3718 = vmatprep.subr.bf16.mxu0 %v4967_v47  ;;  %v1255_v47 = vrot.slane %v6491_v15, %v1254_v21 }
 0x17f   :  { %3608 = vmatpush1.bf16.msra.mxu1 %v4885_v49  ;;  %v2848_v49 = vld [vmem:[%s6666_s5 + $0x50] sm:$0xff]  }
 0x180   :  { %3720 = vmatpush1.bf16.msra.mxu0 %v4969_v20  ;;  %3610 = vmatprep.subr.bf16.mxu1 %v4886_v46  ;;  %v1339_v20 = vadd.f32 %v6010_v58, %v1251_v44  ;;  %v2840_v46 = vld [vmem:[%s6666_s5 + $0x10] sm:$0xff]  }
 0x181   :  { %3722 = vmatprep.subr.bf16.mxu0 %v4970_v50  ;;  %v1341_v50 = vadd.f32 %v6012_v59, %v1255_v47  ;;  %v4997_v58 = vld [vmem:[%s6664_s3 + $0x114] ss:$8 sps:$4 sm:$0xff]  }
 0x182   :  { %2118 = vmatmul.mubr.f32.vlgmr.msra.gmra.mrb[2].mxu1 %v41_v7  ;;  %v4894_v7 = vld [vmem:[%s6662_s1 + $0xa48] ss:$16 sps:$4 sm:$0xff]  }
 0x183   :  { %3612 = vmatpush1.bf16.msra.mxu1 %v4888_v52  ;;  %2188 = vmatprep.mubr.f32.mxu1 %v44_v37  ;;  %v4895_v37 = vld [vmem:[%s6662_s1 + $0xa6c] ss:$16 sps:$4 sm:$0xff]  }
 0x184   :  { %3614 = vmatprep.subr.bf16.mxu1 %v4889_v53  ;;  %3724 = vmatpush1.bf16.msra.mxu0 %v4972_v28  ;;  %v2849_v53 = vld [vmem:[%s6666_s5 + $0x58] sm:$0xff]  }
 0x185   :  { %3726 = vmatprep.subr.bf16.mxu0 %v4973_v54  ;;  %v2841_v59 = vld [vmem:[%s6666_s5 + $0x18] sm:$0xff]  }
 0x187   :  { %3616 = vmatpush1.bf16.msra.mxu1 %v4891_v55 }
 0x188   :  { %3618 = vmatprep.subr.bf16.mxu1 %v4892_v56  ;;  %3728 = vmatpush1.bf16.msra.mxu0 %v4975_v57  ;;  %v4996_v56 = vld [vmem:[%s6664_s3 + $0x100] ss:$8 sps:$4 sm:$0xff]  }
 0x189   :  { %3730 = vmatprep.subr.bf16.mxu0 %v4976_v6  ;;  %v2850_v57 = vld [vmem:[%s6666_s5 + $0x60] sm:$0xff]   ;;  %v4999_v6 = vld [vmem:[%s6664_s3 + $0x110] ss:$8 sps:$4 sm:$0xff]  }
 0x18b   :  { %3620 = vmatpush1.bf16.msra.mxu1 %v4894_v7  ;;  %v5000_v7 = vld [vmem:[%s6664_s3 + $0x124] ss:$8 sps:$4 sm:$0xff]  }
 0x18c   :  { %3622 = vmatprep.subr.bf16.mxu1 %v4895_v37  ;;  %3732 = vmatpush1.bf16.msra.mxu0 %v4978_v60  ;;  %v2842_v37 = vld [vmem:[%s6666_s5 + $0x20] sm:$0xff]   ;;  %v2851_v60 = vld [vmem:[%s6666_s5 + $0x68] sm:$0xff]  }
 0x18d   :  { %3734 = vmatprep.subr.bf16.mxu0 %v4979_v61  ;;  %v5002_v61 = vld [vmem:[%s6664_s3 + $0x120] ss:$8 sps:$4 sm:$0xff]  }
 0x18f   :  { %3624 = vmatpush1.bf16.msra.mxu1 %v4897_v62  ;;  %v5003_v62 = vld [vmem:[%s6664_s3 + $0x134] ss:$8 sps:$4 sm:$0xff]  }
 0x190   :  { %3626 = vmatprep.subr.bf16.mxu1 %v4898_v63  ;;  %3736 = vmatpush1.bf16.msra.mxu0 %v4981_v0  ;;  %v2843_v63 = vld [vmem:[%s6666_s5 + $0x28] sm:$0xff]   ;;  %v2852_v0 = vld [vmem:[%s6666_s5 + $0x70] sm:$0xff]  }
 0x191   :  { %3738 = vmatprep.subr.bf16.mxu0 %v4982_v1  ;;  %v5005_v1 = vld [vmem:[%s6664_s3 + $0x130] ss:$8 sps:$4 sm:$0xff]  }
 0x193   :  { %3628 = vmatpush1.bf16.msra.mxu1 %v4900_v2  ;;  %v5006_v2 = vld [vmem:[%s6664_s3 + $0x144] ss:$8 sps:$4 sm:$0xff]  }
 0x194   :  { %3630 = vmatprep.subr.bf16.mxu1 %v4901_v3  ;;  %3740 = vmatpush1.bf16.msra.mxu0 %v4984_v4  ;;  %v2844_v3 = vld [vmem:[%s6666_s5 + $0x30] sm:$0xff]  }
 0x195   :  { %3742 = vmatprep.subr.bf16.mxu0 %v4985_v5 }
 0x197   :  { %3632 = vmatpush1.bf16.msra.mxu1 %v4903_v8  ;;  %v5008_v8 = vld [vmem:[%s6664_s3 + $0x140] ss:$8 sps:$4 sm:$0xff]  }
 0x198   :  { %3634 = vmatprep.subr.bf16.mxu1 %v4904_v9  ;;  %3744 = vmatpush1.bf16.msra.mxu0 %v4987_v10  ;;  %v5009_v9 = vld [vmem:[%s6664_s3 + $0x154] ss:$8 sps:$4 sm:$0xff]   ;;  %v5011_v10 = vld [vmem:[%s6664_s3 + $0x150] ss:$8 sps:$4 sm:$0xff]  }
 0x199   :  { %3746 = vmatprep.subr.bf16.mxu0 %v4988_v11  ;;  %v5012_v11 = vld [vmem:[%s6664_s3 + $0x164] ss:$8 sps:$4 sm:$0xff]  }
 0x19b   :  { %3636 = vmatpush1.bf16.msra.mxu1 %v4906_v12  ;;  %v5014_v12 = vld [vmem:[%s6664_s3 + $0x160] ss:$8 sps:$4 sm:$0xff]  }
 0x19c   :  { %3638 = vmatprep.subr.bf16.mxu1 %v4907_v13  ;;  %3748 = vmatpush1.bf16.msra.mxu0 %v4990_v14  ;;  %v5015_v13 = vld [vmem:[%s6664_s3 + $0x174] ss:$8 sps:$4 sm:$0xff]   ;;  %v5017_v14 = vld [vmem:[%s6664_s3 + $0x170] ss:$8 sps:$4 sm:$0xff]  }
 0x19d   :  { %3750 = vmatprep.subr.bf16.mxu0 %v4991_v24  ;;  %v5027_v24 = vld [vmem:[%s6664_s3 + $0x1b4] ss:$8 sps:$4 sm:$0xff]  }
 0x19f   :  { %3640 = vmatpush1.bf16.msra.mxu1 %v4909_v16  ;;  %v5018_v16 = vld [vmem:[%s6664_s3 + $0x184] ss:$8 sps:$4 sm:$0xff]  }
 0x1a0   :  { %3642 = vmatprep.subr.bf16.mxu1 %v4910_v17  ;;  %3752 = vmatpush1.bf16.msra.mxu0 %v4993_v25  ;;  %v5020_v17 = vld [vmem:[%s6664_s3 + $0x180] ss:$8 sps:$4 sm:$0xff]   ;;  %v5029_v25 = vld [vmem:[%s6664_s3 + $0x1b0] ss:$8 sps:$4 sm:$0xff]  }
 0x1a1   :  { %3754 = vmatprep.subr.bf16.mxu0 %v4994_v27  ;;  %v5033_v27 = vld [vmem:[%s6664_s3 + $0x1d4] ss:$8 sps:$4 sm:$0xff]  }
 0x1a3   :  { %3644 = vmatpush1.bf16.msra.mxu1 %v4912_v18  ;;  %v5021_v18 = vld [vmem:[%s6664_s3 + $0x194] ss:$8 sps:$4 sm:$0xff]  }
 0x1a4   :  { %3646 = vmatprep.subr.bf16.mxu1 %v4913_v19  ;;  %v5023_v19 = vld [vmem:[%s6664_s3 + $0x190] ss:$8 sps:$4 sm:$0xff]  }
 0x1a7   :  { %3648 = vmatpush1.bf16.msra.mxu1 %v4915_v22  ;;  %v5024_v22 = vld [vmem:[%s6664_s3 + $0x1a4] ss:$8 sps:$4 sm:$0xff]  }
 0x1a8   :  { %3650 = vmatprep.subr.bf16.mxu1 %v4916_v23  ;;  %v5026_v23 = vld [vmem:[%s6664_s3 + $0x1a0] ss:$8 sps:$4 sm:$0xff]  }
 0x1ab   :  { %3652 = vmatpush1.bf16.msra.mxu1 %v4918_v26  ;;  %v5030_v26 = vld [vmem:[%s6664_s3 + $0x1c4] ss:$8 sps:$4 sm:$0xff]  }
 0x1ac   :  { %3654 = vmatprep.subr.bf16.mxu1 %v4919_v51  ;;  %v5032_v51 = vld [vmem:[%s6664_s3 + $0x1c0] ss:$8 sps:$4 sm:$0xff]  }
 0x1af   :  { %3656 = vmatpush1.bf16.msra.mxu1 %v4921_v29  ;;  %v5035_v29 = vld [vmem:[%s6664_s3 + $0x1d0] ss:$8 sps:$4 sm:$0xff]  }
 0x1b0   :  { %3658 = vmatprep.subr.bf16.mxu1 %v4922_v30  ;;  %v5036_v30 = vld [vmem:[%s6664_s3 + $0x1e4] ss:$8 sps:$4 sm:$0xff]  }
 0x1b3   :  { %3660 = vmatpush1.bf16.msra.mxu1 %v4924_v31  ;;  %v5038_v31 = vld [vmem:[%s6664_s3 + $0x1e0] ss:$8 sps:$4 sm:$0xff]  }
 0x1b4   :  { %3662 = vmatprep.subr.bf16.mxu1 %v4928_v33  ;;  %v5039_v33 = vld [vmem:[%s6664_s3 + $0x1f4] ss:$8 sps:$4 sm:$0xff]  }
 0x1b7   :  { %3664 = vmatpush1.bf16.msra.mxu1 %v4930_v35  ;;  %v5041_v35 = vld [vmem:[%s6664_s3 + $0x1f0] ss:$8 sps:$4 sm:$0xff]  }
 0x1b8   :  { %3666 = vmatprep.subr.bf16.mxu1 %v4934_v34  ;;  %v1258_v34 = vsub.s32 2, %v6486_v32 }
 0x1bb   :  { %3668 = vmatpush1.bf16.msra.mxu1 %v4936_v36  ;;  %v1262_v36 = vsub.s32 3, %v6486_v32 }
 0x1bc   :  { %3670 = vmatprep.subr.bf16.mxu1 %v4940_v38  ;;  %v1259_v38 = vrot.slane %v6491_v15, %v1258_v34 }
 0x1bf   :  { %3672 = vmatpush1.bf16.msra.mxu1 %v4942_v39  ;;  %v1263_v39 = vrot.slane %v6491_v15, %v1262_v36  ;;  %v2458_v15 = vld [vmem:[%s6667_s4] sm:$0x3] }
 0x1c0   :  { %3818 = vmatprep.subr.bf16.mxu1 %v2846_v43 }
 0x1c2   :  { %2189 = vmatmul.mubr.f32.vlgmr.msra.gmra.mrb[2].mxu1 %v43_v41  ;;  %v2847_v41 = vld [vmem:[%s6666_s5 + $0x48] sm:$0xff]  }
 0x1c3   :  { %3820 = vmatpush3.bf16.msra.mxu1 %v2776_v48 }
 0x1c4   :  { %3822 = vmatprep.subr.bf16.mxu1 %v2847_v41 }
 0x1c7   :  { %3824 = vmatpush3.bf16.msra.mxu1 %v2839_v45 }
 0x1c8   :  { %3826 = vmatprep.subr.bf16.mxu1 %v2848_v49  ;;  %v2853_v49 = vld [vmem:[%s6666_s5 + $0x78] sm:$0xff]  }
 0x1cb   :  { %3828 = vmatpush3.bf16.msra.mxu1 %v2840_v46  ;;  %v2467_v46 = vrot.slane %v2458_v15, %v1254_v21 }
 0x1cc   :  { %3830 = vmatprep.subr.bf16.mxu1 %v2849_v53 }
 0x1cf   :  { %3832 = vmatpush3.bf16.msra.mxu1 %v2841_v59  ;;  %v2774_v59 = vld [vmem:[%s6668_s6] ss:$0 sm:$0xff] }
 0x1d0   :  { %3834 = vmatprep.subr.bf16.mxu1 %v2850_v57 }
 0x1d3   :  { %3836 = vmatpush3.bf16.msra.mxu1 %v2842_v37 }
 0x1d4   :  { %3838 = vmatprep.subr.bf16.mxu1 %v2851_v60 }
 0x1d7   :  { %3840 = vmatpush3.bf16.msra.mxu1 %v2843_v63 }
 0x1d8   :  { %3842 = vmatprep.subr.bf16.mxu1 %v2852_v0 }
 0x1db   :  { %3844 = vmatpush3.bf16.msra.mxu1 %v2844_v3 }
 0x1dc   :  { %3846 = vmatprep.subr.bf16.mxu1 %v2853_v49 }
 0x226   :  { %v1764_v52 = vpop.f32.mrb[0].mxu0 }
 0x227   :  { %v3850_v28 = vadd.f32 %v1764_v52, %v1339_v20  ;;  %v1766_v54 = vpop.f32.mrb[1].mxu0  ;;  %v2845_v20 = vld [vmem:[%s6666_s5 + $0x38] sm:$0xff]  }
 0x228   :  { %v3852_v55 = vadd.f32 %v1766_v54, %v1341_v50  ;;  %3848 = vmatpush3.bf16.msra.mxu1 %v2845_v20  ;;  %v2463_v50 = vrot.slane %v2458_v15, %v1250_v42 }
 0x22a   :  { %2534 = vmatprep.mubr.f32.mxu0 %v3852_v55  ;;  %v2754_v55 = vand.u32 127, %v1248_v40 }
 0x22b   :  { %2535 = vmatmul.mubr.f32.vlgmr.msra.gmra.mrb[4].mxu0 %v3850_v28 }
 0x22c   :  { %3756 = vmatpush1.bf16.msra.mxu0 %v4996_v56  ;;  %vm2755_vm1 = vcmp.lt.s32.totalorder %v2754_v55, 4 }
 0x22d   :  { %3758 = vmatprep.subr.bf16.mxu0 %v4997_v58 }
 0x230   :  { %3760 = vmatpush1.bf16.msra.mxu0 %v4999_v6 }
 0x231   :  { %3762 = vmatprep.subr.bf16.mxu0 %v5000_v7 }
 0x234   :  { %3764 = vmatpush1.bf16.msra.mxu0 %v5002_v61 }
 0x235   :  { %3766 = vmatprep.subr.bf16.mxu0 %v5003_v62 }
 0x236   :  { %v2261_v4 = vpop.f32.mrb[2].mxu0 }
 0x237   :  { %v2263_v5 = vpop.f32.mrb[3].mxu0 }
 0x238   :  { %3768 = vmatpush1.bf16.msra.mxu0 %v5005_v1 }
 0x239   :  { %3770 = vmatprep.subr.bf16.mxu0 %v5006_v2 }
 0x23c   :  { %3772 = vmatpush1.bf16.msra.mxu0 %v5008_v8 }
 0x23d   :  { %3774 = vmatprep.subr.bf16.mxu0 %v5009_v9 }
 0x240   :  { %3776 = vmatpush1.bf16.msra.mxu0 %v5011_v10 }
 0x241   :  { %3778 = vmatprep.subr.bf16.mxu0 %v5012_v11 }
 0x244   :  { %3780 = vmatpush1.bf16.msra.mxu0 %v5014_v12 }
 0x245   :  { %3782 = vmatprep.subr.bf16.mxu0 %v5015_v13 }
 0x248   :  { %3784 = vmatpush1.bf16.msra.mxu0 %v5017_v14 }
 0x249   :  { %3786 = vmatprep.subr.bf16.mxu0 %v5018_v16 }
 0x24c   :  { %3788 = vmatpush1.bf16.msra.mxu0 %v5020_v17 }
 0x24d   :  { %3790 = vmatprep.subr.bf16.mxu0 %v5021_v18 }
 0x250   :  { %3792 = vmatpush1.bf16.msra.mxu0 %v5023_v19 }
 0x251   :  { %3794 = vmatprep.subr.bf16.mxu0 %v5024_v22 }
 0x254   :  { %3796 = vmatpush1.bf16.msra.mxu0 %v5026_v23 }
 0x255   :  { %3798 = vmatprep.subr.bf16.mxu0 %v5027_v24 }
 0x258   :  { %3800 = vmatpush1.bf16.msra.mxu0 %v5029_v25 }
 0x259   :  { %3802 = vmatprep.subr.bf16.mxu0 %v5030_v26 }
 0x25c   :  { %3804 = vmatpush1.bf16.msra.mxu0 %v5032_v51 }
 0x25d   :  { %3806 = vmatprep.subr.bf16.mxu0 %v5033_v27 }
 0x260   :  { %3808 = vmatpush1.bf16.msra.mxu0 %v5035_v29 }
 0x261   :  { %3810 = vmatprep.subr.bf16.mxu0 %v5036_v30 }
 0x264   :  { %3812 = vmatpush1.bf16.msra.mxu0 %v5038_v31 }
 0x265   :  { %3814 = vmatprep.subr.bf16.mxu0 %v5039_v33 }
 0x268   :  { %3816 = vmatpush1.bf16.msra.mxu0 %v5041_v35 }
 0x295   :  { %v2190_v43 = vpop.f32.mrb[2].mxu1 }
 0x296   :  { %v3853_v48 = vadd.f32 %v2190_v43, %v1259_v38  ;;  %v2192_v41 = vpop.f32.mrb[3].mxu1 }
 0x297   :  { %v3855_v44 = vadd.f32 %v2192_v41, %v1263_v39 }
 0x298   :  { %v3854_v45 = vadd.f32 %v3853_v48, %v2261_v4 }
 0x299   :  { %v3856_v47 = vadd.f32 %v3855_v44, %v2263_v5 }
 0x29b   :  { %2605 = vmatprep.mubr.f32.mxu0 %v3856_v47 }
 0x29c   :  { %2606 = vmatmul.mubr.f32.vlgmr.msra.gmra.mrb[4].mxu0 %v3854_v45 }
 0x36f   :  { %v2607_v52 = vpop.f32.mrb[4].mxu0 }
 0x370   :  { %v2609_v53 = vpop.f32.mrb[5].mxu0  ;;  %v3857_v54 = vadd.f32 %v2607_v52, %v2463_v50 }
 0x371   :  { %v3858_v28 = vadd.f32 %v2609_v53, %v2467_v46 }
 0x373   :  { %2747 = vmatprep.mubr.f32.mxu1 %v3858_v28 }
 0x374   :  { %2748 = vmatmul.mubr.f32.vlgmr.msra.gmra.mrb[4].mxu1 %v3857_v54 }
 0x447   :  { %v2886_v56 = vpop.f32.mrb[4].mxu1 }
 0x448   :  { %v2887_v58 = vpop.f32.mrb[5].mxu1 }
 0x449   :  { %v2888_v57 = vadd.f32 %v2887_v58, %v2886_v56 }
 0x44b   :  { %v2750_v21 = vadd.f32 %v2888_v57, %v2774_v59 }
 0x44d   :  { %v2756_v6 = vsel %vm2755_vm1, %v2750_v21, -1e+30 }
 0x44e   :  { %2757 = vmax.xlane.f32.xlu0 %v2756_v6 }
 0x4db   :  { %v2758_v32 = vpop.xlane.xlu0 %2757 }
 0x4dc   :  { %v2759_v42 = vsub.f32 %v2756_v6, %v2758_v32 }
 0x4de   :  { %v2760_v7 = vmul.f32 1.442695, %v2759_v42 }
 0x4e0   :  { %5042 = vpow2.f32 %v2760_v7 }
 0x4ea   :  { %v5043_v37 = vpop.eup %5042 }
 0x4eb   :  { %2762 = vadd.xlane.f32.xlu0 %v5043_v37 }
 0x578   :  { %v2763_v60 = vpop.xlane.xlu0 %2762 }
 0x579   :  { %5044 = vlog2.f32 %v2763_v60 }
 0x583   :  { %v5045_v40 = vpop.eup %5044 }
 0x584   :  { %v2765_v61 = vmul.f32 0.6931472, %v5045_v40 }
 0x586   :  { %v2766_v62 = vsub.f32 %v2759_v42, %v2765_v61 }
 0x588   :  { %2767 = vst [vmem:[%s6669_s7] sm:$0xff] %v2766_v62 }

</bundles_post_ra>
